<compile_context>
chip_gen: v6e
topology: v6e:2x2x1
jax: 0.10.0
libtpu: 0.0.40
codegen_flags: <defaults>
</compile_context>

<pallas_src>
import functools

import jax
import jax.numpy as jnp
from jax.experimental import pallas as pl
from jax.experimental.pallas import tpu as pltpu

EPS = 1e-5


def _compiler_params(**kwargs):
    cls = getattr(pltpu, "CompilerParams", None) or getattr(
        pltpu, "TPUCompilerParams", None)
    return cls(**kwargs) if cls is not None else None


# ----------------------------------------------------------------------------
# Capability probe: can Mosaic lower a static sublane-axis roll, with
# jnp.roll semantics?  If not, the conv kernel uses the slice-per-tap path.
# ----------------------------------------------------------------------------
def _probe_roll(rows=288, cols=128):
    try:
        def kernel(x_ref, o1_ref, o2_ref):
            o1_ref[...] = pltpu.roll(x_ref[...], 1, 0)
            o2_ref[...] = pltpu.roll(x_ref[...], 2, 0)

        x = jnp.arange(rows * cols, dtype=jnp.float32).reshape(rows, cols)
        r1, r2 = pl.pallas_call(
            kernel,
            out_shape=(jax.ShapeDtypeStruct((rows, cols), jnp.float32),
                       jax.ShapeDtypeStruct((rows, cols), jnp.float32)),
        )(x)
        return (bool(jnp.array_equal(r1, jnp.roll(x, 1, axis=0)))
                and bool(jnp.array_equal(r2, jnp.roll(x, 2, axis=0))))
    except Exception:
        return False


_USE_ROLL = _probe_roll()


# ----------------------------------------------------------------------------
# Kernels
# ----------------------------------------------------------------------------
def _conv3x3_kernel(x_ref, w_ref, a_ref, b_ref, y_ref, s_ref, ss_ref, xpad_s,
                    *, apply_bn_relu, use_roll):
    """Fused: [optional BN+ReLU on the input] -> 3x3 conv (stride 1, zero halo)
    -> conv output + per-sample channel sum / sum-of-squares (BN statistics).

    x_ref: (1, H, W, Cin)   w_ref: (3, 3, Cin, Cout) bf16
    a_ref, b_ref: (1, Cin)  per-channel scale/shift of the *input* BN
    y_ref: (1, H, W, Cout)  s_ref, ss_ref: (1, 1, Cout)
    xpad_s: VMEM scratch (H+2, W+2, Cin) f32
    """
    _, H, W, Cin = x_ref.shape
    Cout = y_ref.shape[3]
    Wp = W + 2

    # Build the zero-padded input tile in VMEM (no HBM padding pass).
    xpad_s[...] = jnp.zeros_like(xpad_s)
    x = x_ref[0].astype(jnp.float32)
    if apply_bn_relu:
        # Fold the previous BatchNorm + ReLU into this conv's input load.
        x = jnp.maximum(x * a_ref[0] + b_ref[0], 0.0)
    xpad_s[pl.ds(1, H), pl.ds(1, W), :] = x

    if use_roll:
        # Merge (row, padded-col) only once per ky (3 relayouts instead of 9);
        # the kx shift becomes an XLU roll of the accumulated product, which
        # overlaps with the MXU instead of eating load/store slots.
        L = H * Wp
        strips = [
            xpad_s[pl.ds(ky, H), :, :].reshape(L, Cin).astype(jnp.bfloat16)
            for ky in range(3)
        ]
        acc = jnp.zeros((L, Cout), jnp.float32)
        for kx in range(3):
            p = jnp.zeros((L, Cout), jnp.float32)
            for ky in range(3):
                p = p + jnp.dot(strips[ky], w_ref[ky, kx],
                                preferred_element_type=jnp.float32)
            shift = 2 - kx
            acc = acc + (pltpu.roll(p, shift, 0) if shift else p)
        # out(y, x) == acc[y*Wp + x + 2]
        out = acc.reshape(H, Wp, Cout)[:, 2:, :]
    else:
        # Fallback: classic 9-tap slice + matmul.
        acc = jnp.zeros((H * W, Cout), jnp.float32)
        for ky in range(3):
            for kx in range(3):
                patch = xpad_s[pl.ds(ky, H), pl.ds(kx, W), :]
                patch = patch.reshape(H * W, Cin).astype(jnp.bfloat16)
                acc = acc + jnp.dot(patch, w_ref[ky, kx],
                                    preferred_element_type=jnp.float32)
        out = acc.reshape(H, W, Cout)

    y_ref[0] = out.astype(y_ref.dtype)
    # Single-pass batch-norm statistics of this conv's output (E[x], E[x^2]).
    row = jnp.sum(out, axis=0)                            # (W, Cout)
    s_ref[0] = jnp.sum(row, axis=0, keepdims=True)        # (1, Cout)
    row2 = jnp.sum(out * out, axis=0)
    ss_ref[0] = jnp.sum(row2, axis=0, keepdims=True)


def _bn_add_relu_kernel(y_ref, r_ref, a_ref, b_ref, o_ref):
    """out = relu(y*scale + shift + residual)."""
    y = y_ref[...].astype(jnp.float32)
    z = y * a_ref[0] + b_ref[0] + r_ref[...].astype(jnp.float32)
    o_ref[...] = jnp.maximum(z, 0.0).astype(o_ref.dtype)


# ----------------------------------------------------------------------------
# Pallas wrappers
# ----------------------------------------------------------------------------
def _conv3x3_stats(x, w_bf16, scale, shift, *, apply_bn_relu):
    N, H, W, Cin = x.shape
    Cout = w_bf16.shape[-1]
    kernel = functools.partial(_conv3x3_kernel,
                               apply_bn_relu=apply_bn_relu,
                               use_roll=_USE_ROLL)
    return pl.pallas_call(
        kernel,
        out_shape=(
            jax.ShapeDtypeStruct((N, H, W, Cout), jnp.float32),
            jax.ShapeDtypeStruct((N, 1, Cout), jnp.float32),
            jax.ShapeDtypeStruct((N, 1, Cout), jnp.float32),
        ),
        grid_spec=pltpu.PrefetchScalarGridSpec(
            num_scalar_prefetch=0,
            grid=(N,),
            in_specs=[
                pl.BlockSpec((1, H, W, Cin), lambda i: (i, 0, 0, 0)),
                pl.BlockSpec((3, 3, Cin, Cout), lambda i: (0, 0, 0, 0)),
                pl.BlockSpec((1, Cin), lambda i: (0, 0)),
                pl.BlockSpec((1, Cin), lambda i: (0, 0)),
            ],
            out_specs=[
                pl.BlockSpec((1, H, W, Cout), lambda i: (i, 0, 0, 0)),
                pl.BlockSpec((1, 1, Cout), lambda i: (i, 0, 0)),
                pl.BlockSpec((1, 1, Cout), lambda i: (i, 0, 0)),
            ],
            scratch_shapes=[pltpu.VMEM((H + 2, W + 2, Cin), jnp.float32)],
        ),
        compiler_params=_compiler_params(dimension_semantics=("parallel",)),
    )(x, w_bf16, scale, shift)


def _bn_add_relu(y, res, scale, shift):
    N, H, W, C = y.shape
    img = pl.BlockSpec((1, H, W, C), lambda i: (i, 0, 0, 0))
    vec = pl.BlockSpec((1, C), lambda i: (0, 0))
    return pl.pallas_call(
        _bn_add_relu_kernel,
        out_shape=jax.ShapeDtypeStruct((N, H, W, C), jnp.float32),
        grid_spec=pltpu.PrefetchScalarGridSpec(
            num_scalar_prefetch=0,
            grid=(N,),
            in_specs=[img, img, vec, vec],
            out_specs=img,
        ),
        compiler_params=_compiler_params(dimension_semantics=("parallel",)),
    )(y, res, scale, shift)


@jax.jit
def block_forward(x_nchw, params):
    """Pre-activation ResNet block forward (identity shortcut, stride=1)."""
    x = jnp.transpose(x_nchw, (0, 2, 3, 1))          # NCHW -> NHWC
    N, H, W, C = x.shape
    cnt = float(N * H * W)

    w1 = params["w1"].astype(jnp.bfloat16)
    w2 = params["w2"].astype(jnp.bfloat16)
    ones = jnp.ones((1, C), jnp.float32)
    zeros = jnp.zeros((1, C), jnp.float32)

    # conv1 (+ fused batch statistics).  Conv bias omitted: it is cancelled
    # exactly by the following BatchNorm's mean subtraction.
    y1, s1, ss1 = _conv3x3_stats(x, w1, ones, zeros, apply_bn_relu=False)
    m1 = jnp.sum(s1, axis=(0, 1)) / cnt
    v1 = jnp.sum(ss1, axis=(0, 1)) / cnt - m1 * m1          # biased variance
    a1 = params["g1"] * jax.lax.rsqrt(v1 + EPS)
    b1 = params["be1"] - m1 * a1

    # BN1 + ReLU folded into conv2's input load; conv2 (+ fused statistics).
    y2, s2, ss2 = _conv3x3_stats(y1, w2, a1.reshape(1, C), b1.reshape(1, C),
                                 apply_bn_relu=True)
    m2 = jnp.sum(s2, axis=(0, 1)) / cnt
    v2 = jnp.sum(ss2, axis=(0, 1)) / cnt - m2 * m2
    a2 = params["g2"] * jax.lax.rsqrt(v2 + EPS)
    b2 = params["be2"] - m2 * a2

    # BN2 + residual add + ReLU.
    out = _bn_add_relu(y2, x, a2.reshape(1, C), b2.reshape(1, C))
    return jnp.transpose(out, (0, 3, 1, 2))          # NHWC -> NCHW


# ----------------------------------------------------------------------------
# Pure-JAX reference (module semantics; conv operands in bf16 / f32 accumulate
# to mirror the kernel's MXU precision choice).
# ----------------------------------------------------------------------------
def ref_forward(x_nchw, params):
    x = jnp.transpose(x_nchw, (0, 2, 3, 1))

    def conv(z, w, b):
        y = jax.lax.conv_general_dilated(
            z.astype(jnp.bfloat16), w.astype(jnp.bfloat16), (1, 1), "SAME",
            dimension_numbers=("NHWC", "HWIO", "NHWC"),
            preferred_element_type=jnp.float32)
        return y + b

    def bn(z, g, be):
        m = jnp.mean(z, axis=(0, 1, 2))
        v = jnp.mean((z - m) ** 2, axis=(0, 1, 2))
        return (z - m) * g * jax.lax.rsqrt(v + EPS) + be

    res = x
    o = jax.nn.relu(bn(conv(x, params["w1"], params["b1"]),
                       params["g1"], params["be1"]))
    o = bn(conv(o, params["w2"], params["b2"]), params["g2"], params["be2"])
    o = jax.nn.relu(o + res)
    return jnp.transpose(o, (0, 3, 1, 2))


# ----------------------------------------------------------------------------
if __name__ == "__main__":
    key = jax.random.PRNGKey(0)
    kx, kw1, kb1, kw2, kb2, kg1, kbe1, kg2, kbe2 = jax.random.split(key, 9)

    # Identity-shortcut block (in_channels == out_channels, stride=1).
    # C is a multiple of 128 so the channel (lane) axis and MXU K/N are dense.
    N, C, H, W = 2, 128, 16, 16

    params = {
        # conv weights stored as HWIO (3, 3, Cin, Cout)
        "w1": 0.1 * jax.random.normal(kw1, (3, 3, C, C), jnp.float32),
        "b1": 0.1 * jax.random.normal(kb1, (C,), jnp.float32),
        "w2": 0.1 * jax.random.normal(kw2, (3, 3, C, C), jnp.float32),
        "b2": 0.1 * jax.random.normal(kb2, (C,), jnp.float32),
        "g1": 1.0 + 0.1 * jax.random.normal(kg1, (C,), jnp.float32),
        "be1": 0.1 * jax.random.normal(kbe1, (C,), jnp.float32),
        "g2": 1.0 + 0.1 * jax.random.normal(kg2, (C,), jnp.float32),
        "be2": 0.1 * jax.random.normal(kbe2, (C,), jnp.float32),
    }

    x = jax.random.normal(kx, (N, C, H, W), jnp.float32)   # NCHW like PyTorch

    out = jax.block_until_ready(block_forward(x, params))
    ref = jax.block_until_ready(ref_forward(x, params))

    assert out.shape == (N, C, H, W), out.shape
    assert jnp.allclose(out, ref, atol=5e-3, rtol=5e-3), float(
        jnp.max(jnp.abs(out - ref)))

    print("KERNEL_OK")
</pallas_src>

<mosaic_0001>
module attributes {stable_mosaic.version = 11 : i64} {
  func.func @kernel(%arg0: memref<288x128xf32, #tpu.memory_space<vmem>>, %arg1: memref<288x128xf32, #tpu.memory_space<vmem>>, %arg2: memref<288x128xf32, #tpu.memory_space<vmem>>) attributes {dimension_semantics = [], scalar_prefetch = 0 : i64, scratch_operands = 0 : i64, tpu.core_type = #tpu.core_type<tc>} {
    %c0 = arith.constant 0 : index
    %c0_0 = arith.constant 0 : index
    %0 = vector.load %arg0[%c0, %c0_0] : memref<288x128xf32, #tpu.memory_space<vmem>>, vector<288x128xf32>
    %c1_i32 = arith.constant 1 : i32
    %1 = tpu.dynamic_rotate %0 by %c1_i32 dim 0 : vector<288x128xf32>, i32 -> vector<288x128xf32>
    %c0_1 = arith.constant 0 : index
    %c0_2 = arith.constant 0 : index
    %2 = vector.load %arg1[%c0_1, %c0_2] : memref<288x128xf32, #tpu.memory_space<vmem>>, vector<288x128xf32>
    tpu.vector_store %arg1[%c0_1, %c0_2], %1 {strides = array<i32>} : memref<288x128xf32, #tpu.memory_space<vmem>>, vector<288x128xf32>,
    %c0_3 = arith.constant 0 : index
    %c0_4 = arith.constant 0 : index
    %3 = vector.load %arg0[%c0_3, %c0_4] : memref<288x128xf32, #tpu.memory_space<vmem>>, vector<288x128xf32>
    %c2_i32 = arith.constant 2 : i32
    %4 = tpu.dynamic_rotate %3 by %c2_i32 dim 0 : vector<288x128xf32>, i32 -> vector<288x128xf32>
    %c0_5 = arith.constant 0 : index
    %c0_6 = arith.constant 0 : index
    %5 = vector.load %arg2[%c0_5, %c0_6] : memref<288x128xf32, #tpu.memory_space<vmem>>, vector<288x128xf32>
    tpu.vector_store %arg2[%c0_5, %c0_6], %4 {strides = array<i32>} : memref<288x128xf32, #tpu.memory_space<vmem>>, vector<288x128xf32>,
    return
  }
}

module attributes {stable_mosaic.version = 11 : i64} {
  func.func @_conv3x3_kernel(%arg0: i32, %arg1: memref<1x16x16x128xf32, #tpu.memory_space<vmem>>, %arg2: memref<3x3x128x128xbf16, #tpu.memory_space<vmem>>, %arg3: memref<1x128xf32, #tpu.memory_space<vmem>>, %arg4: memref<1x128xf32, #tpu.memory_space<vmem>>, %arg5: memref<1x16x16x128xf32, #tpu.memory_space<vmem>>, %arg6: memref<1x1x128xf32, #tpu.memory_space<vmem>>, %arg7: memref<1x1x128xf32, #tpu.memory_space<vmem>>, %arg8: memref<18x18x128xf32, #tpu.memory_space<vmem>>) attributes {dimension_semantics = [#tpu.dimension_semantics<parallel>], iteration_bounds = array<i64: 2>, scalar_prefetch = 0 : i64, scratch_operands = 1 : i64, tpu.core_type = #tpu.core_type<tc>, window_params = [{transform_indices = @transform_0, window_bounds = array<i64: 1, 16, 16, 128>}, {pipeline_mode = #tpu.pipeline_mode<synchronous>, transform_indices = @transform_1, window_bounds = array<i64: 3, 3, 128, 128>}, {pipeline_mode = #tpu.pipeline_mode<synchronous>, transform_indices = @transform_2, window_bounds = array<i64: 1, 128>}, {pipeline_mode = #tpu.pipeline_mode<synchronous>, transform_indices = @transform_3, window_bounds = array<i64: 1, 128>}, {transform_indices = @transform_4, window_bounds = array<i64: 1, 16, 16, 128>}, {transform_indices = @transform_5, window_bounds = array<i64: 1, 1, 128>}, {transform_indices = @transform_6, window_bounds = array<i64: 1, 1, 128>}]} {
    %cst = arith.constant 0.000000e+00 : f32
    %0 = vector.broadcast %cst : f32 to vector<18x18x128xf32>
    %c0 = arith.constant 0 : index
    %c0_0 = arith.constant 0 : index
    %c0_1 = arith.constant 0 : index
    %1 = vector.load %arg8[%c0, %c0_0, %c0_1] : memref<18x18x128xf32, #tpu.memory_space<vmem>>, vector<18x18x128xf32>
    tpu.vector_store %arg8[%c0, %c0_0, %c0_1], %0 {strides = array<i32>} : memref<18x18x128xf32, #tpu.memory_space<vmem>>, vector<18x18x128xf32>,
    %c0_2 = arith.constant 0 : index
    %c0_3 = arith.constant 0 : index
    %c0_4 = arith.constant 0 : index
    %c0_5 = arith.constant 0 : index
    %2 = vector.load %arg1[%c0_2, %c0_3, %c0_4, %c0_5] : memref<1x16x16x128xf32, #tpu.memory_space<vmem>>, vector<1x16x16x128xf32>
    %3 = vector.shape_cast %2 : vector<1x16x16x128xf32> to vector<16x16x128xf32>
    %c1 = arith.constant 1 : index
    %c1_6 = arith.constant 1 : index
    %c0_7 = arith.constant 0 : index
    %4 = vector.load %arg8[%c1, %c1_6, %c0_7] : memref<18x18x128xf32, #tpu.memory_space<vmem>>, vector<16x16x128xf32>
    tpu.vector_store %arg8[%c1, %c1_6, %c0_7], %3 {strides = array<i32>} : memref<18x18x128xf32, #tpu.memory_space<vmem>>, vector<16x16x128xf32>,
    %cst_8 = arith.constant 0.000000e+00 : f32
    %5 = vector.broadcast %cst_8 : f32 to vector<256x128xf32>
    %c0_9 = arith.constant 0 : index
    %c0_10 = arith.constant 0 : index
    %c0_11 = arith.constant 0 : index
    %6 = vector.load %arg8[%c0_9, %c0_10, %c0_11] : memref<18x18x128xf32, #tpu.memory_space<vmem>>, vector<16x16x128xf32>
    %7 = vector.shape_cast %6 : vector<16x16x128xf32> to vector<256x128xf32>
    %8 = arith.truncf %7 : vector<256x128xf32> to vector<256x128xbf16>
    %c0_12 = arith.constant 0 : index
    %c0_13 = arith.constant 0 : index
    %c0_14 = arith.constant 0 : index
    %c0_15 = arith.constant 0 : index
    %9 = vector.load %arg2[%c0_12, %c0_13, %c0_14, %c0_15] : memref<3x3x128x128xbf16, #tpu.memory_space<vmem>>, vector<1x1x128x128xbf16>
    %10 = vector.shape_cast %9 : vector<1x1x128x128xbf16> to vector<128x128xbf16>
    %cst_16 = arith.constant dense<0.000000e+00> : vector<256x128xf32>
    %11 = tpu.matmul %8, %10, %cst_16 {dimension_numbers = #tpu.dot_dimension_numbers<[1], [0], [0], [1], [0, 0, 1, 1], [], []>} : vector<256x128xbf16>, vector<128x128xbf16>, vector<256x128xf32> -> vector<256x128xf32>
    %12 = arith.addf %5, %11 : vector<256x128xf32>
    %c0_17 = arith.constant 0 : index
    %c1_18 = arith.constant 1 : index
    %c0_19 = arith.constant 0 : index
    %13 = vector.load %arg8[%c0_17, %c1_18, %c0_19] : memref<18x18x128xf32, #tpu.memory_space<vmem>>, vector<16x16x128xf32>
    %14 = vector.shape_cast %13 : vector<16x16x128xf32> to vector<256x128xf32>
    %15 = arith.truncf %14 : vector<256x128xf32> to vector<256x128xbf16>
    %c0_20 = arith.constant 0 : index
    %c1_21 = arith.constant 1 : index
    %c0_22 = arith.constant 0 : index
    %c0_23 = arith.constant 0 : index
    %16 = vector.load %arg2[%c0_20, %c1_21, %c0_22, %c0_23] : memref<3x3x128x128xbf16, #tpu.memory_space<vmem>>, vector<1x1x128x128xbf16>
    %17 = vector.shape_cast %16 : vector<1x1x128x128xbf16> to vector<128x128xbf16>
    %cst_24 = arith.constant dense<0.000000e+00> : vector<256x128xf32>
    %18 = tpu.matmul %15, %17, %cst_24 {dimension_numbers = #tpu.dot_dimension_numbers<[1], [0], [0], [1], [0, 0, 1, 1], [], []>} : vector<256x128xbf16>, vector<128x128xbf16>, vector<256x128xf32> -> vector<256x128xf32>
    %19 = arith.addf %12, %18 : vector<256x128xf32>
    %c0_25 = arith.constant 0 : index
    %c2 = arith.constant 2 : index
    %c0_26 = arith.constant 0 : index
    %20 = vector.load %arg8[%c0_25, %c2, %c0_26] : memref<18x18x128xf32, #tpu.memory_space<vmem>>, vector<16x16x128xf32>
    %21 = vector.shape_cast %20 : vector<16x16x128xf32> to vector<256x128xf32>
    %22 = arith.truncf %21 : vector<256x128xf32> to vector<256x128xbf16>
    %c0_27 = arith.constant 0 : index
    %c2_28 = arith.constant 2 : index
    %c0_29 = arith.constant 0 : index
    %c0_30 = arith.constant 0 : index
    %23 = vector.load %arg2[%c0_27, %c2_28, %c0_29, %c0_30] : memref<3x3x128x128xbf16, #tpu.memory_space<vmem>>, vector<1x1x128x128xbf16>
    %24 = vector.shape_cast %23 : vector<1x1x128x128xbf16> to vector<128x128xbf16>
    %cst_31 = arith.constant dense<0.000000e+00> : vector<256x128xf32>
    %25 = tpu.matmul %22, %24, %cst_31 {dimension_numbers = #tpu.dot_dimension_numbers<[1], [0], [0], [1], [0, 0, 1, 1], [], []>} : vector<256x128xbf16>, vector<128x128xbf16>, vector<256x128xf32> -> vector<256x128xf32>
    %26 = arith.addf %19, %25 : vector<256x128xf32>
    %c1_32 = arith.constant 1 : index
    %c0_33 = arith.constant 0 : index
    %c0_34 = arith.constant 0 : index
    %27 = vector.load %arg8[%c1_32, %c0_33, %c0_34] : memref<18x18x128xf32, #tpu.memory_space<vmem>>, vector<16x16x128xf32>
    %28 = vector.shape_cast %27 : vector<16x16x128xf32> to vector<256x128xf32>
    %29 = arith.truncf %28 : vector<256x128xf32> to vector<256x128xbf16>
    %c1_35 = arith.constant 1 : index
    %c0_36 = arith.constant 0 : index
    %c0_37 = arith.constant 0 : index
    %c0_38 = arith.constant 0 : index
    %30 = vector.load %arg2[%c1_35, %c0_36, %c0_37, %c0_38] : memref<3x3x128x128xbf16, #tpu.memory_space<vmem>>, vector<1x1x128x128xbf16>
    %31 = vector.shape_cast %30 : vector<1x1x128x128xbf16> to vector<128x128xbf16>
    %cst_39 = arith.constant dense<0.000000e+00> : vector<256x128xf32>
    %32 = tpu.matmul %29, %31, %cst_39 {dimension_numbers = #tpu.dot_dimension_numbers<[1], [0], [0], [1], [0, 0, 1, 1], [], []>} : vector<256x128xbf16>, vector<128x128xbf16>, vector<256x128xf32> -> vector<256x128xf32>
    %33 = arith.addf %26, %32 : vector<256x128xf32>
    %c1_40 = arith.constant 1 : index
    %c1_41 = arith.constant 1 : index
    %c0_42 = arith.constant 0 : index
    %34 = vector.load %arg8[%c1_40, %c1_41, %c0_42] : memref<18x18x128xf32, #tpu.memory_space<vmem>>, vector<16x16x128xf32>
    %35 = vector.shape_cast %34 : vector<16x16x128xf32> to vector<256x128xf32>
    %36 = arith.truncf %35 : vector<256x128xf32> to vector<256x128xbf16>
    %c1_43 = arith.constant 1 : index
    %c1_44 = arith.constant 1 : index
    %c0_45 = arith.constant 0 : index
    %c0_46 = arith.constant 0 : index
    %37 = vector.load %arg2[%c1_43, %c1_44, %c0_45, %c0_46] : memref<3x3x128x128xbf16, #tpu.memory_space<vmem>>, vector<1x1x128x128xbf16>
    %38 = vector.shape_cast %37 : vector<1x1x128x128xbf16> to vector<128x128xbf16>
    %cst_47 = arith.constant dense<0.000000e+00> : vector<256x128xf32>
    %39 = tpu.matmul %36, %38, %cst_47 {dimension_numbers = #tpu.dot_dimension_numbers<[1], [0], [0], [1], [0, 0, 1, 1], [], []>} : vector<256x128xbf16>, vector<128x128xbf16>, vector<256x128xf32> -> vector<256x128xf32>
    %40 = arith.addf %33, %39 : vector<256x128xf32>
    %c1_48 = arith.constant 1 : index
    %c2_49 = arith.constant 2 : index
    %c0_50 = arith.constant 0 : index
    %41 = vector.load %arg8[%c1_48, %c2_49, %c0_50] : memref<18x18x128xf32, #tpu.memory_space<vmem>>, vector<16x16x128xf32>
    %42 = vector.shape_cast %41 : vector<16x16x128xf32> to vector<256x128xf32>
    %43 = arith.truncf %42 : vector<256x128xf32> to vector<256x128xbf16>
    %c1_51 = arith.constant 1 : index
    %c2_52 = arith.constant 2 : index
    %c0_53 = arith.constant 0 : index
    %c0_54 = arith.constant 0 : index
    %44 = vector.load %arg2[%c1_51, %c2_52, %c0_53, %c0_54] : memref<3x3x128x128xbf16, #tpu.memory_space<vmem>>, vector<1x1x128x128xbf16>
    %45 = vector.shape_cast %44 : vector<1x1x128x128xbf16> to vector<128x128xbf16>
    %cst_55 = arith.constant dense<0.000000e+00> : vector<256x128xf32>
    %46 = tpu.matmul %43, %45, %cst_55 {dimension_numbers = #tpu.dot_dimension_numbers<[1], [0], [0], [1], [0, 0, 1, 1], [], []>} : vector<256x128xbf16>, vector<128x128xbf16>, vector<256x128xf32> -> vector<256x128xf32>
    %47 = arith.addf %40, %46 : vector<256x128xf32>
    %c2_56 = arith.constant 2 : index
    %c0_57 = arith.constant 0 : index
    %c0_58 = arith.constant 0 : index
    %48 = vector.load %arg8[%c2_56, %c0_57, %c0_58] : memref<18x18x128xf32, #tpu.memory_space<vmem>>, vector<16x16x128xf32>
    %49 = vector.shape_cast %48 : vector<16x16x128xf32> to vector<256x128xf32>
    %50 = arith.truncf %49 : vector<256x128xf32> to vector<256x128xbf16>
    %c2_59 = arith.constant 2 : index
    %c0_60 = arith.constant 0 : index
    %c0_61 = arith.constant 0 : index
    %c0_62 = arith.constant 0 : index
    %51 = vector.load %arg2[%c2_59, %c0_60, %c0_61, %c0_62] : memref<3x3x128x128xbf16, #tpu.memory_space<vmem>>, vector<1x1x128x128xbf16>
    %52 = vector.shape_cast %51 : vector<1x1x128x128xbf16> to vector<128x128xbf16>
    %cst_63 = arith.constant dense<0.000000e+00> : vector<256x128xf32>
    %53 = tpu.matmul %50, %52, %cst_63 {dimension_numbers = #tpu.dot_dimension_numbers<[1], [0], [0], [1], [0, 0, 1, 1], [], []>} : vector<256x128xbf16>, vector<128x128xbf16>, vector<256x128xf32> -> vector<256x128xf32>
    %54 = arith.addf %47, %53 : vector<256x128xf32>
    %c2_64 = arith.constant 2 : index
    %c1_65 = arith.constant 1 : index
    %c0_66 = arith.constant 0 : index
    %55 = vector.load %arg8[%c2_64, %c1_65, %c0_66] : memref<18x18x128xf32, #tpu.memory_space<vmem>>, vector<16x16x128xf32>
    %56 = vector.shape_cast %55 : vector<16x16x128xf32> to vector<256x128xf32>
    %57 = arith.truncf %56 : vector<256x128xf32> to vector<256x128xbf16>
    %c2_67 = arith.constant 2 : index
    %c1_68 = arith.constant 1 : index
    %c0_69 = arith.constant 0 : index
    %c0_70 = arith.constant 0 : index
    %58 = vector.load %arg2[%c2_67, %c1_68, %c0_69, %c0_70] : memref<3x3x128x128xbf16, #tpu.memory_space<vmem>>, vector<1x1x128x128xbf16>
    %59 = vector.shape_cast %58 : vector<1x1x128x128xbf16> to vector<128x128xbf16>
    %cst_71 = arith.constant dense<0.000000e+00> : vector<256x128xf32>
    %60 = tpu.matmul %57, %59, %cst_71 {dimension_numbers = #tpu.dot_dimension_numbers<[1], [0], [0], [1], [0, 0, 1, 1], [], []>} : vector<256x128xbf16>, vector<128x128xbf16>, vector<256x128xf32> -> vector<256x128xf32>
    %61 = arith.addf %54, %60 : vector<256x128xf32>
    %c2_72 = arith.constant 2 : index
    %c2_73 = arith.constant 2 : index
    %c0_74 = arith.constant 0 : index
    %62 = vector.load %arg8[%c2_72, %c2_73, %c0_74] : memref<18x18x128xf32, #tpu.memory_space<vmem>>, vector<16x16x128xf32>
    %63 = vector.shape_cast %62 : vector<16x16x128xf32> to vector<256x128xf32>
    %64 = arith.truncf %63 : vector<256x128xf32> to vector<256x128xbf16>
    %c2_75 = arith.constant 2 : index
    %c2_76 = arith.constant 2 : index
    %c0_77 = arith.constant 0 : index
    %c0_78 = arith.constant 0 : index
    %65 = vector.load %arg2[%c2_75, %c2_76, %c0_77, %c0_78] : memref<3x3x128x128xbf16, #tpu.memory_space<vmem>>, vector<1x1x128x128xbf16>
    %66 = vector.shape_cast %65 : vector<1x1x128x128xbf16> to vector<128x128xbf16>
    %cst_79 = arith.constant dense<0.000000e+00> : vector<256x128xf32>
    %67 = tpu.matmul %64, %66, %cst_79 {dimension_numbers = #tpu.dot_dimension_numbers<[1], [0], [0], [1], [0, 0, 1, 1], [], []>} : vector<256x128xbf16>, vector<128x128xbf16>, vector<256x128xf32> -> vector<256x128xf32>
    %68 = arith.addf %61, %67 : vector<256x128xf32>
    %69 = vector.shape_cast %68 : vector<256x128xf32> to vector<16x16x128xf32>
    %c0_80 = arith.constant 0 : index
    %c0_81 = arith.constant 0 : index
    %c0_82 = arith.constant 0 : index
    %c0_83 = arith.constant 0 : index
    %70 = vector.load %arg5[%c0_80, %c0_81, %c0_82, %c0_83] : memref<1x16x16x128xf32, #tpu.memory_space<vmem>>, vector<1x16x16x128xf32>
    %71 = vector.shape_cast %70 : vector<1x16x16x128xf32> to vector<16x16x128xf32>
    %72 = vector.shape_cast %69 : vector<16x16x128xf32> to vector<1x16x16x128xf32>
    tpu.vector_store %arg5[%c0_80, %c0_81, %c0_82, %c0_83], %72 {strides = array<i32>} : memref<1x16x16x128xf32, #tpu.memory_space<vmem>>, vector<1x16x16x128xf32>,
    %cst_84 = arith.constant dense<0.000000e+00> : vector<16x128xf32>
    %73 = vector.multi_reduction <add>, %69, %cst_84 [0] : vector<16x16x128xf32> to vector<16x128xf32>
    %cst_85 = arith.constant dense<0.000000e+00> : vector<128xf32>
    %74 = vector.multi_reduction <add>, %73, %cst_85 [0] : vector<16x128xf32> to vector<128xf32>
    %75 = vector.shape_cast %74 : vector<128xf32> to vector<1x128xf32>
    %c0_86 = arith.constant 0 : index
    %c0_87 = arith.constant 0 : index
    %c0_88 = arith.constant 0 : index
    %76 = vector.load %arg6[%c0_86, %c0_87, %c0_88] : memref<1x1x128xf32, #tpu.memory_space<vmem>>, vector<1x1x128xf32>
    %77 = vector.shape_cast %76 : vector<1x1x128xf32> to vector<1x128xf32>
    %78 = vector.shape_cast %75 : vector<1x128xf32> to vector<1x1x128xf32>
    tpu.vector_store %arg6[%c0_86, %c0_87, %c0_88], %78 {strides = array<i32>} : memref<1x1x128xf32, #tpu.memory_space<vmem>>, vector<1x1x128xf32>,
    %79 = arith.mulf %69, %69 : vector<16x16x128xf32>
    %cst_89 = arith.constant dense<0.000000e+00> : vector<16x128xf32>
    %80 = vector.multi_reduction <add>, %79, %cst_89 [0] : vector<16x16x128xf32> to vector<16x128xf32>
    %cst_90 = arith.constant dense<0.000000e+00> : vector<128xf32>
    %81 = vector.multi_reduction <add>, %80, %cst_90 [0] : vector<16x128xf32> to vector<128xf32>
    %82 = vector.shape_cast %81 : vector<128xf32> to vector<1x128xf32>
    %c0_91 = arith.constant 0 : index
    %c0_92 = arith.constant 0 : index
    %c0_93 = arith.constant 0 : index
    %83 = vector.load %arg7[%c0_91, %c0_92, %c0_93] : memref<1x1x128xf32, #tpu.memory_space<vmem>>, vector<1x1x128xf32>
    %84 = vector.shape_cast %83 : vector<1x1x128xf32> to vector<1x128xf32>
    %85 = vector.shape_cast %82 : vector<1x128xf32> to vector<1x1x128xf32>
    tpu.vector_store %arg7[%c0_91, %c0_92, %c0_93], %85 {strides = array<i32>} : memref<1x1x128xf32, #tpu.memory_space<vmem>>, vector<1x1x128xf32>,
    return
  }
  func.func @transform_0(%arg0: i32) -> (i32, i32, i32, i32) {
    %c0_i32 = arith.constant 0 : i32
    %c0_i32_0 = arith.constant 0 : i32
    %c0_i32_1 = arith.constant 0 : i32
    %c0_i32_2 = arith.constant 0 : i32
    return %arg0, %c0_i32, %c0_i32_0, %c0_i32_1 : i32, i32, i32, i32
  }
  func.func @transform_1(%arg0: i32) -> (i32, i32, i32, i32) {
    %c0_i32 = arith.constant 0 : i32
    %c0_i32_0 = arith.constant 0 : i32
    %c0_i32_1 = arith.constant 0 : i32
    %c0_i32_2 = arith.constant 0 : i32
    %c0_i32_3 = arith.constant 0 : i32
    return %c0_i32, %c0_i32_0, %c0_i32_1, %c0_i32_2 : i32, i32, i32, i32
  }
  func.func @transform_2(%arg0: i32) -> (i32, i32) {
    %c0_i32 = arith.constant 0 : i32
    %c0_i32_0 = arith.constant 0 : i32
    %c0_i32_1 = arith.constant 0 : i32
    return %c0_i32, %c0_i32_0 : i32, i32
  }
  func.func @transform_3(%arg0: i32) -> (i32, i32) {
    %c0_i32 = arith.constant 0 : i32
    %c0_i32_0 = arith.constant 0 : i32
    %c0_i32_1 = arith.constant 0 : i32
    return %c0_i32, %c0_i32_0 : i32, i32
  }
  func.func @transform_4(%arg0: i32) -> (i32, i32, i32, i32) {
    %c0_i32 = arith.constant 0 : i32
    %c0_i32_0 = arith.constant 0 : i32
    %c0_i32_1 = arith.constant 0 : i32
    %c0_i32_2 = arith.constant 0 : i32
    return %arg0, %c0_i32, %c0_i32_0, %c0_i32_1 : i32, i32, i32, i32
  }
  func.func @transform_5(%arg0: i32) -> (i32, i32, i32) {
    %c0_i32 = arith.constant 0 : i32
    %c0_i32_0 = arith.constant 0 : i32
    %c0_i32_1 = arith.constant 0 : i32
    return %arg0, %c0_i32, %c0_i32_0 : i32, i32, i32
  }
  func.func @transform_6(%arg0: i32) -> (i32, i32, i32) {
    %c0_i32 = arith.constant 0 : i32
    %c0_i32_0 = arith.constant 0 : i32
    %c0_i32_1 = arith.constant 0 : i32
    return %arg0, %c0_i32, %c0_i32_0 : i32, i32, i32
  }
}

module attributes {stable_mosaic.version = 11 : i64} {
  func.func @_conv3x3_kernel(%arg0: i32, %arg1: memref<1x16x16x128xf32, #tpu.memory_space<vmem>>, %arg2: memref<3x3x128x128xbf16, #tpu.memory_space<vmem>>, %arg3: memref<1x128xf32, #tpu.memory_space<vmem>>, %arg4: memref<1x128xf32, #tpu.memory_space<vmem>>, %arg5: memref<1x16x16x128xf32, #tpu.memory_space<vmem>>, %arg6: memref<1x1x128xf32, #tpu.memory_space<vmem>>, %arg7: memref<1x1x128xf32, #tpu.memory_space<vmem>>, %arg8: memref<18x18x128xf32, #tpu.memory_space<vmem>>) attributes {dimension_semantics = [#tpu.dimension_semantics<parallel>], iteration_bounds = array<i64: 2>, scalar_prefetch = 0 : i64, scratch_operands = 1 : i64, tpu.core_type = #tpu.core_type<tc>, window_params = [{transform_indices = @transform_0, window_bounds = array<i64: 1, 16, 16, 128>}, {pipeline_mode = #tpu.pipeline_mode<synchronous>, transform_indices = @transform_1, window_bounds = array<i64: 3, 3, 128, 128>}, {pipeline_mode = #tpu.pipeline_mode<synchronous>, transform_indices = @transform_2, window_bounds = array<i64: 1, 128>}, {pipeline_mode = #tpu.pipeline_mode<synchronous>, transform_indices = @transform_3, window_bounds = array<i64: 1, 128>}, {transform_indices = @transform_4, window_bounds = array<i64: 1, 16, 16, 128>}, {transform_indices = @transform_5, window_bounds = array<i64: 1, 1, 128>}, {transform_indices = @transform_6, window_bounds = array<i64: 1, 1, 128>}]} {
    %cst = arith.constant 0.000000e+00 : f32
    %0 = vector.broadcast %cst : f32 to vector<18x18x128xf32>
    %c0 = arith.constant 0 : index
    %c0_0 = arith.constant 0 : index
    %c0_1 = arith.constant 0 : index
    %1 = vector.load %arg8[%c0, %c0_0, %c0_1] : memref<18x18x128xf32, #tpu.memory_space<vmem>>, vector<18x18x128xf32>
    tpu.vector_store %arg8[%c0, %c0_0, %c0_1], %0 {strides = array<i32>} : memref<18x18x128xf32, #tpu.memory_space<vmem>>, vector<18x18x128xf32>,
    %c0_2 = arith.constant 0 : index
    %c0_3 = arith.constant 0 : index
    %c0_4 = arith.constant 0 : index
    %c0_5 = arith.constant 0 : index
    %2 = vector.load %arg1[%c0_2, %c0_3, %c0_4, %c0_5] : memref<1x16x16x128xf32, #tpu.memory_space<vmem>>, vector<1x16x16x128xf32>
    %3 = vector.shape_cast %2 : vector<1x16x16x128xf32> to vector<16x16x128xf32>
    %c0_6 = arith.constant 0 : index
    %c0_7 = arith.constant 0 : index
    %4 = vector.load %arg3[%c0_6, %c0_7] : memref<1x128xf32, #tpu.memory_space<vmem>>, vector<1x128xf32>
    %5 = vector.shape_cast %4 : vector<1x128xf32> to vector<128xf32>
    %6 = vector.shape_cast %5 : vector<128xf32> to vector<1x1x128xf32>
    %7 = vector.broadcast %6 : vector<1x1x128xf32> to vector<16x16x128xf32>
    %8 = arith.mulf %3, %7 : vector<16x16x128xf32>
    %c0_8 = arith.constant 0 : index
    %c0_9 = arith.constant 0 : index
    %9 = vector.load %arg4[%c0_8, %c0_9] : memref<1x128xf32, #tpu.memory_space<vmem>>, vector<1x128xf32>
    %10 = vector.shape_cast %9 : vector<1x128xf32> to vector<128xf32>
    %11 = vector.shape_cast %10 : vector<128xf32> to vector<1x1x128xf32>
    %12 = vector.broadcast %11 : vector<1x1x128xf32> to vector<16x16x128xf32>
    %13 = arith.addf %8, %12 : vector<16x16x128xf32>
    %cst_10 = arith.constant 0.000000e+00 : f32
    %14 = vector.broadcast %cst_10 : f32 to vector<16x16x128xf32>
    %15 = arith.maximumf %13, %14 : vector<16x16x128xf32>
    %c1 = arith.constant 1 : index
    %c1_11 = arith.constant 1 : index
    %c0_12 = arith.constant 0 : index
    %16 = vector.load %arg8[%c1, %c1_11, %c0_12] : memref<18x18x128xf32, #tpu.memory_space<vmem>>, vector<16x16x128xf32>
    tpu.vector_store %arg8[%c1, %c1_11, %c0_12], %15 {strides = array<i32>} : memref<18x18x128xf32, #tpu.memory_space<vmem>>, vector<16x16x128xf32>,
    %cst_13 = arith.constant 0.000000e+00 : f32
    %17 = vector.broadcast %cst_13 : f32 to vector<256x128xf32>
    %c0_14 = arith.constant 0 : index
    %c0_15 = arith.constant 0 : index
    %c0_16 = arith.constant 0 : index
    %18 = vector.load %arg8[%c0_14, %c0_15, %c0_16] : memref<18x18x128xf32, #tpu.memory_space<vmem>>, vector<16x16x128xf32>
    %19 = vector.shape_cast %18 : vector<16x16x128xf32> to vector<256x128xf32>
    %20 = arith.truncf %19 : vector<256x128xf32> to vector<256x128xbf16>
    %c0_17 = arith.constant 0 : index
    %c0_18 = arith.constant 0 : index
    %c0_19 = arith.constant 0 : index
    %c0_20 = arith.constant 0 : index
    %21 = vector.load %arg2[%c0_17, %c0_18, %c0_19, %c0_20] : memref<3x3x128x128xbf16, #tpu.memory_space<vmem>>, vector<1x1x128x128xbf16>
    %22 = vector.shape_cast %21 : vector<1x1x128x128xbf16> to vector<128x128xbf16>
    %cst_21 = arith.constant dense<0.000000e+00> : vector<256x128xf32>
    %23 = tpu.matmul %20, %22, %cst_21 {dimension_numbers = #tpu.dot_dimension_numbers<[1], [0], [0], [1], [0, 0, 1, 1], [], []>} : vector<256x128xbf16>, vector<128x128xbf16>, vector<256x128xf32> -> vector<256x128xf32>
    %24 = arith.addf %17, %23 : vector<256x128xf32>
    %c0_22 = arith.constant 0 : index
    %c1_23 = arith.constant 1 : index
    %c0_24 = arith.constant 0 : index
    %25 = vector.load %arg8[%c0_22, %c1_23, %c0_24] : memref<18x18x128xf32, #tpu.memory_space<vmem>>, vector<16x16x128xf32>
    %26 = vector.shape_cast %25 : vector<16x16x128xf32> to vector<256x128xf32>
    %27 = arith.truncf %26 : vector<256x128xf32> to vector<256x128xbf16>
    %c0_25 = arith.constant 0 : index
    %c1_26 = arith.constant 1 : index
    %c0_27 = arith.constant 0 : index
    %c0_28 = arith.constant 0 : index
    %28 = vector.load %arg2[%c0_25, %c1_26, %c0_27, %c0_28] : memref<3x3x128x128xbf16, #tpu.memory_space<vmem>>, vector<1x1x128x128xbf16>
    %29 = vector.shape_cast %28 : vector<1x1x128x128xbf16> to vector<128x128xbf16>
    %cst_29 = arith.constant dense<0.000000e+00> : vector<256x128xf32>
    %30 = tpu.matmul %27, %29, %cst_29 {dimension_numbers = #tpu.dot_dimension_numbers<[1], [0], [0], [1], [0, 0, 1, 1], [], []>} : vector<256x128xbf16>, vector<128x128xbf16>, vector<256x128xf32> -> vector<256x128xf32>
    %31 = arith.addf %24, %30 : vector<256x128xf32>
    %c0_30 = arith.constant 0 : index
    %c2 = arith.constant 2 : index
    %c0_31 = arith.constant 0 : index
    %32 = vector.load %arg8[%c0_30, %c2, %c0_31] : memref<18x18x128xf32, #tpu.memory_space<vmem>>, vector<16x16x128xf32>
    %33 = vector.shape_cast %32 : vector<16x16x128xf32> to vector<256x128xf32>
    %34 = arith.truncf %33 : vector<256x128xf32> to vector<256x128xbf16>
    %c0_32 = arith.constant 0 : index
    %c2_33 = arith.constant 2 : index
    %c0_34 = arith.constant 0 : index
    %c0_35 = arith.constant 0 : index
    %35 = vector.load %arg2[%c0_32, %c2_33, %c0_34, %c0_35] : memref<3x3x128x128xbf16, #tpu.memory_space<vmem>>, vector<1x1x128x128xbf16>
    %36 = vector.shape_cast %35 : vector<1x1x128x128xbf16> to vector<128x128xbf16>
    %cst_36 = arith.constant dense<0.000000e+00> : vector<256x128xf32>
    %37 = tpu.matmul %34, %36, %cst_36 {dimension_numbers = #tpu.dot_dimension_numbers<[1], [0], [0], [1], [0, 0, 1, 1], [], []>} : vector<256x128xbf16>, vector<128x128xbf16>, vector<256x128xf32> -> vector<256x128xf32>
    %38 = arith.addf %31, %37 : vector<256x128xf32>
    %c1_37 = arith.constant 1 : index
    %c0_38 = arith.constant 0 : index
    %c0_39 = arith.constant 0 : index
    %39 = vector.load %arg8[%c1_37, %c0_38, %c0_39] : memref<18x18x128xf32, #tpu.memory_space<vmem>>, vector<16x16x128xf32>
    %40 = vector.shape_cast %39 : vector<16x16x128xf32> to vector<256x128xf32>
    %41 = arith.truncf %40 : vector<256x128xf32> to vector<256x128xbf16>
    %c1_40 = arith.constant 1 : index
    %c0_41 = arith.constant 0 : index
    %c0_42 = arith.constant 0 : index
    %c0_43 = arith.constant 0 : index
    %42 = vector.load %arg2[%c1_40, %c0_41, %c0_42, %c0_43] : memref<3x3x128x128xbf16, #tpu.memory_space<vmem>>, vector<1x1x128x128xbf16>
    %43 = vector.shape_cast %42 : vector<1x1x128x128xbf16> to vector<128x128xbf16>
    %cst_44 = arith.constant dense<0.000000e+00> : vector<256x128xf32>
    %44 = tpu.matmul %41, %43, %cst_44 {dimension_numbers = #tpu.dot_dimension_numbers<[1], [0], [0], [1], [0, 0, 1, 1], [], []>} : vector<256x128xbf16>, vector<128x128xbf16>, vector<256x128xf32> -> vector<256x128xf32>
    %45 = arith.addf %38, %44 : vector<256x128xf32>
    %c1_45 = arith.constant 1 : index
    %c1_46 = arith.constant 1 : index
    %c0_47 = arith.constant 0 : index
    %46 = vector.load %arg8[%c1_45, %c1_46, %c0_47] : memref<18x18x128xf32, #tpu.memory_space<vmem>>, vector<16x16x128xf32>
    %47 = vector.shape_cast %46 : vector<16x16x128xf32> to vector<256x128xf32>
    %48 = arith.truncf %47 : vector<256x128xf32> to vector<256x128xbf16>
    %c1_48 = arith.constant 1 : index
    %c1_49 = arith.constant 1 : index
    %c0_50 = arith.constant 0 : index
    %c0_51 = arith.constant 0 : index
    %49 = vector.load %arg2[%c1_48, %c1_49, %c0_50, %c0_51] : memref<3x3x128x128xbf16, #tpu.memory_space<vmem>>, vector<1x1x128x128xbf16>
    %50 = vector.shape_cast %49 : vector<1x1x128x128xbf16> to vector<128x128xbf16>
    %cst_52 = arith.constant dense<0.000000e+00> : vector<256x128xf32>
    %51 = tpu.matmul %48, %50, %cst_52 {dimension_numbers = #tpu.dot_dimension_numbers<[1], [0], [0], [1], [0, 0, 1, 1], [], []>} : vector<256x128xbf16>, vector<128x128xbf16>, vector<256x128xf32> -> vector<256x128xf32>
    %52 = arith.addf %45, %51 : vector<256x128xf32>
    %c1_53 = arith.constant 1 : index
    %c2_54 = arith.constant 2 : index
    %c0_55 = arith.constant 0 : index
    %53 = vector.load %arg8[%c1_53, %c2_54, %c0_55] : memref<18x18x128xf32, #tpu.memory_space<vmem>>, vector<16x16x128xf32>
    %54 = vector.shape_cast %53 : vector<16x16x128xf32> to vector<256x128xf32>
    %55 = arith.truncf %54 : vector<256x128xf32> to vector<256x128xbf16>
    %c1_56 = arith.constant 1 : index
    %c2_57 = arith.constant 2 : index
    %c0_58 = arith.constant 0 : index
    %c0_59 = arith.constant 0 : index
    %56 = vector.load %arg2[%c1_56, %c2_57, %c0_58, %c0_59] : memref<3x3x128x128xbf16, #tpu.memory_space<vmem>>, vector<1x1x128x128xbf16>
    %57 = vector.shape_cast %56 : vector<1x1x128x128xbf16> to vector<128x128xbf16>
    %cst_60 = arith.constant dense<0.000000e+00> : vector<256x128xf32>
    %58 = tpu.matmul %55, %57, %cst_60 {dimension_numbers = #tpu.dot_dimension_numbers<[1], [0], [0], [1], [0, 0, 1, 1], [], []>} : vector<256x128xbf16>, vector<128x128xbf16>, vector<256x128xf32> -> vector<256x128xf32>
    %59 = arith.addf %52, %58 : vector<256x128xf32>
    %c2_61 = arith.constant 2 : index
    %c0_62 = arith.constant 0 : index
    %c0_63 = arith.constant 0 : index
    %60 = vector.load %arg8[%c2_61, %c0_62, %c0_63] : memref<18x18x128xf32, #tpu.memory_space<vmem>>, vector<16x16x128xf32>
    %61 = vector.shape_cast %60 : vector<16x16x128xf32> to vector<256x128xf32>
    %62 = arith.truncf %61 : vector<256x128xf32> to vector<256x128xbf16>
    %c2_64 = arith.constant 2 : index
    %c0_65 = arith.constant 0 : index
    %c0_66 = arith.constant 0 : index
    %c0_67 = arith.constant 0 : index
    %63 = vector.load %arg2[%c2_64, %c0_65, %c0_66, %c0_67] : memref<3x3x128x128xbf16, #tpu.memory_space<vmem>>, vector<1x1x128x128xbf16>
    %64 = vector.shape_cast %63 : vector<1x1x128x128xbf16> to vector<128x128xbf16>
    %cst_68 = arith.constant dense<0.000000e+00> : vector<256x128xf32>
    %65 = tpu.matmul %62, %64, %cst_68 {dimension_numbers = #tpu.dot_dimension_numbers<[1], [0], [0], [1], [0, 0, 1, 1], [], []>} : vector<256x128xbf16>, vector<128x128xbf16>, vector<256x128xf32> -> vector<256x128xf32>
    %66 = arith.addf %59, %65 : vector<256x128xf32>
    %c2_69 = arith.constant 2 : index
    %c1_70 = arith.constant 1 : index
    %c0_71 = arith.constant 0 : index
    %67 = vector.load %arg8[%c2_69, %c1_70, %c0_71] : memref<18x18x128xf32, #tpu.memory_space<vmem>>, vector<16x16x128xf32>
    %68 = vector.shape_cast %67 : vector<16x16x128xf32> to vector<256x128xf32>
    %69 = arith.truncf %68 : vector<256x128xf32> to vector<256x128xbf16>
    %c2_72 = arith.constant 2 : index
    %c1_73 = arith.constant 1 : index
    %c0_74 = arith.constant 0 : index
    %c0_75 = arith.constant 0 : index
    %70 = vector.load %arg2[%c2_72, %c1_73, %c0_74, %c0_75] : memref<3x3x128x128xbf16, #tpu.memory_space<vmem>>, vector<1x1x128x128xbf16>
    %71 = vector.shape_cast %70 : vector<1x1x128x128xbf16> to vector<128x128xbf16>
    %cst_76 = arith.constant dense<0.000000e+00> : vector<256x128xf32>
    %72 = tpu.matmul %69, %71, %cst_76 {dimension_numbers = #tpu.dot_dimension_numbers<[1], [0], [0], [1], [0, 0, 1, 1], [], []>} : vector<256x128xbf16>, vector<128x128xbf16>, vector<256x128xf32> -> vector<256x128xf32>
    %73 = arith.addf %66, %72 : vector<256x128xf32>
    %c2_77 = arith.constant 2 : index
    %c2_78 = arith.constant 2 : index
    %c0_79 = arith.constant 0 : index
    %74 = vector.load %arg8[%c2_77, %c2_78, %c0_79] : memref<18x18x128xf32, #tpu.memory_space<vmem>>, vector<16x16x128xf32>
    %75 = vector.shape_cast %74 : vector<16x16x128xf32> to vector<256x128xf32>
    %76 = arith.truncf %75 : vector<256x128xf32> to vector<256x128xbf16>
    %c2_80 = arith.constant 2 : index
    %c2_81 = arith.constant 2 : index
    %c0_82 = arith.constant 0 : index
    %c0_83 = arith.constant 0 : index
    %77 = vector.load %arg2[%c2_80, %c2_81, %c0_82, %c0_83] : memref<3x3x128x128xbf16, #tpu.memory_space<vmem>>, vector<1x1x128x128xbf16>
    %78 = vector.shape_cast %77 : vector<1x1x128x128xbf16> to vector<128x128xbf16>
    %cst_84 = arith.constant dense<0.000000e+00> : vector<256x128xf32>
    %79 = tpu.matmul %76, %78, %cst_84 {dimension_numbers = #tpu.dot_dimension_numbers<[1], [0], [0], [1], [0, 0, 1, 1], [], []>} : vector<256x128xbf16>, vector<128x128xbf16>, vector<256x128xf32> -> vector<256x128xf32>
    %80 = arith.addf %73, %79 : vector<256x128xf32>
    %81 = vector.shape_cast %80 : vector<256x128xf32> to vector<16x16x128xf32>
    %c0_85 = arith.constant 0 : index
    %c0_86 = arith.constant 0 : index
    %c0_87 = arith.constant 0 : index
    %c0_88 = arith.constant 0 : index
    %82 = vector.load %arg5[%c0_85, %c0_86, %c0_87, %c0_88] : memref<1x16x16x128xf32, #tpu.memory_space<vmem>>, vector<1x16x16x128xf32>
    %83 = vector.shape_cast %82 : vector<1x16x16x128xf32> to vector<16x16x128xf32>
    %84 = vector.shape_cast %81 : vector<16x16x128xf32> to vector<1x16x16x128xf32>
    tpu.vector_store %arg5[%c0_85, %c0_86, %c0_87, %c0_88], %84 {strides = array<i32>} : memref<1x16x16x128xf32, #tpu.memory_space<vmem>>, vector<1x16x16x128xf32>,
    %cst_89 = arith.constant dense<0.000000e+00> : vector<16x128xf32>
    %85 = vector.multi_reduction <add>, %81, %cst_89 [0] : vector<16x16x128xf32> to vector<16x128xf32>
    %cst_90 = arith.constant dense<0.000000e+00> : vector<128xf32>
    %86 = vector.multi_reduction <add>, %85, %cst_90 [0] : vector<16x128xf32> to vector<128xf32>
    %87 = vector.shape_cast %86 : vector<128xf32> to vector<1x128xf32>
    %c0_91 = arith.constant 0 : index
    %c0_92 = arith.constant 0 : index
    %c0_93 = arith.constant 0 : index
    %88 = vector.load %arg6[%c0_91, %c0_92, %c0_93] : memref<1x1x128xf32, #tpu.memory_space<vmem>>, vector<1x1x128xf32>
    %89 = vector.shape_cast %88 : vector<1x1x128xf32> to vector<1x128xf32>
    %90 = vector.shape_cast %87 : vector<1x128xf32> to vector<1x1x128xf32>
    tpu.vector_store %arg6[%c0_91, %c0_92, %c0_93], %90 {strides = array<i32>} : memref<1x1x128xf32, #tpu.memory_space<vmem>>, vector<1x1x128xf32>,
    %91 = arith.mulf %81, %81 : vector<16x16x128xf32>
    %cst_94 = arith.constant dense<0.000000e+00> : vector<16x128xf32>
    %92 = vector.multi_reduction <add>, %91, %cst_94 [0] : vector<16x16x128xf32> to vector<16x128xf32>
    %cst_95 = arith.constant dense<0.000000e+00> : vector<128xf32>
    %93 = vector.multi_reduction <add>, %92, %cst_95 [0] : vector<16x128xf32> to vector<128xf32>
    %94 = vector.shape_cast %93 : vector<128xf32> to vector<1x128xf32>
    %c0_96 = arith.constant 0 : index
    %c0_97 = arith.constant 0 : index
    %c0_98 = arith.constant 0 : index
    %95 = vector.load %arg7[%c0_96, %c0_97, %c0_98] : memref<1x1x128xf32, #tpu.memory_space<vmem>>, vector<1x1x128xf32>
    %96 = vector.shape_cast %95 : vector<1x1x128xf32> to vector<1x128xf32>
    %97 = vector.shape_cast %94 : vector<1x128xf32> to vector<1x1x128xf32>
    tpu.vector_store %arg7[%c0_96, %c0_97, %c0_98], %97 {strides = array<i32>} : memref<1x1x128xf32, #tpu.memory_space<vmem>>, vector<1x1x128xf32>,
    return
  }
  func.func @transform_0(%arg0: i32) -> (i32, i32, i32, i32) {
    %c0_i32 = arith.constant 0 : i32
    %c0_i32_0 = arith.constant 0 : i32
    %c0_i32_1 = arith.constant 0 : i32
    %c0_i32_2 = arith.constant 0 : i32
    return %arg0, %c0_i32, %c0_i32_0, %c0_i32_1 : i32, i32, i32, i32
  }
  func.func @transform_1(%arg0: i32) -> (i32, i32, i32, i32) {
    %c0_i32 = arith.constant 0 : i32
    %c0_i32_0 = arith.constant 0 : i32
    %c0_i32_1 = arith.constant 0 : i32
    %c0_i32_2 = arith.constant 0 : i32
    %c0_i32_3 = arith.constant 0 : i32
    return %c0_i32, %c0_i32_0, %c0_i32_1, %c0_i32_2 : i32, i32, i32, i32
  }
  func.func @transform_2(%arg0: i32) -> (i32, i32) {
    %c0_i32 = arith.constant 0 : i32
    %c0_i32_0 = arith.constant 0 : i32
    %c0_i32_1 = arith.constant 0 : i32
    return %c0_i32, %c0_i32_0 : i32, i32
  }
  func.func @transform_3(%arg0: i32) -> (i32, i32) {
    %c0_i32 = arith.constant 0 : i32
    %c0_i32_0 = arith.constant 0 : i32
    %c0_i32_1 = arith.constant 0 : i32
    return %c0_i32, %c0_i32_0 : i32, i32
  }
  func.func @transform_4(%arg0: i32) -> (i32, i32, i32, i32) {
    %c0_i32 = arith.constant 0 : i32
    %c0_i32_0 = arith.constant 0 : i32
    %c0_i32_1 = arith.constant 0 : i32
    %c0_i32_2 = arith.constant 0 : i32
    return %arg0, %c0_i32, %c0_i32_0, %c0_i32_1 : i32, i32, i32, i32
  }
  func.func @transform_5(%arg0: i32) -> (i32, i32, i32) {
    %c0_i32 = arith.constant 0 : i32
    %c0_i32_0 = arith.constant 0 : i32
    %c0_i32_1 = arith.constant 0 : i32
    return %arg0, %c0_i32, %c0_i32_0 : i32, i32, i32
  }
  func.func @transform_6(%arg0: i32) -> (i32, i32, i32) {
    %c0_i32 = arith.constant 0 : i32
    %c0_i32_0 = arith.constant 0 : i32
    %c0_i32_1 = arith.constant 0 : i32
    return %arg0, %c0_i32, %c0_i32_0 : i32, i32, i32
  }
}

module attributes {stable_mosaic.version = 11 : i64} {
  func.func @_bn_add_relu_kernel(%arg0: i32, %arg1: memref<1x16x16x128xf32, #tpu.memory_space<vmem>>, %arg2: memref<1x16x16x128xf32, #tpu.memory_space<vmem>>, %arg3: memref<1x128xf32, #tpu.memory_space<vmem>>, %arg4: memref<1x128xf32, #tpu.memory_space<vmem>>, %arg5: memref<1x16x16x128xf32, #tpu.memory_space<vmem>>) attributes {dimension_semantics = [#tpu.dimension_semantics<parallel>], iteration_bounds = array<i64: 2>, scalar_prefetch = 0 : i64, scratch_operands = 0 : i64, tpu.core_type = #tpu.core_type<tc>, window_params = [{transform_indices = @transform_0, window_bounds = array<i64: 1, 16, 16, 128>}, {transform_indices = @transform_1, window_bounds = array<i64: 1, 16, 16, 128>}, {pipeline_mode = #tpu.pipeline_mode<synchronous>, transform_indices = @transform_2, window_bounds = array<i64: 1, 128>}, {pipeline_mode = #tpu.pipeline_mode<synchronous>, transform_indices = @transform_3, window_bounds = array<i64: 1, 128>}, {transform_indices = @transform_4, window_bounds = array<i64: 1, 16, 16, 128>}]} {
    %c0 = arith.constant 0 : index
    %c0_0 = arith.constant 0 : index
    %c0_1 = arith.constant 0 : index
    %c0_2 = arith.constant 0 : index
    %0 = vector.load %arg1[%c0, %c0_0, %c0_1, %c0_2] : memref<1x16x16x128xf32, #tpu.memory_space<vmem>>, vector<1x16x16x128xf32>
    %c0_3 = arith.constant 0 : index
    %c0_4 = arith.constant 0 : index
    %1 = vector.load %arg3[%c0_3, %c0_4] : memref<1x128xf32, #tpu.memory_space<vmem>>, vector<1x128xf32>
    %2 = vector.shape_cast %1 : vector<1x128xf32> to vector<128xf32>
    %3 = vector.shape_cast %2 : vector<128xf32> to vector<1x1x1x128xf32>
    %4 = vector.broadcast %3 : vector<1x1x1x128xf32> to vector<1x16x16x128xf32>
    %5 = arith.mulf %0, %4 : vector<1x16x16x128xf32>
    %c0_5 = arith.constant 0 : index
    %c0_6 = arith.constant 0 : index
    %6 = vector.load %arg4[%c0_5, %c0_6] : memref<1x128xf32, #tpu.memory_space<vmem>>, vector<1x128xf32>
    %7 = vector.shape_cast %6 : vector<1x128xf32> to vector<128xf32>
    %8 = vector.shape_cast %7 : vector<128xf32> to vector<1x1x1x128xf32>
    %9 = vector.broadcast %8 : vector<1x1x1x128xf32> to vector<1x16x16x128xf32>
    %10 = arith.addf %5, %9 : vector<1x16x16x128xf32>
    %c0_7 = arith.constant 0 : index
    %c0_8 = arith.constant 0 : index
    %c0_9 = arith.constant 0 : index
    %c0_10 = arith.constant 0 : index
    %11 = vector.load %arg2[%c0_7, %c0_8, %c0_9, %c0_10] : memref<1x16x16x128xf32, #tpu.memory_space<vmem>>, vector<1x16x16x128xf32>
    %12 = arith.addf %10, %11 : vector<1x16x16x128xf32>
    %cst = arith.constant 0.000000e+00 : f32
    %13 = vector.broadcast %cst : f32 to vector<1x16x16x128xf32>
    %14 = arith.maximumf %12, %13 : vector<1x16x16x128xf32>
    %c0_11 = arith.constant 0 : index
    %c0_12 = arith.constant 0 : index
    %c0_13 = arith.constant 0 : index
    %c0_14 = arith.constant 0 : index
    %15 = vector.load %arg5[%c0_11, %c0_12, %c0_13, %c0_14] : memref<1x16x16x128xf32, #tpu.memory_space<vmem>>, vector<1x16x16x128xf32>
    tpu.vector_store %arg5[%c0_11, %c0_12, %c0_13, %c0_14], %14 {strides = array<i32>} : memref<1x16x16x128xf32, #tpu.memory_space<vmem>>, vector<1x16x16x128xf32>,
    return
  }
  func.func @transform_0(%arg0: i32) -> (i32, i32, i32, i32) {
    %c0_i32 = arith.constant 0 : i32
    %c0_i32_0 = arith.constant 0 : i32
    %c0_i32_1 = arith.constant 0 : i32
    %c0_i32_2 = arith.constant 0 : i32
    return %arg0, %c0_i32, %c0_i32_0, %c0_i32_1 : i32, i32, i32, i32
  }
  func.func @transform_1(%arg0: i32) -> (i32, i32, i32, i32) {
    %c0_i32 = arith.constant 0 : i32
    %c0_i32_0 = arith.constant 0 : i32
    %c0_i32_1 = arith.constant 0 : i32
    %c0_i32_2 = arith.constant 0 : i32
    return %arg0, %c0_i32, %c0_i32_0, %c0_i32_1 : i32, i32, i32, i32
  }
  func.func @transform_2(%arg0: i32) -> (i32, i32) {
    %c0_i32 = arith.constant 0 : i32
    %c0_i32_0 = arith.constant 0 : i32
    %c0_i32_1 = arith.constant 0 : i32
    return %c0_i32, %c0_i32_0 : i32, i32
  }
  func.func @transform_3(%arg0: i32) -> (i32, i32) {
    %c0_i32 = arith.constant 0 : i32
    %c0_i32_0 = arith.constant 0 : i32
    %c0_i32_1 = arith.constant 0 : i32
    return %c0_i32, %c0_i32_0 : i32, i32
  }
  func.func @transform_4(%arg0: i32) -> (i32, i32, i32, i32) {
    %c0_i32 = arith.constant 0 : i32
    %c0_i32_0 = arith.constant 0 : i32
    %c0_i32_1 = arith.constant 0 : i32
    %c0_i32_2 = arith.constant 0 : i32
    return %arg0, %c0_i32, %c0_i32_0, %c0_i32_1 : i32, i32, i32, i32
  }
}

</mosaic_0001>

<bundles_post_ra>
// kernel: tpu_custom_call.1
= control target key start
LH: loop header
LB: loop body
LE: loop exit
PB: predicated region body
PF: predicated region fallthrough
CT: control target
= control target key end

     0   :  { %8 = vsyncpa [#allocation3], 0  ;;  %s767_s0 = inlined_call_operand.hbm [shape: f32[288,128], index: 0, kind: input, shape index: {}]   ;;  %s768_s1 = inlined_call_operand.hbm [shape: f32[288,128], index: 1, kind: output, shape index: {0}]   ;;  %s769_s2 = inlined_call_operand.hbm [shape: f32[288,128], index: 2, kind: output, shape index: {1}]  }
   0x1   :  { %9 = vsyncpa [#allocation4], 0 }
   0x2   :  { %10 = vsyncpa [#allocation7], 0  ;;  %s422_s9 = smov [#allocation2]  }
   0x3   :  { %s16_s10 = sshll.u32 %s422_s9, 4  ;;  %s17_s10 = int_to_ptr.vmem [resolvable:$true] %s16_s10 }
   0x4   :  { %s364_s11 = scalar_lea.vmem %s17_s10, 4608  ;;  %p369_p1 = scmp.lt.s32.totalorder %s17_s10, %s17_s10 }
   0x5   :  { %p365_p0 = scmp.ne.s32.totalorder %s17_s10, %s364_s11  ;;  %p370_p2 = scmp.lt.s32.totalorder %s364_s11, %s364_s11 }
   0x7   :  { %p371_p3 = por %p370_p2, %p369_p1 }
   0x9   :  { %p372_p4 = pnand %p371_p3, %p365_p0 }
   0xb   :  { %375 = shalt.err (!%p372_p4)
}
   0xc   :  { %s423_s12 = smov 128   ;;  %s424_s13 = smov 8  }
   0xd   :  { %22 = dma.hbm_to_vmem [thread:$0]  %s767_s0, 4608, %s17_s10, [#allocation3], %s423_s12, %s423_s12, %s424_s13  }
   0xe   :  { %416 = dma.done.wait [#allocation3], 4608  }
   0xf   :  { %417 = vsyncadd [#allocation3], 4294962688  ;;  %v98_v0 = vlaneseq  ;;  %v450_v2 = vld [vmem:[#allocation2] sm:$0xff]  ;;  %v452_v3 = vld [vmem:[#allocation2 + $0x118] sm:$0xff]  ;;  %s425_s0 = smov [#allocation5]  }
  0x10   :  { %v455_v4 = vld [vmem:[#allocation2 + $0x8] sm:$0xff]  ;;  %v62_v5 = vrot.slane %v450_v2, 7  ;;  %v97_v6 = vrot.slane %v452_v3, 7  ;;  %v460_v8 = vld [vmem:[#allocation2 + $0x10] sm:$0xff]  ;;  %v462_v9 = vld [vmem:[#allocation2 + $0x18] sm:$0xff]  ;;  %s323_s16 = sshll.u32 %s425_s0, 4  ;;  %s634_s16 = int_to_ptr.vmem [resolvable:$true] %s323_s16 }
  0x11   :  { %v448_v1 = vshrl.u32 %v98_v0, 7  ;;  %v63_v7 = vrot.slane %v455_v4, 7  ;;  %v464_v10 = vld [vmem:[#allocation2 + $0x20] sm:$0xff]  ;;  %v64_v11 = vrot.slane %v460_v8, 7  ;;  %v65_v12 = vrot.slane %v462_v9, 7  ;;  %v469_v14 = vld [vmem:[#allocation2 + $0x28] sm:$0xff]  ;;  %p381_p6 = scmp.lt.s32.totalorder %s634_s16, %s634_s16 }
  0x12   :  { %v66_v13 = vrot.slane %v464_v10, 7  ;;  %v471_v15 = vld [vmem:[#allocation2 + $0x30] sm:$0xff]  ;;  %v473_v16 = vld [vmem:[#allocation2 + $0x38] sm:$0xff]  ;;  %v67_v19 = vrot.slane %v469_v14, 7  ;;  %v483_v21 = vld [vmem:[#allocation2 + $0x40] sm:$0xff]  ;;  %s376_s17 = scalar_lea.vmem %s634_s16, 4608 }
  0x13   :  { %vm100_vm0 = vcmp.lt.s32.totalorder %v448_v1, 1  ;;  %v68_v20 = vrot.slane %v471_v15, 7  ;;  %v485_v22 = vld [vmem:[#allocation2 + $0x48] sm:$0xff]  ;;  %v487_v23 = vld [vmem:[#allocation2 + $0x50] sm:$0xff]  ;;  %v69_v27 = vrot.slane %v473_v16, 7  ;;  %v496_v28 = vld [vmem:[#allocation2 + $0x58] sm:$0xff]  ;;  %p377_p5 = scmp.ne.s32.totalorder %s634_s16, %s376_s17  ;;  %p382_p7 = scmp.lt.s32.totalorder %s376_s17, %s376_s17 }
  0x14   :  { %v136_v17 = vsel %vm100_vm0, %v97_v6, %v62_v5  ;;  %v135_v18 = vsel %vm100_vm0, %v62_v5, %v63_v7  ;;  %v134_v24 = vsel %vm100_vm0, %v63_v7, %v64_v11  ;;  %v133_v25 = vsel %vm100_vm0, %v64_v11, %v65_v12  ;;  %v498_v29 = vld [vmem:[#allocation2 + $0x60] sm:$0xff]  ;;  %v500_v30 = vld [vmem:[#allocation2 + $0x68] sm:$0xff]  ;;  %v508_v35 = vld [vmem:[#allocation2 + $0x70] sm:$0xff] }
  0x15   :  { %137 = vst [vmem:[#allocation5] sm:$0xff] %v136_v17  ;;  %138 = vst [vmem:[#allocation5 + $0x8] sm:$0xff] %v135_v18  ;;  %v132_v26 = vsel %vm100_vm0, %v65_v12, %v66_v13  ;;  %v131_v31 = vsel %vm100_vm0, %v66_v13, %v67_v19  ;;  %v130_v32 = vsel %vm100_vm0, %v67_v19, %v68_v20  ;;  %v70_v33 = vrot.slane %v483_v21, 7  ;;  %v510_v36 = vld [vmem:[#allocation2 + $0x78] sm:$0xff]  ;;  %v517_v41 = vld [vmem:[#allocation2 + $0x80] sm:$0xff]  ;;  %p383_p8 = por %p382_p7, %p381_p6 }
  0x16   :  { %139 = vst [vmem:[#allocation5 + $0x10] sm:$0xff] %v134_v24  ;;  %140 = vst [vmem:[#allocation5 + $0x18] sm:$0xff] %v133_v25  ;;  %v71_v34 = vrot.slane %v485_v22, 7  ;;  %v129_v37 = vsel %vm100_vm0, %v68_v20, %v69_v27  ;;  %v72_v38 = vrot.slane %v487_v23, 7  ;;  %v73_v39 = vrot.slane %v496_v28, 7  ;;  %v519_v42 = vld [vmem:[#allocation2 + $0x88] sm:$0xff] }
  0x17   :  { %141 = vst [vmem:[#allocation5 + $0x20] sm:$0xff] %v132_v26  ;;  %142 = vst [vmem:[#allocation5 + $0x28] sm:$0xff] %v131_v31  ;;  %v74_v40 = vrot.slane %v498_v29, 7  ;;  %v128_v43 = vsel %vm100_vm0, %v69_v27, %v70_v33  ;;  %v75_v45 = vrot.slane %v500_v30, 7  ;;  %v76_v46 = vrot.slane %v508_v35, 7  ;;  %v527_v47 = vld [vmem:[#allocation2 + $0x90] sm:$0xff]  ;;  %p384_p9 = pnand %p383_p8, %p377_p5 }
  0x18   :  { %143 = vst [vmem:[#allocation5 + $0x30] sm:$0xff] %v130_v32  ;;  %144 = vst [vmem:[#allocation5 + $0x38] sm:$0xff] %v129_v37  ;;  %v127_v44 = vsel %vm100_vm0, %v70_v33, %v71_v34  ;;  %v529_v48 = vld [vmem:[#allocation2 + $0x98] sm:$0xff]  ;;  %v531_v49 = vld [vmem:[#allocation2 + $0xa0] sm:$0xff]  ;;  %v126_v50 = vsel %vm100_vm0, %v71_v34, %v72_v38  ;;  %v125_v51 = vsel %vm100_vm0, %v72_v38, %v73_v39  ;;  %v77_v53 = vrot.slane %v510_v36, 7 }
  0x19   :  { %145 = vst [vmem:[#allocation5 + $0x40] sm:$0xff] %v128_v43  ;;  %146 = vst [vmem:[#allocation5 + $0x48] sm:$0xff] %v127_v44  ;;  %v124_v52 = vsel %vm100_vm0, %v73_v39, %v74_v40  ;;  %v540_v54 = vld [vmem:[#allocation2 + $0xa8] sm:$0xff]  ;;  %v542_v55 = vld [vmem:[#allocation2 + $0xb0] sm:$0xff]  ;;  %v123_v56 = vsel %vm100_vm0, %v74_v40, %v75_v45  ;;  %v122_v57 = vsel %vm100_vm0, %v75_v45, %v76_v46  ;;  %v78_v58 = vrot.slane %v517_v41, 7 }
  0x1a   :  { %147 = vst [vmem:[#allocation5 + $0x50] sm:$0xff] %v126_v50  ;;  %148 = vst [vmem:[#allocation5 + $0x58] sm:$0xff] %v125_v51  ;;  %v79_v59 = vrot.slane %v519_v42, 7  ;;  %v550_v60 = vld [vmem:[#allocation2 + $0xb8] sm:$0xff]  ;;  %vm245_vm1 = vcmp.lt.s32.totalorder %v448_v1, 2  ;;  %v121_v61 = vsel %vm100_vm0, %v76_v46, %v77_v53  ;;  %v80_v62 = vrot.slane %v527_v47, 7 }
  0x1b   :  { %149 = vst [vmem:[#allocation5 + $0x60] sm:$0xff] %v124_v52  ;;  %150 = vst [vmem:[#allocation5 + $0x68] sm:$0xff] %v123_v56  ;;  %v81_v63 = vrot.slane %v529_v48, 7  ;;  %v82_v0 = vrot.slane %v531_v49, 7  ;;  %v558_v5 = vld [vmem:[#allocation2 + $0xc0] sm:$0xff]  ;;  %v560_v7 = vld [vmem:[#allocation2 + $0xc8] sm:$0xff]  ;;  %v120_v11 = vsel %vm100_vm0, %v77_v53, %v78_v58 }
  0x1c   :  { %151 = vst [vmem:[#allocation5 + $0x70] sm:$0xff] %v122_v57  ;;  %152 = vst [vmem:[#allocation5 + $0x78] sm:$0xff] %v121_v61  ;;  %v119_v12 = vsel %vm100_vm0, %v78_v58, %v79_v59  ;;  %v83_v13 = vrot.slane %v540_v54, 7  ;;  %v84_v17 = vrot.slane %v542_v55, 7  ;;  %v568_v18 = vld [vmem:[#allocation2 + $0xd0] sm:$0xff]  ;;  %v570_v19 = vld [vmem:[#allocation2 + $0xd8] sm:$0xff]  ;;  %v118_v24 = vsel %vm100_vm0, %v79_v59, %v80_v62 }
  0x1d   :  { %v572_v20 = vld [vmem:[#allocation2 + $0xe0] sm:$0xff]  ;;  %153 = vst [vmem:[#allocation5 + $0x80] sm:$0xff] %v120_v11  ;;  %154 = vst [vmem:[#allocation5 + $0x88] sm:$0xff] %v119_v12  ;;  %v117_v25 = vsel %vm100_vm0, %v80_v62, %v81_v63  ;;  %v116_v26 = vsel %vm100_vm0, %v81_v63, %v82_v0  ;;  %v85_v27 = vrot.slane %v550_v60, 7  ;;  %v581_v31 = vld [vmem:[#allocation2 + $0xe8] sm:$0xff]  ;;  %v86_v37 = vrot.slane %v558_v5, 7 }
  0x1e   :  { %v583_v32 = vld [vmem:[#allocation2 + $0xf0] sm:$0xff]  ;;  %155 = vst [vmem:[#allocation5 + $0x90] sm:$0xff] %v118_v24  ;;  %156 = vst [vmem:[#allocation5 + $0x98] sm:$0xff] %v117_v25  ;;  %v115_v33 = vsel %vm100_vm0, %v82_v0, %v83_v13  ;;  %v114_v34 = vsel %vm100_vm0, %v83_v13, %v84_v17  ;;  %v87_v38 = vrot.slane %v560_v7, 7  ;;  %v591_v39 = vld [vmem:[#allocation2 + $0xf8] sm:$0xff]  ;;  %v88_v43 = vrot.slane %v568_v18, 7 }
  0x1f   :  { %157 = vst [vmem:[#allocation5 + $0xa0] sm:$0xff] %v116_v26  ;;  %158 = vst [vmem:[#allocation5 + $0xa8] sm:$0xff] %v115_v33  ;;  %v113_v40 = vsel %vm100_vm0, %v84_v17, %v85_v27  ;;  %v89_v44 = vrot.slane %v570_v19, 7  ;;  %v90_v45 = vrot.slane %v572_v20, 7  ;;  %v598_v46 = vld [vmem:[#allocation2 + $0x100] sm:$0xff]  ;;  %v600_v50 = vld [vmem:[#allocation2 + $0x108] sm:$0xff]  ;;  %v112_v51 = vsel %vm100_vm0, %v85_v27, %v86_v37 }
  0x20   :  { %159 = vst [vmem:[#allocation5 + $0xb0] sm:$0xff] %v114_v34  ;;  %160 = vst [vmem:[#allocation5 + $0xb8] sm:$0xff] %v113_v40  ;;  %v111_v52 = vsel %vm100_vm0, %v86_v37, %v87_v38  ;;  %v91_v53 = vrot.slane %v581_v31, 7  ;;  %v92_v56 = vrot.slane %v583_v32, 7  ;;  %v608_v57 = vld [vmem:[#allocation2 + $0x110] sm:$0xff]  ;;  %v110_v58 = vsel %vm100_vm0, %v87_v38, %v88_v43 }
  0x21   :  { %161 = vst [vmem:[#allocation5 + $0xc0] sm:$0xff] %v112_v51  ;;  %162 = vst [vmem:[#allocation5 + $0xc8] sm:$0xff] %v111_v52  ;;  %v109_v59 = vsel %vm100_vm0, %v88_v43, %v89_v44  ;;  %v108_v61 = vsel %vm100_vm0, %v89_v44, %v90_v45  ;;  %v93_v62 = vrot.slane %v591_v39, 7  ;;  %v94_v11 = vrot.slane %v598_v46, 7 }
  0x22   :  { %163 = vst [vmem:[#allocation5 + $0xd0] sm:$0xff] %v110_v58  ;;  %164 = vst [vmem:[#allocation5 + $0xd8] sm:$0xff] %v109_v59  ;;  %v107_v63 = vsel %vm100_vm0, %v90_v45, %v91_v53  ;;  %v106_v0 = vsel %vm100_vm0, %v91_v53, %v92_v56  ;;  %v95_v12 = vrot.slane %v600_v50, 7  ;;  %v96_v17 = vrot.slane %v608_v57, 7 }
  0x23   :  { %165 = vst [vmem:[#allocation5 + $0xe0] sm:$0xff] %v108_v61  ;;  %166 = vst [vmem:[#allocation5 + $0xe8] sm:$0xff] %v107_v63  ;;  %v105_v13 = vsel %vm100_vm0, %v92_v56, %v93_v62  ;;  %v209_v24 = vrot.slane %v450_v2, 6  ;;  %v244_v25 = vrot.slane %v452_v3, 6  ;;  %v104_v26 = vsel %vm100_vm0, %v93_v62, %v94_v11 }
  0x24   :  { %167 = vst [vmem:[#allocation5 + $0xf0] sm:$0xff] %v106_v0  ;;  %168 = vst [vmem:[#allocation5 + $0xf8] sm:$0xff] %v105_v13  ;;  %v103_v27 = vsel %vm100_vm0, %v94_v11, %v95_v12  ;;  %v210_v33 = vrot.slane %v455_v4, 6  ;;  %v211_v34 = vrot.slane %v460_v8, 6  ;;  %v102_v2 = vsel %vm100_vm0, %v95_v12, %v96_v17 }
  0x25   :  { %169 = vst [vmem:[#allocation5 + $0x100] sm:$0xff] %v104_v26  ;;  %170 = vst [vmem:[#allocation5 + $0x108] sm:$0xff] %v103_v27  ;;  %v101_v37 = vsel %vm100_vm0, %v96_v17, %v97_v6  ;;  %v281_v4 = vsel %vm245_vm1, %v244_v25, %v209_v24  ;;  %v212_v8 = vrot.slane %v462_v9, 6  ;;  %v213_v6 = vrot.slane %v464_v10, 6 }
  0x26   :  { %171 = vst [vmem:[#allocation5 + $0x110] sm:$0xff] %v102_v2  ;;  %172 = vst [vmem:[#allocation5 + $0x118] sm:$0xff] %v101_v37  ;;  %v280_v38 = vsel %vm245_vm1, %v209_v24, %v210_v33  ;;  %v279_v40 = vsel %vm245_vm1, %v210_v33, %v211_v34  ;;  %v214_v43 = vrot.slane %v469_v14, 6  ;;  %v215_v9 = vrot.slane %v471_v15, 6 }
  0x27   :  { %282 = vst [vmem:[#allocation6] sm:$0xff] %v281_v4  ;;  %283 = vst [vmem:[#allocation6 + $0x8] sm:$0xff] %v280_v38  ;;  %v278_v44 = vsel %vm245_vm1, %v211_v34, %v212_v8  ;;  %v216_v45 = vrot.slane %v473_v16, 6  ;;  %v217_v51 = vrot.slane %v483_v21, 6 }
  0x28   :  { %284 = vst [vmem:[#allocation6 + $0x10] sm:$0xff] %v279_v40 }
  0x29   :  { %387 = shalt.err (!%p384_p9)
}
  0x2a   :  { %329 = dma.vmem_to_hbm [thread:$0]  %s634_s16, 4608, %s768_s1, [#allocation4], %s423_s12, %s423_s12, %s424_s13   ;;  %285 = vst [vmem:[#allocation6 + $0x18] sm:$0xff] %v278_v44  ;;  %v277_v10 = vsel %vm245_vm1, %v212_v8, %v213_v6  ;;  %v276_v14 = vsel %vm245_vm1, %v213_v6, %v214_v43  ;;  %v218_v15 = vrot.slane %v485_v22, 6  ;;  %v219_v16 = vrot.slane %v487_v23, 6 }
  0x2b   :  { %286 = vst [vmem:[#allocation6 + $0x20] sm:$0xff] %v277_v10  ;;  %287 = vst [vmem:[#allocation6 + $0x28] sm:$0xff] %v276_v14  ;;  %v275_v21 = vsel %vm245_vm1, %v214_v43, %v215_v9  ;;  %v274_v52 = vsel %vm245_vm1, %v215_v9, %v216_v45  ;;  %v273_v53 = vsel %vm245_vm1, %v216_v45, %v217_v51  ;;  %v220_v56 = vrot.slane %v496_v28, 6  ;;  %s426_s1 = smov [#allocation6]  }
  0x2c   :  { %288 = vst [vmem:[#allocation6 + $0x30] sm:$0xff] %v275_v21  ;;  %289 = vst [vmem:[#allocation6 + $0x38] sm:$0xff] %v274_v52  ;;  %v272_v22 = vsel %vm245_vm1, %v217_v51, %v218_v15  ;;  %v271_v23 = vsel %vm245_vm1, %v218_v15, %v219_v16  ;;  %v221_v58 = vrot.slane %v498_v29, 6  ;;  %v222_v59 = vrot.slane %v500_v30, 6  ;;  %s335_s20 = sshll.u32 %s426_s1, 4  ;;  %s336_s20 = int_to_ptr.vmem [resolvable:$true] %s335_s20 }
  0x2d   :  { %290 = vst [vmem:[#allocation6 + $0x40] sm:$0xff] %v273_v53  ;;  %291 = vst [vmem:[#allocation6 + $0x48] sm:$0xff] %v272_v22  ;;  %v270_v61 = vsel %vm245_vm1, %v219_v16, %v220_v56  ;;  %v223_v28 = vrot.slane %v508_v35, 6  ;;  %v224_v62 = vrot.slane %v510_v36, 6  ;;  %v225_v63 = vrot.slane %v517_v41, 6  ;;  %s396_s21 = scalar_lea.vmem %s336_s20, 4608  ;;  %p401_p11 = scmp.lt.s32.totalorder %s336_s20, %s336_s20 }
  0x2e   :  { %292 = vst [vmem:[#allocation6 + $0x50] sm:$0xff] %v271_v23  ;;  %293 = vst [vmem:[#allocation6 + $0x58] sm:$0xff] %v270_v61  ;;  %v269_v0 = vsel %vm245_vm1, %v220_v56, %v221_v58  ;;  %v268_v29 = vsel %vm245_vm1, %v221_v58, %v222_v59  ;;  %v226_v30 = vrot.slane %v519_v42, 6  ;;  %v227_v11 = vrot.slane %v527_v47, 6  ;;  %p397_p10 = scmp.ne.s32.totalorder %s336_s20, %s396_s21  ;;  %p402_p12 = scmp.lt.s32.totalorder %s396_s21, %s396_s21 }
  0x2f   :  { %294 = vst [vmem:[#allocation6 + $0x60] sm:$0xff] %v269_v0  ;;  %295 = vst [vmem:[#allocation6 + $0x68] sm:$0xff] %v268_v29  ;;  %v267_v35 = vsel %vm245_vm1, %v222_v59, %v223_v28  ;;  %v266_v36 = vsel %vm245_vm1, %v223_v28, %v224_v62  ;;  %v265_v41 = vsel %vm245_vm1, %v224_v62, %v225_v63  ;;  %v228_v12 = vrot.slane %v529_v48, 6 }
  0x30   :  { %296 = vst [vmem:[#allocation6 + $0x70] sm:$0xff] %v267_v35  ;;  %297 = vst [vmem:[#allocation6 + $0x78] sm:$0xff] %v266_v36  ;;  %v264_v42 = vsel %vm245_vm1, %v225_v63, %v226_v30  ;;  %v263_v47 = vsel %vm245_vm1, %v226_v30, %v227_v11  ;;  %v229_v13 = vrot.slane %v531_v49, 6  ;;  %v230_v17 = vrot.slane %v540_v54, 6  ;;  %p403_p13 = por %p402_p12, %p401_p11 }
  0x31   :  { %298 = vst [vmem:[#allocation6 + $0x80] sm:$0xff] %v265_v41  ;;  %299 = vst [vmem:[#allocation6 + $0x88] sm:$0xff] %v264_v42  ;;  %v262_v24 = vsel %vm245_vm1, %v227_v11, %v228_v12  ;;  %v231_v48 = vrot.slane %v542_v55, 6  ;;  %v232_v26 = vrot.slane %v550_v60, 6  ;;  %v233_v27 = vrot.slane %v558_v5, 6 }
  0x32   :  { %300 = vst [vmem:[#allocation6 + $0x90] sm:$0xff] %v263_v47  ;;  %301 = vst [vmem:[#allocation6 + $0x98] sm:$0xff] %v262_v24  ;;  %v261_v33 = vsel %vm245_vm1, %v228_v12, %v229_v13  ;;  %v260_v49 = vsel %vm245_vm1, %v229_v13, %v230_v17  ;;  %v234_v54 = vrot.slane %v560_v7, 6  ;;  %v235_v34 = vrot.slane %v568_v18, 6  ;;  %p404_p0 = pnand %p403_p13, %p397_p10 }
  0x33   :  { %302 = vst [vmem:[#allocation6 + $0xa0] sm:$0xff] %v261_v33  ;;  %303 = vst [vmem:[#allocation6 + $0xa8] sm:$0xff] %v260_v49  ;;  %v259_v55 = vsel %vm245_vm1, %v230_v17, %v231_v48  ;;  %v258_v60 = vsel %vm245_vm1, %v231_v48, %v232_v26  ;;  %v257_v5 = vsel %vm245_vm1, %v232_v26, %v233_v27  ;;  %v236_v2 = vrot.slane %v570_v19, 6 }
  0x34   :  { %304 = vst [vmem:[#allocation6 + $0xb0] sm:$0xff] %v259_v55  ;;  %305 = vst [vmem:[#allocation6 + $0xb8] sm:$0xff] %v258_v60  ;;  %v256_v7 = vsel %vm245_vm1, %v233_v27, %v234_v54  ;;  %v255_v18 = vsel %vm245_vm1, %v234_v54, %v235_v34  ;;  %v237_v37 = vrot.slane %v572_v20, 6  ;;  %v238_v4 = vrot.slane %v581_v31, 6 }
  0x35   :  { %306 = vst [vmem:[#allocation6 + $0xc0] sm:$0xff] %v257_v5  ;;  %307 = vst [vmem:[#allocation6 + $0xc8] sm:$0xff] %v256_v7  ;;  %v254_v19 = vsel %vm245_vm1, %v235_v34, %v236_v2  ;;  %v239_v8 = vrot.slane %v583_v32, 6  ;;  %v240_v38 = vrot.slane %v591_v39, 6  ;;  %v241_v40 = vrot.slane %v598_v46, 6 }
  0x36   :  { %308 = vst [vmem:[#allocation6 + $0xd0] sm:$0xff] %v255_v18  ;;  %309 = vst [vmem:[#allocation6 + $0xd8] sm:$0xff] %v254_v19  ;;  %v253_v6 = vsel %vm245_vm1, %v236_v2, %v237_v37  ;;  %v252_v20 = vsel %vm245_vm1, %v237_v37, %v238_v4  ;;  %v242_v31 = vrot.slane %v600_v50, 6  ;;  %v243_v43 = vrot.slane %v608_v57, 6 }
  0x37   :  { %310 = vst [vmem:[#allocation6 + $0xe0] sm:$0xff] %v253_v6  ;;  %311 = vst [vmem:[#allocation6 + $0xe8] sm:$0xff] %v252_v20  ;;  %v251_v32 = vsel %vm245_vm1, %v238_v4, %v239_v8  ;;  %v250_v39 = vsel %vm245_vm1, %v239_v8, %v240_v38  ;;  %v249_v46 = vsel %vm245_vm1, %v240_v38, %v241_v40 }
  0x38   :  { %312 = vst [vmem:[#allocation6 + $0xf0] sm:$0xff] %v251_v32  ;;  %313 = vst [vmem:[#allocation6 + $0xf8] sm:$0xff] %v250_v39  ;;  %v248_v50 = vsel %vm245_vm1, %v241_v40, %v242_v31  ;;  %v247_v57 = vsel %vm245_vm1, %v242_v31, %v243_v43  ;;  %v246_v44 = vsel %vm245_vm1, %v243_v43, %v244_v25 }
  0x39   :  { %314 = vst [vmem:[#allocation6 + $0x100] sm:$0xff] %v249_v46  ;;  %315 = vst [vmem:[#allocation6 + $0x108] sm:$0xff] %v248_v50 }
  0x3a   :  { %316 = vst [vmem:[#allocation6 + $0x110] sm:$0xff] %v247_v57  ;;  %317 = vst [vmem:[#allocation6 + $0x118] sm:$0xff] %v246_v44 }
  0x3b   :  { %407 = shalt.err (!%p404_p0)
}
  0x3c   :  { %341 = dma.vmem_to_hbm [thread:$0]  %s336_s20, 4608, %s769_s2, [#allocation7], %s423_s12, %s423_s12, %s424_s13  }
  0x3d   :  { %418 = dma.done.wait [#allocation4], 4608  }
  0x3e   :  { %419 = vsyncadd [#allocation4], 4294962688 }
  0x3f   :  { %420 = dma.done.wait [#allocation7], 4608  }
  0x40   :  { %421 = vsyncadd [#allocation7], 4294962688 }
  0x41   :  { %348 = vsyncpa [#allocation3], 1 }
  0x42   :  { %349 = vsyncpa [#allocation4], 1 }
  0x43   :  { %350 = vsyncpa [#allocation7], 1 }

// kernel: block_forward.5
= control target key start
LH: loop header
LB: loop body
LE: loop exit
PB: predicated region body
PF: predicated region fallthrough
CT: control target
= control target key end

     0   :  { %9 = vsyncpa [#allocation3], 0  ;;  %s981_s0 = inlined_call_operand.vmem [shape: f32[2,16,16,128], index: 0, kind: input, shape index: {}]   ;;  %s982_s1 = inlined_call_operand.vmem [shape: f32[2,16,16,128], index: 1, kind: input, shape index: {}]   ;;  %s983_s2 = inlined_call_operand.vmem [shape: f32[1,128], index: 2, kind: input, shape index: {}]   ;;  %s984_s3 = inlined_call_operand.vmem [shape: f32[1,128], index: 3, kind: input, shape index: {}]   ;;  %s985_s4 = inlined_call_operand.hbm [shape: f32[2,16,16,128], index: 4, kind: output, shape index: {}]  }
   0x1   :  { %11 = vsyncpa [#allocation3 + $0x1], 0  ;;  %s692_s15 = smov 0   ;;  %s694_s16 = smov 0  }
   0x2   :  { %s696_s17 = smov 0   ;;  %s698_s18 = smov 0  }
   0x3 LB: > { %s713_s19 = sadd.s32 4294967295, %s662_s18   ;;  %s542_s20 = sadd.s32 4294967294, %s662_s18   ;;  %s662_s18 = sphi %s698_s18, %s991_s18   ;;  %s658_s17 = sphi %s696_s17, %s990_s17   ;;  %s654_s16 = sphi %s694_s16, %s989_s16   ;;  %s650_s15 = sphi %s692_s15, %s988_s15  }
   0x4   : > { %s717_s21 = sadd.s32 1, %s662_s18   ;;  %s118_s22 = sadd.s32 1, %s658_s17 }
   0x5   : > { %s115_s23 = ssub.s32 %s662_s18, %s717_s21  ;;  %p128_p0 = scmp.ne.s32.totalorder %s658_s17, %s654_s16 }
   0x6   : > { %p116_p1 = scmp.eq.s32.totalorder %s115_s23, 0  ;;  %p129_p2 = scmp.eq.s32.totalorder %s713_s19, 1 }
   0x7   : > { %p134_p3 = scmp.ne.s32.totalorder %s654_s16, %s650_s15  ;;  %p135_p4 = scmp.eq.s32.totalorder %s542_s20, 1 }
   0x8   : > { %s728_s24 = scalar_select %p116_p1, %s658_s17, %s118_s22  }
   0x9   : > { %p730_p5 = por %p129_p2, %p128_p0  ;;  %p734_p6 = por %p135_p4, %p134_p3 }
   0xa   : > { %p545_p7 = scmp.ge.s32.totalorder %s662_s18, 1  ;;  %p175_p8 = scmp.lt.s32.totalorder %s662_s18, 3 }
   0xc   : > { %p176_p9 = pnand %p545_p7, %p175_p8 }
   0xd   : > { %p206_p10 = scmp.lt.s32.totalorder (!%p176_p9), %s713_s19, 1  ;;  %s203_s11 = sand.u32 (!%p176_p9), 1, %s654_s16  }
   0xe   : > { %179 = sbr.rel (%p176_p9) target bundleno = 75 (0x4b), region = 36  ;;  %s775_s14 = sshll.u32 (!%p176_p9), %s203_s11, 8 }
   0xf   : > { %s805_s20 = scalar_lea.vmem (!%p176_p9), [#allocation2], %s775_s14  ;;  %s560_s22 = sshll.u32 (!%p176_p9), %s713_s19, 12 }
  0x10   : > { %s468_s23 = sshll.u32 (!%p176_p9), %s805_s20, 4  ;;  %s932_s29 = scalar_lea.hbm (!%p176_p9), %s985_s4, %s560_s22  ;;  %s934_s23 = int_to_ptr.vmem [resolvable:$true] %s468_s23 }
  0x11   : > { %s602_s30 = scalar_lea.vmem (!%p176_p9), %s934_s23, 4096  ;;  %s664_s5 = smov (!%p176_p9), [#allocation2]  }
  0x12   : > { %p603_p11 = scmp.ne.s32.totalorder (!%p176_p9), %s934_s23, %s602_s30  ;;  %s606_s6 = sshll.u32 (!%p176_p9), %s664_s5, 4  ;;  %s607_s6 = int_to_ptr.vmem [resolvable:$false] %s606_s6 }
  0x13   : > { %s207_s27 = scalar_select %p206_p10, %s713_s19, 1  ;;  %v745_v0 = vld [vmem:[%s983_s2] ss:$0 sm:$0xff] }
  0x14   : > { %v762_v2 = vld [vmem:[%s984_s3] ss:$0 sm:$0xff]  ;;  %s941_s19 = scalar_lea.sflag [#allocation3], %s203_s11  ;;  %p604_p12 = pnand %p603_p11, %p730_p5 }
  0x15   : > { %s558_s28 = sshll.u32 %s207_s27, 8  ;;  %p609_p0 = scmp.lt.s32.totalorder %s934_s23, %s607_s6 }
  0x16   : > { %s750_s7 = scalar_lea.vmem %s981_s0, %s558_s28  ;;  %s755_s10 = scalar_lea.vmem %s982_s1, %s558_s28 }
  0x17   : > { %v216_v1 = vld [vmem:[%s750_s7] sm:$0xff]  ;;  %v217_v3 = vld [vmem:[%s750_s7 + $0x8] sm:$0xff]  ;;  %v218_v7 = vld [vmem:[%s750_s7 + $0x10] sm:$0xff]  ;;  %p605_p13 = pneg %p604_p12 }
  0x18   : > { %v255_v4 = vmul.f32 %v745_v0, %v216_v1  ;;  %v326_v5 = vld [vmem:[%s755_s10] sm:$0xff]  ;;  %v256_v6 = vmul.f32 %v745_v0, %v217_v3  ;;  %v327_v8 = vld [vmem:[%s755_s10 + $0x8] sm:$0xff]  ;;  %v257_v9 = vmul.f32 %v745_v0, %v218_v7  ;;  %v219_v10 = vld [vmem:[%s750_s7 + $0x18] sm:$0xff] }
  0x19   : > { %v220_v11 = vld [vmem:[%s750_s7 + $0x20] sm:$0xff]  ;;  %v328_v14 = vld [vmem:[%s755_s10 + $0x10] sm:$0xff]  ;;  %v258_v15 = vmul.f32 %v745_v0, %v219_v10  ;;  %v329_v16 = vld [vmem:[%s755_s10 + $0x18] sm:$0xff] }
  0x1a   : > { %v294_v12 = vadd.f32 %v762_v2, %v255_v4  ;;  %v295_v13 = vadd.f32 %v762_v2, %v256_v6  ;;  %v259_v17 = vmul.f32 %v745_v0, %v220_v11  ;;  %v221_v18 = vld [vmem:[%s750_s7 + $0x28] sm:$0xff]  ;;  %v296_v19 = vadd.f32 %v762_v2, %v257_v9  ;;  %v330_v20 = vld [vmem:[%s755_s10 + $0x20] sm:$0xff]  ;;  %v222_v22 = vld [vmem:[%s750_s7 + $0x30] sm:$0xff] }
  0x1b   : > { %v260_v21 = vmul.f32 %v745_v0, %v221_v18  ;;  %v223_v23 = vld [vmem:[%s750_s7 + $0x38] sm:$0xff]  ;;  %v297_v26 = vadd.f32 %v762_v2, %v258_v15  ;;  %v331_v28 = vld [vmem:[%s755_s10 + $0x28] sm:$0xff]  ;;  %v261_v31 = vmul.f32 %v745_v0, %v222_v22  ;;  %v224_v33 = vld [vmem:[%s750_s7 + $0x40] sm:$0xff] }
  0x1c   : > { %v358_v24 = vadd.f32 %v326_v5, %v294_v12  ;;  %v359_v25 = vadd.f32 %v327_v8, %v295_v13  ;;  %v298_v27 = vadd.f32 %v762_v2, %v259_v17  ;;  %v360_v29 = vadd.f32 %v328_v14, %v296_v19  ;;  %v225_v34 = vld [vmem:[%s750_s7 + $0x48] sm:$0xff]  ;;  %v332_v39 = vld [vmem:[%s755_s10 + $0x30] sm:$0xff]  ;;  %v333_v40 = vld [vmem:[%s755_s10 + $0x38] sm:$0xff] }
  0x1d   : > { %v299_v30 = vadd.f32 %v762_v2, %v260_v21  ;;  %v262_v32 = vmul.f32 %v745_v0, %v223_v23  ;;  %v361_v37 = vadd.f32 %v329_v16, %v297_v26  ;;  %v226_v41 = vld [vmem:[%s750_s7 + $0x50] sm:$0xff]  ;;  %v300_v44 = vadd.f32 %v762_v2, %v261_v31  ;;  %v227_v46 = vld [vmem:[%s750_s7 + $0x58] sm:$0xff]  ;;  %v228_v47 = vld [vmem:[%s750_s7 + $0x60] sm:$0xff] }
  0x1e   : > { %v390_v35 = vmax.f32 %v358_v24, 0.0  ;;  %v391_v36 = vmax.f32 %v359_v25, 0.0  ;;  %v362_v38 = vadd.f32 %v330_v20, %v298_v27  ;;  %v392_v42 = vmax.f32 %v360_v29, 0.0  ;;  %v229_v52 = vld [vmem:[%s750_s7 + $0x68] sm:$0xff]  ;;  %v334_v56 = vld [vmem:[%s755_s10 + $0x40] sm:$0xff]  ;;  %v336_v61 = vld [vmem:[%s755_s10 + $0x50] sm:$0xff] }
  0x1f   : > { %v363_v43 = vadd.f32 %v331_v28, %v299_v30  ;;  %v301_v45 = vadd.f32 %v762_v2, %v262_v32  ;;  %v393_v48 = vmax.f32 %v361_v37, 0.0  ;;  %v263_v50 = vmul.f32 %v745_v0, %v224_v33  ;;  %v335_v57 = vld [vmem:[%s755_s10 + $0x48] sm:$0xff]  ;;  %v230_v1 = vld [vmem:[%s750_s7 + $0x70] sm:$0xff]  ;;  %v231_v3 = vld [vmem:[%s750_s7 + $0x78] sm:$0xff] }
  0x20   : > { %422 = vst [vmem:[%s805_s20] sm:$0xff] %v390_v35  ;;  %423 = vst [vmem:[%s805_s20 + $0x8] sm:$0xff] %v391_v36  ;;  %v394_v49 = vmax.f32 %v362_v38, 0.0  ;;  %v264_v51 = vmul.f32 %v745_v0, %v225_v34  ;;  %v364_v54 = vadd.f32 %v332_v39, %v300_v44  ;;  %v265_v58 = vmul.f32 %v745_v0, %v226_v41  ;;  %v337_v7 = vld [vmem:[%s755_s10 + $0x58] sm:$0xff]  ;;  %v338_v8 = vld [vmem:[%s755_s10 + $0x60] sm:$0xff] }
  0x21   : > { %424 = vst [vmem:[%s805_s20 + $0x10] sm:$0xff] %v392_v42  ;;  %v395_v53 = vmax.f32 %v363_v43, 0.0  ;;  %v365_v55 = vadd.f32 %v333_v40, %v301_v45  ;;  %425 = vst [vmem:[%s805_s20 + $0x18] sm:$0xff] %v393_v48  ;;  %v302_v59 = vadd.f32 %v762_v2, %v263_v50  ;;  %v266_v62 = vmul.f32 %v745_v0, %v227_v46  ;;  %v339_v14 = vld [vmem:[%s755_s10 + $0x68] sm:$0xff]  ;;  %v232_v19 = vld [vmem:[%s750_s7 + $0x80] sm:$0xff] }
  0x22   : > { %426 = vst [vmem:[%s805_s20 + $0x20] sm:$0xff] %v394_v49  ;;  %v303_v60 = vadd.f32 %v762_v2, %v264_v51  ;;  %v267_v63 = vmul.f32 %v745_v0, %v228_v47  ;;  %v396_v4 = vmax.f32 %v364_v54, 0.0  ;;  %v304_v6 = vadd.f32 %v762_v2, %v265_v58  ;;  %v233_v20 = vld [vmem:[%s750_s7 + $0x88] sm:$0xff]  ;;  %v340_v25 = vld [vmem:[%s755_s10 + $0x70] sm:$0xff]  ;;  %v341_v26 = vld [vmem:[%s755_s10 + $0x78] sm:$0xff] }
  0x23   : > { %427 = vst [vmem:[%s805_s20 + $0x28] sm:$0xff] %v395_v53  ;;  %v397_v5 = vmax.f32 %v365_v55, 0.0  ;;  %v268_v9 = vmul.f32 %v745_v0, %v229_v52  ;;  %v366_v10 = vadd.f32 %v334_v56, %v302_v59  ;;  %v305_v12 = vadd.f32 %v762_v2, %v266_v62  ;;  %v234_v27 = vld [vmem:[%s750_s7 + $0x90] sm:$0xff]  ;;  %v235_v32 = vld [vmem:[%s750_s7 + $0x98] sm:$0xff]  ;;  %v236_v33 = vld [vmem:[%s750_s7 + $0xa0] sm:$0xff] }
  0x24   : > { %v367_v11 = vadd.f32 %v335_v57, %v303_v60  ;;  %v306_v13 = vadd.f32 %v762_v2, %v267_v63  ;;  %428 = vst [vmem:[%s805_s20 + $0x30] sm:$0xff] %v396_v4  ;;  %v368_v15 = vadd.f32 %v336_v61, %v304_v6  ;;  %v269_v17 = vmul.f32 %v745_v0, %v230_v1  ;;  %v237_v38 = vld [vmem:[%s750_s7 + $0xa8] sm:$0xff]  ;;  %v342_v42 = vld [vmem:[%s755_s10 + $0x80] sm:$0xff]  ;;  %v344_v47 = vld [vmem:[%s755_s10 + $0x90] sm:$0xff] }
  0x25   : > { %429 = vst [vmem:[%s805_s20 + $0x38] sm:$0xff] %v397_v5  ;;  %v307_v16 = vadd.f32 %v762_v2, %v268_v9  ;;  %v270_v18 = vmul.f32 %v745_v0, %v231_v3  ;;  %v398_v21 = vmax.f32 %v366_v10, 0.0  ;;  %v369_v23 = vadd.f32 %v337_v7, %v305_v12  ;;  %v343_v43 = vld [vmem:[%s755_s10 + $0x88] sm:$0xff]  ;;  %v238_v50 = vld [vmem:[%s750_s7 + $0xb0] sm:$0xff]  ;;  %v239_v51 = vld [vmem:[%s750_s7 + $0xb8] sm:$0xff] }
  0x26   : > { %v399_v22 = vmax.f32 %v367_v11, 0.0  ;;  %v370_v24 = vadd.f32 %v338_v8, %v306_v13  ;;  %v400_v28 = vmax.f32 %v368_v15, 0.0  ;;  %v308_v30 = vadd.f32 %v762_v2, %v269_v17  ;;  %v345_v55 = vld [vmem:[%s755_s10 + $0x98] sm:$0xff]  ;;  %v346_v56 = vld [vmem:[%s755_s10 + $0xa0] sm:$0xff]  ;;  %v347_v62 = vld [vmem:[%s755_s10 + $0xa8] sm:$0xff] }
  0x27   : > { %v371_v29 = vadd.f32 %v339_v14, %v307_v16  ;;  %v309_v31 = vadd.f32 %v762_v2, %v270_v18  ;;  %430 = vst [vmem:[%s805_s20 + $0x40] sm:$0xff] %v398_v21  ;;  %v401_v34 = vmax.f32 %v369_v23, 0.0  ;;  %v271_v36 = vmul.f32 %v745_v0, %v232_v19  ;;  %v240_v5 = vld [vmem:[%s750_s7 + $0xc0] sm:$0xff]  ;;  %v241_v6 = vld [vmem:[%s750_s7 + $0xc8] sm:$0xff]  ;;  %v348_v11 = vld [vmem:[%s755_s10 + $0xb0] sm:$0xff] }
  0x28   : > { %431 = vst [vmem:[%s805_s20 + $0x48] sm:$0xff] %v399_v22  ;;  %v402_v35 = vmax.f32 %v370_v24, 0.0  ;;  %v272_v37 = vmul.f32 %v745_v0, %v233_v20  ;;  %432 = vst [vmem:[%s805_s20 + $0x50] sm:$0xff] %v400_v28  ;;  %v372_v40 = vadd.f32 %v340_v25, %v308_v30  ;;  %v273_v44 = vmul.f32 %v745_v0, %v234_v27  ;;  %v349_v12 = vld [vmem:[%s755_s10 + $0xb8] sm:$0xff]  ;;  %v242_v13 = vld [vmem:[%s750_s7 + $0xd0] sm:$0xff] }
  0x29   : > { %v403_v39 = vmax.f32 %v371_v29, 0.0  ;;  %v373_v41 = vadd.f32 %v341_v26, %v309_v31  ;;  %433 = vst [vmem:[%s805_s20 + $0x58] sm:$0xff] %v401_v34  ;;  %v310_v45 = vadd.f32 %v762_v2, %v271_v36  ;;  %v274_v48 = vmul.f32 %v745_v0, %v235_v32  ;;  %v243_v18 = vld [vmem:[%s750_s7 + $0xd8] sm:$0xff]  ;;  %v244_v19 = vld [vmem:[%s750_s7 + $0xe0] sm:$0xff]  ;;  %v245_v24 = vld [vmem:[%s750_s7 + $0xe8] sm:$0xff] }
  0x2a   : > { %434 = vst [vmem:[%s805_s20 + $0x60] sm:$0xff] %v402_v35  ;;  %v311_v46 = vadd.f32 %v762_v2, %v272_v37  ;;  %v275_v49 = vmul.f32 %v745_v0, %v236_v33  ;;  %v404_v52 = vmax.f32 %v372_v40, 0.0  ;;  %v312_v54 = vadd.f32 %v762_v2, %v273_v44  ;;  %v350_v28 = vld [vmem:[%s755_s10 + $0xc0] sm:$0xff]  ;;  %v351_v29 = vld [vmem:[%s755_s10 + $0xc8] sm:$0xff]  ;;  %v352_v33 = vld [vmem:[%s755_s10 + $0xd0] sm:$0xff] }
  0x2b   : > { %435 = vst [vmem:[%s805_s20 + $0x68] sm:$0xff] %v403_v39  ;;  %v405_v53 = vmax.f32 %v373_v41, 0.0  ;;  %v276_v57 = vmul.f32 %v745_v0, %v237_v38  ;;  %v374_v58 = vadd.f32 %v342_v42, %v310_v45  ;;  %v313_v60 = vadd.f32 %v762_v2, %v274_v48  ;;  %v246_v36 = vld [vmem:[%s750_s7 + $0xf0] sm:$0xff]  ;;  %v247_v37 = vld [vmem:[%s750_s7 + $0xf8] sm:$0xff]  ;;  %v354_v42 = vld [vmem:[%s755_s10 + $0xe0] sm:$0xff]  ;;  %s608_s7 = scalar_lea.vmem %s607_s6, 8192 }
  0x2c   : > { %v375_v59 = vadd.f32 %v343_v43, %v311_v46  ;;  %v314_v61 = vadd.f32 %v762_v2, %v275_v49  ;;  %436 = vst [vmem:[%s805_s20 + $0x70] sm:$0xff] %v404_v52  ;;  %v376_v63 = vadd.f32 %v344_v47, %v312_v54  ;;  %v277_v3 = vmul.f32 %v745_v0, %v238_v50  ;;  %v353_v41 = vld [vmem:[%s755_s10 + $0xd8] sm:$0xff]  ;;  %v355_v48 = vld [vmem:[%s755_s10 + $0xe8] sm:$0xff]  ;;  %p610_p1 = scmp.lt.s32.totalorder %s608_s7, %s602_s30 }
  0x2d   : > { %437 = vst [vmem:[%s805_s20 + $0x78] sm:$0xff] %v405_v53  ;;  %v315_v1 = vadd.f32 %v762_v2, %v276_v57  ;;  %v278_v4 = vmul.f32 %v745_v0, %v239_v51  ;;  %v406_v7 = vmax.f32 %v374_v58, 0.0  ;;  %v377_v9 = vadd.f32 %v345_v55, %v313_v60  ;;  %v356_v57 = vld [vmem:[%s755_s10 + $0xf0] sm:$0xff]  ;;  %v357_v58 = vld [vmem:[%s755_s10 + $0xf8] sm:$0xff] }
  0x2e   : > { %v407_v8 = vmax.f32 %v375_v59, 0.0  ;;  %v378_v10 = vadd.f32 %v346_v56, %v314_v61  ;;  %v408_v14 = vmax.f32 %v376_v63, 0.0  ;;  %v316_v16 = vadd.f32 %v762_v2, %v277_v3  ;;  %p611_p2 = por %p610_p1, %p609_p0 }
  0x2f   : > { %v379_v15 = vadd.f32 %v347_v62, %v315_v1  ;;  %v317_v17 = vadd.f32 %v762_v2, %v278_v4  ;;  %438 = vst [vmem:[%s805_s20 + $0x80] sm:$0xff] %v406_v7  ;;  %v409_v20 = vmax.f32 %v377_v9, 0.0  ;;  %v279_v22 = vmul.f32 %v745_v0, %v240_v5 }
  0x30   : > { %439 = vst [vmem:[%s805_s20 + $0x88] sm:$0xff] %v407_v8  ;;  %v410_v21 = vmax.f32 %v378_v10, 0.0  ;;  %v280_v23 = vmul.f32 %v745_v0, %v241_v6  ;;  %440 = vst [vmem:[%s805_s20 + $0x90] sm:$0xff] %v408_v14  ;;  %v380_v26 = vadd.f32 %v348_v11, %v316_v16  ;;  %v281_v30 = vmul.f32 %v745_v0, %v242_v13  ;;  %p612_p3 = pnand %p611_p2, %p605_p13 }
  0x31   : > { %v411_v25 = vmax.f32 %v379_v15, 0.0  ;;  %v381_v27 = vadd.f32 %v349_v12, %v317_v17  ;;  %441 = vst [vmem:[%s805_s20 + $0x98] sm:$0xff] %v409_v20  ;;  %v318_v31 = vadd.f32 %v762_v2, %v279_v22  ;;  %v282_v34 = vmul.f32 %v745_v0, %v243_v18 }
  0x32   : > { %442 = vst [vmem:[%s805_s20 + $0xa0] sm:$0xff] %v410_v21  ;;  %v319_v32 = vadd.f32 %v762_v2, %v280_v23  ;;  %v283_v35 = vmul.f32 %v745_v0, %v244_v19  ;;  %v412_v38 = vmax.f32 %v380_v26, 0.0  ;;  %v320_v40 = vadd.f32 %v762_v2, %v281_v30 }
  0x33   : > { %443 = vst [vmem:[%s805_s20 + $0xa8] sm:$0xff] %v411_v25  ;;  %v413_v39 = vmax.f32 %v381_v27, 0.0  ;;  %v284_v43 = vmul.f32 %v745_v0, %v245_v24  ;;  %v382_v44 = vadd.f32 %v350_v28, %v318_v31  ;;  %v321_v46 = vadd.f32 %v762_v2, %v282_v34 }
  0x34   : > { %v383_v45 = vadd.f32 %v351_v29, %v319_v32  ;;  %v322_v47 = vadd.f32 %v762_v2, %v283_v35  ;;  %444 = vst [vmem:[%s805_s20 + $0xb0] sm:$0xff] %v412_v38  ;;  %v384_v49 = vadd.f32 %v352_v33, %v320_v40  ;;  %v285_v51 = vmul.f32 %v745_v0, %v246_v36 }
  0x35   : > { %445 = vst [vmem:[%s805_s20 + $0xb8] sm:$0xff] %v413_v39  ;;  %v323_v50 = vadd.f32 %v762_v2, %v284_v43  ;;  %v286_v52 = vmul.f32 %v745_v0, %v247_v37  ;;  %v414_v53 = vmax.f32 %v382_v44, 0.0  ;;  %v385_v55 = vadd.f32 %v353_v41, %v321_v46 }
  0x36   : > { %v415_v54 = vmax.f32 %v383_v45, 0.0  ;;  %v386_v56 = vadd.f32 %v354_v42, %v322_v47  ;;  %v416_v59 = vmax.f32 %v384_v49, 0.0  ;;  %v324_v61 = vadd.f32 %v762_v2, %v285_v51 }
  0x37   : > { %v387_v60 = vadd.f32 %v355_v48, %v323_v50  ;;  %v325_v62 = vadd.f32 %v762_v2, %v286_v52  ;;  %446 = vst [vmem:[%s805_s20 + $0xc0] sm:$0xff] %v414_v53  ;;  %v417_v0 = vmax.f32 %v385_v55, 0.0 }
  0x38   : > { %447 = vst [vmem:[%s805_s20 + $0xc8] sm:$0xff] %v415_v54  ;;  %v418_v63 = vmax.f32 %v386_v56, 0.0  ;;  %448 = vst [vmem:[%s805_s20 + $0xd0] sm:$0xff] %v416_v59  ;;  %v388_v3 = vadd.f32 %v356_v57, %v324_v61 }
  0x39   : > { %v419_v1 = vmax.f32 %v387_v60, 0.0  ;;  %v389_v4 = vadd.f32 %v357_v58, %v325_v62  ;;  %449 = vst [vmem:[%s805_s20 + $0xd8] sm:$0xff] %v417_v0 }
  0x3a   : > { %450 = vst [vmem:[%s805_s20 + $0xe0] sm:$0xff] %v418_v63  ;;  %v420_v2 = vmax.f32 %v388_v3, 0.0 }
  0x3b   : > { %451 = vst [vmem:[%s805_s20 + $0xe8] sm:$0xff] %v419_v1  ;;  %v421_v5 = vmax.f32 %v389_v4, 0.0 }
  0x3c   : > { %452 = vst [vmem:[%s805_s20 + $0xf0] sm:$0xff] %v420_v2 }
  0x3d   : > { %453 = vst [vmem:[%s805_s20 + $0xf8] sm:$0xff] %v421_v5 }
  0x3e   : > { %615 = shalt.err (!%p612_p3)
}
  0x3f   : > { %s616_s8 = scalar_lea.hbm %s932_s29, 4096  ;;  %s620_s11 = scalar_lea.hbm %s985_s4, 8192 }
  0x40   : > { %p617_p4 = scmp.ne.s32.totalorder %s932_s29, %s616_s8  ;;  %p621_p9 = scmp.lt.s32.totalorder %s932_s29, %s985_s4 }
  0x41   : > { %p622_p10 = scmp.lt.s32.totalorder %s620_s11, %s616_s8 }
  0x42   : > { %p618_p7 = pnand %p617_p4, %p730_p5 }
  0x43   : > { %p623_p11 = por %p622_p10, %p621_p9 }
  0x44   : > { %p619_p8 = pneg %p618_p7 }
  0x46   : > { %p624_p12 = pnand %p623_p11, %p619_p8 }
  0x48   : > { %627 = shalt.err (!%p624_p12)
}
  0x49   : > { %s665_s14 = smov 128   ;;  %s666_s20 = smov 8  }
  0x4a   : > { %561 = dma.vmem_to_hbm [thread:$0]  (%p730_p5), %s934_s23, 4096, %s932_s29, %s941_s19, %s665_s14, %s665_s14, %s666_s20  }
  0x4b PF: > { %p567_p13 = scmp.ge.s32.totalorder %s662_s18, 2  ;;  %s483_s22 = sand.u32 1, %s650_s15  }
  0x4c   : > { %s484_s27 = scalar_lea.sflag [#allocation3], %s483_s22 }
  0x4d   : > { %p564_p0 = pnand %p567_p13, %p734_p6 }
  0x4f   : > { %p565_p1 = pneg %p564_p0 }
  0x51   : > { %645 = dma.done.wait (%p565_p1), %s484_s27, 4096  }
  0x52   : > { %647 = vsyncadd (%p565_p1), %s484_s27, 4294963200  ;;  %p14_p2 = scmp.ge.s32.totalorder %s717_s21, 4   ;;  %s988_s15 = smov %s654_s16 }
  0x53   : > { %s989_s16 = smov %s658_s17  ;;  %s990_s17 = smov %s728_s24 }
  0x54   : > { %s991_s18 = smov %s717_s21  ;;  %16 = sbr.rel (!%p14_p2) target bundleno = 3 (0x3), region = 74 }
  0x59   :  { %489 = vsyncpa [#allocation3], 1 }
  0x5a   :  { %491 = vsyncpa [#allocation3 + $0x1], 1 }

// kernel: block_forward.3
= control target key start
LH: loop header
LB: loop body
LE: loop exit
PB: predicated region body
PF: predicated region fallthrough
CT: control target
= control target key end

     0   :  { %s4328_s21 = smov 0   ;;  %s5438_s0 = inlined_call_operand.vmem [shape: f32[2,16,16,128], index: 0, kind: input, shape index: {}]   ;;  %s5439_s1 = inlined_call_operand.vmem [shape: bf16[3,3,128,128], index: 1, kind: input, shape index: {}]   ;;  %s5440_s2 = inlined_call_operand.vmem [shape: f32[1,128], index: 2, kind: input, shape index: {}]   ;;  %s5441_s3 = inlined_call_operand.vmem [shape: f32[1,128], index: 3, kind: input, shape index: {}]   ;;  %s5442_s4 = inlined_call_operand.vmem [shape: f32[2,16,16,128], index: 4, kind: output, shape index: {0}]   ;;  %s5443_s5 = inlined_call_operand.vmem [shape: f32[2,1,128], index: 5, kind: output, shape index: {1}]   ;;  %s5444_s6 = inlined_call_operand.vmem [shape: f32[2,1,128], index: 6, kind: output, shape index: {2}]  }
   0x1 LB: > { %s3324_s2 = sadd.s32 4294967295, %s4289_s21   ;;  %p3328_p0 = scmp.ge.s32.totalorder %s4289_s21, 1  ;;  %s4289_s21 = sphi %s4328_s21, %s17_s21  }
   0x2   : > { %p217_p1 = scmp.lt.s32.totalorder %s4289_s21, 3 }
   0x4   : > { %p218_p2 = pnand %p3328_p0, %p217_p1 }
   0x6   : > { %221 = sbr.rel (%p218_p2) target bundleno = 548 (0x224), region = 36 }
   0xb   : > { %v4210_v0 = vld [vmem:[%s5439_s1 + $0x78] sm:$0xff]   ;;  %v4342_v1 = vld [vmem:[%s5439_s1 + $0x70] sm:$0xff]   ;;  %v4291_v2 = vmov 0.0   ;;  %p253_p3 = scmp.lt.s32.totalorder %s3324_s2, 1  ;;  %v4212_v3 = vld [vmem:[%s5439_s1 + $0x68] sm:$0xff]  }
   0xc   : > { %270 = vst [vmem:[#allocation2] sm:$0xff] %v4291_v2  ;;  %271 = vst [vmem:[#allocation2 + $0x8] sm:$0xff] %v4291_v2  ;;  %3753 = vmatprep.subr.bf16.mxu0 %v4210_v0  ;;  %4185 = vmatprep.subr.bf16.mxu1 %v4210_v0  ;;  %v4213_v4 = vld [vmem:[%s5439_s1 + $0x60] sm:$0xff]   ;;  %v4214_v15 = vld [vmem:[%s5439_s1 + $0x58] sm:$0xff]  }
   0xd   : > { %272 = vst [vmem:[#allocation2 + $0x10] sm:$0x3] %v4291_v2  ;;  %273 = vst [vmem:[#allocation2 + $0x18] sm:$0xff] %v4291_v2  ;;  %3754 = vmatpush3.bf16.msra.mxu0 %v4210_v0  ;;  %4193 = vmatpush3.bf16.msra.mxu1 %v4210_v0  ;;  %s5526_s2 = smov (!%p253_p3, %s3324_s2), 1  ;;  %v4215_v16 = vld [vmem:[%s5439_s1 + $0x50] sm:$0xff]   ;;  %v4216_v25 = vld [vmem:[%s5439_s1 + $0x48] sm:$0xff]  }
   0xe   : > { %274 = vst [vmem:[#allocation2 + $0x20] sm:$0xff] %v4291_v2  ;;  %275 = vst [vmem:[#allocation2 + $0x28] sm:$0x3] %v4291_v2  ;;  %3755 = vmatprep.subr.bf16.mxu0 %v4342_v1  ;;  %4186 = vmatprep.subr.bf16.mxu1 %v4342_v1  ;;  %s3535_s27 = sshll.u32 %s5526_s2, 8  ;;  %v4217_v34 = vld [vmem:[%s5439_s1 + $0x40] sm:$0xff]   ;;  %v4218_v35 = vld [vmem:[%s5439_s1 + $0x38] sm:$0xff]   ;;  %s265_s13 = scalar_lea.vmem %s5443_s5, %s5526_s2 }
   0xf   : > { %276 = vst [vmem:[#allocation2 + $0x30] sm:$0xff] %v4291_v2  ;;  %277 = vst [vmem:[#allocation2 + $0x38] sm:$0xff] %v4291_v2  ;;  %s4361_s30 = scalar_lea.vmem %s5438_s0, %s3535_s27  ;;  %v4219_v36 = vld [vmem:[%s5439_s1 + $0xb8] sm:$0xff]   ;;  %v4220_v47 = vld [vmem:[%s5439_s1 + $0x30] sm:$0xff]   ;;  %s5309_s12 = scalar_lea.vmem %s5442_s4, %s3535_s27 }
  0x10   : > { %278 = vst [vmem:[#allocation2 + $0x40] sm:$0x3] %v4291_v2  ;;  %279 = vst [vmem:[#allocation2 + $0x48] sm:$0xff] %v4291_v2  ;;  %v338_v7 = vld [vmem:[%s4361_s30 + $0x70] sm:$0xff]  ;;  %v339_v9 = vld [vmem:[%s4361_s30 + $0x78] sm:$0xff]  ;;  %s268_s16 = scalar_lea.vmem %s5444_s6, %s5526_s2 }
  0x11   : > { %280 = vst [vmem:[#allocation2 + $0x50] sm:$0xff] %v4291_v2  ;;  %281 = vst [vmem:[#allocation2 + $0x58] sm:$0x3] %v4291_v2  ;;  %3756 = vmatpush3.bf16.msra.mxu0 %v4342_v1  ;;  %4194 = vmatpush3.bf16.msra.mxu1 %v4342_v1  ;;  %v4371_v10 = vld [vmem:[%s4361_s30] sm:$0xff]  ;;  %v4374_v11 = vld [vmem:[%s4361_s30 + $0x8] sm:$0xff]  ;;  %v4376_v12 = vpack.c.bf16 %v339_v9, %v338_v7 }
  0x12   : > { %282 = vst [vmem:[#allocation2 + $0x60] sm:$0xff] %v4291_v2  ;;  %283 = vst [vmem:[#allocation2 + $0x68] sm:$0xff] %v4291_v2  ;;  %3757 = vmatprep.subr.bf16.mxu0 %v4212_v3  ;;  %4187 = vmatprep.subr.bf16.mxu1 %v4212_v3  ;;  %v4381_v13 = vld [vmem:[%s4361_s30 + $0x80] sm:$0xff]  ;;  %v4384_v14 = vld [vmem:[%s4361_s30 + $0x88] sm:$0xff]  ;;  %v4492_v43 = vpack.c.bf16 %v4374_v11, %v4371_v10 }
  0x13   : > { %284 = vst [vmem:[#allocation2 + $0x70] sm:$0x3] %v4291_v2  ;;  %285 = vst [vmem:[#allocation2 + $0x78] sm:$0xff] %v4291_v2  ;;  %v453_v5 = vld [vmem:[#allocation2 + $0x1] sm:$0xff]  ;;  %3785 = vmatprep.mubr.bf16.mxu1 %v4376_v12  ;;  %v4396_v17 = vld [vmem:[%s4361_s30 + $0x10] sm:$0xff]  ;;  %v4496_v44 = vpack.c.bf16 %v4384_v14, %v4381_v13 }
  0x14   : > { %286 = vst [vmem:[#allocation2 + $0x80] sm:$0xff] %v4291_v2  ;;  %287 = vst [vmem:[#allocation2 + $0x88] sm:$0x3] %v4291_v2  ;;  %v454_v6 = vld [vmem:[#allocation2 + $0x9] sm:$0xff]  ;;  %v4399_v18 = vld [vmem:[%s4361_s30 + $0x18] sm:$0xff] }
  0x15   : > { %288 = vst [vmem:[#allocation2 + $0x90] sm:$0xff] %v4291_v2  ;;  %289 = vst [vmem:[#allocation2 + $0x98] sm:$0xff] %v4291_v2  ;;  %v485_v8 = vpack.c.bf16 %v454_v6, %v453_v5  ;;  %3758 = vmatpush3.bf16.msra.mxu0 %v4212_v3  ;;  %4195 = vmatpush3.bf16.msra.mxu1 %v4212_v3  ;;  %v4403_v19 = vld [vmem:[%s4361_s30 + $0x90] sm:$0xff]  ;;  %v4406_v20 = vld [vmem:[%s4361_s30 + $0x98] sm:$0xff]  ;;  %v4513_v49 = vpack.c.bf16 %v4399_v18, %v4396_v17 }
  0x16   : > { %290 = vst [vmem:[#allocation2 + $0xa0] sm:$0x3] %v4291_v2  ;;  %291 = vst [vmem:[#allocation2 + $0xa8] sm:$0xff] %v4291_v2  ;;  %3759 = vmatprep.subr.bf16.mxu0 %v4213_v4  ;;  %4188 = vmatprep.subr.bf16.mxu1 %v4213_v4  ;;  %v4412_v21 = vld [vmem:[%s4361_s30 + $0x20] sm:$0xff]  ;;  %v4415_v22 = vld [vmem:[%s4361_s30 + $0x28] sm:$0xff]  ;;  %v4517_v50 = vpack.c.bf16 %v4406_v20, %v4403_v19 }
  0x17   : > { %292 = vst [vmem:[#allocation2 + $0xb0] sm:$0xff] %v4291_v2  ;;  %293 = vst [vmem:[#allocation2 + $0xb8] sm:$0x3] %v4291_v2  ;;  %3769 = vmatprep.mubr.bf16.mxu0 %v485_v8  ;;  %v4418_v23 = vld [vmem:[%s4361_s30 + $0xa0] sm:$0xff]  ;;  %v4423_v24 = vld [vmem:[%s4361_s30 + $0xa8] sm:$0xff]  ;;  %v4531_v53 = vpack.c.bf16 %v4415_v22, %v4412_v21 }
  0x18   : > { %294 = vst [vmem:[#allocation2 + $0xc0] sm:$0xff] %v4291_v2  ;;  %295 = vst [vmem:[#allocation2 + $0xc8] sm:$0xff] %v4291_v2  ;;  %v4431_v26 = vld [vmem:[%s4361_s30 + $0x30] sm:$0xff]  ;;  %v4434_v27 = vld [vmem:[%s4361_s30 + $0x38] sm:$0xff]  ;;  %v4535_v54 = vpack.c.bf16 %v4423_v24, %v4418_v23 }
  0x19   : > { %296 = vst [vmem:[#allocation2 + $0xd0] sm:$0x3] %v4291_v2  ;;  %297 = vst [vmem:[#allocation2 + $0xd8] sm:$0xff] %v4291_v2  ;;  %3760 = vmatpush3.bf16.msra.mxu0 %v4213_v4  ;;  %4196 = vmatpush3.bf16.msra.mxu1 %v4213_v4  ;;  %v4439_v28 = vld [vmem:[%s4361_s30 + $0xb0] sm:$0xff]  ;;  %v4442_v29 = vld [vmem:[%s4361_s30 + $0xb8] sm:$0xff]  ;;  %v4545_v57 = vpack.c.bf16 %v4434_v27, %v4431_v26 }
  0x1a   : > { %298 = vst [vmem:[#allocation2 + $0xe0] sm:$0xff] %v4291_v2  ;;  %299 = vst [vmem:[#allocation2 + $0xe8] sm:$0x3] %v4291_v2  ;;  %3761 = vmatprep.subr.bf16.mxu0 %v4214_v15  ;;  %4189 = vmatprep.subr.bf16.mxu1 %v4214_v15  ;;  %v4445_v30 = vld [vmem:[%s4361_s30 + $0x40] sm:$0xff]  ;;  %v4450_v31 = vld [vmem:[%s4361_s30 + $0x48] sm:$0xff]  ;;  %v4549_v58 = vpack.c.bf16 %v4442_v29, %v4439_v28 }
  0x1b   : > { %300 = vst [vmem:[#allocation2 + $0xf0] sm:$0xff] %v4291_v2  ;;  %301 = vst [vmem:[#allocation2 + $0xf8] sm:$0xff] %v4291_v2  ;;  %v4454_v32 = vld [vmem:[%s4361_s30 + $0xc0] sm:$0xff]  ;;  %v4457_v33 = vld [vmem:[%s4361_s30 + $0xc8] sm:$0xff]  ;;  %v4563_v61 = vpack.c.bf16 %v4450_v31, %v4445_v30 }
  0x1c   : > { %302 = vst [vmem:[#allocation2 + $0x100] sm:$0x3] %v4291_v2  ;;  %303 = vst [vmem:[#allocation2 + $0x108] sm:$0xff] %v4291_v2  ;;  %v4472_v37 = vld [vmem:[%s4361_s30 + $0x50] sm:$0xff]  ;;  %v4475_v38 = vld [vmem:[%s4361_s30 + $0x58] sm:$0xff]  ;;  %v4567_v62 = vpack.c.bf16 %v4457_v33, %v4454_v32 }
  0x1d   : > { %304 = vst [vmem:[#allocation2 + $0x110] sm:$0xff] %v4291_v2  ;;  %305 = vst [vmem:[#allocation2 + $0x118] sm:$0x3] %v4291_v2  ;;  %3762 = vmatpush3.bf16.msra.mxu0 %v4214_v15  ;;  %4197 = vmatpush3.bf16.msra.mxu1 %v4214_v15  ;;  %v4478_v39 = vld [vmem:[%s4361_s30 + $0xd0] sm:$0xff]  ;;  %v351_v40 = vld [vmem:[%s4361_s30 + $0xd8] sm:$0xff]  ;;  %v4577_v1 = vpack.c.bf16 %v4475_v38, %v4472_v37 }
  0x1e   : > { %306 = vst [vmem:[#allocation2 + $0x120] sm:$0xff] %v4291_v2  ;;  %307 = vst [vmem:[#allocation2 + $0x128] sm:$0xff] %v4291_v2  ;;  %3763 = vmatprep.subr.bf16.mxu0 %v4215_v16  ;;  %4190 = vmatprep.subr.bf16.mxu1 %v4215_v16  ;;  %v4485_v41 = vld [vmem:[%s4361_s30 + $0x60] sm:$0xff]  ;;  %v4488_v42 = vld [vmem:[%s4361_s30 + $0x68] sm:$0xff] }
  0x1f   : > { %308 = vst [vmem:[#allocation2 + $0x130] sm:$0x3] %v4291_v2  ;;  %309 = vst [vmem:[#allocation2 + $0x138] sm:$0xff] %v4291_v2  ;;  %v4501_v45 = vld [vmem:[%s4361_s30 + $0xe0] sm:$0xff]  ;;  %v353_v46 = vld [vmem:[%s4361_s30 + $0xe8] sm:$0xff]  ;;  %v4594_v5 = vpack.c.bf16 %v4488_v42, %v4485_v41 }
  0x20   : > { %310 = vst [vmem:[#allocation2 + $0x140] sm:$0xff] %v4291_v2  ;;  %311 = vst [vmem:[#allocation2 + $0x148] sm:$0x3] %v4291_v2  ;;  %v4221_v48 = vld [vmem:[%s5439_s1 + $0xb0] sm:$0xff]   ;;  %v4222_v51 = vld [vmem:[%s5439_s1 + $0x28] sm:$0xff]   ;;  %v4597_v6 = vpack.c.bf16 %v353_v46, %v4501_v45 }
  0x21   : > { %312 = vst [vmem:[#allocation2 + $0x150] sm:$0xff] %v4291_v2  ;;  %313 = vst [vmem:[#allocation2 + $0x158] sm:$0xff] %v4291_v2  ;;  %3764 = vmatpush3.bf16.msra.mxu0 %v4215_v16  ;;  %4198 = vmatpush3.bf16.msra.mxu1 %v4215_v16  ;;  %v4223_v52 = vld [vmem:[%s5439_s1 + $0xa8] sm:$0xff]   ;;  %v4224_v55 = vld [vmem:[%s5439_s1 + $0x20] sm:$0xff]  }
  0x22   : > { %314 = vst [vmem:[#allocation2 + $0x160] sm:$0x3] %v4291_v2  ;;  %315 = vst [vmem:[#allocation2 + $0x168] sm:$0xff] %v4291_v2  ;;  %3765 = vmatprep.subr.bf16.mxu0 %v4216_v25  ;;  %4191 = vmatprep.subr.bf16.mxu1 %v4216_v25  ;;  %v4225_v56 = vld [vmem:[%s5439_s1 + $0xa0] sm:$0xff]   ;;  %v4226_v59 = vld [vmem:[%s5439_s1 + $0x18] sm:$0xff]  }
  0x23   : > { %316 = vst [vmem:[#allocation2 + $0x170] sm:$0xff] %v4291_v2  ;;  %317 = vst [vmem:[#allocation2 + $0x178] sm:$0x3] %v4291_v2  ;;  %v4227_v60 = vld [vmem:[%s5439_s1 + $0x98] sm:$0xff]   ;;  %v4228_v63 = vld [vmem:[%s5439_s1 + $0x10] sm:$0xff]  }
  0x24   : > { %318 = vst [vmem:[#allocation2 + $0x180] sm:$0xff] %v4291_v2  ;;  %319 = vst [vmem:[#allocation2 + $0x188] sm:$0xff] %v4291_v2  ;;  %v4229_v0 = vld [vmem:[%s5439_s1 + $0x90] sm:$0xff]   ;;  %v4230_v3 = vld [vmem:[%s5439_s1 + $0x8] sm:$0xff]  }
  0x25   : > { %320 = vst [vmem:[#allocation2 + $0x190] sm:$0x3] %v4291_v2  ;;  %321 = vst [vmem:[#allocation2 + $0x198] sm:$0xff] %v4291_v2  ;;  %3766 = vmatpush3.bf16.msra.mxu0 %v4216_v25  ;;  %4199 = vmatpush3.bf16.msra.mxu1 %v4216_v25  ;;  %v4231_v4 = vld [vmem:[%s5439_s1 + $0x88] sm:$0xff]  }
  0x26   : > { %322 = vst [vmem:[#allocation2 + $0x1a0] sm:$0xff] %v4291_v2  ;;  %323 = vst [vmem:[#allocation2 + $0x1a8] sm:$0x3] %v4291_v2  ;;  %3767 = vmatprep.subr.bf16.mxu0 %v4217_v34  ;;  %4192 = vmatprep.subr.bf16.mxu1 %v4217_v34  ;;  %v4580_v2 = vpack.c.bf16 %v351_v40, %v4478_v39  ;;  %v937_v8 = vld [vmem:[#allocation2 + $0xa] sm:$0xff] }
  0x27   : > { %371 = vst [vmem:[#allocation2 + $0xc1] sm:$0xff] %v338_v7  ;;  %372 = vst [vmem:[#allocation2 + $0xc9] sm:$0xff] %v339_v9  ;;  %v936_v7 = vld [vmem:[#allocation2 + $0x2] sm:$0xff] }
  0x28   : > { %357 = vst [vmem:[#allocation2 + $0x19] sm:$0xff] %v4371_v10  ;;  %358 = vst [vmem:[#allocation2 + $0x21] sm:$0xff] %v4374_v11  ;;  %v4232_v9 = vld [vmem:[%s5439_s1] sm:$0xff]   ;;  %v968_v11 = vpack.c.bf16 %v937_v8, %v936_v7 }
  0x29   : > { %373 = vst [vmem:[#allocation2 + $0xd9] sm:$0xff] %v4381_v13  ;;  %374 = vst [vmem:[#allocation2 + $0xe1] sm:$0xff] %v4384_v14  ;;  %3768 = vmatpush3.bf16.msra.mxu0 %v4217_v34  ;;  %4200 = vmatpush3.bf16.msra.mxu1 %v4217_v34  ;;  %v4233_v10 = vld [vmem:[%s5439_s1 + $0x80] sm:$0xff]  }
  0x2a   : > { %359 = vst [vmem:[#allocation2 + $0x31] sm:$0xff] %v4396_v17  ;;  %360 = vst [vmem:[#allocation2 + $0x39] sm:$0xff] %v4399_v18  ;;  %3801 = vmatprep.subr.bf16.mxu1 %v4218_v35  ;;  %3849 = vmatprep.subr.bf16.mxu0 %v4219_v36  ;;  %v4234_v17 = vld [vmem:[%s5439_s1 + $0xf8] sm:$0xff]  }
  0x2b   : > { %375 = vst [vmem:[#allocation2 + $0xf1] sm:$0xff] %v4403_v19  ;;  %376 = vst [vmem:[#allocation2 + $0xf9] sm:$0xff] %v4406_v20  ;;  %v4235_v18 = vld [vmem:[%s5439_s1 + $0x138] sm:$0xff]  }
  0x2c   : > { %361 = vst [vmem:[#allocation2 + $0x49] sm:$0xff] %v4412_v21  ;;  %362 = vst [vmem:[#allocation2 + $0x51] sm:$0xff] %v4415_v22  ;;  %3770 = vmatmul.mubr.bf16.vlgmr.msra.gmra.mxu0 %v4492_v43  ;;  %3786 = vmatmul.mubr.bf16.vlgmr.msra.gmra.mxu1 %v4496_v44  ;;  %v4292_v22 = vmov 0.0|0.0  }
  0x2d   : > { %377 = vst [vmem:[#allocation2 + $0x109] sm:$0xff] %v4418_v23  ;;  %378 = vst [vmem:[#allocation2 + $0x111] sm:$0xff] %v4423_v24  ;;  %3802 = vmatpush3.bf16.msra.mxu1 %v4218_v35  ;;  %3850 = vmatpush3.bf16.msra.mxu0 %v4219_v36 }
  0x2e   : > { %363 = vst [vmem:[#allocation2 + $0x61] sm:$0xff] %v4431_v26  ;;  %364 = vst [vmem:[#allocation2 + $0x69] sm:$0xff] %v4434_v27  ;;  %3803 = vmatprep.subr.bf16.mxu1 %v4220_v47  ;;  %3851 = vmatprep.subr.bf16.mxu0 %v4221_v48 }
  0x2f   : > { %379 = vst [vmem:[#allocation2 + $0x121] sm:$0xff] %v4439_v28  ;;  %380 = vst [vmem:[#allocation2 + $0x129] sm:$0xff] %v4442_v29  ;;  %3773 = vmatprep.mubr.bf16.mxu0 %v4513_v49  ;;  %3789 = vmatprep.mubr.bf16.mxu1 %v4517_v50  ;;  %v391_v13 = vld [vmem:[#allocation2 + $0x18] sm:$0xff]  ;;  %v392_v14 = vld [vmem:[#allocation2 + $0x20] sm:$0xff] }
  0x30   : > { %365 = vst [vmem:[#allocation2 + $0x79] sm:$0xff] %v4445_v30  ;;  %366 = vst [vmem:[#allocation2 + $0x81] sm:$0xff] %v4450_v31  ;;  %v938_v15 = vld [vmem:[#allocation2 + $0x1a] sm:$0xff]  ;;  %v939_v16 = vld [vmem:[#allocation2 + $0x22] sm:$0xff]  ;;  %v4613_v24 = vpack.c.bf16 %v392_v14, %v391_v13 }
  0x31   : > { %381 = vst [vmem:[#allocation2 + $0x139] sm:$0xff] %v4454_v32  ;;  %382 = vst [vmem:[#allocation2 + $0x141] sm:$0xff] %v4457_v33  ;;  %3804 = vmatpush3.bf16.msra.mxu1 %v4220_v47  ;;  %3852 = vmatpush3.bf16.msra.mxu0 %v4221_v48  ;;  %v393_v19 = vld [vmem:[#allocation2 + $0x30] sm:$0xff]  ;;  %v394_v20 = vld [vmem:[#allocation2 + $0x38] sm:$0xff]  ;;  %v4615_v25 = vpack.c.bf16 %v939_v16, %v938_v15 }
  0x32   : > { %367 = vst [vmem:[#allocation2 + $0x91] sm:$0xff] %v4472_v37  ;;  %368 = vst [vmem:[#allocation2 + $0x99] sm:$0xff] %v4475_v38  ;;  %3805 = vmatprep.subr.bf16.mxu1 %v4222_v51  ;;  %3853 = vmatprep.subr.bf16.mxu0 %v4223_v52  ;;  %v940_v21 = vld [vmem:[#allocation2 + $0x32] sm:$0xff]  ;;  %v941_v23 = vld [vmem:[#allocation2 + $0x3a] sm:$0xff]  ;;  %v4617_v26 = vpack.c.bf16 %v394_v20, %v393_v19 }
  0x33   : > { %383 = vst [vmem:[#allocation2 + $0x151] sm:$0xff] %v4478_v39  ;;  %384 = vst [vmem:[#allocation2 + $0x159] sm:$0xff] %v351_v40  ;;  %v4619_v27 = vpack.c.bf16 %v941_v23, %v940_v21  ;;  %v4236_v28 = vld [vmem:[%s5439_s1 + $0xf0] sm:$0xff]   ;;  %v395_v29 = vld [vmem:[#allocation2 + $0x48] sm:$0xff] }
  0x34   : > { %369 = vst [vmem:[#allocation2 + $0xa9] sm:$0xff] %v4485_v41  ;;  %370 = vst [vmem:[#allocation2 + $0xb1] sm:$0xff] %v4488_v42  ;;  %3774 = vmatmul.mubr.bf16.gmra.mxu0 %v4531_v53  ;;  %3790 = vmatmul.mubr.bf16.gmra.mxu1 %v4535_v54  ;;  %v396_v30 = vld [vmem:[#allocation2 + $0x50] sm:$0xff]  ;;  %v4238_v38 = vld [vmem:[%s5439_s1 + $0xe8] sm:$0xff]  }
  0x35   : > { %385 = vst [vmem:[#allocation2 + $0x169] sm:$0xff] %v4501_v45  ;;  %386 = vst [vmem:[#allocation2 + $0x171] sm:$0xff] %v353_v46  ;;  %3806 = vmatpush3.bf16.msra.mxu1 %v4222_v51  ;;  %3854 = vmatpush3.bf16.msra.mxu0 %v4223_v52  ;;  %v4237_v31 = vld [vmem:[%s5439_s1 + $0x130] sm:$0xff]   ;;  %v397_v34 = vld [vmem:[#allocation2 + $0x60] sm:$0xff]  ;;  %v4637_v40 = vpack.c.bf16 %v396_v30, %v395_v29 }
  0x36   : > { %3807 = vmatprep.subr.bf16.mxu1 %v4224_v55  ;;  %3855 = vmatprep.subr.bf16.mxu0 %v4225_v56  ;;  %v942_v32 = vld [vmem:[#allocation2 + $0x4a] sm:$0xff]  ;;  %v943_v33 = vld [vmem:[#allocation2 + $0x52] sm:$0xff]  ;;  %v944_v36 = vld [vmem:[#allocation2 + $0x62] sm:$0xff] }
  0x37   : > { %3777 = vmatprep.mubr.bf16.mxu0 %v4545_v57  ;;  %3793 = vmatprep.mubr.bf16.mxu1 %v4549_v58  ;;  %v398_v35 = vld [vmem:[#allocation2 + $0x68] sm:$0xff]  ;;  %v4639_v41 = vpack.c.bf16 %v943_v33, %v942_v32  ;;  %v4240_v46 = vld [vmem:[%s5439_s1 + $0xe0] sm:$0xff]   ;;  %v399_v47 = vld [vmem:[#allocation2 + $0x78] sm:$0xff] }
  0x38   : > { %v945_v37 = vld [vmem:[#allocation2 + $0x6a] sm:$0xff]  ;;  %v4641_v42 = vpack.c.bf16 %v398_v35, %v397_v34  ;;  %v400_v48 = vld [vmem:[#allocation2 + $0x80] sm:$0xff]  ;;  %v407_v35 = vld [vmem:[#allocation2 + $0xd8] sm:$0xff] }
  0x39   : > { %3808 = vmatpush3.bf16.msra.mxu1 %v4224_v55  ;;  %3856 = vmatpush3.bf16.msra.mxu0 %v4225_v56  ;;  %v4239_v39 = vld [vmem:[%s5439_s1 + $0x128] sm:$0xff]   ;;  %v4643_v45 = vpack.c.bf16 %v945_v37, %v944_v36  ;;  %v946_v51 = vld [vmem:[#allocation2 + $0x7a] sm:$0xff]  ;;  %v401_v56 = vld [vmem:[#allocation2 + $0x90] sm:$0xff] }
  0x3a   : > { %3809 = vmatprep.subr.bf16.mxu1 %v4226_v59  ;;  %3857 = vmatprep.subr.bf16.mxu0 %v4227_v60  ;;  %v947_v52 = vld [vmem:[#allocation2 + $0x82] sm:$0xff]  ;;  %v4245_v16 = vld [vmem:[%s5439_s1 + $0x110] sm:$0xff]   ;;  %v954_v37 = vld [vmem:[#allocation2 + $0xda] sm:$0xff] }
  0x3b   : > { %v4241_v55 = vld [vmem:[%s5439_s1 + $0x120] sm:$0xff]   ;;  %v4663_v7 = vpack.c.bf16 %v947_v52, %v946_v51  ;;  %v404_v13 = vld [vmem:[#allocation2 + $0xb0] sm:$0xff]  ;;  %v4246_v21 = vld [vmem:[%s5439_s1 + $0xc8] sm:$0xff]  }
  0x3c   : > { %3778 = vmatmul.mubr.bf16.gmra.mxu0 %v4563_v61  ;;  %3794 = vmatmul.mubr.bf16.gmra.mxu1 %v4567_v62  ;;  %v950_v14 = vld [vmem:[#allocation2 + $0xaa] sm:$0xff]  ;;  %v951_v15 = vld [vmem:[#allocation2 + $0xb2] sm:$0xff]  ;;  %v952_v19 = vld [vmem:[#allocation2 + $0xc2] sm:$0xff] }
  0x3d   : > { %3810 = vmatpush3.bf16.msra.mxu1 %v4226_v59  ;;  %3858 = vmatpush3.bf16.msra.mxu0 %v4227_v60  ;;  %v402_v59 = vld [vmem:[#allocation2 + $0x98] sm:$0xff]  ;;  %v953_v20 = vld [vmem:[#allocation2 + $0xca] sm:$0xff]  ;;  %v4689_v30 = vpack.c.bf16 %v951_v15, %v950_v14  ;;  %v4248_v34 = vld [vmem:[%s5439_s1 + $0xc0] sm:$0xff]  }
  0x3e   : > { %3811 = vmatprep.subr.bf16.mxu1 %v4228_v63  ;;  %3859 = vmatprep.subr.bf16.mxu0 %v4229_v0  ;;  %v948_v60 = vld [vmem:[#allocation2 + $0x92] sm:$0xff]  ;;  %v4665_v8 = vpack.c.bf16 %v402_v59, %v401_v56  ;;  %v4695_v33 = vpack.c.bf16 %v953_v20, %v952_v19  ;;  %v408_v36 = vld [vmem:[#allocation2 + $0xe0] sm:$0xff]  ;;  %v414_v14 = vld [vmem:[#allocation2 + $0x128] sm:$0xff] }
  0x3f   : > { %3781 = vmatprep.mubr.bf16.mxu0 %v4577_v1  ;;  %3797 = vmatprep.mubr.bf16.mxu1 %v4580_v2  ;;  %v354_v23 = vld [vmem:[%s4361_s30 + $0xf0] sm:$0xff]  ;;  %v957_v51 = vld [vmem:[#allocation2 + $0xfa] sm:$0xff]  ;;  %v4713_v56 = vpack.c.bf16 %v408_v36, %v407_v35  ;;  %v960_v15 = vld [vmem:[#allocation2 + $0x122] sm:$0xff] }
  0x40   : > { %387 = vst [vmem:[#allocation2 + $0x181] sm:$0xff] %v354_v23  ;;  %v4250_v52 = vld [vmem:[%s5439_s1 + $0x178] sm:$0xff]  }
  0x41   : > { %3812 = vmatpush3.bf16.msra.mxu1 %v4228_v63  ;;  %3860 = vmatpush3.bf16.msra.mxu0 %v4229_v0  ;;  %v949_v63 = vld [vmem:[#allocation2 + $0x9a] sm:$0xff]  ;;  %v964_v36 = vld [vmem:[#allocation2 + $0x152] sm:$0xff] }
  0x42   : > { %3813 = vmatprep.subr.bf16.mxu1 %v4230_v3  ;;  %3861 = vmatprep.subr.bf16.mxu0 %v4231_v4  ;;  %v4242_v0 = vld [vmem:[%s5439_s1 + $0xd8] sm:$0xff]  }
  0x43   : > { %v418_v35 = vld [vmem:[#allocation2 + $0x158] sm:$0xff] }
  0x44   : > { %3782 = vmatmul.mubr.bf16.gmra.mxu0 %v4594_v5  ;;  %3798 = vmatmul.mubr.bf16.gmra.mxu1 %v4597_v6 }
  0x45   : > { %3814 = vmatpush3.bf16.msra.mxu1 %v4230_v3  ;;  %3862 = vmatpush3.bf16.msra.mxu0 %v4231_v4  ;;  %v4243_v3 = vld [vmem:[%s5439_s1 + $0x118] sm:$0xff]   ;;  %v4661_v4 = vpack.c.bf16 %v400_v48, %v399_v47 }
  0x46   : > { %3815 = vmatprep.subr.bf16.mxu1 %v4232_v9  ;;  %3863 = vmatprep.subr.bf16.mxu0 %v4233_v10  ;;  %v410_v47 = vld [vmem:[#allocation2 + $0xf8] sm:$0xff] }
  0x47   : > { %3817 = vmatprep.mubr.bf16.mxu1 %v4292_v22  ;;  %3865 = vmatprep.mubr.bf16.mxu0 %v968_v11  ;;  %v403_v11 = vld [vmem:[#allocation2 + $0xa8] sm:$0xff]  ;;  %v956_v48 = vld [vmem:[#allocation2 + $0xf2] sm:$0xff] }
  0x48   : > { %v4247_v22 = vld [vmem:[%s5439_s1 + $0x108] sm:$0xff]   ;;  %v4687_v29 = vpack.c.bf16 %v404_v13, %v403_v11  ;;  %v959_v11 = vld [vmem:[#allocation2 + $0x112] sm:$0xff]  ;;  %v413_v13 = vld [vmem:[#allocation2 + $0x120] sm:$0xff] }
  0x49   : > { %3816 = vmatpush3.bf16.msra.mxu1 %v4232_v9  ;;  %3864 = vmatpush3.bf16.msra.mxu0 %v4233_v10  ;;  %v4667_v9 = vpack.c.bf16 %v949_v63, %v948_v60  ;;  %v4244_v10 = vld [vmem:[%s5439_s1 + $0xd0] sm:$0xff]   ;;  %v4719_v63 = vpack.c.bf16 %v957_v51, %v956_v48  ;;  %v4729_v19 = vpack.c.bf16 %v414_v14, %v413_v13  ;;  %v419_v48 = vld [vmem:[#allocation2 + $0x168] sm:$0xff] }
  0x4a   : > { %3897 = vmatprep.subr.bf16.mxu1 %v4234_v17  ;;  %3945 = vmatprep.subr.bf16.mxu0 %v4235_v18  ;;  %v420_v51 = vld [vmem:[#allocation2 + $0x170] sm:$0xff] }
  0x4b   : > { %v4252_v13 = vld [vmem:[%s5439_s1 + $0x170] sm:$0xff]  }
  0x4c   : > { %3818 = vmatmul.mubr.bf16.vlgmr.msra.gmra.mxu1 %v4613_v24  ;;  %3866 = vmatmul.mubr.bf16.vlgmr.msra.gmra.mxu0 %v4615_v25  ;;  %v4253_v14 = vld [vmem:[%s5439_s1 + $0x1b0] sm:$0xff]  }
  0x4d   : > { %3898 = vmatpush3.bf16.msra.mxu1 %v4234_v17  ;;  %3946 = vmatpush3.bf16.msra.mxu0 %v4235_v18  ;;  %v405_v17 = vld [vmem:[#allocation2 + $0xc0] sm:$0xff]  ;;  %v406_v18 = vld [vmem:[#allocation2 + $0xc8] sm:$0xff] }
  0x4e   : > { %3821 = vmatprep.mubr.bf16.mxu1 %v4617_v26  ;;  %3869 = vmatprep.mubr.bf16.mxu0 %v4619_v27  ;;  %v4693_v32 = vpack.c.bf16 %v406_v18, %v405_v17 }
  0x4f   : > { %3899 = vmatprep.subr.bf16.mxu1 %v4236_v28  ;;  %3947 = vmatprep.subr.bf16.mxu0 %v4237_v31 }
  0x51   : > { %3900 = vmatpush3.bf16.msra.mxu1 %v4236_v28  ;;  %3948 = vmatpush3.bf16.msra.mxu0 %v4237_v31  ;;  %v355_v28 = vld [vmem:[%s4361_s30 + $0xf8] sm:$0xff] }
  0x52   : > { %3901 = vmatprep.subr.bf16.mxu1 %v4238_v38  ;;  %3949 = vmatprep.subr.bf16.mxu0 %v4239_v39  ;;  %388 = vst [vmem:[#allocation2 + $0x189] sm:$0xff] %v355_v28  ;;  %v4691_v31 = vpack.c.bf16 %v355_v28, %v354_v23  ;;  %v962_v23 = vld [vmem:[#allocation2 + $0x13a] sm:$0xff]  ;;  %v963_v28 = vld [vmem:[#allocation2 + $0x142] sm:$0xff] }
  0x54   : > { %3822 = vmatmul.mubr.bf16.gmra.mxu1 %v4637_v40  ;;  %3870 = vmatmul.mubr.bf16.gmra.mxu0 %v4639_v41 }
  0x55   : > { %3825 = vmatprep.mubr.bf16.mxu1 %v4641_v42  ;;  %3873 = vmatprep.mubr.bf16.mxu0 %v4643_v45 }
  0x56   : > { %3902 = vmatpush3.bf16.msra.mxu1 %v4238_v38  ;;  %3950 = vmatpush3.bf16.msra.mxu0 %v4239_v39  ;;  %v955_v38 = vld [vmem:[#allocation2 + $0xe2] sm:$0xff] }
  0x57   : > { %3903 = vmatprep.subr.bf16.mxu1 %v4240_v46  ;;  %3951 = vmatprep.subr.bf16.mxu0 %v4241_v55  ;;  %v4249_v39 = vld [vmem:[%s5439_s1 + $0x100] sm:$0xff]   ;;  %v4715_v59 = vpack.c.bf16 %v955_v38, %v954_v37 }
  0x58   : > { %v965_v37 = vld [vmem:[#allocation2 + $0x15a] sm:$0xff] }
  0x5a   : > { %3904 = vmatpush3.bf16.msra.mxu1 %v4240_v46  ;;  %3952 = vmatpush3.bf16.msra.mxu0 %v4241_v55  ;;  %v409_v46 = vld [vmem:[#allocation2 + $0xf0] sm:$0xff]  ;;  %v4251_v55 = vld [vmem:[%s5439_s1 + $0x1b8] sm:$0xff]  }
  0x5b   : > { %3905 = vmatprep.subr.bf16.mxu1 %v4242_v0  ;;  %3953 = vmatprep.subr.bf16.mxu0 %v4243_v3  ;;  %v4717_v60 = vpack.c.bf16 %v410_v47, %v409_v46  ;;  %v4743_v47 = vpack.c.bf16 %v965_v37, %v964_v36  ;;  %v1884_v36 = vld [vmem:[#allocation2 + $0x182] sm:$0xff]  ;;  %v1885_v37 = vld [vmem:[#allocation2 + $0x18a] sm:$0xff] }
  0x5c   : > { %3826 = vmatmul.mubr.bf16.gmra.mxu1 %v4661_v4  ;;  %3874 = vmatmul.mubr.bf16.gmra.mxu0 %v4663_v7 }
  0x5d   : > { %3829 = vmatprep.mubr.bf16.mxu1 %v4665_v8  ;;  %3877 = vmatprep.mubr.bf16.mxu0 %v4667_v9 }
  0x5e   : > { %3906 = vmatpush3.bf16.msra.mxu1 %v4242_v0  ;;  %3954 = vmatpush3.bf16.msra.mxu0 %v4243_v3  ;;  %v411_v0 = vld [vmem:[#allocation2 + $0x108] sm:$0xff]  ;;  %v412_v3 = vld [vmem:[#allocation2 + $0x110] sm:$0xff] }
  0x5f   : > { %3907 = vmatprep.subr.bf16.mxu1 %v4244_v10  ;;  %3955 = vmatprep.subr.bf16.mxu0 %v4245_v16  ;;  %v4725_v17 = vpack.c.bf16 %v412_v3, %v411_v0  ;;  %v966_v0 = vld [vmem:[#allocation2 + $0x16a] sm:$0xff]  ;;  %v967_v3 = vld [vmem:[#allocation2 + $0x172] sm:$0xff] }
  0x62   : > { %3908 = vmatpush3.bf16.msra.mxu1 %v4244_v10  ;;  %3956 = vmatpush3.bf16.msra.mxu0 %v4245_v16  ;;  %v958_v10 = vld [vmem:[#allocation2 + $0x10a] sm:$0xff] }
  0x63   : > { %3909 = vmatprep.subr.bf16.mxu1 %v4246_v21  ;;  %3957 = vmatprep.subr.bf16.mxu0 %v4247_v22  ;;  %v961_v16 = vld [vmem:[#allocation2 + $0x12a] sm:$0xff]  ;;  %v4727_v18 = vpack.c.bf16 %v959_v11, %v958_v10  ;;  %v4749_v10 = vpack.c.bf16 %v420_v51, %v419_v48  ;;  %v4751_v11 = vpack.c.bf16 %v967_v3, %v966_v0  ;;  %v2468_v48 = vld [vmem:[#allocation2 + $0x39] sm:$0xff] }
  0x64   : > { %3830 = vmatmul.mubr.bf16.gmra.mxu1 %v4687_v29  ;;  %3878 = vmatmul.mubr.bf16.gmra.mxu0 %v4689_v30  ;;  %v4731_v20 = vpack.c.bf16 %v961_v16, %v960_v15  ;;  %v4262_v15 = vld [vmem:[%s5439_s1 + $0x148] sm:$0xff]   ;;  %v2773_v51 = vld [vmem:[#allocation2 + $0x32] sm:$0xff]  ;;  %v2774_v0 = vld [vmem:[#allocation2 + $0x3a] sm:$0xff] }
  0x65   : > { %3833 = vmatprep.mubr.bf16.mxu1 %v4693_v32  ;;  %3881 = vmatprep.mubr.bf16.mxu0 %v4695_v33  ;;  %v4263_v16 = vld [vmem:[%s5439_s1 + $0x188] sm:$0xff]  }
  0x66   : > { %3910 = vmatpush3.bf16.msra.mxu1 %v4246_v21  ;;  %3958 = vmatpush3.bf16.msra.mxu0 %v4247_v22  ;;  %v415_v21 = vld [vmem:[#allocation2 + $0x138] sm:$0xff]  ;;  %v416_v22 = vld [vmem:[#allocation2 + $0x140] sm:$0xff] }
  0x67   : > { %3911 = vmatprep.subr.bf16.mxu1 %v4248_v34  ;;  %3959 = vmatprep.subr.bf16.mxu0 %v4249_v39  ;;  %v4737_v38 = vpack.c.bf16 %v416_v22, %v415_v21  ;;  %v4266_v21 = vld [vmem:[%s5439_s1 + $0x1f8] sm:$0xff]  }
  0x68   : > { %v4267_v22 = vld [vmem:[%s5439_s1 + $0x238] sm:$0xff]  }
  0x6a   : > { %3912 = vmatpush3.bf16.msra.mxu1 %v4248_v34  ;;  %3960 = vmatpush3.bf16.msra.mxu0 %v4249_v39  ;;  %v417_v34 = vld [vmem:[#allocation2 + $0x150] sm:$0xff]  ;;  %v4739_v39 = vpack.c.bf16 %v963_v28, %v962_v23 }
  0x6b   : > { %3993 = vmatprep.subr.bf16.mxu1 %v4250_v52  ;;  %4041 = vmatprep.subr.bf16.mxu0 %v4251_v55  ;;  %v4741_v46 = vpack.c.bf16 %v418_v35, %v417_v34 }
  0x6c   : > { %3834 = vmatmul.mubr.bf16.gmra.mxu1 %v4713_v56  ;;  %3882 = vmatmul.mubr.bf16.gmra.mxu0 %v4715_v59 }
  0x6d   : > { %3837 = vmatprep.mubr.bf16.mxu1 %v4717_v60  ;;  %3885 = vmatprep.mubr.bf16.mxu0 %v4719_v63 }
  0x74   : > { %3838 = vmatmul.mubr.bf16.gmra.mxu1 %v4725_v17  ;;  %3886 = vmatmul.mubr.bf16.gmra.mxu0 %v4727_v18 }
  0x75   : > { %3841 = vmatprep.mubr.bf16.mxu1 %v4729_v19  ;;  %3889 = vmatprep.mubr.bf16.mxu0 %v4731_v20 }
  0x7c   : > { %3842 = vmatmul.mubr.bf16.gmra.mxu1 %v4737_v38  ;;  %3890 = vmatmul.mubr.bf16.gmra.mxu0 %v4739_v39 }
  0x7d   : > { %3845 = vmatprep.mubr.bf16.mxu1 %v4741_v46  ;;  %3893 = vmatprep.mubr.bf16.mxu0 %v4743_v47 }
  0x84   : > { %3846 = vmatmul.mubr.bf16.gmra.mxu1 %v4749_v10  ;;  %3894 = vmatmul.mubr.bf16.gmra.mxu0 %v4751_v11 }
  0x85   : > { %3913 = vmatprep.mubr.bf16.mxu1 %v4613_v24  ;;  %3961 = vmatprep.mubr.bf16.mxu0 %v4492_v43  ;;  %v4254_v43 = vld [vmem:[%s5439_s1 + $0x168] sm:$0xff]  }
  0x86   : > { %v4255_v24 = vld [vmem:[%s5439_s1 + $0x1a8] sm:$0xff]  }
  0x8c   : > { %3914 = vmatmul.mubr.bf16.vlgmr.msra.gmra.mxu1 %v4617_v26  ;;  %3962 = vmatmul.mubr.bf16.vlgmr.msra.gmra.mxu0 %v4513_v49  ;;  %v4256_v49 = vld [vmem:[%s5439_s1 + $0x160] sm:$0xff]  }
  0x8d   : > { %3994 = vmatpush3.bf16.msra.mxu1 %v4250_v52  ;;  %4042 = vmatpush3.bf16.msra.mxu0 %v4251_v55  ;;  %v4258_v52 = vld [vmem:[%s5439_s1 + $0x158] sm:$0xff]  }
  0x8e   : > { %3917 = vmatprep.mubr.bf16.mxu1 %v4637_v40  ;;  %3965 = vmatprep.mubr.bf16.mxu0 %v4531_v53  ;;  %v4257_v53 = vld [vmem:[%s5439_s1 + $0x1a0] sm:$0xff]   ;;  %v4259_v55 = vld [vmem:[%s5439_s1 + $0x198] sm:$0xff]  }
  0x8f   : > { %3995 = vmatprep.subr.bf16.mxu1 %v4252_v13  ;;  %4043 = vmatprep.subr.bf16.mxu0 %v4253_v14 }
  0x91   : > { %3996 = vmatpush3.bf16.msra.mxu1 %v4252_v13  ;;  %4044 = vmatpush3.bf16.msra.mxu0 %v4253_v14 }
  0x92   : > { %3997 = vmatprep.subr.bf16.mxu1 %v4254_v43  ;;  %4045 = vmatprep.subr.bf16.mxu0 %v4255_v24 }
  0x94   : > { %3918 = vmatmul.mubr.bf16.gmra.mxu1 %v4641_v42  ;;  %3966 = vmatmul.mubr.bf16.gmra.mxu0 %v4545_v57  ;;  %v4260_v57 = vld [vmem:[%s5439_s1 + $0x150] sm:$0xff]  }
  0x95   : > { %3921 = vmatprep.mubr.bf16.mxu1 %v4661_v4  ;;  %3969 = vmatprep.mubr.bf16.mxu0 %v4563_v61  ;;  %v4261_v61 = vld [vmem:[%s5439_s1 + $0x190] sm:$0xff]  }
  0x96   : > { %3998 = vmatpush3.bf16.msra.mxu1 %v4254_v43  ;;  %4046 = vmatpush3.bf16.msra.mxu0 %v4255_v24  ;;  %v2805_v43 = vpack.c.bf16 %v2774_v0, %v2773_v51  ;;  %v2782_v51 = vld [vmem:[#allocation2 + $0x9a] sm:$0xff] }
  0x97   : > { %3999 = vmatprep.subr.bf16.mxu1 %v4256_v49  ;;  %4047 = vmatprep.subr.bf16.mxu0 %v4257_v53 }
  0x9a   : > { %4000 = vmatpush3.bf16.msra.mxu1 %v4256_v49  ;;  %4048 = vmatpush3.bf16.msra.mxu0 %v4257_v53 }
  0x9b   : > { %4001 = vmatprep.subr.bf16.mxu1 %v4258_v52  ;;  %4049 = vmatprep.subr.bf16.mxu0 %v4259_v55 }
  0x9c   : > { %3922 = vmatmul.mubr.bf16.gmra.mxu1 %v4665_v8  ;;  %3970 = vmatmul.mubr.bf16.gmra.mxu0 %v4577_v1  ;;  %v4264_v1 = vld [vmem:[%s5439_s1 + $0x140] sm:$0xff]  }
  0x9d   : > { %3925 = vmatprep.mubr.bf16.mxu1 %v4687_v29  ;;  %3973 = vmatprep.mubr.bf16.mxu0 %v4594_v5  ;;  %v4265_v5 = vld [vmem:[%s5439_s1 + $0x180] sm:$0xff]  }
  0x9e   : > { %4002 = vmatpush3.bf16.msra.mxu1 %v4258_v52  ;;  %4050 = vmatpush3.bf16.msra.mxu0 %v4259_v55  ;;  %v2469_v55 = vld [vmem:[#allocation2 + $0x49] sm:$0xff] }
  0x9f   : > { %4003 = vmatprep.subr.bf16.mxu1 %v4260_v57  ;;  %4051 = vmatprep.subr.bf16.mxu0 %v4261_v61 }
  0xa2   : > { %4004 = vmatpush3.bf16.msra.mxu1 %v4260_v57  ;;  %4052 = vmatpush3.bf16.msra.mxu0 %v4261_v61  ;;  %v2470_v57 = vld [vmem:[#allocation2 + $0x51] sm:$0xff] }
  0xa3   : > { %4005 = vmatprep.subr.bf16.mxu1 %v4262_v15  ;;  %4053 = vmatprep.subr.bf16.mxu0 %v4263_v16  ;;  %v2775_v61 = vld [vmem:[#allocation2 + $0x4a] sm:$0xff] }
  0xa4   : > { %3926 = vmatmul.mubr.bf16.gmra.mxu1 %v4693_v32  ;;  %3974 = vmatmul.mubr.bf16.gmra.mxu0 %v4376_v12  ;;  %v1272_v12 = vld [vmem:[#allocation2 + $0x180] sm:$0xff] }
  0xa5   : > { %3929 = vmatprep.mubr.bf16.mxu1 %v4713_v56  ;;  %3977 = vmatprep.mubr.bf16.mxu0 %v4496_v44  ;;  %v1273_v44 = vld [vmem:[#allocation2 + $0x188] sm:$0xff] }
  0xa6   : > { %4006 = vmatpush3.bf16.msra.mxu1 %v4262_v15  ;;  %4054 = vmatpush3.bf16.msra.mxu0 %v4263_v16  ;;  %v2776_v15 = vld [vmem:[#allocation2 + $0x52] sm:$0xff]  ;;  %v2471_v16 = vld [vmem:[#allocation2 + $0x61] sm:$0xff] }
  0xa7   : > { %4007 = vmatprep.subr.bf16.mxu1 %v4264_v1  ;;  %4055 = vmatprep.subr.bf16.mxu0 %v4265_v5 }
  0xaa   : > { %4008 = vmatpush3.bf16.msra.mxu1 %v4264_v1  ;;  %4056 = vmatpush3.bf16.msra.mxu0 %v4265_v5 }
  0xab   : > { %4089 = vmatprep.subr.bf16.mxu1 %v4266_v21  ;;  %4137 = vmatprep.subr.bf16.mxu0 %v4267_v22 }
  0xac   : > { %3930 = vmatmul.mubr.bf16.gmra.mxu1 %v4717_v60  ;;  %3978 = vmatmul.mubr.bf16.gmra.mxu0 %v4517_v50  ;;  %v4833_v50 = vpack.c.bf16 %v1273_v44, %v1272_v12  ;;  %v2778_v12 = vld [vmem:[#allocation2 + $0x6a] sm:$0xff] }
  0xad   : > { %3933 = vmatprep.mubr.bf16.mxu1 %v4725_v17  ;;  %3981 = vmatprep.mubr.bf16.mxu0 %v4535_v54  ;;  %v4268_v54 = vld [vmem:[%s5439_s1 + $0x1f0] sm:$0xff]  }
  0xb4   : > { %3934 = vmatmul.mubr.bf16.gmra.mxu1 %v4729_v19  ;;  %3982 = vmatmul.mubr.bf16.gmra.mxu0 %v4549_v58  ;;  %v4269_v58 = vld [vmem:[%s5439_s1 + $0x230] sm:$0xff]  }
  0xb5   : > { %3937 = vmatprep.mubr.bf16.mxu1 %v4737_v38  ;;  %3985 = vmatprep.mubr.bf16.mxu0 %v4567_v62  ;;  %v4270_v62 = vld [vmem:[%s5439_s1 + $0x1e8] sm:$0xff]  }
  0xbc   : > { %3938 = vmatmul.mubr.bf16.gmra.mxu1 %v4741_v46  ;;  %3986 = vmatmul.mubr.bf16.gmra.mxu0 %v4580_v2  ;;  %v4271_v2 = vld [vmem:[%s5439_s1 + $0x228] sm:$0xff]  }
  0xbd   : > { %3941 = vmatprep.mubr.bf16.mxu1 %v4749_v10  ;;  %3989 = vmatprep.mubr.bf16.mxu0 %v4597_v6  ;;  %v4272_v6 = vld [vmem:[%s5439_s1 + $0x1e0] sm:$0xff]  }
  0xc4   : > { %3942 = vmatmul.mubr.bf16.gmra.mxu1 %v4833_v50  ;;  %3990 = vmatmul.mubr.bf16.gmra.mxu0 %v4691_v31 }
  0xc5   : > { %4009 = vmatprep.mubr.bf16.mxu1 %v4615_v25  ;;  %4057 = vmatprep.mubr.bf16.mxu0 %v4617_v26  ;;  %v4273_v25 = vld [vmem:[%s5439_s1 + $0x220] sm:$0xff]   ;;  %v4274_v26 = vld [vmem:[%s5439_s1 + $0x1d8] sm:$0xff]  }
  0xcc   : > { %4010 = vmatmul.mubr.bf16.vlgmr.msra.gmra.mxu1 %v4619_v27  ;;  %4058 = vmatmul.mubr.bf16.vlgmr.msra.gmra.mxu0 %v4637_v40  ;;  %v4275_v27 = vld [vmem:[%s5439_s1 + $0x218] sm:$0xff]   ;;  %v4276_v40 = vld [vmem:[%s5439_s1 + $0x1d0] sm:$0xff]  }
  0xcd   : > { %4090 = vmatpush3.bf16.msra.mxu1 %v4266_v21  ;;  %4138 = vmatpush3.bf16.msra.mxu0 %v4267_v22  ;;  %v2472_v21 = vld [vmem:[#allocation2 + $0x69] sm:$0xff] }
  0xce   : > { %4013 = vmatprep.mubr.bf16.mxu1 %v4639_v41  ;;  %4061 = vmatprep.mubr.bf16.mxu0 %v4641_v42  ;;  %v4277_v41 = vld [vmem:[%s5439_s1 + $0x210] sm:$0xff]   ;;  %v4278_v42 = vld [vmem:[%s5439_s1 + $0x1c8] sm:$0xff]  }
  0xcf   : > { %4091 = vmatprep.subr.bf16.mxu1 %v4268_v54  ;;  %4139 = vmatprep.subr.bf16.mxu0 %v4269_v58  ;;  %v2777_v22 = vld [vmem:[#allocation2 + $0x62] sm:$0xff] }
  0xd1   : > { %4092 = vmatpush3.bf16.msra.mxu1 %v4268_v54  ;;  %4140 = vmatpush3.bf16.msra.mxu0 %v4269_v58  ;;  %v2500_v54 = vpack.c.bf16 %v2470_v57, %v2469_v55  ;;  %v2806_v58 = vpack.c.bf16 %v2776_v15, %v2775_v61 }
  0xd2   : > { %4093 = vmatprep.subr.bf16.mxu1 %v4270_v62  ;;  %4141 = vmatprep.subr.bf16.mxu0 %v4271_v2 }
  0xd4   : > { %4014 = vmatmul.mubr.bf16.gmra.mxu1 %v4643_v45  ;;  %4062 = vmatmul.mubr.bf16.gmra.mxu0 %v4661_v4  ;;  %v4279_v45 = vld [vmem:[%s5439_s1 + $0x208] sm:$0xff]   ;;  %v4280_v4 = vld [vmem:[%s5439_s1 + $0x1c0] sm:$0xff]  }
  0xd5   : > { %4017 = vmatprep.mubr.bf16.mxu1 %v4663_v7  ;;  %4065 = vmatprep.mubr.bf16.mxu0 %v4665_v8  ;;  %v4281_v7 = vld [vmem:[%s5439_s1 + $0x200] sm:$0xff]  }
  0xd6   : > { %4094 = vmatpush3.bf16.msra.mxu1 %v4270_v62  ;;  %4142 = vmatpush3.bf16.msra.mxu0 %v4271_v2  ;;  %v2501_v62 = vpack.c.bf16 %v2472_v21, %v2471_v16  ;;  %v2807_v2 = vpack.c.bf16 %v2778_v12, %v2777_v22 }
  0xd7   : > { %4095 = vmatprep.subr.bf16.mxu1 %v4272_v6  ;;  %4143 = vmatprep.subr.bf16.mxu0 %v4273_v25 }
  0xda   : > { %4096 = vmatpush3.bf16.msra.mxu1 %v4272_v6  ;;  %4144 = vmatpush3.bf16.msra.mxu0 %v4273_v25 }
  0xdb   : > { %4097 = vmatprep.subr.bf16.mxu1 %v4274_v26  ;;  %4145 = vmatprep.subr.bf16.mxu0 %v4275_v27 }
  0xdc   : > { %4018 = vmatmul.mubr.bf16.gmra.mxu1 %v4667_v9  ;;  %4066 = vmatmul.mubr.bf16.gmra.mxu0 %v4687_v29 }
  0xdd   : > { %4021 = vmatprep.mubr.bf16.mxu1 %v4689_v30  ;;  %4069 = vmatprep.mubr.bf16.mxu0 %v4693_v32 }
  0xde   : > { %4098 = vmatpush3.bf16.msra.mxu1 %v4274_v26  ;;  %4146 = vmatpush3.bf16.msra.mxu0 %v4275_v27 }
  0xdf   : > { %4099 = vmatprep.subr.bf16.mxu1 %v4276_v40  ;;  %4147 = vmatprep.subr.bf16.mxu0 %v4277_v41 }
  0xe2   : > { %4100 = vmatpush3.bf16.msra.mxu1 %v4276_v40  ;;  %4148 = vmatpush3.bf16.msra.mxu0 %v4277_v41  ;;  %v2473_v40 = vld [vmem:[#allocation2 + $0x79] sm:$0xff]  ;;  %v2474_v41 = vld [vmem:[#allocation2 + $0x81] sm:$0xff] }
  0xe3   : > { %4101 = vmatprep.subr.bf16.mxu1 %v4278_v42  ;;  %4149 = vmatprep.subr.bf16.mxu0 %v4279_v45 }
  0xe4   : > { %4022 = vmatmul.mubr.bf16.gmra.mxu1 %v4695_v33  ;;  %4070 = vmatmul.mubr.bf16.gmra.mxu0 %v4713_v56 }
  0xe5   : > { %4025 = vmatprep.mubr.bf16.mxu1 %v4715_v59  ;;  %4073 = vmatprep.mubr.bf16.mxu0 %v4717_v60 }
  0xe6   : > { %4102 = vmatpush3.bf16.msra.mxu1 %v4278_v42  ;;  %4150 = vmatpush3.bf16.msra.mxu0 %v4279_v45  ;;  %v2779_v45 = vld [vmem:[#allocation2 + $0x7a] sm:$0xff] }
  0xe7   : > { %4103 = vmatprep.subr.bf16.mxu1 %v4280_v4  ;;  %4151 = vmatprep.subr.bf16.mxu0 %v4281_v7 }
  0xea   : > { %4104 = vmatpush3.bf16.msra.mxu1 %v4280_v4  ;;  %4152 = vmatpush3.bf16.msra.mxu0 %v4281_v7  ;;  %v2780_v4 = vld [vmem:[#allocation2 + $0x82] sm:$0xff]  ;;  %v2475_v7 = vld [vmem:[#allocation2 + $0x91] sm:$0xff] }
  0xeb   : > { %v2808_v55 = vpack.c.bf16 %v2780_v4, %v2779_v45  ;;  %v2480_v45 = vld [vmem:[#allocation2 + $0xc9] sm:$0xff] }
  0xec   : > { %v4897_v8 = vpop.f32.mrf.mxu0  ;;  %v4899_v9 = vpop.f32.mrf.mxu1  ;;  %4026 = vmatmul.mubr.bf16.gmra.mxu1 %v4719_v63  ;;  %4074 = vmatmul.mubr.bf16.gmra.mxu0 %v4725_v17  ;;  %v2785_v4 = vld [vmem:[#allocation2 + $0xc2] sm:$0xff] }
  0xed   : > { %4029 = vmatprep.mubr.bf16.mxu1 %v4727_v18  ;;  %4077 = vmatprep.mubr.bf16.mxu0 %v4729_v19 }
  0xee   : > { %v4905_v29 = vpop.f32.mrf.mxu0  ;;  %v4907_v30 = vpop.f32.mrf.mxu1 }
  0xf0   : > { %v4909_v32 = vpop.f32.mrf.mxu0  ;;  %v4911_v33 = vpop.f32.mrf.mxu1 }
  0xf2   : > { %v4913_v56 = vpop.f32.mrf.mxu0  ;;  %v4915_v59 = vpop.f32.mrf.mxu1 }
  0xf4   : > { %v4917_v60 = vpop.f32.mrf.mxu0  ;;  %v4919_v63 = vpop.f32.mrf.mxu1  ;;  %4030 = vmatmul.mubr.bf16.gmra.mxu1 %v4731_v20  ;;  %4078 = vmatmul.mubr.bf16.gmra.mxu0 %v4737_v38  ;;  %v2467_v38 = vld [vmem:[#allocation2 + $0x31] sm:$0xff] }
  0xf5   : > { %4033 = vmatprep.mubr.bf16.mxu1 %v4739_v39  ;;  %4081 = vmatprep.mubr.bf16.mxu0 %v4741_v46  ;;  %v2499_v14 = vpack.c.bf16 %v2468_v48, %v2467_v38  ;;  %v2476_v38 = vld [vmem:[#allocation2 + $0x99] sm:$0xff] }
  0xf6   : > { %v4925_v17 = vpop.f32.mrf.mxu0  ;;  %v4927_v18 = vpop.f32.mrf.mxu1  ;;  %v2781_v48 = vld [vmem:[#allocation2 + $0x92] sm:$0xff]  ;;  %v2503_v61 = vpack.c.bf16 %v2476_v38, %v2475_v7 }
  0xf7   : > { %v2809_v15 = vpack.c.bf16 %v2782_v51, %v2781_v48 }
  0xf8   : > { %v4929_v19 = vpop.f32.mrf.mxu0  ;;  %v4931_v23 = vpop.f32.mrf.mxu1 }
  0xfa   : > { %v4933_v28 = vpop.f32.mrf.mxu0  ;;  %v4935_v34 = vpop.f32.mrf.mxu1 }
  0xfc   : > { %v4937_v35 = vpop.f32.mrf.mxu0  ;;  %v4939_v20 = vpop.f32.mrf.mxu1  ;;  %4034 = vmatmul.mubr.bf16.gmra.mxu1 %v4743_v47  ;;  %4082 = vmatmul.mubr.bf16.gmra.mxu0 %v4749_v10  ;;  %v4953_v47 = vpack.c.bf16 %v1885_v37, %v1884_v36  ;;  %v4282_v10 = vld [vmem:[#allocation2] sm:$0xff] }
  0xfd   : > { %4037 = vmatprep.mubr.bf16.mxu1 %v4751_v11  ;;  %4085 = vmatprep.mubr.bf16.mxu0 %v4833_v50  ;;  %v2208_v11 = vpack.c.bf16 %v4282_v10, %v4282_v10 }
  0xfe   : > { %v4945_v39 = vpop.f32.mrf.mxu0  ;;  %v4947_v46 = vpop.f32.mrf.mxu1 }
 0x100   : > { %v4949_v3 = vpop.f32.mrf.mxu0  ;;  %v4951_v13 = vpop.f32.mrf.mxu1 }
 0x102   : > { %v4955_v24 = vpop.f32.mrf.mxu0  ;;  %v4957_v49 = vpop.f32.mrf.mxu1 }
 0x104   : > { %v4959_v53 = vpop.f32.mrf.mxu0  ;;  %v4961_v52 = vpop.f32.mrf.mxu1  ;;  %4038 = vmatmul.mubr.bf16.gmra.mxu1 %v4953_v47  ;;  %4086 = vmatmul.mubr.bf16.gmra.mxu0 %v2208_v11 }
 0x105   : > { %4105 = vmatprep.mubr.bf16.mxu1 %v2499_v14  ;;  %4153 = vmatprep.mubr.bf16.mxu0 %v2805_v43  ;;  %v2502_v43 = vpack.c.bf16 %v2474_v41, %v2473_v40  ;;  %v2479_v40 = vld [vmem:[#allocation2 + $0xc1] sm:$0xff] }
 0x106   : > { %v4964_v1 = vpop.f32.mrf.mxu0  ;;  %v4966_v5 = vpop.f32.mrf.mxu1 }
 0x108   : > { %v4968_v44 = vpop.f32.mrf.mxu0  ;;  %v4970_v50 = vpop.f32.mrf.mxu1 }
 0x10a   : > { %v4972_v6 = vpop.f32.mrf.mxu0  ;;  %v4974_v25 = vpop.f32.mrf.mxu1 }
 0x10c   : > { %v3819_v26 = vpop.f32.mrf.mxu1  ;;  %v3867_v27 = vpop.f32.mrf.mxu0  ;;  %4106 = vmatmul.mubr.bf16.vlgmr.msra.gmra.mxu1 %v2500_v54  ;;  %4154 = vmatmul.mubr.bf16.vlgmr.msra.gmra.mxu0 %v2806_v58 }
 0x10d   : > { %v818_v42 = vadd.f32 %v3819_v26, %v4897_v8  ;;  %4109 = vmatprep.mubr.bf16.mxu1 %v2501_v62  ;;  %4157 = vmatprep.mubr.bf16.mxu0 %v2807_v2  ;;  %v2478_v62 = vld [vmem:[#allocation2 + $0xb1] sm:$0xff] }
 0x10e   : > { %v809_v36 = vpop.f32.mrf.mxu1  ;;  %v1083_v37 = vpop.f32.mrf.mxu0 }
 0x10f   : > { %v4977_v0 = vadd.f32 %v3867_v27, %v818_v42  ;;  %v810_v10 = vadd.f32 %v809_v36, %v4905_v29  ;;  %v2477_v29 = vld [vmem:[#allocation2 + $0xa9] sm:$0xff]  ;;  %v2784_v27 = vld [vmem:[#allocation2 + $0xb2] sm:$0xff] }
 0x110   : > { %v3820_v11 = vpop.f32.mrf.mxu1  ;;  %v3868_v14 = vpop.f32.mrf.mxu0  ;;  %v2504_v48 = vpack.c.bf16 %v2478_v62, %v2477_v29  ;;  %v2483_v29 = vld [vmem:[#allocation2 + $0xf1] sm:$0xff] }
 0x111   : > { %v4980_v57 = vadd.f32 %v1083_v37, %v810_v10  ;;  %v821_v8 = vadd.f32 %v3820_v11, %v4909_v32  ;;  %v2783_v32 = vld [vmem:[#allocation2 + $0xaa] sm:$0xff]  ;;  %v2505_v11 = vpack.c.bf16 %v2480_v45, %v2479_v40 }
 0x112   : > { %v812_v16 = vpop.f32.mrf.mxu1  ;;  %v1086_v21 = vpop.f32.mrf.mxu0  ;;  %v2810_v51 = vpack.c.bf16 %v2784_v27, %v2783_v32  ;;  %v2484_v32 = vld [vmem:[#allocation2 + $0xf9] sm:$0xff] }
 0x113   : > { %v4983_v22 = vadd.f32 %v3868_v14, %v821_v8  ;;  %v813_v12 = vadd.f32 %v812_v16, %v4913_v56  ;;  %v2786_v56 = vld [vmem:[#allocation2 + $0xca] sm:$0xff]  ;;  %v2789_v27 = vld [vmem:[#allocation2 + $0xf2] sm:$0xff] }
 0x114   : > { %v3823_v54 = vpop.f32.mrf.mxu1  ;;  %v3871_v58 = vpop.f32.mrf.mxu0  ;;  %4110 = vmatmul.mubr.bf16.gmra.mxu1 %v2502_v43  ;;  %4158 = vmatmul.mubr.bf16.gmra.mxu0 %v2808_v55  ;;  %v2811_v14 = vpack.c.bf16 %v2786_v56, %v2785_v4 }
 0x115   : > { %v4986_v2 = vadd.f32 %v1086_v21, %v813_v12  ;;  %v834_v26 = vadd.f32 %v3823_v54, %v4917_v60  ;;  %4113 = vmatprep.mubr.bf16.mxu1 %v2503_v61  ;;  %4161 = vmatprep.mubr.bf16.mxu0 %v2809_v15  ;;  %v2482_v21 = vld [vmem:[#allocation2 + $0xe1] sm:$0xff] }
 0x116   : > { %v825_v41 = vpop.f32.mrf.mxu1  ;;  %v1099_v42 = vpop.f32.mrf.mxu0 }
 0x117   : > { %v4989_v7 = vadd.f32 %v3871_v58, %v834_v26  ;;  %v826_v36 = vadd.f32 %v825_v41, %v4925_v17  ;;  %v2481_v17 = vld [vmem:[#allocation2 + $0xd9] sm:$0xff]  ;;  %v2788_v58 = vld [vmem:[#allocation2 + $0xe2] sm:$0xff] }
 0x118   : > { %v3824_v37 = vpop.f32.mrf.mxu1  ;;  %v3872_v38 = vpop.f32.mrf.mxu0  ;;  %v2506_v4 = vpack.c.bf16 %v2482_v21, %v2481_v17  ;;  %v2487_v17 = vld [vmem:[#allocation2 + $0x121] sm:$0xff] }
 0x119   : > { %v4992_v10 = vadd.f32 %v1099_v42, %v826_v36  ;;  %v837_v60 = vadd.f32 %v3824_v37, %v4929_v19  ;;  %v2787_v19 = vld [vmem:[#allocation2 + $0xda] sm:$0xff]  ;;  %v2507_v37 = vpack.c.bf16 %v2484_v32, %v2483_v29 }
 0x11a   : > { %v828_v43 = vpop.f32.mrf.mxu1  ;;  %v1102_v55 = vpop.f32.mrf.mxu0  ;;  %v2812_v56 = vpack.c.bf16 %v2788_v58, %v2787_v19  ;;  %v2488_v19 = vld [vmem:[#allocation2 + $0x129] sm:$0xff] }
 0x11b   : > { %v4995_v8 = vadd.f32 %v3872_v38, %v837_v60  ;;  %v829_v61 = vadd.f32 %v828_v43, %v4933_v28  ;;  %v2790_v28 = vld [vmem:[#allocation2 + $0xfa] sm:$0xff]  ;;  %v2793_v58 = vld [vmem:[#allocation2 + $0x122] sm:$0xff] }
 0x11c   : > { %v3827_v15 = vpop.f32.mrf.mxu1  ;;  %v3875_v16 = vpop.f32.mrf.mxu0  ;;  %4114 = vmatmul.mubr.bf16.gmra.mxu1 %v2504_v48  ;;  %4162 = vmatmul.mubr.bf16.gmra.mxu0 %v2810_v51  ;;  %v2813_v38 = vpack.c.bf16 %v2790_v28, %v2789_v27 }
 0x11d   : > { %v4998_v12 = vadd.f32 %v1102_v55, %v829_v61  ;;  %v850_v54 = vadd.f32 %v3827_v15, %v4937_v35  ;;  %4117 = vmatprep.mubr.bf16.mxu1 %v2505_v11  ;;  %4165 = vmatprep.mubr.bf16.mxu0 %v2811_v14  ;;  %v2486_v55 = vld [vmem:[#allocation2 + $0x111] sm:$0xff] }
 0x11e   : > { %v841_v62 = vpop.f32.mrf.mxu1  ;;  %v1115_v26 = vpop.f32.mrf.mxu0 }
 0x11f   : > { %v5001_v40 = vadd.f32 %v3875_v16, %v850_v54  ;;  %v842_v41 = vadd.f32 %v841_v62, %v4945_v39  ;;  %v2485_v39 = vld [vmem:[#allocation2 + $0x109] sm:$0xff]  ;;  %v2792_v16 = vld [vmem:[#allocation2 + $0x112] sm:$0xff] }
 0x120   : > { %v3828_v42 = vpop.f32.mrf.mxu1  ;;  %v3876_v45 = vpop.f32.mrf.mxu0  ;;  %v2508_v27 = vpack.c.bf16 %v2486_v55, %v2485_v39  ;;  %v2491_v39 = vld [vmem:[#allocation2 + $0x151] sm:$0xff] }
 0x121   : > { %v5004_v36 = vadd.f32 %v1115_v26, %v842_v41  ;;  %v853_v35 = vadd.f32 %v3828_v42, %v4949_v3  ;;  %v2791_v3 = vld [vmem:[#allocation2 + $0x10a] sm:$0xff]  ;;  %v2509_v42 = vpack.c.bf16 %v2488_v19, %v2487_v17 }
 0x122   : > { %v844_v48 = vpop.f32.mrf.mxu1  ;;  %v1118_v51 = vpop.f32.mrf.mxu0  ;;  %v2814_v28 = vpack.c.bf16 %v2792_v16, %v2791_v3  ;;  %v2492_v3 = vld [vmem:[#allocation2 + $0x159] sm:$0xff] }
 0x123   : > { %v5007_v60 = vadd.f32 %v3876_v45, %v853_v35  ;;  %v845_v11 = vadd.f32 %v844_v48, %v4955_v24  ;;  %v2794_v24 = vld [vmem:[#allocation2 + $0x12a] sm:$0xff]  ;;  %v2797_v16 = vld [vmem:[#allocation2 + $0x152] sm:$0xff] }
 0x124   : > { %v3831_v14 = vpop.f32.mrf.mxu1  ;;  %v3879_v43 = vpop.f32.mrf.mxu0  ;;  %4118 = vmatmul.mubr.bf16.gmra.mxu1 %v2506_v4  ;;  %4166 = vmatmul.mubr.bf16.gmra.mxu0 %v2812_v56  ;;  %v2815_v45 = vpack.c.bf16 %v2794_v24, %v2793_v58 }
 0x125   : > { %v5010_v61 = vadd.f32 %v1118_v51, %v845_v11  ;;  %v866_v15 = vadd.f32 %v3831_v14, %v4959_v53  ;;  %4121 = vmatprep.mubr.bf16.mxu1 %v2507_v37  ;;  %4169 = vmatprep.mubr.bf16.mxu0 %v2813_v38  ;;  %v2490_v51 = vld [vmem:[#allocation2 + $0x141] sm:$0xff] }
 0x126   : > { %v857_v21 = vpop.f32.mrf.mxu1  ;;  %v1131_v54 = vpop.f32.mrf.mxu0 }
 0x127   : > { %v5013_v29 = vadd.f32 %v3879_v43, %v866_v15  ;;  %v858_v62 = vadd.f32 %v857_v21, %v4964_v1  ;;  %v2489_v1 = vld [vmem:[#allocation2 + $0x139] sm:$0xff]  ;;  %v2796_v43 = vld [vmem:[#allocation2 + $0x142] sm:$0xff] }
 0x128   : > { %v3832_v26 = vpop.f32.mrf.mxu1  ;;  %v3880_v32 = vpop.f32.mrf.mxu0  ;;  %v2510_v58 = vpack.c.bf16 %v2490_v51, %v2489_v1 }
 0x129   : > { %v5016_v41 = vadd.f32 %v1131_v54, %v858_v62  ;;  %v869_v53 = vadd.f32 %v3832_v26, %v4968_v44  ;;  %v2795_v44 = vld [vmem:[#allocation2 + $0x13a] sm:$0xff]  ;;  %v2511_v26 = vpack.c.bf16 %v2492_v3, %v2491_v39 }
 0x12a   : > { %v860_v4 = vpop.f32.mrf.mxu1  ;;  %v1134_v56 = vpop.f32.mrf.mxu0  ;;  %v2816_v24 = vpack.c.bf16 %v2796_v43, %v2795_v44 }
 0x12b   : > { %v5019_v35 = vadd.f32 %v3880_v32, %v869_v53  ;;  %v861_v37 = vadd.f32 %v860_v4, %v4972_v6  ;;  %v2798_v6 = vld [vmem:[#allocation2 + $0x15a] sm:$0xff] }
 0x12c   : > { %v3835_v38 = vpop.f32.mrf.mxu1  ;;  %v3883_v48 = vpop.f32.mrf.mxu0  ;;  %4122 = vmatmul.mubr.bf16.gmra.mxu1 %v2508_v27  ;;  %4170 = vmatmul.mubr.bf16.gmra.mxu0 %v2814_v28  ;;  %v2817_v32 = vpack.c.bf16 %v2798_v6, %v2797_v16 }
 0x12d   : > { %v5022_v11 = vadd.f32 %v1134_v56, %v861_v37  ;;  %v882_v14 = vadd.f32 %v3835_v38, %v4899_v9  ;;  %4125 = vmatprep.mubr.bf16.mxu1 %v2509_v42  ;;  %4173 = vmatprep.mubr.bf16.mxu0 %v2815_v45  ;;  %v2799_v38 = vld [vmem:[#allocation2 + $0x16a] sm:$0xff] }
 0x12e   : > { %v873_v55 = vpop.f32.mrf.mxu1  ;;  %v1147_v15 = vpop.f32.mrf.mxu0 }
 0x12f   : > { %v5025_v17 = vadd.f32 %v3883_v48, %v882_v14  ;;  %v874_v21 = vadd.f32 %v873_v55, %v4907_v30  ;;  %v2493_v30 = vld [vmem:[#allocation2 + $0x169] sm:$0xff]  ;;  %v2800_v48 = vld [vmem:[#allocation2 + $0x172] sm:$0xff] }
 0x130   : > { %v3836_v54 = vpop.f32.mrf.mxu1  ;;  %v3884_v19 = vpop.f32.mrf.mxu0  ;;  %v2818_v55 = vpack.c.bf16 %v2800_v48, %v2799_v38 }
 0x131   : > { %v5028_v62 = vadd.f32 %v1147_v15, %v874_v21  ;;  %v885_v9 = vadd.f32 %v3836_v54, %v4911_v33  ;;  %v2494_v33 = vld [vmem:[#allocation2 + $0x171] sm:$0xff] }
 0x132   : > { %v876_v27 = vpop.f32.mrf.mxu1  ;;  %v1150_v28 = vpop.f32.mrf.mxu0  ;;  %v2512_v39 = vpack.c.bf16 %v2494_v33, %v2493_v30 }
 0x133   : > { %v5031_v53 = vadd.f32 %v3884_v19, %v885_v9  ;;  %v877_v42 = vadd.f32 %v876_v27, %v4915_v59  ;;  %v2803_v9 = vld [vmem:[#allocation2 + $0x19a] sm:$0xff] }
 0x134   : > { %v3839_v45 = vpop.f32.mrf.mxu1  ;;  %v3887_v4 = vpop.f32.mrf.mxu0  ;;  %4126 = vmatmul.mubr.bf16.gmra.mxu1 %v2510_v58  ;;  %4174 = vmatmul.mubr.bf16.gmra.mxu0 %v2816_v24  ;;  %v2497_v58 = vld [vmem:[#allocation2 + $0x199] sm:$0xff] }
 0x135   : > { %v5034_v56 = vadd.f32 %v1150_v28, %v877_v42  ;;  %v898_v37 = vadd.f32 %v3839_v45, %v4919_v63  ;;  %4129 = vmatprep.mubr.bf16.mxu1 %v2511_v26  ;;  %4177 = vmatprep.mubr.bf16.mxu0 %v2817_v32  ;;  %v2804_v26 = vld [vmem:[#allocation2 + $0x1a2] sm:$0xff] }
 0x136   : > { %v889_v1 = vpop.f32.mrf.mxu1  ;;  %v1163_v51 = vpop.f32.mrf.mxu0  ;;  %v2820_v30 = vpack.c.bf16 %v2804_v26, %v2803_v9 }
 0x137   : > { %v5037_v14 = vadd.f32 %v3887_v4, %v898_v37  ;;  %v890_v59 = vadd.f32 %v889_v1, %v4927_v18 }
 0x138   : > { %v3840_v44 = vpop.f32.mrf.mxu1  ;;  %v3888_v43 = vpop.f32.mrf.mxu0 }
 0x139   : > { %v5040_v15 = vadd.f32 %v1163_v51, %v890_v59  ;;  %v901_v3 = vadd.f32 %v3840_v44, %v4931_v23  ;;  %v2498_v23 = vld [vmem:[#allocation2 + $0x1a1] sm:$0xff] }
 0x13a   : > { %v892_v63 = vpop.f32.mrf.mxu1  ;;  %v1166_v16 = vpop.f32.mrf.mxu0  ;;  %v2514_v4 = vpack.c.bf16 %v2498_v23, %v2497_v58 }
 0x13b   : > { %v5043_v6 = vadd.f32 %v3888_v43, %v901_v3  ;;  %v893_v21 = vadd.f32 %v892_v63, %v4935_v34 }
 0x13c   : > { %v3843_v54 = vpop.f32.mrf.mxu1  ;;  %v3891_v19 = vpop.f32.mrf.mxu0  ;;  %4130 = vmatmul.mubr.bf16.gmra.mxu1 %v2512_v39  ;;  %4178 = vmatmul.mubr.bf16.gmra.mxu0 %v2818_v55 }
 0x13d   : > { %v5046_v18 = vadd.f32 %v1166_v16, %v893_v21  ;;  %v914_v24 = vadd.f32 %v3843_v54, %v4939_v20  ;;  %4133 = vmatprep.mubr.bf16.mxu1 %v4691_v31  ;;  %4181 = vmatprep.mubr.bf16.mxu0 %v4953_v47 }
 0x13e   : > { %v905_v32 = vpop.f32.mrf.mxu1  ;;  %v1179_v27 = vpop.f32.mrf.mxu0 }
 0x13f   : > { %v5051_v28 = vadd.f32 %v3891_v19, %v914_v24  ;;  %v906_v34 = vadd.f32 %v905_v32, %v4947_v46 }
 0x140   : > { %v3844_v42 = vpop.f32.mrf.mxu1  ;;  %v3892_v45 = vpop.f32.mrf.mxu0 }
 0x141   : > { %v5054_v37 = vadd.f32 %v1179_v27, %v906_v34  ;;  %v917_v20 = vadd.f32 %v3844_v42, %v4951_v13 }
 0x142   : > { %v908_v31 = vpop.f32.mrf.mxu1  ;;  %v1182_v33 = vpop.f32.mrf.mxu0 }
 0x143   : > { %v5057_v47 = vadd.f32 %v3892_v45, %v917_v20  ;;  %v909_v38 = vadd.f32 %v908_v31, %v4957_v49 }
 0x144   : > { %v3847_v48 = vpop.f32.mrf.mxu1  ;;  %v3895_v1 = vpop.f32.mrf.mxu0  ;;  %4134 = vmatmul.mubr.bf16.gmra.mxu1 %v2514_v4  ;;  %4182 = vmatmul.mubr.bf16.gmra.mxu0 %v2820_v30 }
 0x145   : > { %v5060_v51 = vadd.f32 %v1182_v33, %v909_v38  ;;  %v930_v46 = vadd.f32 %v3847_v48, %v4961_v52 }
 0x146   : > { %v921_v59 = vpop.f32.mrf.mxu1  ;;  %v1195_v44 = vpop.f32.mrf.mxu0 }
 0x147   : > { %v5063_v43 = vadd.f32 %v3895_v1, %v930_v46  ;;  %v922_v13 = vadd.f32 %v921_v59, %v4966_v5 }
 0x148   : > { %v3848_v39 = vpop.f32.mrf.mxu1  ;;  %v3896_v55 = vpop.f32.mrf.mxu0 }
 0x149   : > { %v5066_v3 = vadd.f32 %v1195_v44, %v922_v13  ;;  %v933_v49 = vadd.f32 %v3848_v39, %v4970_v50 }
 0x14a   : > { %v924_v63 = vpop.f32.mrf.mxu1  ;;  %v1198_v16 = vpop.f32.mrf.mxu0 }
 0x14b   : > { %v5069_v21 = vadd.f32 %v3896_v55, %v933_v49  ;;  %v925_v54 = vadd.f32 %v924_v63, %v4974_v25 }
 0x14c   : > { %v3915_v19 = vpop.f32.mrf.mxu1  ;;  %v3963_v52 = vpop.f32.mrf.mxu0 }
 0x14d   : > { %v5072_v58 = vadd.f32 %v1198_v16, %v925_v54  ;;  %v1518_v24 = vadd.f32 %v3915_v19, %v4977_v0 }
 0x14e   : > { %v1389_v23 = vpop.f32.mrf.mxu1  ;;  %v1695_v5 = vpop.f32.mrf.mxu0 }
 0x14f   : > { %v5075_v9 = vadd.f32 %v3963_v52, %v1518_v24  ;;  %v1516_v26 = vadd.f32 %v1389_v23, %v4980_v57 }
 0x150   : > { %v3916_v32 = vpop.f32.mrf.mxu1  ;;  %v3964_v50 = vpop.f32.mrf.mxu0 }
 0x151   : > { %v5078_v27 = vadd.f32 %v1695_v5, %v1516_v26  ;;  %v1519_v34 = vadd.f32 %v3916_v32, %v4983_v22 }
 0x152   : > { %v1392_v42 = vpop.f32.mrf.mxu1  ;;  %v1698_v25 = vpop.f32.mrf.mxu0 }
 0x153   : > { %v5081_v45 = vadd.f32 %v3964_v50, %v1519_v34  ;;  %v1517_v4 = vadd.f32 %v1392_v42, %v4986_v2 }
 0x154   : > { %v3919_v30 = vpop.f32.mrf.mxu1  ;;  %v3967_v0 = vpop.f32.mrf.mxu0 }
 0x155   : > { %v5084_v20 = vadd.f32 %v1698_v25, %v1517_v4  ;;  %v1522_v31 = vadd.f32 %v3919_v30, %v4989_v7 }
 0x156   : > { %v1405_v33 = vpop.f32.mrf.mxu1  ;;  %v1711_v57 = vpop.f32.mrf.mxu0 }
 0x157   : > { %v5087_v38 = vadd.f32 %v3967_v0, %v1522_v31  ;;  %v1520_v48 = vadd.f32 %v1405_v33, %v4992_v10 }
 0x158   : > { %v3920_v1 = vpop.f32.mrf.mxu1  ;;  %v3968_v22 = vpop.f32.mrf.mxu0 }
 0x159   : > { %v5090_v46 = vadd.f32 %v1711_v57, %v1520_v48  ;;  %v1523_v59 = vadd.f32 %v3920_v1, %v4995_v8 }
 0x15a   : > { %v1408_v44 = vpop.f32.mrf.mxu1  ;;  %v1714_v2 = vpop.f32.mrf.mxu0 }
 0x15b   : > { %v5093_v13 = vadd.f32 %v3968_v22, %v1523_v59  ;;  %v1521_v39 = vadd.f32 %v1408_v44, %v4998_v12 }
 0x15c   : > { %v3923_v55 = vpop.f32.mrf.mxu1  ;;  %v3971_v7 = vpop.f32.mrf.mxu0 }
 0x15d   : > { %v5096_v49 = vadd.f32 %v1714_v2, %v1521_v39  ;;  %v1526_v63 = vadd.f32 %v3923_v55, %v5001_v40 }
 0x15e   : > { %v1421_v16 = vpop.f32.mrf.mxu1  ;;  %v1727_v10 = vpop.f32.mrf.mxu0 }
 0x15f   : > { %v5099_v54 = vadd.f32 %v3971_v7, %v1526_v63  ;;  %v1524_v19 = vadd.f32 %v1421_v16, %v5004_v36 }
 0x160   : > { %v3924_v52 = vpop.f32.mrf.mxu1  ;;  %v3972_v8 = vpop.f32.mrf.mxu0 }
 0x161   : > { %v5102_v24 = vadd.f32 %v1727_v10, %v1524_v19  ;;  %v1527_v23 = vadd.f32 %v3924_v52, %v5007_v60 }
 0x162   : > { %v1424_v5 = vpop.f32.mrf.mxu1  ;;  %v1730_v12 = vpop.f32.mrf.mxu0 }
 0x163   : > { %v5105_v26 = vadd.f32 %v3972_v8, %v1527_v23  ;;  %v1525_v32 = vadd.f32 %v1424_v5, %v5010_v61 }
 0x164   : > { %v3927_v50 = vpop.f32.mrf.mxu1  ;;  %v3975_v40 = vpop.f32.mrf.mxu0 }
 0x165   : > { %v5108_v34 = vadd.f32 %v1730_v12, %v1525_v32  ;;  %v1530_v42 = vadd.f32 %v3927_v50, %v5013_v29 }
 0x166   : > { %v1437_v25 = vpop.f32.mrf.mxu1  ;;  %v1743_v36 = vpop.f32.mrf.mxu0 }
 0x167   : > { %v5111_v4 = vadd.f32 %v3975_v40, %v1530_v42  ;;  %v1528_v30 = vadd.f32 %v1437_v25, %v5016_v41 }
 0x168   : > { %v3928_v0 = vpop.f32.mrf.mxu1  ;;  %v3976_v60 = vpop.f32.mrf.mxu0 }
 0x169   : > { %v5114_v31 = vadd.f32 %v1743_v36, %v1528_v30  ;;  %v1531_v33 = vadd.f32 %v3928_v0, %v5019_v35 }
 0x16a   : > { %v1440_v57 = vpop.f32.mrf.mxu1  ;;  %v1746_v61 = vpop.f32.mrf.mxu0 }
 0x16b   : > { %v5117_v48 = vadd.f32 %v3976_v60, %v1531_v33  ;;  %v1529_v1 = vadd.f32 %v1440_v57, %v5022_v11 }
 0x16c   : > { %v3931_v22 = vpop.f32.mrf.mxu1  ;;  %v3979_v29 = vpop.f32.mrf.mxu0 }
 0x16d   : > { %v5120_v59 = vadd.f32 %v1746_v61, %v1529_v1  ;;  %v1534_v44 = vadd.f32 %v3931_v22, %v5025_v17 }
 0x16e   : > { %v1453_v2 = vpop.f32.mrf.mxu1  ;;  %v1759_v41 = vpop.f32.mrf.mxu0 }
 0x16f   : > { %v5123_v39 = vadd.f32 %v3979_v29, %v1534_v44  ;;  %v1532_v55 = vadd.f32 %v1453_v2, %v5028_v62 }
 0x170   : > { %v3932_v7 = vpop.f32.mrf.mxu1  ;;  %v3980_v35 = vpop.f32.mrf.mxu0 }
 0x171   : > { %v5126_v63 = vadd.f32 %v1759_v41, %v1532_v55  ;;  %v1535_v16 = vadd.f32 %v3932_v7, %v5031_v53 }
 0x172   : > { %v1456_v10 = vpop.f32.mrf.mxu1  ;;  %v1762_v11 = vpop.f32.mrf.mxu0 }
 0x173   : > { %v5129_v19 = vadd.f32 %v3980_v35, %v1535_v16  ;;  %v1533_v52 = vadd.f32 %v1456_v10, %v5034_v56 }
 0x174   : > { %v3935_v8 = vpop.f32.mrf.mxu1  ;;  %v3983_v17 = vpop.f32.mrf.mxu0 }
 0x175   : > { %5445 = vst [vmem:[#allocation3_spill] sm:$0xff] %v5129_v19  ;;  %v5132_v23 = vadd.f32 %v1762_v11, %v1533_v52  ;;  %v1538_v5 = vadd.f32 %v3935_v8, %v5037_v14 }
 0x176   : > { %v1469_v12 = vpop.f32.mrf.mxu1  ;;  %v1775_v62 = vpop.f32.mrf.mxu0 }
 0x177   : > { %5446 = vst [vmem:[#allocation4_spill] sm:$0xff] %v5132_v23  ;;  %v5135_v32 = vadd.f32 %v3983_v17, %v1538_v5  ;;  %v1536_v50 = vadd.f32 %v1469_v12, %v5040_v15 }
 0x178   : > { %v3936_v40 = vpop.f32.mrf.mxu1  ;;  %v3984_v53 = vpop.f32.mrf.mxu0 }
 0x179   : > { %5447 = vst [vmem:[#allocation5_spill] sm:$0xff] %v5135_v32  ;;  %v5138_v42 = vadd.f32 %v1775_v62, %v1536_v50  ;;  %v1539_v25 = vadd.f32 %v3936_v40, %v5043_v6 }
 0x17a   : > { %v1472_v36 = vpop.f32.mrf.mxu1  ;;  %v1778_v56 = vpop.f32.mrf.mxu0 }
 0x17b   : > { %5448 = vst [vmem:[#allocation6_spill] sm:$0xff] %v5138_v42  ;;  %v5141_v30 = vadd.f32 %v3984_v53, %v1539_v25  ;;  %v1537_v0 = vadd.f32 %v1472_v36, %v5046_v18 }
 0x17c   : > { %v3939_v60 = vpop.f32.mrf.mxu1  ;;  %v3987_v14 = vpop.f32.mrf.mxu0 }
 0x17d   : > { %5449 = vst [vmem:[#allocation7_spill] sm:$0xff] %v5141_v30  ;;  %v5144_v33 = vadd.f32 %v1778_v56, %v1537_v0  ;;  %v1542_v57 = vadd.f32 %v3939_v60, %v5051_v28 }
 0x17e   : > { %v1485_v61 = vpop.f32.mrf.mxu1  ;;  %v1791_v15 = vpop.f32.mrf.mxu0 }
 0x17f   : > { %5450 = vst [vmem:[#allocation8_spill] sm:$0xff] %v5144_v33  ;;  %v5147_v1 = vadd.f32 %v3987_v14, %v1542_v57  ;;  %v1540_v22 = vadd.f32 %v1485_v61, %v5054_v37 }
 0x180   : > { %v3940_v29 = vpop.f32.mrf.mxu1  ;;  %v3988_v6 = vpop.f32.mrf.mxu0 }
 0x181   : > { %5451 = vst [vmem:[#allocation9_spill] sm:$0xff] %v5147_v1  ;;  %v5150_v44 = vadd.f32 %v1791_v15, %v1540_v22  ;;  %v1543_v2 = vadd.f32 %v3940_v29, %v5057_v47 }
 0x182   : > { %v1488_v41 = vpop.f32.mrf.mxu1  ;;  %v1794_v18 = vpop.f32.mrf.mxu0 }
 0x183   : > { %5452 = vst [vmem:[#allocation10_spill] sm:$0xff] %v5150_v44  ;;  %v5153_v55 = vadd.f32 %v3988_v6, %v1543_v2  ;;  %v1541_v7 = vadd.f32 %v1488_v41, %v5060_v51 }
 0x184   : > { %v3943_v35 = vpop.f32.mrf.mxu1  ;;  %v3991_v28 = vpop.f32.mrf.mxu0 }
 0x185   : > { %5453 = vst [vmem:[#allocation11_spill] sm:$0xff] %v5153_v55  ;;  %v5156_v16 = vadd.f32 %v1794_v18, %v1541_v7  ;;  %v1546_v10 = vadd.f32 %v3943_v35, %v5063_v43 }
 0x186   : > { %v1501_v11 = vpop.f32.mrf.mxu1  ;;  %v1807_v37 = vpop.f32.mrf.mxu0 }
 0x187   : > { %5454 = vst [vmem:[#allocation12_spill] sm:$0xff] %v5156_v16  ;;  %v5159_v52 = vadd.f32 %v3991_v28, %v1546_v10  ;;  %v1544_v8 = vadd.f32 %v1501_v11, %v5066_v3 }
 0x188   : > { %v3944_v17 = vpop.f32.mrf.mxu1  ;;  %v3992_v47 = vpop.f32.mrf.mxu0 }
 0x189   : > { %5455 = vst [vmem:[#allocation13_spill] sm:$0xff] %v5159_v52  ;;  %v5162_v5 = vadd.f32 %v1807_v37, %v1544_v8  ;;  %v1547_v12 = vadd.f32 %v3944_v17, %v5069_v21 }
 0x18a   : > { %v1504_v62 = vpop.f32.mrf.mxu1  ;;  %v1810_v51 = vpop.f32.mrf.mxu0 }
 0x18b   : > { %5456 = vst [vmem:[#allocation14_spill] sm:$0xff] %v5162_v5  ;;  %v5165_v50 = vadd.f32 %v3992_v47, %v1547_v12  ;;  %v1545_v40 = vadd.f32 %v1504_v62, %v5072_v58 }
 0x18c   : > { %v4011_v53 = vpop.f32.mrf.mxu1  ;;  %v5168_v43 = vpop.f32.mrf.mxu0 }
 0x18d   : > { %5457 = vst [vmem:[#allocation15_spill] sm:$0xff] %v5165_v50  ;;  %v5170_v25 = vadd.f32 %v1810_v51, %v1545_v40 }
 0x18e   : > { %v2001_v36 = vpop.f32.mrf.mxu1  ;;  %v5172_v56 = vpop.f32.mrf.mxu0 }
 0x18f   : > { %5458 = vst [vmem:[#allocation16_spill] sm:$0xff] %v5170_v25 }
 0x190   : > { %v5174_v3 = vpop.f32.mrf.mxu1  ;;  %v5176_v0 = vpop.f32.mrf.mxu0 }
 0x192   : > { %v5178_v60 = vpop.f32.mrf.mxu1  ;;  %v5180_v21 = vpop.f32.mrf.mxu0 }
 0x194   : > { %v5182_v14 = vpop.f32.mrf.mxu1  ;;  %v5184_v57 = vpop.f32.mrf.mxu0 }
 0x196   : > { %v5186_v58 = vpop.f32.mrf.mxu1  ;;  %v5188_v61 = vpop.f32.mrf.mxu0 }
 0x198   : > { %v5190_v15 = vpop.f32.mrf.mxu1  ;;  %v5192_v22 = vpop.f32.mrf.mxu0 }
 0x19a   : > { %v5194_v29 = vpop.f32.mrf.mxu1  ;;  %v5196_v6 = vpop.f32.mrf.mxu0 }
 0x19c   : > { %v5198_v2 = vpop.f32.mrf.mxu1  ;;  %v5200_v41 = vpop.f32.mrf.mxu0 }
 0x19e   : > { %v5202_v18 = vpop.f32.mrf.mxu1  ;;  %v5204_v7 = vpop.f32.mrf.mxu0 }
 0x1a0   : > { %v5206_v35 = vpop.f32.mrf.mxu1  ;;  %v5208_v28 = vpop.f32.mrf.mxu0 }
 0x1a2   : > { %v5210_v10 = vpop.f32.mrf.mxu1  ;;  %v5212_v11 = vpop.f32.mrf.mxu0 }
 0x1a4   : > { %v5214_v37 = vpop.f32.mrf.mxu1  ;;  %v5216_v8 = vpop.f32.mrf.mxu0 }
 0x1a6   : > { %v5218_v17 = vpop.f32.mrf.mxu1  ;;  %v5220_v47 = vpop.f32.mrf.mxu0 }
 0x1a8   : > { %v5222_v12 = vpop.f32.mrf.mxu1  ;;  %v5224_v62 = vpop.f32.mrf.mxu0 }
 0x1aa   : > { %v5226_v51 = vpop.f32.mrf.mxu1  ;;  %v5228_v40 = vpop.f32.mrf.mxu0 }
 0x1ac   : > { %v5230_v25 = vpop.f32.mrf.mxu1  ;;  %v5232_v50 = vpop.f32.mrf.mxu0 }
 0x1ae   : > { %v5234_v5 = vpop.f32.mrf.mxu1  ;;  %v5236_v52 = vpop.f32.mrf.mxu0 }
 0x1af   : > { %5459 = vst [vmem:[#allocation17_spill] sm:$0xff] %v5236_v52 }
 0x1b0   : > { %v5238_v16 = vpop.f32.mrf.mxu1  ;;  %v5240_v55 = vpop.f32.mrf.mxu0 }
 0x1b1   : > { %5460 = vst [vmem:[#allocation18_spill] sm:$0xff] %v5238_v16  ;;  %5461 = vst [vmem:[#allocation19_spill] sm:$0xff] %v5240_v55 }
 0x1b2   : > { %v5242_v44 = vpop.f32.mrf.mxu1  ;;  %v5244_v1 = vpop.f32.mrf.mxu0 }
 0x1b3   : > { %5462 = vst [vmem:[#allocation20_spill] sm:$0xff] %v5242_v44  ;;  %5463 = vst [vmem:[#allocation21_spill] sm:$0xff] %v5244_v1 }
 0x1b4   : > { %v5246_v33 = vpop.f32.mrf.mxu1  ;;  %v5248_v30 = vpop.f32.mrf.mxu0 }
 0x1b5   : > { %5464 = vst [vmem:[#allocation22_spill] sm:$0xff] %v5246_v33  ;;  %5465 = vst [vmem:[#allocation23_spill] sm:$0xff] %v5248_v30 }
 0x1b6   : > { %v5250_v42 = vpop.f32.mrf.mxu1  ;;  %v5252_v32 = vpop.f32.mrf.mxu0 }
 0x1b7   : > { %5466 = vst [vmem:[#allocation24_spill] sm:$0xff] %v5250_v42  ;;  %5467 = vst [vmem:[#allocation25_spill] sm:$0xff] %v5252_v32 }
 0x1b8   : > { %v5254_v23 = vpop.f32.mrf.mxu1  ;;  %v5256_v19 = vpop.f32.mrf.mxu0 }
 0x1b9   : > { %5468 = vst [vmem:[#allocation26_spill] sm:$0xff] %v5254_v23  ;;  %5469 = vst [vmem:[#allocation27_spill] sm:$0xff] %v5256_v19 }
 0x1ba   : > { %v5258_v52 = vpop.f32.mrf.mxu1  ;;  %v5260_v16 = vpop.f32.mrf.mxu0 }
 0x1bb   : > { %5470 = vst [vmem:[#allocation28_spill] sm:$0xff] %v5258_v52  ;;  %5471 = vst [vmem:[#allocation29_spill] sm:$0xff] %v5260_v16 }
 0x1bc   : > { %v5262_v55 = vpop.f32.mrf.mxu1  ;;  %v5264_v44 = vpop.f32.mrf.mxu0 }
 0x1bd   : > { %5472 = vst [vmem:[#allocation30_spill] sm:$0xff] %v5262_v55  ;;  %5473 = vst [vmem:[#allocation31_spill] sm:$0xff] %v5264_v44 }
 0x1be   : > { %v5266_v1 = vpop.f32.mrf.mxu1  ;;  %v5268_v33 = vpop.f32.mrf.mxu0 }
 0x1bf   : > { %5474 = vst [vmem:[#allocation32_spill] sm:$0xff] %v5266_v1  ;;  %5475 = vst [vmem:[#allocation33_spill] sm:$0xff] %v5268_v33  ;;  %v2130_v1 = vadd.f32 %v4011_v53, %v5075_v9  ;;  %v2129_v9 = vadd.f32 %v5178_v60, %v5084_v20  ;;  %v2132_v20 = vadd.f32 %v5186_v58, %v5090_v46 }
 0x1c0   : > { %v5270_v30 = vpop.f32.mrf.mxu1  ;;  %v5272_v42 = vpop.f32.mrf.mxu0 }
 0x1c1   : > { %5476 = vst [vmem:[#allocation34_spill] sm:$0xff] %v5270_v30  ;;  %5477 = vst [vmem:[#allocation35_spill] sm:$0xff] %v5272_v42  ;;  %v2128_v42 = vadd.f32 %v2001_v36, %v5078_v27  ;;  %v2134_v27 = vadd.f32 %v5182_v14, %v5087_v38  ;;  %v2436_v38 = vadd.f32 %v5180_v21, %v2129_v9 }
 0x1c2   : > { %v5274_v32 = vpop.f32.mrf.mxu1  ;;  %v5276_v23 = vpop.f32.mrf.mxu0  ;;  %v2135_v14 = vadd.f32 %v5190_v15, %v5093_v13  ;;  %v2439_v21 = vadd.f32 %v5188_v61, %v2132_v20 }
 0x1c3   : > { %5478 = vst [vmem:[#allocation36_spill] sm:$0xff] %v5274_v32  ;;  %5479 = vst [vmem:[#allocation37_spill] sm:$0xff] %v5276_v23  ;;  %v2441_v60 = vadd.f32 %v5184_v57, %v2134_v27 }
 0x1c4   : > { %v5278_v19 = vpop.f32.mrf.mxu1  ;;  %v5280_v52 = vpop.f32.mrf.mxu0  ;;  %v2442_v15 = vadd.f32 %v5192_v22, %v2135_v14 }
 0x1c5   : > { %5480 = vst [vmem:[#allocation38_spill] sm:$0xff] %v5278_v19  ;;  %5481 = vst [vmem:[#allocation39_spill] sm:$0xff] %v5280_v52  ;;  %v2437_v19 = vadd.f32 %v5168_v43, %v2130_v1  ;;  %v2131_v52 = vadd.f32 %v5174_v3, %v5081_v45 }
 0x1c6   : > { %v5282_v16 = vpop.f32.mrf.mxu1  ;;  %v5284_v44 = vpop.f32.mrf.mxu0 }
 0x1c7   : > { %5482 = vst [vmem:[#allocation40_spill] sm:$0xff] %v5282_v16  ;;  %5483 = vst [vmem:[#allocation41_spill] sm:$0xff] %v5284_v44  ;;  %v2435_v44 = vadd.f32 %v5172_v56, %v2128_v42  ;;  %v2438_v43 = vadd.f32 %v5176_v0, %v2131_v52 }
 0x1c8   : > { %v5287_v33 = vpop.f32.mrf.mxu1  ;;  %v5289_v30 = vpop.f32.mrf.mxu0 }
 0x1ca   : > { %v5292_v32 = vpop.f32.mrf.mxu1  ;;  %v5294_v23 = vpop.f32.mrf.mxu0 }
 0x1cb   : > { %5484 = vst [vmem:[#allocation42_spill] sm:$0xff] %v5294_v23 }
 0x1cc   : > { %v4107_v16 = vpop.f32.mrf.mxu1  ;;  %v4155_v55 = vpop.f32.mrf.mxu0 }
 0x1cd   : > { %v2743_v53 = vadd.f32 %v4107_v16, %v2437_v19 }
 0x1ce   : > { %v2614_v1 = vpop.f32.mrf.mxu1  ;;  %v2920_v45 = vpop.f32.mrf.mxu0 }
 0x1cf   : > { %v3049_v42 = vadd.f32 %v4155_v55, %v2743_v53  ;;  %v2741_v36 = vadd.f32 %v2614_v1, %v2435_v44  ;;  %v2133_v1 = vadd.f32 %v5194_v29, %v5096_v49  ;;  %v2136_v49 = vadd.f32 %v5202_v18, %v5102_v24 }
 0x1d0   : > { %v4108_v19 = vpop.f32.mrf.mxu1  ;;  %v4156_v16 = vpop.f32.mrf.mxu0 }
 0x1d1   : > { %3081 = vst [vmem:[%s5309_s12 + $0x10] sm:$0xff] %v3049_v42  ;;  %v3047_v56 = vadd.f32 %v2920_v45, %v2741_v36  ;;  %v2744_v3 = vadd.f32 %v4108_v19, %v2438_v43  ;;  %v3151_v23 = vmul.f32 %v3049_v42, %v3049_v42  ;;  %v2138_v45 = vadd.f32 %v5198_v2, %v5099_v54 }
 0x1d2   : > { %v2617_v52 = vpop.f32.mrf.mxu1  ;;  %v2923_v55 = vpop.f32.mrf.mxu0 }
 0x1d3   : > { %3079 = vst [vmem:[%s5309_s12] sm:$0xff] %v3047_v56  ;;  %v3111_v44 = vadd.f32 %v3049_v42, %v3047_v56  ;;  %v3149_v0 = vmul.f32 %v3047_v56, %v3047_v56  ;;  %v3050_v46 = vadd.f32 %v4156_v16, %v2744_v3  ;;  %v2742_v58 = vadd.f32 %v2617_v52, %v2436_v38 }
 0x1d4   : > { %v4111_v9 = vpop.f32.mrf.mxu1  ;;  %v4159_v53 = vpop.f32.mrf.mxu0  ;;  %v2440_v38 = vadd.f32 %v5196_v6, %v2133_v1  ;;  %v2445_v2 = vadd.f32 %v5200_v41, %v2138_v45  ;;  %v2139_v3 = vadd.f32 %v5206_v35, %v5105_v26  ;;  %v2443_v6 = vadd.f32 %v5204_v7, %v2136_v49 }
 0x1d5   : > { %v3181_v57 = vadd.f32 %v3151_v23, %v3149_v0  ;;  %3082 = vst [vmem:[%s5309_s12 + $0x18] sm:$0xff] %v3050_v46  ;;  %v3048_v27 = vadd.f32 %v2923_v55, %v2742_v58  ;;  %v2747_v13 = vadd.f32 %v4111_v9, %v2441_v60  ;;  %v3152_v43 = vmul.f32 %v3050_v46, %v3050_v46 }
 0x1d6   : > { %v2630_v42 = vpop.f32.mrf.mxu1  ;;  %v2936_v36 = vpop.f32.mrf.mxu0  ;;  %v2137_v58 = vadd.f32 %v5210_v10, %v5108_v34  ;;  %v2446_v26 = vadd.f32 %v5208_v28, %v2139_v3  ;;  %v2142_v35 = vadd.f32 %v5214_v37, %v5111_v4  ;;  %v2140_v34 = vadd.f32 %v5218_v17, %v5114_v31 }
 0x1d7   : > { %3080 = vst [vmem:[%s5309_s12 + $0x8] sm:$0xff] %v3048_v27  ;;  %v3126_v61 = vadd.f32 %v3050_v46, %v3048_v27  ;;  %v3150_v20 = vmul.f32 %v3048_v27, %v3048_v27  ;;  %v3053_v19 = vadd.f32 %v4159_v53, %v2747_v13  ;;  %v2745_v16 = vadd.f32 %v2630_v42, %v2439_v21 }
 0x1d8   : > { %v4112_v23 = vpop.f32.mrf.mxu1  ;;  %v4160_v29 = vpop.f32.mrf.mxu0  ;;  %v2146_v3 = vadd.f32 %v5230_v25, %v5123_v39 }
 0x1d9   : > { %v3196_v22 = vadd.f32 %v3152_v43, %v3150_v20  ;;  %3085 = vst [vmem:[%s5309_s12 + $0x30] sm:$0xff] %v3053_v19  ;;  %v3051_v56 = vadd.f32 %v2936_v36, %v2745_v16  ;;  %v2748_v54 = vadd.f32 %v4112_v23, %v2442_v15  ;;  %v2444_v43 = vadd.f32 %v5212_v11, %v2137_v58 }
 0x1da   : > { %v2633_v60 = vpop.f32.mrf.mxu1  ;;  %v2939_v14 = vpop.f32.mrf.mxu0  ;;  %v2449_v36 = vadd.f32 %v5216_v8, %v2142_v35  ;;  %v2447_v11 = vadd.f32 %v5220_v47, %v2140_v34  ;;  %v2141_v8 = vadd.f32 %v5226_v51, %v5120_v59  ;;  %v2144_v59 = vadd.f32 %v5234_v5, %v5126_v63 }
 0x1db   : > { %3083 = vst [vmem:[%s5309_s12 + $0x20] sm:$0xff] %v3051_v56  ;;  %v3112_v52 = vadd.f32 %v3111_v44, %v3051_v56  ;;  %v3153_v55 = vmul.f32 %v3051_v56, %v3051_v56  ;;  %v3054_v24 = vadd.f32 %v4160_v29, %v2748_v54  ;;  %v2746_v18 = vadd.f32 %v2633_v60, %v2440_v38 }
 0x1dc   : > { %v4115_v0 = vpop.f32.mrf.mxu1  ;;  %v4163_v46 = vpop.f32.mrf.mxu0  ;;  %v3155_v44 = vmul.f32 %v3053_v19, %v3053_v19 }
 0x1dd   : > { %v3182_v21 = vadd.f32 %v3181_v57, %v3153_v55  ;;  %3086 = vst [vmem:[%s5309_s12 + $0x38] sm:$0xff] %v3054_v24  ;;  %v3052_v41 = vadd.f32 %v2939_v14, %v2746_v18  ;;  %v2751_v9 = vadd.f32 %v4115_v0, %v2445_v2  ;;  %v3113_v27 = vadd.f32 %v3112_v52, %v3053_v19 }
 0x1de   : > { %v2646_v53 = vpop.f32.mrf.mxu1  ;;  %v2952_v1 = vpop.f32.mrf.mxu0  ;;  %v3156_v20 = vmul.f32 %v3054_v24, %v3054_v24 }
 0x1df   : > { %3084 = vst [vmem:[%s5309_s12 + $0x28] sm:$0xff] %v3052_v41  ;;  %v3127_v7 = vadd.f32 %v3126_v61, %v3052_v41  ;;  %v3154_v13 = vmul.f32 %v3052_v41, %v3052_v41  ;;  %v3057_v15 = vadd.f32 %v4163_v46, %v2751_v9  ;;  %v2749_v45 = vadd.f32 %v2646_v53, %v2443_v6  ;;  %v5485_v41 = vld [vmem:[#allocation3_spill] sm:$0xff]  ;;  %v5486_v9 = vld [vmem:[#allocation18_spill] sm:$0xff] }
 0x1e0   : > { %v3183_v10 = vadd.f32 %v3182_v21, %v3155_v44  ;;  %v4116_v57 = vpop.f32.mrf.mxu1  ;;  %v4164_v28 = vpop.f32.mrf.mxu0  ;;  %v2143_v61 = vadd.f32 %v5222_v12, %v5117_v48  ;;  %v2448_v46 = vadd.f32 %v5228_v40, %v2141_v8  ;;  %v2453_v21 = vadd.f32 %v5232_v50, %v2146_v3  ;;  %v5487_v40 = vld [vmem:[#allocation17_spill] sm:$0xff]  ;;  %v5488_v50 = vld [vmem:[#allocation4_spill] sm:$0xff] }
 0x1e1   : > { %v3197_v4 = vadd.f32 %v3196_v22, %v3154_v13  ;;  %3089 = vst [vmem:[%s5309_s12 + $0x50] sm:$0xff] %v3057_v15  ;;  %v3055_v37 = vadd.f32 %v2952_v1, %v2749_v45  ;;  %v2752_v42 = vadd.f32 %v4116_v57, %v2446_v26  ;;  %v3128_v49 = vadd.f32 %v3127_v7, %v3054_v24 }
 0x1e2   : > { %v2649_v19 = vpop.f32.mrf.mxu1  ;;  %v2955_v16 = vpop.f32.mrf.mxu0  ;;  %v2450_v2 = vadd.f32 %v5224_v62, %v2143_v61  ;;  %v3159_v60 = vmul.f32 %v3057_v15, %v3057_v15  ;;  %v2147_v26 = vadd.f32 %v5486_v9, %v5485_v41  ;;  %v2451_v13 = vadd.f32 %v5487_v40, %v2144_v59  ;;  %v5492_v61 = vld [vmem:[#allocation22_spill] sm:$0xff]  ;;  %v5503_v40 = vld [vmem:[#allocation9_spill] sm:$0xff] }
 0x1e3   : > { %3087 = vst [vmem:[%s5309_s12 + $0x40] sm:$0xff] %v3055_v37  ;;  %v3114_v31 = vadd.f32 %v3113_v27, %v3055_v37  ;;  %v3157_v17 = vmul.f32 %v3055_v37, %v3055_v37  ;;  %v3058_v23 = vadd.f32 %v4164_v28, %v2752_v42  ;;  %v2750_v29 = vadd.f32 %v2649_v19, %v2444_v43  ;;  %v5490_v37 = vld [vmem:[#allocation19_spill] sm:$0xff] }
 0x1e4   : > { %v3198_v38 = vadd.f32 %v3197_v4, %v3156_v20  ;;  %v4119_v22 = vpop.f32.mrf.mxu1  ;;  %v4167_v56 = vpop.f32.mrf.mxu0  ;;  %v2454_v42 = vadd.f32 %v5490_v37, %v2147_v26  ;;  %v5505_v37 = vld [vmem:[#allocation10_spill] sm:$0xff] }
 0x1e5   : > { %v3184_v48 = vadd.f32 %v3183_v10, %v3157_v17  ;;  %3090 = vst [vmem:[%s5309_s12 + $0x58] sm:$0xff] %v3058_v23  ;;  %v3056_v12 = vadd.f32 %v2955_v16, %v2750_v29  ;;  %v2755_v54 = vadd.f32 %v4119_v22, %v2449_v36  ;;  %v3115_v47 = vadd.f32 %v3114_v31, %v3057_v15  ;;  %v5489_v10 = vld [vmem:[#allocation20_spill] sm:$0xff]  ;;  %v5491_v36 = vld [vmem:[#allocation5_spill] sm:$0xff] }
 0x1e6   : > { %v2662_v14 = vpop.f32.mrf.mxu1  ;;  %v2968_v52 = vpop.f32.mrf.mxu0  ;;  %v3160_v35 = vmul.f32 %v3058_v23, %v3058_v23  ;;  %v2145_v57 = vadd.f32 %v5489_v10, %v5488_v50  ;;  %v2150_v20 = vadd.f32 %v5492_v61, %v5491_v36  ;;  %v5494_v22 = vld [vmem:[#allocation24_spill] sm:$0xff] }
 0x1e7   : > { %3088 = vst [vmem:[%s5309_s12 + $0x48] sm:$0xff] %v3056_v12  ;;  %v3129_v55 = vadd.f32 %v3128_v49, %v3056_v12  ;;  %v3158_v24 = vmul.f32 %v3056_v12, %v3056_v12  ;;  %v3061_v18 = vadd.f32 %v4167_v56, %v2755_v54  ;;  %v2753_v6 = vadd.f32 %v2662_v14, %v2447_v11  ;;  %v5495_v54 = vld [vmem:[#allocation21_spill] sm:$0xff] }
 0x1e8   : > { %v3185_v51 = vadd.f32 %v3184_v48, %v3159_v60  ;;  %v4120_v0 = vpop.f32.mrf.mxu1  ;;  %v4168_v62 = vpop.f32.mrf.mxu0 }
 0x1e9   : > { %v3199_v39 = vadd.f32 %v3198_v38, %v3158_v24  ;;  %3093 = vst [vmem:[%s5309_s12 + $0x70] sm:$0xff] %v3061_v18  ;;  %v3059_v25 = vadd.f32 %v2968_v52, %v2753_v6  ;;  %v2756_v58 = vadd.f32 %v4120_v0, %v2450_v2  ;;  %v3130_v1 = vadd.f32 %v3129_v55, %v3058_v23  ;;  %v5493_v38 = vld [vmem:[#allocation6_spill] sm:$0xff]  ;;  %v5496_v52 = vld [vmem:[#allocation23_spill] sm:$0xff] }
 0x1ea   : > { %v2665_v44 = vpop.f32.mrf.mxu1  ;;  %v2971_v53 = vpop.f32.mrf.mxu0  ;;  %v3163_v19 = vmul.f32 %v3061_v18, %v3061_v18  ;;  %v2148_v56 = vadd.f32 %v5494_v22, %v5493_v38  ;;  %v2452_v2 = vadd.f32 %v5495_v54, %v2145_v57  ;;  %v5497_v55 = vld [vmem:[#allocation7_spill] sm:$0xff]  ;;  %v5498_v24 = vld [vmem:[#allocation26_spill] sm:$0xff] }
 0x1eb   : > { %3091 = vst [vmem:[%s5309_s12 + $0x60] sm:$0xff] %v3059_v25  ;;  %v3116_v63 = vadd.f32 %v3115_v47, %v3059_v25  ;;  %v3161_v5 = vmul.f32 %v3059_v25, %v3059_v25  ;;  %v3062_v27 = vadd.f32 %v4168_v62, %v2756_v58  ;;  %v2754_v7 = vadd.f32 %v2665_v44, %v2448_v46  ;;  %v5499_v58 = vld [vmem:[#allocation25_spill] sm:$0xff]  ;;  %v5501_v44 = vld [vmem:[#allocation28_spill] sm:$0xff]  ;;  %v5509_v38 = vld [vmem:[#allocation11_spill] sm:$0xff] }
 0x1ec   : > { %v3200_v15 = vadd.f32 %v3199_v39, %v3160_v35  ;;  %v4123_v45 = vpop.f32.mrf.mxu1  ;;  %v4171_v34 = vpop.f32.mrf.mxu0  ;;  %v2457_v47 = vadd.f32 %v5496_v52, %v2150_v20  ;;  %v5500_v35 = vld [vmem:[#allocation8_spill] sm:$0xff]  ;;  %v5510_v22 = vld [vmem:[#allocation34_spill] sm:$0xff]  ;;  %v5511_v52 = vld [vmem:[#allocation33_spill] sm:$0xff] }
 0x1ed   : > { %v3186_v28 = vadd.f32 %v3185_v51, %v3161_v5  ;;  %3094 = vst [vmem:[%s5309_s12 + $0x78] sm:$0xff] %v3062_v27  ;;  %v3060_v43 = vadd.f32 %v2971_v53, %v2754_v7  ;;  %v2759_v4 = vadd.f32 %v4123_v45, %v2453_v21  ;;  %v3117_v31 = vadd.f32 %v3116_v63, %v3061_v18  ;;  %v5502_v7 = vld [vmem:[#allocation27_spill] sm:$0xff] }
 0x1ee   : > { %v2678_v16 = vpop.f32.mrf.mxu1  ;;  %v2984_v49 = vpop.f32.mrf.mxu0  ;;  %v2151_v18 = vadd.f32 %v5498_v24, %v5497_v55  ;;  %v3164_v6 = vmul.f32 %v3062_v27, %v3062_v27  ;;  %v2455_v21 = vadd.f32 %v5499_v58, %v2148_v56  ;;  %v2149_v53 = vadd.f32 %v5501_v44, %v5500_v35  ;;  %v5515_v58 = vld [vmem:[#allocation13_spill] sm:$0xff] }
 0x1ef   : > { %3092 = vst [vmem:[%s5309_s12 + $0x68] sm:$0xff] %v3060_v43  ;;  %v3131_v17 = vadd.f32 %v3130_v1, %v3060_v43  ;;  %v3162_v23 = vmul.f32 %v3060_v43, %v3060_v43  ;;  %v3065_v29 = vadd.f32 %v4171_v34, %v2759_v4  ;;  %v2757_v11 = vadd.f32 %v2678_v16, %v2451_v13  ;;  %v5504_v13 = vld [vmem:[#allocation30_spill] sm:$0xff]  ;;  %v5507_v16 = vld [vmem:[#allocation29_spill] sm:$0xff] }
 0x1f0   : > { %v3187_v8 = vadd.f32 %v3186_v28, %v3163_v19  ;;  %v4124_v48 = vpop.f32.mrf.mxu1  ;;  %v4172_v12 = vpop.f32.mrf.mxu0  ;;  %v2155_v56 = vadd.f32 %v5510_v22, %v5509_v38 }
 0x1f1   : > { %v3201_v3 = vadd.f32 %v3200_v15, %v3162_v23  ;;  %3097 = vst [vmem:[%s5309_s12 + $0x90] sm:$0xff] %v3065_v29  ;;  %v3063_v60 = vadd.f32 %v2984_v49, %v2757_v11  ;;  %v2760_v14 = vadd.f32 %v4124_v48, %v2454_v42  ;;  %v3132_v0 = vadd.f32 %v3131_v17, %v3062_v27  ;;  %v5506_v42 = vld [vmem:[#allocation32_spill] sm:$0xff]  ;;  %v5508_v11 = vld [vmem:[#allocation31_spill] sm:$0xff] }
 0x1f2   : > { %v2681_v59 = vpop.f32.mrf.mxu1  ;;  %v2987_v51 = vpop.f32.mrf.mxu0  ;;  %v2458_v27 = vadd.f32 %v5502_v7, %v2151_v18  ;;  %v2154_v15 = vadd.f32 %v5504_v13, %v5503_v40  ;;  %v3167_v45 = vmul.f32 %v3065_v29, %v3065_v29  ;;  %v2152_v36 = vadd.f32 %v5506_v42, %v5505_v37  ;;  %v5517_v7 = vld [vmem:[#allocation14_spill] sm:$0xff]  ;;  %v5521_v37 = vld [vmem:[#allocation15_spill] sm:$0xff] }
 0x1f3   : > { %3095 = vst [vmem:[%s5309_s12 + $0x80] sm:$0xff] %v3063_v60  ;;  %v3118_v62 = vadd.f32 %v3117_v31, %v3063_v60  ;;  %v3165_v46 = vmul.f32 %v3063_v60, %v3063_v60  ;;  %v3066_v39 = vadd.f32 %v4172_v12, %v2760_v14  ;;  %v2758_v25 = vadd.f32 %v2681_v59, %v2452_v2  ;;  %v5513_v59 = vld [vmem:[#allocation36_spill] sm:$0xff] }
 0x1f4   : > { %v3202_v41 = vadd.f32 %v3201_v3, %v3164_v6  ;;  %v4127_v9 = vpop.f32.mrf.mxu1  ;;  %v4175_v26 = vpop.f32.mrf.mxu0  ;;  %v2456_v49 = vadd.f32 %v5507_v16, %v2149_v53  ;;  %v5512_v6 = vld [vmem:[#allocation12_spill] sm:$0xff]  ;;  %v2159_v42 = vadd.f32 %v5287_v33, %v5521_v37 }
 0x1f5   : > { %v3188_v1 = vadd.f32 %v3187_v8, %v3165_v46  ;;  %3098 = vst [vmem:[%s5309_s12 + $0x98] sm:$0xff] %v3066_v39  ;;  %v3064_v63 = vadd.f32 %v2987_v51, %v2758_v25  ;;  %v2763_v5 = vadd.f32 %v4127_v9, %v2457_v47  ;;  %v3119_v10 = vadd.f32 %v3118_v62, %v3065_v29  ;;  %v5514_v25 = vld [vmem:[#allocation35_spill] sm:$0xff] }
 0x1f6   : > { %v2694_v34 = vpop.f32.mrf.mxu1  ;;  %v3000_v50 = vpop.f32.mrf.mxu0  ;;  %v2461_v29 = vadd.f32 %v5508_v11, %v2154_v15  ;;  %v3168_v8 = vmul.f32 %v3066_v39, %v3066_v39  ;;  %v2459_v47 = vadd.f32 %v5511_v52, %v2152_v36  ;;  %v2153_v51 = vadd.f32 %v5513_v59, %v5512_v6  ;;  %v5524_v59 = vld [vmem:[#allocation42_spill] sm:$0xff] }
 0x1f7   : > { %3096 = vst [vmem:[%s5309_s12 + $0x88] sm:$0xff] %v3064_v63  ;;  %v3133_v57 = vadd.f32 %v3132_v0, %v3064_v63  ;;  %v3166_v28 = vmul.f32 %v3064_v63, %v3064_v63  ;;  %v3069_v43 = vadd.f32 %v4175_v26, %v2763_v5  ;;  %v2761_v4 = vadd.f32 %v2694_v34, %v2455_v21  ;;  %v5516_v21 = vld [vmem:[#allocation38_spill] sm:$0xff]  ;;  %v5519_v34 = vld [vmem:[#allocation37_spill] sm:$0xff] }
 0x1f8   : > { %v3189_v61 = vadd.f32 %v3188_v1, %v3167_v45  ;;  %v4128_v20 = vpop.f32.mrf.mxu1  ;;  %v4176_v19 = vpop.f32.mrf.mxu0 }
 0x1f9   : > { %v3203_v31 = vadd.f32 %v3202_v41, %v3166_v28  ;;  %3101 = vst [vmem:[%s5309_s12 + $0xb0] sm:$0xff] %v3069_v43  ;;  %v3067_v17 = vadd.f32 %v3000_v50, %v2761_v4  ;;  %v2764_v23 = vadd.f32 %v4128_v20, %v2458_v27  ;;  %v3134_v54 = vadd.f32 %v3133_v57, %v3066_v39  ;;  %v5518_v27 = vld [vmem:[#allocation40_spill] sm:$0xff]  ;;  %v5520_v4 = vld [vmem:[#allocation39_spill] sm:$0xff] }
 0x1fa   : > { %v2697_v48 = vpop.f32.mrf.mxu1  ;;  %v3003_v12 = vpop.f32.mrf.mxu0  ;;  %v2462_v39 = vadd.f32 %v5514_v25, %v2155_v56  ;;  %v2158_v41 = vadd.f32 %v5516_v21, %v5515_v58  ;;  %v3171_v9 = vmul.f32 %v3069_v43, %v3069_v43  ;;  %v2156_v40 = vadd.f32 %v5518_v27, %v5517_v7  ;;  %v5523_v56 = vld [vmem:[#allocation16_spill] sm:$0xff] }
 0x1fb   : > { %3099 = vst [vmem:[%s5309_s12 + $0xa0] sm:$0xff] %v3067_v17  ;;  %v3120_v2 = vadd.f32 %v3119_v10, %v3067_v17  ;;  %v3169_v3 = vmul.f32 %v3067_v17, %v3067_v17  ;;  %v3070_v60 = vadd.f32 %v4176_v19, %v2764_v23  ;;  %v2762_v14 = vadd.f32 %v2697_v48, %v2456_v49  ;;  %v5522_v23 = vld [vmem:[#allocation41_spill] sm:$0xff] }
 0x1fc   : > { %v3204_v55 = vadd.f32 %v3203_v31, %v3168_v8  ;;  %v4131_v24 = vpop.f32.mrf.mxu1  ;;  %v4179_v18 = vpop.f32.mrf.mxu0  ;;  %v2460_v50 = vadd.f32 %v5519_v34, %v2153_v51  ;;  %v2463_v11 = vadd.f32 %v5522_v23, %v2156_v40  ;;  %v2157_v8 = vadd.f32 %v5292_v32, %v5523_v56 }
 0x1fd   : > { %v3190_v0 = vadd.f32 %v3189_v61, %v3169_v3  ;;  %3102 = vst [vmem:[%s5309_s12 + $0xb8] sm:$0xff] %v3070_v60  ;;  %v3068_v62 = vadd.f32 %v3003_v12, %v2762_v14  ;;  %v2767_v46 = vadd.f32 %v4131_v24, %v2461_v29  ;;  %v3121_v44 = vadd.f32 %v3120_v2, %v3069_v43 }
 0x1fe   : > { %v2710_v26 = vpop.f32.mrf.mxu1  ;;  %v3016_v35 = vpop.f32.mrf.mxu0  ;;  %v2465_v43 = vadd.f32 %v5520_v4, %v2158_v41  ;;  %v3172_v36 = vmul.f32 %v3070_v60, %v3070_v60  ;;  %v2464_v51 = vadd.f32 %v5524_v59, %v2157_v8 }
 0x1ff   : > { %3100 = vst [vmem:[%s5309_s12 + $0xa8] sm:$0xff] %v3068_v62  ;;  %v3135_v53 = vadd.f32 %v3134_v54, %v3068_v62  ;;  %v3170_v1 = vmul.f32 %v3068_v62, %v3068_v62  ;;  %v3073_v63 = vadd.f32 %v4179_v18, %v2767_v46  ;;  %v2765_v5 = vadd.f32 %v2710_v26, %v2459_v47 }
 0x200   : > { %v3191_v13 = vadd.f32 %v3190_v0, %v3171_v9  ;;  %v4132_v15 = vpop.f32.mrf.mxu1  ;;  %v4180_v45 = vpop.f32.mrf.mxu0  ;;  %v2466_v54 = vadd.f32 %v5289_v30, %v2159_v42 }
 0x201   : > { %v3205_v10 = vadd.f32 %v3204_v55, %v3170_v1  ;;  %3105 = vst [vmem:[%s5309_s12 + $0xd0] sm:$0xff] %v3073_v63  ;;  %v3071_v57 = vadd.f32 %v3016_v35, %v2765_v5  ;;  %v2768_v28 = vadd.f32 %v4132_v15, %v2462_v39  ;;  %v3136_v19 = vadd.f32 %v3135_v53, %v3070_v60 }
 0x202   : > { %v2713_v61 = vpop.f32.mrf.mxu1  ;;  %v3019_v20 = vpop.f32.mrf.mxu0  ;;  %v3175_v2 = vmul.f32 %v3073_v63, %v3073_v63 }
 0x203   : > { %3103 = vst [vmem:[%s5309_s12 + $0xc0] sm:$0xff] %v3071_v57  ;;  %v3122_v16 = vadd.f32 %v3121_v44, %v3071_v57  ;;  %v3173_v49 = vmul.f32 %v3071_v57, %v3071_v57  ;;  %v3074_v31 = vadd.f32 %v4180_v45, %v2768_v28  ;;  %v2766_v17 = vadd.f32 %v2713_v61, %v2460_v50 }
 0x204   : > { %v3206_v29 = vadd.f32 %v3205_v10, %v3172_v36  ;;  %v4135_v38 = vpop.f32.mrf.mxu1  ;;  %v4183_v22 = vpop.f32.mrf.mxu0 }
 0x205   : > { %v3192_v33 = vadd.f32 %v3191_v13, %v3173_v49  ;;  %3106 = vst [vmem:[%s5309_s12 + $0xd8] sm:$0xff] %v3074_v31  ;;  %v3072_v48 = vadd.f32 %v3019_v20, %v2766_v17  ;;  %v2771_v12 = vadd.f32 %v4135_v38, %v2465_v43  ;;  %v3123_v14 = vadd.f32 %v3122_v16, %v3073_v63 }
 0x206   : > { %v2726_v3 = vpop.f32.mrf.mxu1  ;;  %v3032_v60 = vpop.f32.mrf.mxu0  ;;  %v3176_v46 = vmul.f32 %v3074_v31, %v3074_v31 }
 0x207   : > { %3104 = vst [vmem:[%s5309_s12 + $0xc8] sm:$0xff] %v3072_v48  ;;  %v3137_v52 = vadd.f32 %v3136_v19, %v3072_v48  ;;  %v3174_v47 = vmul.f32 %v3072_v48, %v3072_v48  ;;  %v3077_v55 = vadd.f32 %v4183_v22, %v2771_v12  ;;  %v2769_v24 = vadd.f32 %v2726_v3, %v2463_v11 }
 0x208   : > { %v3193_v18 = vadd.f32 %v3192_v33, %v3175_v2  ;;  %v4136_v6 = vpop.f32.mrf.mxu1  ;;  %v4184_v32 = vpop.f32.mrf.mxu0 }
 0x209   : > { %v3207_v0 = vadd.f32 %v3206_v29, %v3174_v47  ;;  %3109 = vst [vmem:[%s5309_s12 + $0xf0] sm:$0xff] %v3077_v55  ;;  %v3075_v62 = vadd.f32 %v3032_v60, %v2769_v24  ;;  %v2772_v30 = vadd.f32 %v4136_v6, %v2466_v54  ;;  %v3138_v39 = vadd.f32 %v3137_v52, %v3074_v31 }
 0x20a   : > { %v2729_v25 = vpop.f32.mrf.mxu1  ;;  %v3035_v26 = vpop.f32.mrf.mxu0  ;;  %v3179_v44 = vmul.f32 %v3077_v55, %v3077_v55 }
 0x20b   : > { %3107 = vst [vmem:[%s5309_s12 + $0xe0] sm:$0xff] %v3075_v62  ;;  %v3124_v58 = vadd.f32 %v3123_v14, %v3075_v62  ;;  %v3177_v21 = vmul.f32 %v3075_v62, %v3075_v62  ;;  %v3078_v41 = vadd.f32 %v4184_v32, %v2772_v30  ;;  %v2770_v9 = vadd.f32 %v2729_v25, %v2464_v51 }
 0x20c   : > { %v3208_v35 = vadd.f32 %v3207_v0, %v3176_v46 }
 0x20d   : > { %v3125_v53 = vadd.f32 %v3124_v58, %v3077_v55  ;;  %v3194_v1 = vadd.f32 %v3193_v18, %v3177_v21  ;;  %3110 = vst [vmem:[%s5309_s12 + $0xf8] sm:$0xff] %v3078_v41  ;;  %v3076_v63 = vadd.f32 %v3035_v26, %v2770_v9  ;;  %v3180_v40 = vmul.f32 %v3078_v41, %v3078_v41 }
 0x20f   : > { %v3195_v5 = vadd.f32 %v3194_v1, %v3179_v44  ;;  %3108 = vst [vmem:[%s5309_s12 + $0xe8] sm:$0xff] %v3076_v63  ;;  %v3139_v7 = vadd.f32 %v3138_v39, %v3076_v63  ;;  %v3178_v27 = vmul.f32 %v3076_v63, %v3076_v63 }
 0x211   : > { %v3140_v13 = vadd.f32 %v3139_v7, %v3078_v41  ;;  %v3209_v15 = vadd.f32 %v3208_v35, %v3178_v27 }
 0x213   : > { %v3141_v45 = vadd.f32 %v3140_v13, %v3125_v53  ;;  %v3210_v34 = vadd.f32 %v3209_v15, %v3180_v40 }
 0x215   : > { %v3142_v50 = vrot.slane %v3141_v45, 4  ;;  %v3211_v10 = vadd.f32 %v3210_v34, %v3195_v5 }
 0x217   : > { %v3143_v57 = vadd.f32 %v3142_v50, %v3141_v45  ;;  %v3212_v28 = vrot.slane %v3211_v10, 4 }
 0x219   : > { %v3144_v4 = vrot.slane %v3143_v57, 2  ;;  %v3213_v43 = vadd.f32 %v3212_v28, %v3211_v10 }
 0x21b   : > { %v3145_v37 = vadd.f32 %v3144_v4, %v3143_v57  ;;  %v3214_v42 = vrot.slane %v3213_v43, 2 }
 0x21d   : > { %v3146_v36 = vrot.slane %v3145_v37, 1  ;;  %v3215_v61 = vadd.f32 %v3214_v42, %v3213_v43 }
 0x21f   : > { %v3147_v20 = vadd.f32 %v3146_v36, %v3145_v37  ;;  %v3216_v19 = vrot.slane %v3215_v61, 1 }
 0x221   : > { %3148 = vst [vmem:[%s265_s13] sm:$0x1] %v3147_v20  ;;  %v3217_v16 = vadd.f32 %v3216_v19, %v3215_v61 }
 0x223   : > { %3218 = vst [vmem:[%s268_s16] sm:$0x1] %v3217_v16 }
 0x224 PF: > { %s17_s21 = sadd.s32 1, %s4289_s21  }
 0x225   : > { %p14_p4 = scmp.ge.s32.totalorder %s17_s21, 4  }
 0x227   :  { %16 = sbr.rel (!%p14_p4) target bundleno = 1 (0x1), region = 100 }

// kernel: block_forward.4
= control target key start
LH: loop header
LB: loop body
LE: loop exit
PB: predicated region body
PF: predicated region fallthrough
CT: control target
= control target key end

     0   :  { %s4440_s21 = smov 0   ;;  %s5686_s0 = inlined_call_operand.vmem [shape: f32[2,16,16,128], index: 0, kind: input, shape index: {}]   ;;  %s5687_s1 = inlined_call_operand.vmem [shape: bf16[3,3,128,128], index: 1, kind: input, shape index: {}]   ;;  %s5688_s2 = inlined_call_operand.vmem [shape: f32[1,128], index: 2, kind: input, shape index: {}]   ;;  %s5689_s3 = inlined_call_operand.vmem [shape: f32[1,128], index: 3, kind: input, shape index: {}]   ;;  %s5690_s4 = inlined_call_operand.vmem [shape: f32[2,16,16,128], index: 4, kind: output, shape index: {0}]   ;;  %s5691_s5 = inlined_call_operand.vmem [shape: f32[2,1,128], index: 5, kind: output, shape index: {1}]   ;;  %s5692_s6 = inlined_call_operand.vmem [shape: f32[2,1,128], index: 6, kind: output, shape index: {2}]  }
   0x1 LB: > { %s3434_s22 = sadd.s32 4294967295, %s4401_s21   ;;  %p3438_p0 = scmp.ge.s32.totalorder %s4401_s21, 1  ;;  %s4401_s21 = sphi %s4440_s21, %s17_s21  }
   0x2   : > { %p217_p1 = scmp.lt.s32.totalorder %s4401_s21, 3 }
   0x4   : > { %p218_p2 = pnand %p3438_p0, %p217_p1 }
   0x6   : > { %221 = sbr.rel (%p218_p2) target bundleno = 548 (0x224), region = 36 }
   0xb   : > { %v4322_v0 = vld [vmem:[%s5687_s1 + $0x78] sm:$0xff]   ;;  %v4454_v1 = vld [vmem:[%s5687_s1 + $0x70] sm:$0xff]   ;;  %v4403_v2 = vmov 0.0   ;;  %p253_p3 = scmp.lt.s32.totalorder %s3434_s22, 1  ;;  %v4324_v3 = vld [vmem:[%s5687_s1 + $0x68] sm:$0xff]  }
   0xc   : > { %270 = vst [vmem:[#allocation2] sm:$0xff] %v4403_v2  ;;  %271 = vst [vmem:[#allocation2 + $0x8] sm:$0xff] %v4403_v2  ;;  %3865 = vmatprep.subr.bf16.mxu0 %v4322_v0  ;;  %4297 = vmatprep.subr.bf16.mxu1 %v4322_v0  ;;  %v4325_v4 = vld [vmem:[%s5687_s1 + $0x60] sm:$0xff]   ;;  %v4326_v21 = vld [vmem:[%s5687_s1 + $0x58] sm:$0xff]  }
   0xd   : > { %272 = vst [vmem:[#allocation2 + $0x10] sm:$0x3] %v4403_v2  ;;  %273 = vst [vmem:[#allocation2 + $0x18] sm:$0xff] %v4403_v2  ;;  %3866 = vmatpush3.bf16.msra.mxu0 %v4322_v0  ;;  %4305 = vmatpush3.bf16.msra.mxu1 %v4322_v0  ;;  %s5774_s22 = smov (!%p253_p3, %s3434_s22), 1  ;;  %v4485_v10 = vld [vmem:[%s5688_s2] ss:$0 sm:$0xff] }
   0xe   : > { %274 = vst [vmem:[#allocation2 + $0x20] sm:$0xff] %v4403_v2  ;;  %275 = vst [vmem:[#allocation2 + $0x28] sm:$0x3] %v4403_v2  ;;  %3867 = vmatprep.subr.bf16.mxu0 %v4454_v1  ;;  %4298 = vmatprep.subr.bf16.mxu1 %v4454_v1  ;;  %s3647_s29 = sshll.u32 %s5774_s22, 8  ;;  %v4490_v11 = vld [vmem:[%s5689_s3] ss:$0 sm:$0xff]  ;;  %s265_s11 = scalar_lea.vmem %s5691_s5, %s5774_s22 }
   0xf   : > { %276 = vst [vmem:[#allocation2 + $0x30] sm:$0xff] %v4403_v2  ;;  %277 = vst [vmem:[#allocation2 + $0x38] sm:$0xff] %v4403_v2  ;;  %s4473_s8 = scalar_lea.vmem %s5686_s0, %s3647_s29  ;;  %v4327_v28 = vld [vmem:[%s5687_s1 + $0x50] sm:$0xff]   ;;  %v4328_v55 = vld [vmem:[%s5687_s1 + $0x48] sm:$0xff]   ;;  %s5557_s9 = scalar_lea.vmem %s5690_s4, %s3647_s29 }
  0x10   : > { %278 = vst [vmem:[#allocation2 + $0x40] sm:$0x3] %v4403_v2  ;;  %279 = vst [vmem:[#allocation2 + $0x48] sm:$0xff] %v4403_v2  ;;  %v338_v7 = vld [vmem:[%s4473_s8 + $0x70] sm:$0xff]  ;;  %v339_v9 = vld [vmem:[%s4473_s8 + $0x78] sm:$0xff]  ;;  %s268_s14 = scalar_lea.vmem %s5692_s6, %s5774_s22 }
  0x11   : > { %280 = vst [vmem:[#allocation2 + $0x50] sm:$0xff] %v4403_v2  ;;  %281 = vst [vmem:[#allocation2 + $0x58] sm:$0x3] %v4403_v2  ;;  %3868 = vmatpush3.bf16.msra.mxu0 %v4454_v1  ;;  %4306 = vmatpush3.bf16.msra.mxu1 %v4454_v1  ;;  %v377_v12 = vmul.f32 %v4485_v10, %v338_v7  ;;  %v378_v13 = vmul.f32 %v4485_v10, %v339_v9  ;;  %v324_v14 = vld [vmem:[%s4473_s8] sm:$0xff]  ;;  %v325_v15 = vld [vmem:[%s4473_s8 + $0x8] sm:$0xff] }
  0x12   : > { %282 = vst [vmem:[#allocation2 + $0x60] sm:$0xff] %v4403_v2  ;;  %283 = vst [vmem:[#allocation2 + $0x68] sm:$0xff] %v4403_v2  ;;  %3869 = vmatprep.subr.bf16.mxu0 %v4324_v3  ;;  %4299 = vmatprep.subr.bf16.mxu1 %v4324_v3  ;;  %v340_v16 = vld [vmem:[%s4473_s8 + $0x80] sm:$0xff]  ;;  %v363_v17 = vmul.f32 %v4485_v10, %v324_v14  ;;  %v364_v18 = vmul.f32 %v4485_v10, %v325_v15  ;;  %v341_v19 = vld [vmem:[%s4473_s8 + $0x88] sm:$0xff] }
  0x13   : > { %284 = vst [vmem:[#allocation2 + $0x70] sm:$0x3] %v4403_v2  ;;  %285 = vst [vmem:[#allocation2 + $0x78] sm:$0xff] %v4403_v2  ;;  %v563_v5 = vld [vmem:[#allocation2 + $0x1] sm:$0xff]  ;;  %v379_v20 = vmul.f32 %v4485_v10, %v340_v16  ;;  %v416_v22 = vadd.f32 %v4490_v11, %v377_v12  ;;  %v417_v23 = vadd.f32 %v4490_v11, %v378_v13  ;;  %v326_v35 = vld [vmem:[%s4473_s8 + $0x10] sm:$0xff] }
  0x14   : > { %286 = vst [vmem:[#allocation2 + $0x80] sm:$0xff] %v4403_v2  ;;  %287 = vst [vmem:[#allocation2 + $0x88] sm:$0x3] %v4403_v2  ;;  %v564_v6 = vld [vmem:[#allocation2 + $0x9] sm:$0xff]  ;;  %v380_v24 = vmul.f32 %v4485_v10, %v341_v19  ;;  %v4508_v25 = vadd.f32 %v4490_v11, %v363_v17  ;;  %v4511_v26 = vadd.f32 %v4490_v11, %v364_v18  ;;  %v327_v38 = vld [vmem:[%s4473_s8 + $0x18] sm:$0xff] }
  0x15   : > { %288 = vst [vmem:[#allocation2 + $0x90] sm:$0xff] %v4403_v2  ;;  %289 = vst [vmem:[#allocation2 + $0x98] sm:$0xff] %v4403_v2  ;;  %v595_v8 = vpack.c.bf16 %v564_v6, %v563_v5  ;;  %3870 = vmatpush3.bf16.msra.mxu0 %v4324_v3  ;;  %4307 = vmatpush3.bf16.msra.mxu1 %v4324_v3  ;;  %v4514_v27 = vadd.f32 %v4490_v11, %v379_v20  ;;  %v448_v29 = vmax.f32 %v416_v22, 0.0  ;;  %v342_v40 = vld [vmem:[%s4473_s8 + $0x90] sm:$0xff]  ;;  %v343_v41 = vld [vmem:[%s4473_s8 + $0x98] sm:$0xff] }
  0x16   : > { %290 = vst [vmem:[#allocation2 + $0xa0] sm:$0x3] %v4403_v2  ;;  %291 = vst [vmem:[#allocation2 + $0xa8] sm:$0xff] %v4403_v2  ;;  %3871 = vmatprep.subr.bf16.mxu0 %v4325_v4  ;;  %4300 = vmatprep.subr.bf16.mxu1 %v4325_v4  ;;  %v449_v30 = vmax.f32 %v417_v23, 0.0  ;;  %v4520_v31 = vadd.f32 %v4490_v11, %v380_v24  ;;  %v434_v32 = vmax.f32 %v4508_v25, 0.0  ;;  %v435_v33 = vmax.f32 %v4511_v26, 0.0 }
  0x17   : > { %292 = vst [vmem:[#allocation2 + $0xb0] sm:$0xff] %v4403_v2  ;;  %293 = vst [vmem:[#allocation2 + $0xb8] sm:$0x3] %v4403_v2  ;;  %3881 = vmatprep.mubr.bf16.mxu0 %v595_v8  ;;  %v450_v34 = vmax.f32 %v4514_v27, 0.0  ;;  %v365_v39 = vmul.f32 %v4485_v10, %v326_v35  ;;  %v366_v42 = vmul.f32 %v4485_v10, %v327_v38  ;;  %v328_v45 = vld [vmem:[%s4473_s8 + $0x20] sm:$0xff]  ;;  %v329_v46 = vld [vmem:[%s4473_s8 + $0x28] sm:$0xff] }
  0x18   : > { %294 = vst [vmem:[#allocation2 + $0xc0] sm:$0xff] %v4403_v2  ;;  %295 = vst [vmem:[#allocation2 + $0xc8] sm:$0xff] %v4403_v2  ;;  %v603_v36 = vpack.c.bf16 %v449_v30, %v448_v29  ;;  %v451_v37 = vmax.f32 %v4520_v31, 0.0  ;;  %v381_v43 = vmul.f32 %v4485_v10, %v342_v40  ;;  %v382_v44 = vmul.f32 %v4485_v10, %v343_v41  ;;  %v344_v47 = vld [vmem:[%s4473_s8 + $0xa0] sm:$0xff]  ;;  %v345_v51 = vld [vmem:[%s4473_s8 + $0xa8] sm:$0xff] }
  0x19   : > { %296 = vst [vmem:[#allocation2 + $0xd0] sm:$0x3] %v4403_v2  ;;  %297 = vst [vmem:[#allocation2 + $0xd8] sm:$0xff] %v4403_v2  ;;  %3872 = vmatpush3.bf16.msra.mxu0 %v4325_v4  ;;  %4308 = vmatpush3.bf16.msra.mxu1 %v4325_v4  ;;  %v4546_v48 = vadd.f32 %v4490_v11, %v365_v39  ;;  %v367_v49 = vmul.f32 %v4485_v10, %v328_v45  ;;  %v4578_v0 = vld [vmem:[%s5687_s1 + $0x40] sm:$0xff]   ;;  %v330_v4 = vld [vmem:[%s4473_s8 + $0x30] sm:$0xff] }
  0x1a   : > { %298 = vst [vmem:[#allocation2 + $0xe0] sm:$0xff] %v4403_v2  ;;  %299 = vst [vmem:[#allocation2 + $0xe8] sm:$0x3] %v4403_v2  ;;  %3873 = vmatprep.subr.bf16.mxu0 %v4326_v21  ;;  %4301 = vmatprep.subr.bf16.mxu1 %v4326_v21  ;;  %v368_v50 = vmul.f32 %v4485_v10, %v329_v46  ;;  %v4552_v52 = vadd.f32 %v4490_v11, %v366_v42  ;;  %v331_v6 = vld [vmem:[%s4473_s8 + $0x38] sm:$0xff]  ;;  %v346_v7 = vld [vmem:[%s4473_s8 + $0xb0] sm:$0xff] }
  0x1b   : > { %300 = vst [vmem:[#allocation2 + $0xf0] sm:$0xff] %v4403_v2  ;;  %301 = vst [vmem:[#allocation2 + $0xf8] sm:$0xff] %v4403_v2  ;;  %3897 = vmatprep.mubr.bf16.mxu1 %v603_v36  ;;  %v4555_v53 = vadd.f32 %v4490_v11, %v381_v43  ;;  %v4558_v54 = vadd.f32 %v4490_v11, %v382_v44  ;;  %v436_v56 = vmax.f32 %v4546_v48, 0.0  ;;  %v347_v8 = vld [vmem:[%s4473_s8 + $0xb8] sm:$0xff]  ;;  %v332_v14 = vld [vmem:[%s4473_s8 + $0x40] sm:$0xff] }
  0x1c   : > { %302 = vst [vmem:[#allocation2 + $0x100] sm:$0x3] %v4403_v2  ;;  %303 = vst [vmem:[#allocation2 + $0x108] sm:$0xff] %v4403_v2  ;;  %v4565_v57 = vadd.f32 %v4490_v11, %v367_v49  ;;  %v4568_v58 = vadd.f32 %v4490_v11, %v368_v50  ;;  %v383_v59 = vmul.f32 %v4485_v10, %v344_v47  ;;  %v437_v60 = vmax.f32 %v4552_v52, 0.0  ;;  %v333_v15 = vld [vmem:[%s4473_s8 + $0x48] sm:$0xff]  ;;  %v348_v16 = vld [vmem:[%s4473_s8 + $0xc0] sm:$0xff] }
  0x1d   : > { %304 = vst [vmem:[#allocation2 + $0x110] sm:$0xff] %v4403_v2  ;;  %305 = vst [vmem:[#allocation2 + $0x118] sm:$0x3] %v4403_v2  ;;  %3874 = vmatpush3.bf16.msra.mxu0 %v4326_v21  ;;  %4309 = vmatpush3.bf16.msra.mxu1 %v4326_v21  ;;  %v452_v61 = vmax.f32 %v4555_v53, 0.0  ;;  %v453_v62 = vmax.f32 %v4558_v54, 0.0  ;;  %v384_v63 = vmul.f32 %v4485_v10, %v345_v51  ;;  %v349_v24 = vld [vmem:[%s4473_s8 + $0xc8] sm:$0xff] }
  0x1e   : > { %306 = vst [vmem:[#allocation2 + $0x120] sm:$0xff] %v4403_v2  ;;  %307 = vst [vmem:[#allocation2 + $0x128] sm:$0xff] %v4403_v2  ;;  %3875 = vmatprep.subr.bf16.mxu0 %v4327_v28  ;;  %4302 = vmatprep.subr.bf16.mxu1 %v4327_v28  ;;  %v438_v1 = vmax.f32 %v4565_v57, 0.0  ;;  %v4585_v3 = vadd.f32 %v4490_v11, %v383_v59  ;;  %v369_v12 = vmul.f32 %v4485_v10, %v330_v4  ;;  %v4330_v25 = vld [vmem:[%s5687_s1 + $0x38] sm:$0xff]   ;;  %v334_v43 = vld [vmem:[%s4473_s8 + $0x50] sm:$0xff] }
  0x1f   : > { %308 = vst [vmem:[#allocation2 + $0x130] sm:$0x3] %v4403_v2  ;;  %309 = vst [vmem:[#allocation2 + $0x138] sm:$0xff] %v4403_v2  ;;  %v4595_v5 = vadd.f32 %v4490_v11, %v384_v63  ;;  %v370_v13 = vmul.f32 %v4485_v10, %v331_v6  ;;  %v385_v18 = vmul.f32 %v4485_v10, %v346_v7  ;;  %v4331_v26 = vld [vmem:[%s5687_s1 + $0xb8] sm:$0xff]   ;;  %v350_v50 = vld [vmem:[%s4473_s8 + $0xd0] sm:$0xff] }
  0x20   : > { %310 = vst [vmem:[#allocation2 + $0x140] sm:$0xff] %v4403_v2  ;;  %311 = vst [vmem:[#allocation2 + $0x148] sm:$0x3] %v4403_v2  ;;  %v454_v9 = vmax.f32 %v4585_v3, 0.0  ;;  %v386_v19 = vmul.f32 %v4485_v10, %v347_v8  ;;  %v371_v20 = vmul.f32 %v4485_v10, %v332_v14  ;;  %v4617_v21 = vadd.f32 %v4490_v11, %v369_v12  ;;  %v335_v44 = vld [vmem:[%s4473_s8 + $0x58] sm:$0xff]  ;;  %v336_v27 = vld [vmem:[%s4473_s8 + $0x60] sm:$0xff] }
  0x21   : > { %312 = vst [vmem:[#allocation2 + $0x150] sm:$0xff] %v4403_v2  ;;  %313 = vst [vmem:[#allocation2 + $0x158] sm:$0xff] %v4403_v2  ;;  %3876 = vmatpush3.bf16.msra.mxu0 %v4327_v28  ;;  %4310 = vmatpush3.bf16.msra.mxu1 %v4327_v28  ;;  %v455_v17 = vmax.f32 %v4595_v5, 0.0  ;;  %v4620_v22 = vadd.f32 %v4490_v11, %v370_v13  ;;  %v372_v23 = vmul.f32 %v4485_v10, %v333_v15  ;;  %v351_v51 = vld [vmem:[%s4473_s8 + $0xd8] sm:$0xff]  ;;  %v4332_v31 = vld [vmem:[%s5687_s1 + $0x30] sm:$0xff]  }
  0x22   : > { %314 = vst [vmem:[#allocation2 + $0x160] sm:$0x3] %v4403_v2  ;;  %315 = vst [vmem:[#allocation2 + $0x168] sm:$0xff] %v4403_v2  ;;  %3877 = vmatprep.subr.bf16.mxu0 %v4328_v55  ;;  %4303 = vmatprep.subr.bf16.mxu1 %v4328_v55  ;;  %v387_v28 = vmul.f32 %v4485_v10, %v348_v16  ;;  %v4637_v35 = vadd.f32 %v4490_v11, %v386_v19  ;;  %v337_v63 = vld [vmem:[%s4473_s8 + $0x68] sm:$0xff]  ;;  %v352_v48 = vld [vmem:[%s4473_s8 + $0xe0] sm:$0xff] }
  0x23   : > { %316 = vst [vmem:[#allocation2 + $0x170] sm:$0xff] %v4403_v2  ;;  %317 = vst [vmem:[#allocation2 + $0x178] sm:$0x3] %v4403_v2  ;;  %v4650_v36 = vadd.f32 %v4490_v11, %v371_v20  ;;  %v4653_v38 = vadd.f32 %v4490_v11, %v372_v23  ;;  %v388_v41 = vmul.f32 %v4485_v10, %v349_v24  ;;  %v4333_v52 = vld [vmem:[%s5687_s1 + $0xb0] sm:$0xff]   ;;  %v4334_v16 = vld [vmem:[%s5687_s1 + $0x28] sm:$0xff]  }
  0x24   : > { %318 = vst [vmem:[#allocation2 + $0x180] sm:$0xff] %v4403_v2  ;;  %319 = vst [vmem:[#allocation2 + $0x188] sm:$0xff] %v4403_v2  ;;  %v457_v40 = vmax.f32 %v4637_v35, 0.0  ;;  %v4659_v42 = vadd.f32 %v4490_v11, %v387_v28  ;;  %v604_v45 = vpack.c.bf16 %v451_v37, %v450_v34  ;;  %v373_v49 = vmul.f32 %v4485_v10, %v334_v43  ;;  %v4336_v57 = vld [vmem:[%s5687_s1 + $0x20] sm:$0xff]   ;;  %v4338_v5 = vld [vmem:[%s5687_s1 + $0x18] sm:$0xff]  }
  0x25   : > { %320 = vst [vmem:[#allocation2 + $0x190] sm:$0x3] %v4403_v2  ;;  %321 = vst [vmem:[#allocation2 + $0x198] sm:$0xff] %v4403_v2  ;;  %3878 = vmatpush3.bf16.msra.mxu0 %v4328_v55  ;;  %4311 = vmatpush3.bf16.msra.mxu1 %v4328_v55  ;;  %v442_v46 = vmax.f32 %v4650_v36, 0.0  ;;  %v443_v47 = vmax.f32 %v4653_v38, 0.0  ;;  %v374_v59 = vmul.f32 %v4485_v10, %v335_v44  ;;  %v4343_v36 = vld [vmem:[%s5687_s1 + $0x88] sm:$0xff]  }
  0x26   : > { %322 = vst [vmem:[#allocation2 + $0x1a0] sm:$0xff] %v4403_v2  ;;  %323 = vst [vmem:[#allocation2 + $0x1a8] sm:$0x3] %v4403_v2  ;;  %v439_v2 = vmax.f32 %v4568_v58, 0.0  ;;  %3879 = vmatprep.subr.bf16.mxu0 %v4578_v0  ;;  %4304 = vmatprep.subr.bf16.mxu1 %v4578_v0  ;;  %v458_v55 = vmax.f32 %v4659_v42, 0.0  ;;  %v390_v54 = vmul.f32 %v4485_v10, %v351_v51  ;;  %v4337_v58 = vld [vmem:[%s5687_s1 + $0xa0] sm:$0xff]  }
  0x27   : > { %481 = vst [vmem:[#allocation2 + $0xc1] sm:$0xff] %v448_v29  ;;  %482 = vst [vmem:[#allocation2 + $0xc9] sm:$0xff] %v449_v30  ;;  %v4629_v29 = vpack.c.bf16 %v435_v33, %v434_v32  ;;  %v4634_v30 = vadd.f32 %v4490_v11, %v385_v18  ;;  %v4718_v53 = vadd.f32 %v4490_v11, %v374_v59  ;;  %v4335_v18 = vld [vmem:[%s5687_s1 + $0xa8] sm:$0xff]  }
  0x28   : > { %467 = vst [vmem:[#allocation2 + $0x19] sm:$0xff] %v434_v32  ;;  %468 = vst [vmem:[#allocation2 + $0x21] sm:$0xff] %v435_v33  ;;  %v440_v32 = vmax.f32 %v4617_v21, 0.0  ;;  %v441_v33 = vmax.f32 %v4620_v22, 0.0  ;;  %v376_v8 = vmul.f32 %v4485_v10, %v337_v63  ;;  %v391_v12 = vmul.f32 %v4485_v10, %v352_v48  ;;  %v4340_v22 = vld [vmem:[%s5687_s1 + $0x10] sm:$0xff]  }
  0x29   : > { %483 = vst [vmem:[#allocation2 + $0xd9] sm:$0xff] %v450_v34  ;;  %484 = vst [vmem:[#allocation2 + $0xe1] sm:$0xff] %v451_v37  ;;  %v456_v39 = vmax.f32 %v4634_v30, 0.0  ;;  %3880 = vmatpush3.bf16.msra.mxu0 %v4578_v0  ;;  %4312 = vmatpush3.bf16.msra.mxu1 %v4578_v0  ;;  %v4686_v34 = vpack.c.bf16 %v437_v60, %v436_v56  ;;  %v4693_v37 = vadd.f32 %v4490_v11, %v388_v41  ;;  %v4341_v30 = vld [vmem:[%s5687_s1 + $0x90] sm:$0xff]   ;;  %v4404_v48 = vmov 0.0|0.0  }
  0x2a   : > { %469 = vst [vmem:[#allocation2 + $0x31] sm:$0xff] %v436_v56  ;;  %470 = vst [vmem:[#allocation2 + $0x39] sm:$0xff] %v437_v60  ;;  %3913 = vmatprep.subr.bf16.mxu1 %v4330_v25  ;;  %3961 = vmatprep.subr.bf16.mxu0 %v4331_v26  ;;  %v605_v56 = vpack.c.bf16 %v453_v62, %v452_v61  ;;  %v4711_v60 = vadd.f32 %v4490_v11, %v373_v49  ;;  %v445_v13 = vmax.f32 %v4718_v53, 0.0  ;;  %v1047_v42 = vld [vmem:[#allocation2 + $0xa] sm:$0xff] }
  0x2b   : > { %485 = vst [vmem:[#allocation2 + $0xf1] sm:$0xff] %v452_v61  ;;  %486 = vst [vmem:[#allocation2 + $0xf9] sm:$0xff] %v453_v62  ;;  %v389_v0 = vmul.f32 %v4485_v10, %v350_v50  ;;  %v459_v4 = vmax.f32 %v4693_v37, 0.0  ;;  %v375_v61 = vmul.f32 %v4485_v10, %v336_v27  ;;  %v353_v62 = vld [vmem:[%s4473_s8 + $0xe8] sm:$0xff]  ;;  %v429_v14 = vadd.f32 %v4490_v11, %v390_v54  ;;  %v4346_v37 = vld [vmem:[%s5687_s1 + $0xf8] sm:$0xff]  }
  0x2c   : > { %471 = vst [vmem:[#allocation2 + $0x49] sm:$0xff] %v438_v1  ;;  %472 = vst [vmem:[#allocation2 + $0x51] sm:$0xff] %v439_v2  ;;  %3882 = vmatmul.mubr.bf16.vlgmr.msra.gmra.mxu0 %v4629_v29  ;;  %3898 = vmatmul.mubr.bf16.vlgmr.msra.gmra.mxu1 %v604_v45  ;;  %v444_v6 = vmax.f32 %v4711_v60, 0.0  ;;  %v415_v20 = vadd.f32 %v4490_v11, %v376_v8  ;;  %v392_v23 = vmul.f32 %v4485_v10, %v353_v62  ;;  %v4349_v8 = vld [vmem:[%s5687_s1 + $0x130] sm:$0xff]  }
  0x2d   : > { %487 = vst [vmem:[#allocation2 + $0x109] sm:$0xff] %v454_v9  ;;  %488 = vst [vmem:[#allocation2 + $0x111] sm:$0xff] %v455_v17  ;;  %v4726_v7 = vadd.f32 %v4490_v11, %v389_v0  ;;  %3914 = vmatpush3.bf16.msra.mxu1 %v4330_v25  ;;  %3962 = vmatpush3.bf16.msra.mxu0 %v4331_v26  ;;  %v4735_v15 = vadd.f32 %v4490_v11, %v375_v61  ;;  %v461_v25 = vmax.f32 %v429_v14, 0.0 }
  0x2e   : > { %473 = vst [vmem:[#allocation2 + $0x61] sm:$0xff] %v440_v32  ;;  %474 = vst [vmem:[#allocation2 + $0x69] sm:$0xff] %v441_v33  ;;  %3915 = vmatprep.subr.bf16.mxu1 %v4332_v31  ;;  %3963 = vmatprep.subr.bf16.mxu0 %v4333_v52  ;;  %v430_v24 = vadd.f32 %v4490_v11, %v391_v12  ;;  %v4752_v28 = vpack.c.bf16 %v439_v2, %v438_v1  ;;  %v447_v43 = vmax.f32 %v415_v20, 0.0 }
  0x2f   : > { %489 = vst [vmem:[#allocation2 + $0x121] sm:$0xff] %v456_v39  ;;  %490 = vst [vmem:[#allocation2 + $0x129] sm:$0xff] %v457_v40  ;;  %v460_v19 = vmax.f32 %v4726_v7, 0.0  ;;  %3885 = vmatprep.mubr.bf16.mxu0 %v4686_v34  ;;  %3901 = vmatprep.mubr.bf16.mxu1 %v605_v56  ;;  %v446_v26 = vmax.f32 %v4735_v15, 0.0  ;;  %v606_v41 = vpack.c.bf16 %v455_v17, %v454_v9  ;;  %v4339_v9 = vld [vmem:[%s5687_s1 + $0x98] sm:$0xff]   ;;  %v502_v51 = vld [vmem:[#allocation2 + $0x20] sm:$0xff] }
  0x30   : > { %475 = vst [vmem:[#allocation2 + $0x79] sm:$0xff] %v442_v46  ;;  %476 = vst [vmem:[#allocation2 + $0x81] sm:$0xff] %v443_v47  ;;  %v431_v44 = vadd.f32 %v4490_v11, %v392_v23  ;;  %v462_v45 = vmax.f32 %v430_v24, 0.0  ;;  %v4770_v2 = vpack.c.bf16 %v441_v33, %v440_v32  ;;  %v4776_v3 = vpack.c.bf16 %v457_v40, %v456_v39  ;;  %v4342_v33 = vld [vmem:[%s5687_s1 + $0x8] sm:$0xff]   ;;  %v501_v50 = vld [vmem:[#allocation2 + $0x18] sm:$0xff] }
  0x31   : > { %491 = vst [vmem:[#allocation2 + $0x139] sm:$0xff] %v458_v55  ;;  %492 = vst [vmem:[#allocation2 + $0x141] sm:$0xff] %v459_v4  ;;  %3916 = vmatpush3.bf16.msra.mxu1 %v4332_v31  ;;  %3964 = vmatpush3.bf16.msra.mxu0 %v4333_v52  ;;  %v4791_v17 = vpack.c.bf16 %v443_v47, %v442_v46  ;;  %v4797_v21 = vpack.c.bf16 %v459_v4, %v458_v55  ;;  %v1046_v40 = vld [vmem:[#allocation2 + $0x2] sm:$0xff]  ;;  %v1048_v27 = vld [vmem:[#allocation2 + $0x1a] sm:$0xff] }
  0x32   : > { %477 = vst [vmem:[#allocation2 + $0x91] sm:$0xff] %v444_v6  ;;  %478 = vst [vmem:[#allocation2 + $0x99] sm:$0xff] %v445_v13  ;;  %3917 = vmatprep.subr.bf16.mxu1 %v4334_v16  ;;  %3965 = vmatprep.subr.bf16.mxu0 %v4335_v18  ;;  %v463_v1 = vmax.f32 %v431_v44, 0.0  ;;  %v4805_v35 = vpack.c.bf16 %v445_v13, %v444_v6  ;;  %v4807_v32 = vpack.c.bf16 %v461_v25, %v460_v19  ;;  %v4344_v46 = vld [vmem:[%s5687_s1] sm:$0xff]   ;;  %v4347_v55 = vld [vmem:[%s5687_s1 + $0x138] sm:$0xff]  }
  0x33   : > { %493 = vst [vmem:[#allocation2 + $0x151] sm:$0xff] %v460_v19  ;;  %494 = vst [vmem:[#allocation2 + $0x159] sm:$0xff] %v461_v25  ;;  %v4819_v38 = vpack.c.bf16 %v447_v43, %v446_v26  ;;  %v4345_v47 = vld [vmem:[%s5687_s1 + $0x80] sm:$0xff]   ;;  %v1078_v49 = vpack.c.bf16 %v1047_v42, %v1046_v40  ;;  %v503_v59 = vld [vmem:[#allocation2 + $0x30] sm:$0xff]  ;;  %v4837_v60 = vpack.c.bf16 %v502_v51, %v501_v50 }
  0x34   : > { %479 = vst [vmem:[#allocation2 + $0xa9] sm:$0xff] %v446_v26  ;;  %480 = vst [vmem:[#allocation2 + $0xb1] sm:$0xff] %v447_v43  ;;  %3886 = vmatmul.mubr.bf16.gmra.mxu0 %v4752_v28  ;;  %3902 = vmatmul.mubr.bf16.gmra.mxu1 %v606_v41  ;;  %v4821_v39 = vpack.c.bf16 %v463_v1, %v462_v45  ;;  %v1049_v31 = vld [vmem:[#allocation2 + $0x22] sm:$0xff]  ;;  %v504_v63 = vld [vmem:[#allocation2 + $0x38] sm:$0xff] }
  0x35   : > { %495 = vst [vmem:[#allocation2 + $0x169] sm:$0xff] %v462_v45  ;;  %496 = vst [vmem:[#allocation2 + $0x171] sm:$0xff] %v463_v1  ;;  %3918 = vmatpush3.bf16.msra.mxu1 %v4334_v16  ;;  %3966 = vmatpush3.bf16.msra.mxu0 %v4335_v18  ;;  %v1050_v52 = vld [vmem:[#allocation2 + $0x32] sm:$0xff]  ;;  %v1051_v56 = vld [vmem:[#allocation2 + $0x3a] sm:$0xff]  ;;  %v4839_v0 = vpack.c.bf16 %v1049_v31, %v1048_v27  ;;  %v4841_v4 = vpack.c.bf16 %v504_v63, %v503_v59 }
  0x36   : > { %3919 = vmatprep.subr.bf16.mxu1 %v4336_v57  ;;  %3967 = vmatprep.subr.bf16.mxu0 %v4337_v58  ;;  %v4843_v53 = vpack.c.bf16 %v1051_v56, %v1050_v52  ;;  %v505_v54 = vld [vmem:[#allocation2 + $0x48] sm:$0xff]  ;;  %v506_v61 = vld [vmem:[#allocation2 + $0x50] sm:$0xff]  ;;  %v507_v12 = vld [vmem:[#allocation2 + $0x60] sm:$0xff] }
  0x37   : > { %3889 = vmatprep.mubr.bf16.mxu0 %v4770_v2  ;;  %3905 = vmatprep.mubr.bf16.mxu1 %v4776_v3  ;;  %v1052_v62 = vld [vmem:[#allocation2 + $0x4a] sm:$0xff]  ;;  %v1053_v6 = vld [vmem:[#allocation2 + $0x52] sm:$0xff]  ;;  %v1054_v14 = vld [vmem:[#allocation2 + $0x62] sm:$0xff]  ;;  %v4861_v19 = vpack.c.bf16 %v506_v61, %v505_v54 }
  0x38   : > { %v4348_v7 = vld [vmem:[%s5687_s1 + $0xf0] sm:$0xff]   ;;  %v508_v13 = vld [vmem:[#allocation2 + $0x68] sm:$0xff]  ;;  %v4863_v20 = vpack.c.bf16 %v1053_v6, %v1052_v62  ;;  %v4352_v25 = vld [vmem:[%s5687_s1 + $0xe0] sm:$0xff]  }
  0x39   : > { %3920 = vmatpush3.bf16.msra.mxu1 %v4336_v57  ;;  %3968 = vmatpush3.bf16.msra.mxu0 %v4337_v58  ;;  %v1055_v15 = vld [vmem:[#allocation2 + $0x6a] sm:$0xff]  ;;  %v4865_v23 = vpack.c.bf16 %v508_v13, %v507_v12  ;;  %v509_v26 = vld [vmem:[#allocation2 + $0x78] sm:$0xff]  ;;  %v510_v41 = vld [vmem:[#allocation2 + $0x80] sm:$0xff] }
  0x3a   : > { %3921 = vmatprep.subr.bf16.mxu1 %v4338_v5  ;;  %3969 = vmatprep.subr.bf16.mxu0 %v4339_v9  ;;  %v4350_v16 = vld [vmem:[%s5687_s1 + $0xe8] sm:$0xff]   ;;  %v4867_v24 = vpack.c.bf16 %v1055_v15, %v1054_v14  ;;  %v1056_v43 = vld [vmem:[#allocation2 + $0x7a] sm:$0xff]  ;;  %v511_v57 = vld [vmem:[#allocation2 + $0x90] sm:$0xff] }
  0x3b   : > { %v4351_v18 = vld [vmem:[%s5687_s1 + $0x128] sm:$0xff]   ;;  %v4353_v45 = vld [vmem:[%s5687_s1 + $0x120] sm:$0xff]   ;;  %v512_v58 = vld [vmem:[#allocation2 + $0x98] sm:$0xff] }
  0x3c   : > { %3890 = vmatmul.mubr.bf16.gmra.mxu0 %v4791_v17  ;;  %3906 = vmatmul.mubr.bf16.gmra.mxu1 %v4797_v21  ;;  %v1057_v44 = vld [vmem:[#allocation2 + $0x82] sm:$0xff]  ;;  %v1058_v1 = vld [vmem:[#allocation2 + $0x92] sm:$0xff] }
  0x3d   : > { %3922 = vmatpush3.bf16.msra.mxu1 %v4338_v5  ;;  %3970 = vmatpush3.bf16.msra.mxu0 %v4339_v9  ;;  %v1059_v5 = vld [vmem:[#allocation2 + $0x9a] sm:$0xff]  ;;  %v513_v42 = vld [vmem:[#allocation2 + $0xa8] sm:$0xff]  ;;  %v4357_v50 = vld [vmem:[%s5687_s1 + $0x110] sm:$0xff]  }
  0x3e   : > { %3923 = vmatprep.subr.bf16.mxu1 %v4340_v22  ;;  %3971 = vmatprep.subr.bf16.mxu0 %v4341_v30  ;;  %v4354_v9 = vld [vmem:[%s5687_s1 + $0xd8] sm:$0xff]   ;;  %v4891_v40 = vpack.c.bf16 %v1059_v5, %v1058_v1  ;;  %v515_v27 = vld [vmem:[#allocation2 + $0xc0] sm:$0xff]  ;;  %v516_v31 = vld [vmem:[#allocation2 + $0xc8] sm:$0xff] }
  0x3f   : > { %3893 = vmatprep.mubr.bf16.mxu0 %v4805_v35  ;;  %3909 = vmatprep.mubr.bf16.mxu1 %v4807_v32  ;;  %v1061_v51 = vld [vmem:[#allocation2 + $0xb2] sm:$0xff]  ;;  %v4358_v59 = vld [vmem:[%s5687_s1 + $0xc8] sm:$0xff]   ;;  %v4913_v56 = vpack.c.bf16 %v516_v31, %v515_v27  ;;  %v4360_v61 = vld [vmem:[%s5687_s1 + $0xc0] sm:$0xff]  }
  0x40   : > { %v4359_v63 = vld [vmem:[%s5687_s1 + $0x108] sm:$0xff]   ;;  %v517_v62 = vld [vmem:[#allocation2 + $0xd8] sm:$0xff]  ;;  %v518_v6 = vld [vmem:[#allocation2 + $0xe0] sm:$0xff] }
  0x41   : > { %3924 = vmatpush3.bf16.msra.mxu1 %v4340_v22  ;;  %3972 = vmatpush3.bf16.msra.mxu0 %v4341_v30  ;;  %v4355_v22 = vld [vmem:[%s5687_s1 + $0x118] sm:$0xff]   ;;  %v4885_v30 = vpack.c.bf16 %v510_v41, %v509_v26  ;;  %v4361_v12 = vld [vmem:[%s5687_s1 + $0x100] sm:$0xff]   ;;  %v354_v13 = vld [vmem:[%s4473_s8 + $0xf0] sm:$0xff] }
  0x42   : > { %3925 = vmatprep.subr.bf16.mxu1 %v4342_v33  ;;  %3973 = vmatprep.subr.bf16.mxu0 %v4343_v36  ;;  %v519_v14 = vld [vmem:[#allocation2 + $0xf0] sm:$0xff]  ;;  %v520_v15 = vld [vmem:[#allocation2 + $0xf8] sm:$0xff]  ;;  %v1070_v27 = vld [vmem:[#allocation2 + $0x122] sm:$0xff] }
  0x43   : > { %v1067_v26 = vld [vmem:[#allocation2 + $0xfa] sm:$0xff]  ;;  %v4947_v5 = vpack.c.bf16 %v520_v15, %v519_v14  ;;  %v1071_v31 = vld [vmem:[#allocation2 + $0x12a] sm:$0xff] }
  0x44   : > { %3894 = vmatmul.mubr.bf16.gmra.mxu0 %v4819_v38  ;;  %3910 = vmatmul.mubr.bf16.gmra.mxu1 %v4821_v39  ;;  %v1075_v14 = vld [vmem:[#allocation2 + $0x15a] sm:$0xff] }
  0x45   : > { %3926 = vmatpush3.bf16.msra.mxu1 %v4342_v33  ;;  %3974 = vmatpush3.bf16.msra.mxu0 %v4343_v36  ;;  %v4887_v33 = vpack.c.bf16 %v1057_v44, %v1056_v43  ;;  %v4889_v36 = vpack.c.bf16 %v512_v58, %v511_v57  ;;  %v4934_v43 = vld [vmem:[%s5687_s1 + $0x178] sm:$0xff]   ;;  %v4943_v58 = vpack.c.bf16 %v518_v6, %v517_v62  ;;  %v526_v62 = vld [vmem:[#allocation2 + $0x140] sm:$0xff] }
  0x46   : > { %3927 = vmatprep.subr.bf16.mxu1 %v4344_v46  ;;  %3975 = vmatprep.subr.bf16.mxu0 %v4345_v47  ;;  %v1072_v6 = vld [vmem:[#allocation2 + $0x13a] sm:$0xff] }
  0x47   : > { %3929 = vmatprep.mubr.bf16.mxu1 %v4404_v48  ;;  %3977 = vmatprep.mubr.bf16.mxu0 %v1078_v49  ;;  %v4356_v49 = vld [vmem:[%s5687_s1 + $0xd0] sm:$0xff]  }
  0x49   : > { %3928 = vmatpush3.bf16.msra.mxu1 %v4344_v46  ;;  %3976 = vmatpush3.bf16.msra.mxu0 %v4345_v47  ;;  %v514_v46 = vld [vmem:[#allocation2 + $0xb0] sm:$0xff] }
  0x4a   : > { %4009 = vmatprep.subr.bf16.mxu1 %v4346_v37  ;;  %4057 = vmatprep.subr.bf16.mxu0 %v4347_v55  ;;  %v1060_v47 = vld [vmem:[#allocation2 + $0xaa] sm:$0xff]  ;;  %v4909_v48 = vpack.c.bf16 %v514_v46, %v513_v42 }
  0x4b   : > { %v4911_v52 = vpack.c.bf16 %v1061_v51, %v1060_v47  ;;  %v521_v42 = vld [vmem:[#allocation2 + $0x108] sm:$0xff]  ;;  %v522_v46 = vld [vmem:[#allocation2 + $0x110] sm:$0xff] }
  0x4c   : > { %3930 = vmatmul.mubr.bf16.vlgmr.msra.gmra.mxu1 %v4837_v60  ;;  %3978 = vmatmul.mubr.bf16.vlgmr.msra.gmra.mxu0 %v4839_v0  ;;  %v1068_v47 = vld [vmem:[#allocation2 + $0x10a] sm:$0xff] }
  0x4d   : > { %4010 = vmatpush3.bf16.msra.mxu1 %v4346_v37  ;;  %4058 = vmatpush3.bf16.msra.mxu0 %v4347_v55  ;;  %v1062_v37 = vld [vmem:[#allocation2 + $0xc2] sm:$0xff]  ;;  %v1063_v55 = vld [vmem:[#allocation2 + $0xca] sm:$0xff] }
  0x4e   : > { %3933 = vmatprep.mubr.bf16.mxu1 %v4841_v4  ;;  %3981 = vmatprep.mubr.bf16.mxu0 %v4843_v53  ;;  %v4915_v54 = vpack.c.bf16 %v1063_v55, %v1062_v37  ;;  %v524_v51 = vld [vmem:[#allocation2 + $0x128] sm:$0xff]  ;;  %v4959_v37 = vpack.c.bf16 %v522_v46, %v521_v42  ;;  %v4364_v42 = vld [vmem:[%s5687_s1 + $0x170] sm:$0xff]  }
  0x4f   : > { %4011 = vmatprep.subr.bf16.mxu1 %v4348_v7  ;;  %4059 = vmatprep.subr.bf16.mxu0 %v4349_v8  ;;  %v4365_v46 = vld [vmem:[%s5687_s1 + $0x1b0] sm:$0xff]  }
  0x51   : > { %4012 = vmatpush3.bf16.msra.mxu1 %v4348_v7  ;;  %4060 = vmatpush3.bf16.msra.mxu0 %v4349_v8  ;;  %v1064_v7 = vld [vmem:[#allocation2 + $0xda] sm:$0xff]  ;;  %v1065_v8 = vld [vmem:[#allocation2 + $0xe2] sm:$0xff] }
  0x52   : > { %4013 = vmatprep.subr.bf16.mxu1 %v4350_v16  ;;  %4061 = vmatprep.subr.bf16.mxu0 %v4351_v18 }
  0x54   : > { %3934 = vmatmul.mubr.bf16.gmra.mxu1 %v4861_v19  ;;  %3982 = vmatmul.mubr.bf16.gmra.mxu0 %v4863_v20 }
  0x55   : > { %3937 = vmatprep.mubr.bf16.mxu1 %v4865_v23  ;;  %3985 = vmatprep.mubr.bf16.mxu0 %v4867_v24 }
  0x56   : > { %4014 = vmatpush3.bf16.msra.mxu1 %v4350_v16  ;;  %4062 = vmatpush3.bf16.msra.mxu0 %v4351_v18  ;;  %v1066_v16 = vld [vmem:[#allocation2 + $0xf2] sm:$0xff] }
  0x57   : > { %4015 = vmatprep.subr.bf16.mxu1 %v4352_v25  ;;  %4063 = vmatprep.subr.bf16.mxu0 %v4353_v45  ;;  %v355_v18 = vld [vmem:[%s4473_s8 + $0xf8] sm:$0xff] }
  0x58   : > { %v394_v41 = vmul.f32 %v4485_v10, %v355_v18 }
  0x5a   : > { %4016 = vmatpush3.bf16.msra.mxu1 %v4352_v25  ;;  %4064 = vmatpush3.bf16.msra.mxu0 %v4353_v45  ;;  %v393_v25 = vmul.f32 %v4485_v10, %v354_v13  ;;  %v4940_v45 = vld [vmem:[%s5687_s1 + $0x1b8] sm:$0xff]   ;;  %v433_v57 = vadd.f32 %v4490_v11, %v394_v41  ;;  %v4945_v10 = vpack.c.bf16 %v1065_v8, %v1064_v7  ;;  %v1073_v7 = vld [vmem:[#allocation2 + $0x142] sm:$0xff]  ;;  %v527_v8 = vld [vmem:[#allocation2 + $0x150] sm:$0xff] }
  0x5b   : > { %4017 = vmatprep.subr.bf16.mxu1 %v4354_v9  ;;  %4065 = vmatprep.subr.bf16.mxu0 %v4355_v22  ;;  %v1074_v13 = vld [vmem:[#allocation2 + $0x152] sm:$0xff] }
  0x5c   : > { %3938 = vmatmul.mubr.bf16.gmra.mxu1 %v4885_v30  ;;  %3986 = vmatmul.mubr.bf16.gmra.mxu0 %v4887_v33  ;;  %v432_v44 = vadd.f32 %v4490_v11, %v393_v25  ;;  %v4977_v25 = vpack.c.bf16 %v1075_v14, %v1074_v13  ;;  %v530_v41 = vld [vmem:[#allocation2 + $0x170] sm:$0xff]  ;;  %v4378_v13 = vld [vmem:[%s5687_s1 + $0x1f8] sm:$0xff]  }
  0x5d   : > { %3941 = vmatprep.mubr.bf16.mxu1 %v4889_v36  ;;  %3989 = vmatprep.mubr.bf16.mxu0 %v4891_v40  ;;  %v4379_v14 = vld [vmem:[%s5687_s1 + $0x238] sm:$0xff]  }
  0x5e   : > { %4018 = vmatpush3.bf16.msra.mxu1 %v4354_v9  ;;  %4066 = vmatpush3.bf16.msra.mxu0 %v4355_v22  ;;  %v464_v1 = vmax.f32 %v432_v44, 0.0  ;;  %v4949_v9 = vpack.c.bf16 %v1067_v26, %v1066_v16  ;;  %v465_v22 = vmax.f32 %v433_v57, 0.0  ;;  %v4973_v16 = vpack.c.bf16 %v1073_v7, %v1072_v6  ;;  %v529_v26 = vld [vmem:[#allocation2 + $0x168] sm:$0xff]  ;;  %v1077_v57 = vld [vmem:[#allocation2 + $0x172] sm:$0xff] }
  0x5f   : > { %4019 = vmatprep.subr.bf16.mxu1 %v4356_v49  ;;  %4067 = vmatprep.subr.bf16.mxu0 %v4357_v50  ;;  %v1076_v44 = vld [vmem:[#allocation2 + $0x16a] sm:$0xff]  ;;  %v1677_v7 = vld [vmem:[#allocation2 + $0xf9] sm:$0xff] }
  0x60   : > { %497 = vst [vmem:[#allocation2 + $0x181] sm:$0xff] %v464_v1  ;;  %498 = vst [vmem:[#allocation2 + $0x189] sm:$0xff] %v465_v22  ;;  %v4953_v11 = vpack.c.bf16 %v465_v22, %v464_v1  ;;  %v4983_v1 = vpack.c.bf16 %v530_v41, %v529_v26  ;;  %v4985_v22 = vpack.c.bf16 %v1077_v57, %v1076_v44  ;;  %v1676_v6 = vld [vmem:[#allocation2 + $0xf1] sm:$0xff] }
  0x61   : > { %v5061_v26 = vpack.c.bf16 %v1677_v7, %v1676_v6  ;;  %v2579_v7 = vld [vmem:[#allocation2 + $0x49] sm:$0xff] }
  0x62   : > { %4020 = vmatpush3.bf16.msra.mxu1 %v4356_v49  ;;  %4068 = vmatpush3.bf16.msra.mxu0 %v4357_v50  ;;  %v1069_v49 = vld [vmem:[#allocation2 + $0x112] sm:$0xff]  ;;  %v523_v50 = vld [vmem:[#allocation2 + $0x120] sm:$0xff] }
  0x63   : > { %4021 = vmatprep.subr.bf16.mxu1 %v4358_v59  ;;  %4069 = vmatprep.subr.bf16.mxu0 %v4359_v63  ;;  %v4961_v55 = vpack.c.bf16 %v1069_v49, %v1068_v47  ;;  %v1672_v47 = vld [vmem:[#allocation2 + $0xc1] sm:$0xff]  ;;  %v1673_v49 = vld [vmem:[#allocation2 + $0xc9] sm:$0xff] }
  0x64   : > { %3942 = vmatmul.mubr.bf16.gmra.mxu1 %v4909_v48  ;;  %3990 = vmatmul.mubr.bf16.gmra.mxu0 %v4911_v52 }
  0x65   : > { %3945 = vmatprep.mubr.bf16.mxu1 %v4913_v56  ;;  %3993 = vmatprep.mubr.bf16.mxu0 %v4915_v54 }
  0x66   : > { %4022 = vmatpush3.bf16.msra.mxu1 %v4358_v59  ;;  %4070 = vmatpush3.bf16.msra.mxu0 %v4359_v63  ;;  %v4963_v59 = vpack.c.bf16 %v524_v51, %v523_v50  ;;  %v4965_v63 = vpack.c.bf16 %v1071_v31, %v1070_v27  ;;  %v1674_v50 = vld [vmem:[#allocation2 + $0xd9] sm:$0xff]  ;;  %v1675_v51 = vld [vmem:[#allocation2 + $0xe1] sm:$0xff]  ;;  %v5041_v31 = vpack.c.bf16 %v1673_v49, %v1672_v47 }
  0x67   : > { %4023 = vmatprep.subr.bf16.mxu1 %v4360_v61  ;;  %4071 = vmatprep.subr.bf16.mxu0 %v4361_v12  ;;  %v4374_v27 = vld [vmem:[%s5687_s1 + $0x148] sm:$0xff]   ;;  %v1382_v44 = vld [vmem:[#allocation2 + $0x180] sm:$0xff] }
  0x68   : > { %v1383_v57 = vld [vmem:[#allocation2 + $0x188] sm:$0xff]  ;;  %v2884_v47 = vld [vmem:[#allocation2 + $0x3a] sm:$0xff] }
  0x6a   : > { %4024 = vmatpush3.bf16.msra.mxu1 %v4360_v61  ;;  %4072 = vmatpush3.bf16.msra.mxu0 %v4361_v12  ;;  %v525_v61 = vld [vmem:[#allocation2 + $0x138] sm:$0xff] }
  0x6b   : > { %4105 = vmatprep.subr.bf16.mxu1 %v4934_v43  ;;  %4153 = vmatprep.subr.bf16.mxu0 %v4940_v45  ;;  %v528_v12 = vld [vmem:[#allocation2 + $0x158] sm:$0xff]  ;;  %v4971_v15 = vpack.c.bf16 %v526_v62, %v525_v61  ;;  %v5043_v61 = vpack.c.bf16 %v1675_v51, %v1674_v50  ;;  %v4377_v62 = vld [vmem:[%s5687_s1 + $0x180] sm:$0xff]  }
  0x6c   : > { %3946 = vmatmul.mubr.bf16.gmra.mxu1 %v4943_v58  ;;  %3994 = vmatmul.mubr.bf16.gmra.mxu0 %v4945_v10  ;;  %v4975_v18 = vpack.c.bf16 %v528_v12, %v527_v8  ;;  %v1678_v8 = vld [vmem:[#allocation2 + $0x109] sm:$0xff]  ;;  %v1679_v12 = vld [vmem:[#allocation2 + $0x111] sm:$0xff] }
  0x6d   : > { %3949 = vmatprep.mubr.bf16.mxu1 %v4947_v5  ;;  %3997 = vmatprep.mubr.bf16.mxu0 %v4949_v9  ;;  %v5063_v41 = vpack.c.bf16 %v1679_v12, %v1678_v8  ;;  %v2580_v8 = vld [vmem:[#allocation2 + $0x51] sm:$0xff] }
  0x6e   : > { %v2885_v12 = vld [vmem:[#allocation2 + $0x4a] sm:$0xff] }
  0x74   : > { %3950 = vmatmul.mubr.bf16.gmra.mxu1 %v4959_v37  ;;  %3998 = vmatmul.mubr.bf16.gmra.mxu0 %v4961_v55 }
  0x75   : > { %3953 = vmatprep.mubr.bf16.mxu1 %v4963_v59  ;;  %4001 = vmatprep.mubr.bf16.mxu0 %v4965_v63 }
  0x7c   : > { %3954 = vmatmul.mubr.bf16.gmra.mxu1 %v4971_v15  ;;  %4002 = vmatmul.mubr.bf16.gmra.mxu0 %v4973_v16 }
  0x7d   : > { %3957 = vmatprep.mubr.bf16.mxu1 %v4975_v18  ;;  %4005 = vmatprep.mubr.bf16.mxu0 %v4977_v25 }
  0x84   : > { %3958 = vmatmul.mubr.bf16.gmra.mxu1 %v4983_v1  ;;  %4006 = vmatmul.mubr.bf16.gmra.mxu0 %v4985_v22 }
  0x85   : > { %4025 = vmatprep.mubr.bf16.mxu1 %v4837_v60  ;;  %4073 = vmatprep.mubr.bf16.mxu0 %v4629_v29  ;;  %v4366_v29 = vld [vmem:[%s5687_s1 + $0x168] sm:$0xff]  }
  0x86   : > { %v4367_v60 = vld [vmem:[%s5687_s1 + $0x1a8] sm:$0xff]  }
  0x8c   : > { %4026 = vmatmul.mubr.bf16.vlgmr.msra.gmra.mxu1 %v4841_v4  ;;  %4074 = vmatmul.mubr.bf16.vlgmr.msra.gmra.mxu0 %v4686_v34  ;;  %v4368_v34 = vld [vmem:[%s5687_s1 + $0x160] sm:$0xff]  }
  0x8d   : > { %4106 = vmatpush3.bf16.msra.mxu1 %v4934_v43  ;;  %4154 = vmatpush3.bf16.msra.mxu0 %v4940_v45  ;;  %v4370_v43 = vld [vmem:[%s5687_s1 + $0x158] sm:$0xff]  }
  0x8e   : > { %4029 = vmatprep.mubr.bf16.mxu1 %v4861_v19  ;;  %4077 = vmatprep.mubr.bf16.mxu0 %v4752_v28  ;;  %v4369_v28 = vld [vmem:[%s5687_s1 + $0x1a0] sm:$0xff]   ;;  %v4371_v45 = vld [vmem:[%s5687_s1 + $0x198] sm:$0xff]  }
  0x8f   : > { %4107 = vmatprep.subr.bf16.mxu1 %v4364_v42  ;;  %4155 = vmatprep.subr.bf16.mxu0 %v4365_v46 }
  0x91   : > { %4108 = vmatpush3.bf16.msra.mxu1 %v4364_v42  ;;  %4156 = vmatpush3.bf16.msra.mxu0 %v4365_v46  ;;  %v5077_v42 = vpack.c.bf16 %v1383_v57, %v1382_v44 }
  0x92   : > { %4109 = vmatprep.subr.bf16.mxu1 %v4366_v29  ;;  %4157 = vmatprep.subr.bf16.mxu0 %v4367_v60 }
  0x94   : > { %4030 = vmatmul.mubr.bf16.gmra.mxu1 %v4865_v23  ;;  %4078 = vmatmul.mubr.bf16.gmra.mxu0 %v4770_v2  ;;  %v4372_v2 = vld [vmem:[%s5687_s1 + $0x150] sm:$0xff]  }
  0x95   : > { %4033 = vmatprep.mubr.bf16.mxu1 %v4885_v30  ;;  %4081 = vmatprep.mubr.bf16.mxu0 %v4791_v17  ;;  %v4373_v17 = vld [vmem:[%s5687_s1 + $0x190] sm:$0xff]  }
  0x96   : > { %4110 = vmatpush3.bf16.msra.mxu1 %v4366_v29  ;;  %4158 = vmatpush3.bf16.msra.mxu0 %v4367_v60 }
  0x97   : > { %4111 = vmatprep.subr.bf16.mxu1 %v4368_v34  ;;  %4159 = vmatprep.subr.bf16.mxu0 %v4369_v28 }
  0x9a   : > { %4112 = vmatpush3.bf16.msra.mxu1 %v4368_v34  ;;  %4160 = vmatpush3.bf16.msra.mxu0 %v4369_v28 }
  0x9b   : > { %4113 = vmatprep.subr.bf16.mxu1 %v4370_v43  ;;  %4161 = vmatprep.subr.bf16.mxu0 %v4371_v45 }
  0x9c   : > { %4034 = vmatmul.mubr.bf16.gmra.mxu1 %v4889_v36  ;;  %4082 = vmatmul.mubr.bf16.gmra.mxu0 %v4805_v35  ;;  %v4375_v35 = vld [vmem:[%s5687_s1 + $0x188] sm:$0xff]  }
  0x9d   : > { %4037 = vmatprep.mubr.bf16.mxu1 %v4909_v48  ;;  %4085 = vmatprep.mubr.bf16.mxu0 %v4819_v38  ;;  %v4376_v38 = vld [vmem:[%s5687_s1 + $0x140] sm:$0xff]  }
  0x9e   : > { %4114 = vmatpush3.bf16.msra.mxu1 %v4370_v43  ;;  %4162 = vmatpush3.bf16.msra.mxu0 %v4371_v45 }
  0x9f   : > { %4115 = vmatprep.subr.bf16.mxu1 %v4372_v2  ;;  %4163 = vmatprep.subr.bf16.mxu0 %v4373_v17 }
  0xa2   : > { %4116 = vmatpush3.bf16.msra.mxu1 %v4372_v2  ;;  %4164 = vmatpush3.bf16.msra.mxu0 %v4373_v17  ;;  %v2578_v2 = vld [vmem:[#allocation2 + $0x39] sm:$0xff] }
  0xa3   : > { %4117 = vmatprep.subr.bf16.mxu1 %v4374_v27  ;;  %4165 = vmatprep.subr.bf16.mxu0 %v4375_v35  ;;  %v2883_v17 = vld [vmem:[#allocation2 + $0x32] sm:$0xff] }
  0xa4   : > { %4038 = vmatmul.mubr.bf16.gmra.mxu1 %v4913_v56  ;;  %4086 = vmatmul.mubr.bf16.gmra.mxu0 %v5041_v31 }
  0xa5   : > { %4041 = vmatprep.mubr.bf16.mxu1 %v4943_v58  ;;  %4089 = vmatprep.mubr.bf16.mxu0 %v5043_v61 }
  0xa6   : > { %4118 = vmatpush3.bf16.msra.mxu1 %v4374_v27  ;;  %4166 = vmatpush3.bf16.msra.mxu0 %v4375_v35  ;;  %v2915_v27 = vpack.c.bf16 %v2884_v47, %v2883_v17 }
  0xa7   : > { %4119 = vmatprep.subr.bf16.mxu1 %v4376_v38  ;;  %4167 = vmatprep.subr.bf16.mxu0 %v4377_v62 }
  0xaa   : > { %4120 = vmatpush3.bf16.msra.mxu1 %v4376_v38  ;;  %4168 = vmatpush3.bf16.msra.mxu0 %v4377_v62 }
  0xab   : > { %4201 = vmatprep.subr.bf16.mxu1 %v4378_v13  ;;  %4249 = vmatprep.subr.bf16.mxu0 %v4379_v14 }
  0xac   : > { %4042 = vmatmul.mubr.bf16.gmra.mxu1 %v4947_v5  ;;  %4090 = vmatmul.mubr.bf16.gmra.mxu0 %v5061_v26 }
  0xad   : > { %4045 = vmatprep.mubr.bf16.mxu1 %v4959_v37  ;;  %4093 = vmatprep.mubr.bf16.mxu0 %v5063_v41 }
  0xb4   : > { %4046 = vmatmul.mubr.bf16.gmra.mxu1 %v4963_v59  ;;  %4094 = vmatmul.mubr.bf16.gmra.mxu0 %v4776_v3  ;;  %v4380_v3 = vld [vmem:[%s5687_s1 + $0x1f0] sm:$0xff]  }
  0xb5   : > { %4049 = vmatprep.mubr.bf16.mxu1 %v4971_v15  ;;  %4097 = vmatprep.mubr.bf16.mxu0 %v4797_v21  ;;  %v4381_v21 = vld [vmem:[%s5687_s1 + $0x230] sm:$0xff]  }
  0xbc   : > { %4050 = vmatmul.mubr.bf16.gmra.mxu1 %v4975_v18  ;;  %4098 = vmatmul.mubr.bf16.gmra.mxu0 %v4807_v32  ;;  %v4382_v32 = vld [vmem:[%s5687_s1 + $0x1e8] sm:$0xff]  }
  0xbd   : > { %4053 = vmatprep.mubr.bf16.mxu1 %v4983_v1  ;;  %4101 = vmatprep.mubr.bf16.mxu0 %v4821_v39  ;;  %v4383_v39 = vld [vmem:[%s5687_s1 + $0x228] sm:$0xff]  }
  0xc4   : > { %4054 = vmatmul.mubr.bf16.gmra.mxu1 %v5077_v42  ;;  %4102 = vmatmul.mubr.bf16.gmra.mxu0 %v4953_v11 }
  0xc5   : > { %4121 = vmatprep.mubr.bf16.mxu1 %v4839_v0  ;;  %4169 = vmatprep.mubr.bf16.mxu0 %v4841_v4  ;;  %v4384_v0 = vld [vmem:[%s5687_s1 + $0x1e0] sm:$0xff]  }
  0xc6   : > { %v4385_v4 = vld [vmem:[%s5687_s1 + $0x220] sm:$0xff]  }
  0xcc   : > { %4122 = vmatmul.mubr.bf16.vlgmr.msra.gmra.mxu1 %v4843_v53  ;;  %4170 = vmatmul.mubr.bf16.vlgmr.msra.gmra.mxu0 %v4861_v19  ;;  %v4386_v53 = vld [vmem:[%s5687_s1 + $0x1d8] sm:$0xff]  }
  0xcd   : > { %4202 = vmatpush3.bf16.msra.mxu1 %v4378_v13  ;;  %4250 = vmatpush3.bf16.msra.mxu0 %v4379_v14  ;;  %v4387_v19 = vld [vmem:[%s5687_s1 + $0x218] sm:$0xff]   ;;  %v2581_v14 = vld [vmem:[#allocation2 + $0x61] sm:$0xff] }
  0xce   : > { %4125 = vmatprep.mubr.bf16.mxu1 %v4863_v20  ;;  %4173 = vmatprep.mubr.bf16.mxu0 %v4865_v23  ;;  %v4388_v20 = vld [vmem:[%s5687_s1 + $0x1d0] sm:$0xff]  }
  0xcf   : > { %4203 = vmatprep.subr.bf16.mxu1 %v4380_v3  ;;  %4251 = vmatprep.subr.bf16.mxu0 %v4381_v21  ;;  %v4389_v23 = vld [vmem:[%s5687_s1 + $0x210] sm:$0xff]  }
  0xd0   : > { %v2886_v13 = vld [vmem:[#allocation2 + $0x52] sm:$0xff] }
  0xd1   : > { %4204 = vmatpush3.bf16.msra.mxu1 %v4380_v3  ;;  %4252 = vmatpush3.bf16.msra.mxu0 %v4381_v21  ;;  %v2887_v3 = vld [vmem:[#allocation2 + $0x62] sm:$0xff]  ;;  %v2888_v21 = vld [vmem:[#allocation2 + $0x6a] sm:$0xff] }
  0xd2   : > { %4205 = vmatprep.subr.bf16.mxu1 %v4382_v32  ;;  %4253 = vmatprep.subr.bf16.mxu0 %v4383_v39 }
  0xd4   : > { %4126 = vmatmul.mubr.bf16.gmra.mxu1 %v4867_v24  ;;  %4174 = vmatmul.mubr.bf16.gmra.mxu0 %v4885_v30  ;;  %v4390_v24 = vld [vmem:[%s5687_s1 + $0x1c8] sm:$0xff]  }
  0xd5   : > { %4129 = vmatprep.mubr.bf16.mxu1 %v4887_v33  ;;  %4177 = vmatprep.mubr.bf16.mxu0 %v4889_v36  ;;  %v4391_v30 = vld [vmem:[%s5687_s1 + $0x208] sm:$0xff]   ;;  %v4392_v33 = vld [vmem:[%s5687_s1 + $0x1c0] sm:$0xff]  }
  0xd6   : > { %4206 = vmatpush3.bf16.msra.mxu1 %v4382_v32  ;;  %4254 = vmatpush3.bf16.msra.mxu0 %v4383_v39  ;;  %v4393_v36 = vld [vmem:[%s5687_s1 + $0x200] sm:$0xff]  }
  0xd7   : > { %4207 = vmatprep.subr.bf16.mxu1 %v4384_v0  ;;  %4255 = vmatprep.subr.bf16.mxu0 %v4385_v4 }
  0xda   : > { %4208 = vmatpush3.bf16.msra.mxu1 %v4384_v0  ;;  %4256 = vmatpush3.bf16.msra.mxu0 %v4385_v4  ;;  %v2610_v0 = vpack.c.bf16 %v2580_v8, %v2579_v7  ;;  %v2916_v4 = vpack.c.bf16 %v2886_v13, %v2885_v12 }
  0xdb   : > { %4209 = vmatprep.subr.bf16.mxu1 %v4386_v53  ;;  %4257 = vmatprep.subr.bf16.mxu0 %v4387_v19 }
  0xdc   : > { %4130 = vmatmul.mubr.bf16.gmra.mxu1 %v4891_v40  ;;  %4178 = vmatmul.mubr.bf16.gmra.mxu0 %v4909_v48 }
  0xdd   : > { %4133 = vmatprep.mubr.bf16.mxu1 %v4911_v52  ;;  %4181 = vmatprep.mubr.bf16.mxu0 %v4913_v56 }
  0xde   : > { %4210 = vmatpush3.bf16.msra.mxu1 %v4386_v53  ;;  %4258 = vmatpush3.bf16.msra.mxu0 %v4387_v19  ;;  %v2917_v19 = vpack.c.bf16 %v2888_v21, %v2887_v3 }
  0xdf   : > { %4211 = vmatprep.subr.bf16.mxu1 %v4388_v20  ;;  %4259 = vmatprep.subr.bf16.mxu0 %v4389_v23 }
  0xe2   : > { %4212 = vmatpush3.bf16.msra.mxu1 %v4388_v20  ;;  %4260 = vmatpush3.bf16.msra.mxu0 %v4389_v23 }
  0xe3   : > { %4213 = vmatprep.subr.bf16.mxu1 %v4390_v24  ;;  %4261 = vmatprep.subr.bf16.mxu0 %v4391_v30 }
  0xe4   : > { %4134 = vmatmul.mubr.bf16.gmra.mxu1 %v4915_v54  ;;  %4182 = vmatmul.mubr.bf16.gmra.mxu0 %v4943_v58 }
  0xe5   : > { %4137 = vmatprep.mubr.bf16.mxu1 %v4945_v10  ;;  %4185 = vmatprep.mubr.bf16.mxu0 %v4947_v5 }
  0xe6   : > { %4214 = vmatpush3.bf16.msra.mxu1 %v4390_v24  ;;  %4262 = vmatpush3.bf16.msra.mxu0 %v4391_v30 }
  0xe7   : > { %4215 = vmatprep.subr.bf16.mxu1 %v4392_v33  ;;  %4263 = vmatprep.subr.bf16.mxu0 %v4393_v36 }
  0xea   : > { %4216 = vmatpush3.bf16.msra.mxu1 %v4392_v33  ;;  %4264 = vmatpush3.bf16.msra.mxu0 %v4393_v36  ;;  %v2583_v33 = vld [vmem:[#allocation2 + $0x79] sm:$0xff]  ;;  %v2584_v36 = vld [vmem:[#allocation2 + $0x81] sm:$0xff] }
  0xeb   : > { %v2612_v13 = vpack.c.bf16 %v2584_v36, %v2583_v33  ;;  %v2893_v36 = vld [vmem:[#allocation2 + $0xaa] sm:$0xff] }
  0xec   : > { %v5141_v40 = vpop.f32.mrf.mxu0  ;;  %v5143_v48 = vpop.f32.mrf.mxu1  ;;  %4138 = vmatmul.mubr.bf16.gmra.mxu1 %v4949_v9  ;;  %4186 = vmatmul.mubr.bf16.gmra.mxu0 %v4959_v37 }
  0xed   : > { %4141 = vmatprep.mubr.bf16.mxu1 %v4961_v55  ;;  %4189 = vmatprep.mubr.bf16.mxu0 %v4963_v59 }
  0xee   : > { %v5149_v52 = vpop.f32.mrf.mxu0  ;;  %v5151_v56 = vpop.f32.mrf.mxu1 }
  0xf0   : > { %v5153_v54 = vpop.f32.mrf.mxu0  ;;  %v5155_v58 = vpop.f32.mrf.mxu1 }
  0xf2   : > { %v5157_v10 = vpop.f32.mrf.mxu0  ;;  %v5159_v5 = vpop.f32.mrf.mxu1 }
  0xf4   : > { %v5161_v46 = vpop.f32.mrf.mxu0  ;;  %v5163_v9 = vpop.f32.mrf.mxu1  ;;  %4142 = vmatmul.mubr.bf16.gmra.mxu1 %v4965_v63  ;;  %4190 = vmatmul.mubr.bf16.gmra.mxu0 %v4971_v15  ;;  %v1994_v15 = vld [vmem:[#allocation2 + $0x182] sm:$0xff] }
  0xf5   : > { %4145 = vmatprep.mubr.bf16.mxu1 %v4973_v16  ;;  %4193 = vmatprep.mubr.bf16.mxu0 %v4975_v18  ;;  %v1995_v16 = vld [vmem:[#allocation2 + $0x18a] sm:$0xff] }
  0xf6   : > { %v5169_v37 = vpop.f32.mrf.mxu0  ;;  %v5171_v55 = vpop.f32.mrf.mxu1  ;;  %v2577_v18 = vld [vmem:[#allocation2 + $0x31] sm:$0xff] }
  0xf7   : > { %v2609_v51 = vpack.c.bf16 %v2578_v2, %v2577_v18  ;;  %v2890_v18 = vld [vmem:[#allocation2 + $0x82] sm:$0xff]  ;;  %v2585_v2 = vld [vmem:[#allocation2 + $0x91] sm:$0xff] }
  0xf8   : > { %v5173_v59 = vpop.f32.mrf.mxu0  ;;  %v5175_v29 = vpop.f32.mrf.mxu1 }
  0xfa   : > { %v5177_v60 = vpop.f32.mrf.mxu0  ;;  %v5179_v34 = vpop.f32.mrf.mxu1 }
  0xfc   : > { %v5181_v28 = vpop.f32.mrf.mxu0  ;;  %v5183_v63 = vpop.f32.mrf.mxu1  ;;  %4146 = vmatmul.mubr.bf16.gmra.mxu1 %v4977_v25  ;;  %4194 = vmatmul.mubr.bf16.gmra.mxu0 %v4983_v1  ;;  %v5197_v25 = vpack.c.bf16 %v1995_v16, %v1994_v15  ;;  %v4394_v1 = vld [vmem:[#allocation2] sm:$0xff] }
  0xfd   : > { %4149 = vmatprep.mubr.bf16.mxu1 %v4985_v22  ;;  %4197 = vmatprep.mubr.bf16.mxu0 %v5077_v42  ;;  %v2318_v22 = vpack.c.bf16 %v4394_v1, %v4394_v1  ;;  %v2582_v42 = vld [vmem:[#allocation2 + $0x69] sm:$0xff]  ;;  %v2889_v16 = vld [vmem:[#allocation2 + $0x7a] sm:$0xff] }
  0xfe   : > { %v5189_v43 = vpop.f32.mrf.mxu0  ;;  %v5191_v45 = vpop.f32.mrf.mxu1  ;;  %v2611_v53 = vpack.c.bf16 %v2582_v42, %v2581_v14  ;;  %v2586_v1 = vld [vmem:[#allocation2 + $0x99] sm:$0xff]  ;;  %v2918_v14 = vpack.c.bf16 %v2890_v18, %v2889_v16 }
  0xff   : > { %v2613_v3 = vpack.c.bf16 %v2586_v1, %v2585_v2  ;;  %v2894_v16 = vld [vmem:[#allocation2 + $0xb2] sm:$0xff] }
 0x100   : > { %v5193_v49 = vpop.f32.mrf.mxu0  ;;  %v5195_v50 = vpop.f32.mrf.mxu1 }
 0x102   : > { %v5199_v35 = vpop.f32.mrf.mxu0  ;;  %v5201_v38 = vpop.f32.mrf.mxu1 }
 0x104   : > { %v5203_v62 = vpop.f32.mrf.mxu0  ;;  %v5205_v6 = vpop.f32.mrf.mxu1  ;;  %4150 = vmatmul.mubr.bf16.gmra.mxu1 %v5197_v25  ;;  %4198 = vmatmul.mubr.bf16.gmra.mxu0 %v2318_v22  ;;  %v2891_v22 = vld [vmem:[#allocation2 + $0x92] sm:$0xff] }
 0x105   : > { %4217 = vmatprep.mubr.bf16.mxu1 %v2609_v51  ;;  %4265 = vmatprep.mubr.bf16.mxu0 %v2915_v27  ;;  %v2892_v51 = vld [vmem:[#allocation2 + $0x9a] sm:$0xff] }
 0x106   : > { %v5208_v44 = vpop.f32.mrf.mxu0  ;;  %v5210_v57 = vpop.f32.mrf.mxu1  ;;  %v2919_v21 = vpack.c.bf16 %v2892_v51, %v2891_v22 }
 0x108   : > { %v5212_v32 = vpop.f32.mrf.mxu0  ;;  %v5214_v39 = vpop.f32.mrf.mxu1 }
 0x10a   : > { %v5216_v20 = vpop.f32.mrf.mxu0  ;;  %v5218_v23 = vpop.f32.mrf.mxu1 }
 0x10c   : > { %v3931_v24 = vpop.f32.mrf.mxu1  ;;  %v3979_v30 = vpop.f32.mrf.mxu0  ;;  %4218 = vmatmul.mubr.bf16.vlgmr.msra.gmra.mxu1 %v2610_v0  ;;  %4266 = vmatmul.mubr.bf16.vlgmr.msra.gmra.mxu0 %v2916_v4 }
 0x10d   : > { %v928_v15 = vadd.f32 %v3931_v24, %v5141_v40  ;;  %4221 = vmatprep.mubr.bf16.mxu1 %v2611_v53  ;;  %4269 = vmatprep.mubr.bf16.mxu0 %v2917_v19 }
 0x10e   : > { %v919_v17 = vpop.f32.mrf.mxu1  ;;  %v1193_v47 = vpop.f32.mrf.mxu0 }
 0x10f   : > { %v5221_v27 = vadd.f32 %v3979_v30, %v928_v15  ;;  %v920_v7 = vadd.f32 %v919_v17, %v5149_v52  ;;  %v2587_v52 = vld [vmem:[#allocation2 + $0xa9] sm:$0xff] }
 0x110   : > { %v3932_v8 = vpop.f32.mrf.mxu1  ;;  %v3980_v12 = vpop.f32.mrf.mxu0  ;;  %v2895_v17 = vld [vmem:[#allocation2 + $0xc2] sm:$0xff] }
 0x111   : > { %v5224_v42 = vadd.f32 %v1193_v47, %v920_v7  ;;  %v931_v40 = vadd.f32 %v3932_v8, %v5153_v54  ;;  %v2588_v54 = vld [vmem:[#allocation2 + $0xb1] sm:$0xff]  ;;  %v2920_v8 = vpack.c.bf16 %v2894_v16, %v2893_v36 }
 0x112   : > { %v922_v0 = vpop.f32.mrf.mxu1  ;;  %v1196_v4 = vpop.f32.mrf.mxu0  ;;  %v2896_v47 = vld [vmem:[#allocation2 + $0xca] sm:$0xff]  ;;  %v2614_v7 = vpack.c.bf16 %v2588_v54, %v2587_v52  ;;  %v2900_v54 = vld [vmem:[#allocation2 + $0xfa] sm:$0xff] }
 0x113   : > { %v5227_v53 = vadd.f32 %v3980_v12, %v931_v40  ;;  %v923_v19 = vadd.f32 %v922_v0, %v5157_v10 }
 0x114   : > { %v3935_v24 = vpop.f32.mrf.mxu1  ;;  %v3983_v30 = vpop.f32.mrf.mxu0  ;;  %4222 = vmatmul.mubr.bf16.gmra.mxu1 %v2612_v13  ;;  %4270 = vmatmul.mubr.bf16.gmra.mxu0 %v2918_v14  ;;  %v2921_v13 = vpack.c.bf16 %v2896_v47, %v2895_v17 }
 0x115   : > { %v5230_v15 = vadd.f32 %v1196_v4, %v923_v19  ;;  %v944_v33 = vadd.f32 %v3935_v24, %v5161_v46  ;;  %4225 = vmatprep.mubr.bf16.mxu1 %v2613_v3  ;;  %4273 = vmatprep.mubr.bf16.mxu0 %v2919_v21  ;;  %v2897_v24 = vld [vmem:[#allocation2 + $0xda] sm:$0xff] }
 0x116   : > { %v935_v18 = vpop.f32.mrf.mxu1  ;;  %v1209_v2 = vpop.f32.mrf.mxu0 }
 0x117   : > { %v5233_v1 = vadd.f32 %v3983_v30, %v944_v33  ;;  %v936_v10 = vadd.f32 %v935_v18, %v5169_v37  ;;  %v2899_v33 = vld [vmem:[#allocation2 + $0xf2] sm:$0xff] }
 0x118   : > { %v3936_v22 = vpop.f32.mrf.mxu1  ;;  %v3984_v51 = vpop.f32.mrf.mxu0  ;;  %v2923_v47 = vpack.c.bf16 %v2900_v54, %v2899_v33 }
 0x119   : > { %v5236_v12 = vadd.f32 %v1209_v2, %v936_v10  ;;  %v947_v46 = vadd.f32 %v3936_v22, %v5173_v59  ;;  %v2898_v59 = vld [vmem:[#allocation2 + $0xe2] sm:$0xff] }
 0x11a   : > { %v938_v14 = vpop.f32.mrf.mxu1  ;;  %v1212_v40 = vpop.f32.mrf.mxu0  ;;  %v2922_v2 = vpack.c.bf16 %v2898_v59, %v2897_v24 }
 0x11b   : > { %v5239_v3 = vadd.f32 %v3984_v51, %v947_v46  ;;  %v939_v21 = vadd.f32 %v938_v14, %v5177_v60  ;;  %v2597_v14 = vld [vmem:[#allocation2 + $0x121] sm:$0xff] }
 0x11c   : > { %v3939_v0 = vpop.f32.mrf.mxu1  ;;  %v3987_v4 = vpop.f32.mrf.mxu0  ;;  %4226 = vmatmul.mubr.bf16.gmra.mxu1 %v2614_v7  ;;  %4274 = vmatmul.mubr.bf16.gmra.mxu0 %v2920_v8 }
 0x11d   : > { %v5242_v37 = vadd.f32 %v1212_v40, %v939_v21  ;;  %v960_v19 = vadd.f32 %v3939_v0, %v5181_v28  ;;  %4229 = vmatprep.mubr.bf16.mxu1 %v5041_v31  ;;  %4277 = vmatprep.mubr.bf16.mxu0 %v2921_v13  ;;  %v2902_v13 = vld [vmem:[#allocation2 + $0x112] sm:$0xff]  ;;  %v2598_v0 = vld [vmem:[#allocation2 + $0x129] sm:$0xff] }
 0x11e   : > { %v951_v30 = vpop.f32.mrf.mxu1  ;;  %v1225_v52 = vpop.f32.mrf.mxu0 }
 0x11f   : > { %v5246_v36 = vadd.f32 %v3987_v4, %v960_v19  ;;  %v952_v60 = vadd.f32 %v951_v30, %v5189_v43  ;;  %v2903_v4 = vld [vmem:[#allocation2 + $0x122] sm:$0xff] }
 0x120   : > { %v3940_v16 = vpop.f32.mrf.mxu1  ;;  %v3988_v18 = vpop.f32.mrf.mxu0 }
 0x121   : > { %v5249_v17 = vadd.f32 %v1225_v52, %v952_v60  ;;  %v963_v28 = vadd.f32 %v3940_v16, %v5193_v49  ;;  %v2901_v49 = vld [vmem:[#allocation2 + $0x10a] sm:$0xff] }
 0x122   : > { %v954_v31 = vpop.f32.mrf.mxu1  ;;  %v1228_v10 = vpop.f32.mrf.mxu0  ;;  %v2924_v30 = vpack.c.bf16 %v2902_v13, %v2901_v49  ;;  %v2602_v49 = vld [vmem:[#allocation2 + $0x159] sm:$0xff] }
 0x123   : > { %v5252_v22 = vadd.f32 %v3988_v18, %v963_v28  ;;  %v955_v51 = vadd.f32 %v954_v31, %v5199_v35  ;;  %v2904_v35 = vld [vmem:[#allocation2 + $0x12a] sm:$0xff]  ;;  %v2908_v13 = vld [vmem:[#allocation2 + $0x15a] sm:$0xff] }
 0x124   : > { %v3943_v7 = vpop.f32.mrf.mxu1  ;;  %v3991_v8 = vpop.f32.mrf.mxu0  ;;  %4230 = vmatmul.mubr.bf16.gmra.mxu1 %v5043_v61  ;;  %4278 = vmatmul.mubr.bf16.gmra.mxu0 %v2922_v2  ;;  %v2925_v33 = vpack.c.bf16 %v2904_v35, %v2903_v4 }
 0x125   : > { %v5256_v43 = vadd.f32 %v1228_v10, %v955_v51  ;;  %v976_v46 = vadd.f32 %v3943_v7, %v5203_v62  ;;  %4233 = vmatprep.mubr.bf16.mxu1 %v5061_v26  ;;  %4281 = vmatprep.mubr.bf16.mxu0 %v2923_v47  ;;  %v2619_v62 = vpack.c.bf16 %v2598_v0, %v2597_v14  ;;  %v2600_v47 = vld [vmem:[#allocation2 + $0x141] sm:$0xff]  ;;  %v2601_v7 = vld [vmem:[#allocation2 + $0x151] sm:$0xff] }
 0x126   : > { %v967_v40 = vpop.f32.mrf.mxu1  ;;  %v1241_v21 = vpop.f32.mrf.mxu0  ;;  %v2906_v51 = vld [vmem:[#allocation2 + $0x142] sm:$0xff] }
 0x127   : > { %v5260_v19 = vadd.f32 %v3991_v8, %v976_v46  ;;  %v968_v61 = vadd.f32 %v967_v40, %v5208_v44  ;;  %v2599_v44 = vld [vmem:[#allocation2 + $0x139] sm:$0xff] }
 0x128   : > { %v3944_v24 = vpop.f32.mrf.mxu1  ;;  %v3992_v59 = vpop.f32.mrf.mxu0  ;;  %v2620_v0 = vpack.c.bf16 %v2600_v47, %v2599_v44 }
 0x129   : > { %v5263_v52 = vadd.f32 %v1241_v21, %v968_v61  ;;  %v979_v26 = vadd.f32 %v3944_v24, %v5212_v32  ;;  %v2905_v32 = vld [vmem:[#allocation2 + $0x13a] sm:$0xff]  ;;  %v2621_v61 = vpack.c.bf16 %v2602_v49, %v2601_v7 }
 0x12a   : > { %v970_v54 = vpop.f32.mrf.mxu1  ;;  %v1244_v60 = vpop.f32.mrf.mxu0  ;;  %v2926_v4 = vpack.c.bf16 %v2906_v51, %v2905_v32 }
 0x12b   : > { %v5266_v16 = vadd.f32 %v3992_v59, %v979_v26  ;;  %v971_v18 = vadd.f32 %v970_v54, %v5216_v20  ;;  %v2907_v20 = vld [vmem:[#allocation2 + $0x152] sm:$0xff] }
 0x12c   : > { %v3947_v2 = vpop.f32.mrf.mxu1  ;;  %v3995_v28 = vpop.f32.mrf.mxu0  ;;  %4234 = vmatmul.mubr.bf16.gmra.mxu1 %v5063_v41  ;;  %4282 = vmatmul.mubr.bf16.gmra.mxu0 %v2924_v30  ;;  %v2927_v24 = vpack.c.bf16 %v2908_v13, %v2907_v20 }
 0x12d   : > { %v5270_v31 = vadd.f32 %v1244_v60, %v971_v18  ;;  %v992_v10 = vadd.f32 %v3947_v2, %v5143_v48  ;;  %4237 = vmatprep.mubr.bf16.mxu1 %v2619_v62  ;;  %4285 = vmatprep.mubr.bf16.mxu0 %v2925_v33  ;;  %v2909_v2 = vld [vmem:[#allocation2 + $0x16a] sm:$0xff] }
 0x12e   : > { %v983_v8 = vpop.f32.mrf.mxu1  ;;  %v1257_v46 = vpop.f32.mrf.mxu0 }
 0x12f   : > { %v5273_v14 = vadd.f32 %v3995_v28, %v992_v10  ;;  %v984_v41 = vadd.f32 %v983_v8, %v5151_v56  ;;  %v2603_v56 = vld [vmem:[#allocation2 + $0x169] sm:$0xff]  ;;  %v2910_v28 = vld [vmem:[#allocation2 + $0x172] sm:$0xff] }
 0x130   : > { %v3948_v40 = vpop.f32.mrf.mxu1  ;;  %v3996_v21 = vpop.f32.mrf.mxu0  ;;  %v2928_v8 = vpack.c.bf16 %v2910_v28, %v2909_v2 }
 0x131   : > { %v5276_v35 = vadd.f32 %v1257_v46, %v984_v41  ;;  %v995_v48 = vadd.f32 %v3948_v40, %v5155_v58  ;;  %v2604_v58 = vld [vmem:[#allocation2 + $0x171] sm:$0xff] }
 0x132   : > { %v986_v59 = vpop.f32.mrf.mxu1  ;;  %v1260_v30 = vpop.f32.mrf.mxu0  ;;  %v2622_v7 = vpack.c.bf16 %v2604_v58, %v2603_v56 }
 0x133   : > { %v5279_v26 = vadd.f32 %v3996_v21, %v995_v48  ;;  %v987_v62 = vadd.f32 %v986_v59, %v5159_v5  ;;  %v2913_v48 = vld [vmem:[#allocation2 + $0x19a] sm:$0xff] }
 0x134   : > { %v3951_v33 = vpop.f32.mrf.mxu1  ;;  %v3999_v54 = vpop.f32.mrf.mxu0  ;;  %4238 = vmatmul.mubr.bf16.gmra.mxu1 %v2620_v0  ;;  %4286 = vmatmul.mubr.bf16.gmra.mxu0 %v2926_v4  ;;  %v2607_v0 = vld [vmem:[#allocation2 + $0x199] sm:$0xff] }
 0x135   : > { %v5282_v60 = vadd.f32 %v1260_v30, %v987_v62  ;;  %v1008_v18 = vadd.f32 %v3951_v33, %v5163_v9  ;;  %4241 = vmatprep.mubr.bf16.mxu1 %v2621_v61  ;;  %4289 = vmatprep.mubr.bf16.mxu0 %v2927_v24  ;;  %v2914_v61 = vld [vmem:[#allocation2 + $0x1a2] sm:$0xff] }
 0x136   : > { %v999_v44 = vpop.f32.mrf.mxu1  ;;  %v1273_v47 = vpop.f32.mrf.mxu0  ;;  %v2930_v56 = vpack.c.bf16 %v2914_v61, %v2913_v48 }
 0x137   : > { %v5285_v10 = vadd.f32 %v3999_v54, %v1008_v18  ;;  %v1000_v5 = vadd.f32 %v999_v44, %v5171_v55 }
 0x138   : > { %v3952_v32 = vpop.f32.mrf.mxu1  ;;  %v4000_v51 = vpop.f32.mrf.mxu0 }
 0x139   : > { %v5288_v46 = vadd.f32 %v1273_v47, %v1000_v5  ;;  %v1011_v49 = vadd.f32 %v3952_v32, %v5175_v29  ;;  %v2608_v29 = vld [vmem:[#allocation2 + $0x1a1] sm:$0xff] }
 0x13a   : > { %v1002_v9 = vpop.f32.mrf.mxu1  ;;  %v1276_v20 = vpop.f32.mrf.mxu0  ;;  %v2624_v54 = vpack.c.bf16 %v2608_v29, %v2607_v0 }
 0x13b   : > { %v5291_v13 = vadd.f32 %v4000_v51, %v1011_v49  ;;  %v1003_v41 = vadd.f32 %v1002_v9, %v5179_v34 }
 0x13c   : > { %v3955_v40 = vpop.f32.mrf.mxu1  ;;  %v4003_v21 = vpop.f32.mrf.mxu0  ;;  %4242 = vmatmul.mubr.bf16.gmra.mxu1 %v2622_v7  ;;  %4290 = vmatmul.mubr.bf16.gmra.mxu0 %v2928_v8 }
 0x13d   : > { %v5294_v55 = vadd.f32 %v1276_v20, %v1003_v41  ;;  %v1024_v4 = vadd.f32 %v3955_v40, %v5183_v63  ;;  %4245 = vmatprep.mubr.bf16.mxu1 %v4953_v11  ;;  %4293 = vmatprep.mubr.bf16.mxu0 %v5197_v25 }
 0x13e   : > { %v1015_v24 = vpop.f32.mrf.mxu1  ;;  %v1289_v59 = vpop.f32.mrf.mxu0 }
 0x13f   : > { %v5299_v30 = vadd.f32 %v4003_v21, %v1024_v4  ;;  %v1016_v34 = vadd.f32 %v1015_v24, %v5191_v45 }
 0x140   : > { %v3956_v62 = vpop.f32.mrf.mxu1  ;;  %v4004_v33 = vpop.f32.mrf.mxu0 }
 0x141   : > { %v5302_v18 = vadd.f32 %v1289_v59, %v1016_v34  ;;  %v1027_v63 = vadd.f32 %v3956_v62, %v5195_v50 }
 0x142   : > { %v1018_v11 = vpop.f32.mrf.mxu1  ;;  %v1292_v58 = vpop.f32.mrf.mxu0 }
 0x143   : > { %v5305_v25 = vadd.f32 %v4004_v33, %v1027_v63  ;;  %v1019_v2 = vadd.f32 %v1018_v11, %v5201_v38 }
 0x144   : > { %v3959_v28 = vpop.f32.mrf.mxu1  ;;  %v4007_v44 = vpop.f32.mrf.mxu0  ;;  %4246 = vmatmul.mubr.bf16.gmra.mxu1 %v2624_v54  ;;  %4294 = vmatmul.mubr.bf16.gmra.mxu0 %v2930_v56 }
 0x145   : > { %v5308_v47 = vadd.f32 %v1292_v58, %v1019_v2  ;;  %v1040_v45 = vadd.f32 %v3959_v28, %v5205_v6 }
 0x146   : > { %v1031_v5 = vpop.f32.mrf.mxu1  ;;  %v1305_v32 = vpop.f32.mrf.mxu0 }
 0x147   : > { %v5311_v51 = vadd.f32 %v4007_v44, %v1040_v45  ;;  %v1032_v50 = vadd.f32 %v1031_v5, %v5210_v57 }
 0x148   : > { %v3960_v7 = vpop.f32.mrf.mxu1  ;;  %v4008_v8 = vpop.f32.mrf.mxu0 }
 0x149   : > { %v5314_v49 = vadd.f32 %v1305_v32, %v1032_v50  ;;  %v1043_v38 = vadd.f32 %v3960_v7, %v5214_v39 }
 0x14a   : > { %v1034_v9 = vpop.f32.mrf.mxu1  ;;  %v1308_v20 = vpop.f32.mrf.mxu0 }
 0x14b   : > { %v5317_v41 = vadd.f32 %v4008_v8, %v1043_v38  ;;  %v1035_v40 = vadd.f32 %v1034_v9, %v5218_v23 }
 0x14c   : > { %v4027_v21 = vpop.f32.mrf.mxu1  ;;  %v4075_v6 = vpop.f32.mrf.mxu0 }
 0x14d   : > { %v5320_v0 = vadd.f32 %v1308_v20, %v1035_v40  ;;  %v1628_v4 = vadd.f32 %v4027_v21, %v5221_v27 }
 0x14e   : > { %v1499_v29 = vpop.f32.mrf.mxu1  ;;  %v1805_v57 = vpop.f32.mrf.mxu0 }
 0x14f   : > { %v5323_v48 = vadd.f32 %v4075_v6, %v1628_v4  ;;  %v1626_v61 = vadd.f32 %v1499_v29, %v5224_v42 }
 0x150   : > { %v4028_v24 = vpop.f32.mrf.mxu1  ;;  %v4076_v39 = vpop.f32.mrf.mxu0 }
 0x151   : > { %v5326_v59 = vadd.f32 %v1805_v57, %v1626_v61  ;;  %v1629_v34 = vadd.f32 %v4028_v24, %v5227_v53 }
 0x152   : > { %v1502_v62 = vpop.f32.mrf.mxu1  ;;  %v1808_v23 = vpop.f32.mrf.mxu0 }
 0x153   : > { %v5329_v33 = vadd.f32 %v4076_v39, %v1629_v34  ;;  %v1627_v54 = vadd.f32 %v1502_v62, %v5230_v15 }
 0x154   : > { %v4031_v56 = vpop.f32.mrf.mxu1  ;;  %v4079_v27 = vpop.f32.mrf.mxu0 }
 0x155   : > { %v5332_v63 = vadd.f32 %v1808_v23, %v1627_v54  ;;  %v1632_v11 = vadd.f32 %v4031_v56, %v5233_v1 }
 0x156   : > { %v1515_v58 = vpop.f32.mrf.mxu1  ;;  %v1821_v42 = vpop.f32.mrf.mxu0 }
 0x157   : > { %v5335_v2 = vadd.f32 %v4079_v27, %v1632_v11  ;;  %v1630_v28 = vadd.f32 %v1515_v58, %v5236_v12 }
 0x158   : > { %v4032_v44 = vpop.f32.mrf.mxu1  ;;  %v4080_v53 = vpop.f32.mrf.mxu0 }
 0x159   : > { %v5338_v45 = vadd.f32 %v1821_v42, %v1630_v28  ;;  %v1633_v5 = vadd.f32 %v4032_v44, %v5239_v3 }
 0x15a   : > { %v1518_v32 = vpop.f32.mrf.mxu1  ;;  %v1824_v15 = vpop.f32.mrf.mxu0 }
 0x15b   : > { %v5341_v50 = vadd.f32 %v4080_v53, %v1633_v5  ;;  %v1631_v7 = vadd.f32 %v1518_v32, %v5242_v37 }
 0x15c   : > { %v4035_v8 = vpop.f32.mrf.mxu1  ;;  %v4083_v1 = vpop.f32.mrf.mxu0 }
 0x15d   : > { %v5344_v38 = vadd.f32 %v1824_v15, %v1631_v7  ;;  %v1636_v9 = vadd.f32 %v4035_v8, %v5246_v36 }
 0x15e   : > { %v1531_v20 = vpop.f32.mrf.mxu1  ;;  %v1837_v12 = vpop.f32.mrf.mxu0 }
 0x15f   : > { %v5347_v40 = vadd.f32 %v4083_v1, %v1636_v9  ;;  %v1634_v21 = vadd.f32 %v1531_v20, %v5249_v17 }
 0x160   : > { %v4036_v6 = vpop.f32.mrf.mxu1  ;;  %v4084_v3 = vpop.f32.mrf.mxu0 }
 0x161   : > { %v5350_v4 = vadd.f32 %v1837_v12, %v1634_v21  ;;  %v1637_v29 = vadd.f32 %v4036_v6, %v5252_v22 }
 0x162   : > { %v1534_v57 = vpop.f32.mrf.mxu1  ;;  %v1840_v37 = vpop.f32.mrf.mxu0 }
 0x163   : > { %v5353_v61 = vadd.f32 %v4084_v3, %v1637_v29  ;;  %v1635_v24 = vadd.f32 %v1534_v57, %v5256_v43 }
 0x164   : > { %v4039_v39 = vpop.f32.mrf.mxu1  ;;  %v4087_v36 = vpop.f32.mrf.mxu0 }
 0x165   : > { %v5356_v34 = vadd.f32 %v1840_v37, %v1635_v24  ;;  %v1640_v62 = vadd.f32 %v4039_v39, %v5260_v19 }
 0x166   : > { %v1547_v23 = vpop.f32.mrf.mxu1  ;;  %v1853_v17 = vpop.f32.mrf.mxu0 }
 0x167   : > { %v5359_v54 = vadd.f32 %v4087_v36, %v1640_v62  ;;  %v1638_v56 = vadd.f32 %v1547_v23, %v5263_v52 }
 0x168   : > { %v4040_v27 = vpop.f32.mrf.mxu1  ;;  %v4088_v22 = vpop.f32.mrf.mxu0 }
 0x169   : > { %v5362_v11 = vadd.f32 %v1853_v17, %v1638_v56  ;;  %v1641_v58 = vadd.f32 %v4040_v27, %v5266_v16 }
 0x16a   : > { %v1550_v42 = vpop.f32.mrf.mxu1  ;;  %v1856_v43 = vpop.f32.mrf.mxu0 }
 0x16b   : > { %v5365_v28 = vadd.f32 %v4088_v22, %v1641_v58  ;;  %v1639_v44 = vadd.f32 %v1550_v42, %v5270_v31 }
 0x16c   : > { %v4043_v53 = vpop.f32.mrf.mxu1  ;;  %v4091_v19 = vpop.f32.mrf.mxu0 }
 0x16d   : > { %v5368_v5 = vadd.f32 %v1856_v43, %v1639_v44  ;;  %v1644_v32 = vadd.f32 %v4043_v53, %v5273_v14 }
 0x16e   : > { %v1563_v15 = vpop.f32.mrf.mxu1  ;;  %v1869_v52 = vpop.f32.mrf.mxu0 }
 0x16f   : > { %v5371_v7 = vadd.f32 %v4091_v19, %v1644_v32  ;;  %v1642_v8 = vadd.f32 %v1563_v15, %v5276_v35 }
 0x170   : > { %v4044_v1 = vpop.f32.mrf.mxu1  ;;  %v4092_v16 = vpop.f32.mrf.mxu0 }
 0x171   : > { %v5374_v9 = vadd.f32 %v1869_v52, %v1642_v8  ;;  %v1645_v20 = vadd.f32 %v4044_v1, %v5279_v26 }
 0x172   : > { %v1566_v12 = vpop.f32.mrf.mxu1  ;;  %v1872_v31 = vpop.f32.mrf.mxu0 }
 0x173   : > { %v5377_v21 = vadd.f32 %v4092_v16, %v1645_v20  ;;  %v1643_v6 = vadd.f32 %v1566_v12, %v5282_v60 }
 0x174   : > { %v4047_v3 = vpop.f32.mrf.mxu1  ;;  %v4095_v14 = vpop.f32.mrf.mxu0 }
 0x175   : > { %5693 = vst [vmem:[#allocation3_spill] sm:$0xff] %v5377_v21  ;;  %v5380_v29 = vadd.f32 %v1872_v31, %v1643_v6  ;;  %v1648_v57 = vadd.f32 %v4047_v3, %v5285_v10 }
 0x176   : > { %v1579_v37 = vpop.f32.mrf.mxu1  ;;  %v1885_v35 = vpop.f32.mrf.mxu0 }
 0x177   : > { %5694 = vst [vmem:[#allocation4_spill] sm:$0xff] %v5380_v29  ;;  %v5383_v24 = vadd.f32 %v4095_v14, %v1648_v57  ;;  %v1646_v39 = vadd.f32 %v1579_v37, %v5288_v46 }
 0x178   : > { %v4048_v36 = vpop.f32.mrf.mxu1  ;;  %v4096_v26 = vpop.f32.mrf.mxu0 }
 0x179   : > { %5695 = vst [vmem:[#allocation5_spill] sm:$0xff] %v5383_v24  ;;  %v5386_v62 = vadd.f32 %v1885_v35, %v1646_v39  ;;  %v1649_v23 = vadd.f32 %v4048_v36, %v5291_v13 }
 0x17a   : > { %v1582_v17 = vpop.f32.mrf.mxu1  ;;  %v1888_v60 = vpop.f32.mrf.mxu0 }
 0x17b   : > { %5696 = vst [vmem:[#allocation6_spill] sm:$0xff] %v5386_v62  ;;  %v5389_v56 = vadd.f32 %v4096_v26, %v1649_v23  ;;  %v1647_v27 = vadd.f32 %v1582_v17, %v5294_v55 }
 0x17c   : > { %v4051_v22 = vpop.f32.mrf.mxu1  ;;  %v4099_v10 = vpop.f32.mrf.mxu0 }
 0x17d   : > { %5697 = vst [vmem:[#allocation7_spill] sm:$0xff] %v5389_v56  ;;  %v5392_v58 = vadd.f32 %v1888_v60, %v1647_v27  ;;  %v1652_v42 = vadd.f32 %v4051_v22, %v5299_v30 }
 0x17e   : > { %v1595_v43 = vpop.f32.mrf.mxu1  ;;  %v1901_v46 = vpop.f32.mrf.mxu0 }
 0x17f   : > { %5698 = vst [vmem:[#allocation8_spill] sm:$0xff] %v5392_v58  ;;  %v5395_v44 = vadd.f32 %v4099_v10, %v1652_v42  ;;  %v1650_v53 = vadd.f32 %v1595_v43, %v5302_v18 }
 0x180   : > { %v4052_v19 = vpop.f32.mrf.mxu1  ;;  %v4100_v13 = vpop.f32.mrf.mxu0 }
 0x181   : > { %5699 = vst [vmem:[#allocation9_spill] sm:$0xff] %v5395_v44  ;;  %v5398_v32 = vadd.f32 %v1901_v46, %v1650_v53  ;;  %v1653_v15 = vadd.f32 %v4052_v19, %v5305_v25 }
 0x182   : > { %v1598_v52 = vpop.f32.mrf.mxu1  ;;  %v1904_v55 = vpop.f32.mrf.mxu0 }
 0x183   : > { %5700 = vst [vmem:[#allocation10_spill] sm:$0xff] %v5398_v32  ;;  %v5401_v8 = vadd.f32 %v4100_v13, %v1653_v15  ;;  %v1651_v1 = vadd.f32 %v1598_v52, %v5308_v47 }
 0x184   : > { %v4055_v16 = vpop.f32.mrf.mxu1  ;;  %v4103_v30 = vpop.f32.mrf.mxu0 }
 0x185   : > { %5701 = vst [vmem:[#allocation11_spill] sm:$0xff] %v5401_v8  ;;  %v5404_v20 = vadd.f32 %v1904_v55, %v1651_v1  ;;  %v1656_v12 = vadd.f32 %v4055_v16, %v5311_v51 }
 0x186   : > { %v1611_v31 = vpop.f32.mrf.mxu1  ;;  %v1917_v18 = vpop.f32.mrf.mxu0 }
 0x187   : > { %5702 = vst [vmem:[#allocation12_spill] sm:$0xff] %v5404_v20  ;;  %v5407_v6 = vadd.f32 %v4103_v30, %v1656_v12  ;;  %v1654_v3 = vadd.f32 %v1611_v31, %v5314_v49 }
 0x188   : > { %v4056_v14 = vpop.f32.mrf.mxu1  ;;  %v4104_v25 = vpop.f32.mrf.mxu0 }
 0x189   : > { %5703 = vst [vmem:[#allocation13_spill] sm:$0xff] %v5407_v6  ;;  %v5410_v57 = vadd.f32 %v1917_v18, %v1654_v3  ;;  %v1657_v37 = vadd.f32 %v4056_v14, %v5317_v41 }
 0x18a   : > { %v1614_v35 = vpop.f32.mrf.mxu1  ;;  %v1920_v47 = vpop.f32.mrf.mxu0 }
 0x18b   : > { %5704 = vst [vmem:[#allocation14_spill] sm:$0xff] %v5410_v57  ;;  %v5413_v39 = vadd.f32 %v4104_v25, %v1657_v37  ;;  %v1655_v36 = vadd.f32 %v1614_v35, %v5320_v0 }
 0x18c   : > { %v4123_v26 = vpop.f32.mrf.mxu1  ;;  %v5416_v51 = vpop.f32.mrf.mxu0 }
 0x18d   : > { %5705 = vst [vmem:[#allocation15_spill] sm:$0xff] %v5413_v39  ;;  %v5418_v23 = vadd.f32 %v1920_v47, %v1655_v36 }
 0x18e   : > { %v2111_v17 = vpop.f32.mrf.mxu1  ;;  %v5420_v60 = vpop.f32.mrf.mxu0 }
 0x18f   : > { %5706 = vst [vmem:[#allocation16_spill] sm:$0xff] %v5418_v23 }
 0x190   : > { %v5422_v49 = vpop.f32.mrf.mxu1  ;;  %v5424_v27 = vpop.f32.mrf.mxu0 }
 0x192   : > { %v5426_v22 = vpop.f32.mrf.mxu1  ;;  %v5428_v41 = vpop.f32.mrf.mxu0 }
 0x194   : > { %v5430_v10 = vpop.f32.mrf.mxu1  ;;  %v5432_v42 = vpop.f32.mrf.mxu0 }
 0x196   : > { %v5434_v0 = vpop.f32.mrf.mxu1  ;;  %v5436_v43 = vpop.f32.mrf.mxu0 }
 0x198   : > { %v5438_v46 = vpop.f32.mrf.mxu1  ;;  %v5440_v53 = vpop.f32.mrf.mxu0 }
 0x19a   : > { %v5442_v19 = vpop.f32.mrf.mxu1  ;;  %v5444_v13 = vpop.f32.mrf.mxu0 }
 0x19c   : > { %v5446_v15 = vpop.f32.mrf.mxu1  ;;  %v5448_v52 = vpop.f32.mrf.mxu0 }
 0x19e   : > { %v5450_v55 = vpop.f32.mrf.mxu1  ;;  %v5452_v1 = vpop.f32.mrf.mxu0 }
 0x1a0   : > { %v5454_v16 = vpop.f32.mrf.mxu1  ;;  %v5456_v30 = vpop.f32.mrf.mxu0 }
 0x1a2   : > { %v5458_v12 = vpop.f32.mrf.mxu1  ;;  %v5460_v31 = vpop.f32.mrf.mxu0 }
 0x1a4   : > { %v5462_v18 = vpop.f32.mrf.mxu1  ;;  %v5464_v3 = vpop.f32.mrf.mxu0 }
 0x1a6   : > { %v5466_v14 = vpop.f32.mrf.mxu1  ;;  %v5468_v25 = vpop.f32.mrf.mxu0 }
 0x1a8   : > { %v5470_v37 = vpop.f32.mrf.mxu1  ;;  %v5472_v35 = vpop.f32.mrf.mxu0 }
 0x1aa   : > { %v5474_v47 = vpop.f32.mrf.mxu1  ;;  %v5476_v36 = vpop.f32.mrf.mxu0 }
 0x1ac   : > { %v5478_v23 = vpop.f32.mrf.mxu1  ;;  %v5480_v39 = vpop.f32.mrf.mxu0 }
 0x1ae   : > { %v5482_v57 = vpop.f32.mrf.mxu1  ;;  %v5484_v6 = vpop.f32.mrf.mxu0 }
 0x1af   : > { %5707 = vst [vmem:[#allocation17_spill] sm:$0xff] %v5484_v6 }
 0x1b0   : > { %v5486_v20 = vpop.f32.mrf.mxu1  ;;  %v5488_v8 = vpop.f32.mrf.mxu0 }
 0x1b1   : > { %5708 = vst [vmem:[#allocation18_spill] sm:$0xff] %v5486_v20  ;;  %5709 = vst [vmem:[#allocation19_spill] sm:$0xff] %v5488_v8 }
 0x1b2   : > { %v5490_v32 = vpop.f32.mrf.mxu1  ;;  %v5492_v44 = vpop.f32.mrf.mxu0 }
 0x1b3   : > { %5710 = vst [vmem:[#allocation20_spill] sm:$0xff] %v5490_v32  ;;  %5711 = vst [vmem:[#allocation21_spill] sm:$0xff] %v5492_v44 }
 0x1b4   : > { %v5494_v58 = vpop.f32.mrf.mxu1  ;;  %v5496_v56 = vpop.f32.mrf.mxu0 }
 0x1b5   : > { %5712 = vst [vmem:[#allocation22_spill] sm:$0xff] %v5494_v58  ;;  %5713 = vst [vmem:[#allocation23_spill] sm:$0xff] %v5496_v56 }
 0x1b6   : > { %v5498_v62 = vpop.f32.mrf.mxu1  ;;  %v5500_v24 = vpop.f32.mrf.mxu0 }
 0x1b7   : > { %5714 = vst [vmem:[#allocation24_spill] sm:$0xff] %v5498_v62  ;;  %5715 = vst [vmem:[#allocation25_spill] sm:$0xff] %v5500_v24 }
 0x1b8   : > { %v5502_v29 = vpop.f32.mrf.mxu1  ;;  %v5504_v21 = vpop.f32.mrf.mxu0 }
 0x1b9   : > { %5716 = vst [vmem:[#allocation26_spill] sm:$0xff] %v5502_v29  ;;  %5717 = vst [vmem:[#allocation27_spill] sm:$0xff] %v5504_v21 }
 0x1ba   : > { %v5506_v6 = vpop.f32.mrf.mxu1  ;;  %v5508_v20 = vpop.f32.mrf.mxu0 }
 0x1bb   : > { %5718 = vst [vmem:[#allocation28_spill] sm:$0xff] %v5506_v6  ;;  %5719 = vst [vmem:[#allocation29_spill] sm:$0xff] %v5508_v20 }
 0x1bc   : > { %v5510_v8 = vpop.f32.mrf.mxu1  ;;  %v5512_v32 = vpop.f32.mrf.mxu0 }
 0x1bd   : > { %5720 = vst [vmem:[#allocation30_spill] sm:$0xff] %v5510_v8  ;;  %5721 = vst [vmem:[#allocation31_spill] sm:$0xff] %v5512_v32 }
 0x1be   : > { %v5514_v44 = vpop.f32.mrf.mxu1  ;;  %v5516_v58 = vpop.f32.mrf.mxu0 }
 0x1bf   : > { %5722 = vst [vmem:[#allocation32_spill] sm:$0xff] %v5514_v44  ;;  %5723 = vst [vmem:[#allocation33_spill] sm:$0xff] %v5516_v58  ;;  %v2240_v44 = vadd.f32 %v4123_v26, %v5323_v48  ;;  %v2239_v48 = vadd.f32 %v5426_v22, %v5332_v63  ;;  %v2242_v63 = vadd.f32 %v5434_v0, %v5338_v45 }
 0x1c0   : > { %v5518_v56 = vpop.f32.mrf.mxu1  ;;  %v5520_v62 = vpop.f32.mrf.mxu0 }
 0x1c1   : > { %5724 = vst [vmem:[#allocation34_spill] sm:$0xff] %v5518_v56  ;;  %5725 = vst [vmem:[#allocation35_spill] sm:$0xff] %v5520_v62  ;;  %v2238_v62 = vadd.f32 %v2111_v17, %v5326_v59  ;;  %v2244_v59 = vadd.f32 %v5430_v10, %v5335_v2  ;;  %v2546_v2 = vadd.f32 %v5428_v41, %v2239_v48 }
 0x1c2   : > { %v5522_v24 = vpop.f32.mrf.mxu1  ;;  %v5524_v29 = vpop.f32.mrf.mxu0  ;;  %v2245_v10 = vadd.f32 %v5438_v46, %v5341_v50  ;;  %v2549_v41 = vadd.f32 %v5436_v43, %v2242_v63 }
 0x1c3   : > { %5726 = vst [vmem:[#allocation36_spill] sm:$0xff] %v5522_v24  ;;  %5727 = vst [vmem:[#allocation37_spill] sm:$0xff] %v5524_v29  ;;  %v2551_v22 = vadd.f32 %v5432_v42, %v2244_v59 }
 0x1c4   : > { %v5526_v21 = vpop.f32.mrf.mxu1  ;;  %v5528_v6 = vpop.f32.mrf.mxu0  ;;  %v2552_v46 = vadd.f32 %v5440_v53, %v2245_v10 }
 0x1c5   : > { %5728 = vst [vmem:[#allocation38_spill] sm:$0xff] %v5526_v21  ;;  %5729 = vst [vmem:[#allocation39_spill] sm:$0xff] %v5528_v6  ;;  %v2547_v21 = vadd.f32 %v5416_v51, %v2240_v44  ;;  %v2241_v6 = vadd.f32 %v5422_v49, %v5329_v33 }
 0x1c6   : > { %v5530_v20 = vpop.f32.mrf.mxu1  ;;  %v5532_v32 = vpop.f32.mrf.mxu0 }
 0x1c7   : > { %5730 = vst [vmem:[#allocation40_spill] sm:$0xff] %v5530_v20  ;;  %5731 = vst [vmem:[#allocation41_spill] sm:$0xff] %v5532_v32  ;;  %v2545_v32 = vadd.f32 %v5420_v60, %v2238_v62  ;;  %v2548_v51 = vadd.f32 %v5424_v27, %v2241_v6 }
 0x1c8   : > { %v5535_v58 = vpop.f32.mrf.mxu1  ;;  %v5537_v56 = vpop.f32.mrf.mxu0 }
 0x1ca   : > { %v5540_v24 = vpop.f32.mrf.mxu1  ;;  %v5542_v29 = vpop.f32.mrf.mxu0 }
 0x1cb   : > { %5732 = vst [vmem:[#allocation42_spill] sm:$0xff] %v5542_v29 }
 0x1cc   : > { %v4219_v20 = vpop.f32.mrf.mxu1  ;;  %v4267_v8 = vpop.f32.mrf.mxu0 }
 0x1cd   : > { %v2853_v26 = vadd.f32 %v4219_v20, %v2547_v21 }
 0x1ce   : > { %v2724_v44 = vpop.f32.mrf.mxu1  ;;  %v3030_v33 = vpop.f32.mrf.mxu0 }
 0x1cf   : > { %v3159_v62 = vadd.f32 %v4267_v8, %v2853_v26  ;;  %v2851_v17 = vadd.f32 %v2724_v44, %v2545_v32  ;;  %v2243_v44 = vadd.f32 %v5442_v19, %v5344_v38  ;;  %v2246_v38 = vadd.f32 %v5450_v55, %v5350_v4 }
 0x1d0   : > { %v4220_v21 = vpop.f32.mrf.mxu1  ;;  %v4268_v20 = vpop.f32.mrf.mxu0 }
 0x1d1   : > { %3191 = vst [vmem:[%s5557_s9 + $0x10] sm:$0xff] %v3159_v62  ;;  %v3157_v60 = vadd.f32 %v3030_v33, %v2851_v17  ;;  %v2854_v49 = vadd.f32 %v4220_v21, %v2548_v51  ;;  %v3261_v29 = vmul.f32 %v3159_v62, %v3159_v62  ;;  %v2248_v33 = vadd.f32 %v5446_v15, %v5347_v40 }
 0x1d2   : > { %v2727_v6 = vpop.f32.mrf.mxu1  ;;  %v3033_v8 = vpop.f32.mrf.mxu0 }
 0x1d3   : > { %3189 = vst [vmem:[%s5557_s9] sm:$0xff] %v3157_v60  ;;  %v3221_v32 = vadd.f32 %v3159_v62, %v3157_v60  ;;  %v3259_v27 = vmul.f32 %v3157_v60, %v3157_v60  ;;  %v3160_v45 = vadd.f32 %v4268_v20, %v2854_v49  ;;  %v2852_v0 = vadd.f32 %v2727_v6, %v2546_v2 }
 0x1d4   : > { %v4223_v48 = vpop.f32.mrf.mxu1  ;;  %v4271_v26 = vpop.f32.mrf.mxu0  ;;  %v2550_v2 = vadd.f32 %v5444_v13, %v2243_v44  ;;  %v2555_v15 = vadd.f32 %v5448_v52, %v2248_v33  ;;  %v2249_v49 = vadd.f32 %v5454_v16, %v5353_v61  ;;  %v2553_v13 = vadd.f32 %v5452_v1, %v2246_v38 }
 0x1d5   : > { %v3291_v42 = vadd.f32 %v3261_v29, %v3259_v27  ;;  %3192 = vst [vmem:[%s5557_s9 + $0x18] sm:$0xff] %v3160_v45  ;;  %v3158_v59 = vadd.f32 %v3033_v8, %v2852_v0  ;;  %v2857_v50 = vadd.f32 %v4223_v48, %v2551_v22  ;;  %v3262_v51 = vmul.f32 %v3160_v45, %v3160_v45 }
 0x1d6   : > { %v2740_v62 = vpop.f32.mrf.mxu1  ;;  %v3046_v17 = vpop.f32.mrf.mxu0  ;;  %v2247_v0 = vadd.f32 %v5458_v12, %v5356_v34  ;;  %v2556_v61 = vadd.f32 %v5456_v30, %v2249_v49  ;;  %v2252_v16 = vadd.f32 %v5462_v18, %v5359_v54  ;;  %v2250_v34 = vadd.f32 %v5466_v14, %v5362_v11 }
 0x1d7   : > { %3190 = vst [vmem:[%s5557_s9 + $0x8] sm:$0xff] %v3158_v59  ;;  %v3236_v43 = vadd.f32 %v3160_v45, %v3158_v59  ;;  %v3260_v63 = vmul.f32 %v3158_v59, %v3158_v59  ;;  %v3163_v21 = vadd.f32 %v4271_v26, %v2857_v50  ;;  %v2855_v20 = vadd.f32 %v2740_v62, %v2549_v41 }
 0x1d8   : > { %v4224_v29 = vpop.f32.mrf.mxu1  ;;  %v4272_v19 = vpop.f32.mrf.mxu0  ;;  %v2256_v49 = vadd.f32 %v5478_v23, %v5371_v7 }
 0x1d9   : > { %v3306_v53 = vadd.f32 %v3262_v51, %v3260_v63  ;;  %3195 = vst [vmem:[%s5557_s9 + $0x30] sm:$0xff] %v3163_v21  ;;  %v3161_v60 = vadd.f32 %v3046_v17, %v2855_v20  ;;  %v2858_v40 = vadd.f32 %v4224_v29, %v2552_v46  ;;  %v2554_v51 = vadd.f32 %v5460_v31, %v2247_v0 }
 0x1da   : > { %v2743_v22 = vpop.f32.mrf.mxu1  ;;  %v3049_v10 = vpop.f32.mrf.mxu0  ;;  %v2559_v17 = vadd.f32 %v5464_v3, %v2252_v16  ;;  %v2557_v31 = vadd.f32 %v5468_v25, %v2250_v34  ;;  %v2251_v3 = vadd.f32 %v5474_v47, %v5368_v5  ;;  %v2254_v5 = vadd.f32 %v5482_v57, %v5374_v9 }
 0x1db   : > { %3193 = vst [vmem:[%s5557_s9 + $0x20] sm:$0xff] %v3161_v60  ;;  %v3222_v6 = vadd.f32 %v3221_v32, %v3161_v60  ;;  %v3263_v8 = vmul.f32 %v3161_v60, %v3161_v60  ;;  %v3164_v4 = vadd.f32 %v4272_v19, %v2858_v40  ;;  %v2856_v55 = vadd.f32 %v2743_v22, %v2550_v2 }
 0x1dc   : > { %v4227_v27 = vpop.f32.mrf.mxu1  ;;  %v4275_v45 = vpop.f32.mrf.mxu0  ;;  %v3265_v32 = vmul.f32 %v3163_v21, %v3163_v21 }
 0x1dd   : > { %v3292_v41 = vadd.f32 %v3291_v42, %v3263_v8  ;;  %3196 = vst [vmem:[%s5557_s9 + $0x38] sm:$0xff] %v3164_v4  ;;  %v3162_v52 = vadd.f32 %v3049_v10, %v2856_v55  ;;  %v2861_v48 = vadd.f32 %v4227_v27, %v2555_v15  ;;  %v3223_v59 = vadd.f32 %v3222_v6, %v3163_v21 }
 0x1de   : > { %v2756_v26 = vpop.f32.mrf.mxu1  ;;  %v3062_v44 = vpop.f32.mrf.mxu0  ;;  %v3266_v63 = vmul.f32 %v3164_v4, %v3164_v4 }
 0x1df   : > { %3194 = vst [vmem:[%s5557_s9 + $0x28] sm:$0xff] %v3162_v52  ;;  %v3237_v1 = vadd.f32 %v3236_v43, %v3162_v52  ;;  %v3264_v50 = vmul.f32 %v3162_v52, %v3162_v52  ;;  %v3167_v46 = vadd.f32 %v4275_v45, %v2861_v48  ;;  %v2859_v33 = vadd.f32 %v2756_v26, %v2553_v13  ;;  %v5733_v52 = vld [vmem:[#allocation3_spill] sm:$0xff]  ;;  %v5734_v48 = vld [vmem:[#allocation18_spill] sm:$0xff] }
 0x1e0   : > { %v3293_v12 = vadd.f32 %v3292_v41, %v3265_v32  ;;  %v4228_v42 = vpop.f32.mrf.mxu1  ;;  %v4276_v30 = vpop.f32.mrf.mxu0  ;;  %v2253_v43 = vadd.f32 %v5470_v37, %v5365_v28  ;;  %v2558_v45 = vadd.f32 %v5476_v36, %v2251_v3  ;;  %v2563_v41 = vadd.f32 %v5480_v39, %v2256_v49  ;;  %v5735_v36 = vld [vmem:[#allocation17_spill] sm:$0xff]  ;;  %v5736_v39 = vld [vmem:[#allocation4_spill] sm:$0xff] }
 0x1e1   : > { %v3307_v54 = vadd.f32 %v3306_v53, %v3264_v50  ;;  %3199 = vst [vmem:[%s5557_s9 + $0x50] sm:$0xff] %v3167_v46  ;;  %v3165_v18 = vadd.f32 %v3062_v44, %v2859_v33  ;;  %v2862_v62 = vadd.f32 %v4228_v42, %v2556_v61  ;;  %v3238_v38 = vadd.f32 %v3237_v1, %v3164_v4 }
 0x1e2   : > { %v2759_v21 = vpop.f32.mrf.mxu1  ;;  %v3065_v20 = vpop.f32.mrf.mxu0  ;;  %v2560_v15 = vadd.f32 %v5472_v35, %v2253_v43  ;;  %v3269_v22 = vmul.f32 %v3167_v46, %v3167_v46  ;;  %v2257_v61 = vadd.f32 %v5734_v48, %v5733_v52  ;;  %v2561_v50 = vadd.f32 %v5735_v36, %v2254_v5  ;;  %v5740_v43 = vld [vmem:[#allocation22_spill] sm:$0xff]  ;;  %v5751_v36 = vld [vmem:[#allocation9_spill] sm:$0xff] }
 0x1e3   : > { %3197 = vst [vmem:[%s5557_s9 + $0x40] sm:$0xff] %v3165_v18  ;;  %v3224_v11 = vadd.f32 %v3223_v59, %v3165_v18  ;;  %v3267_v14 = vmul.f32 %v3165_v18, %v3165_v18  ;;  %v3168_v29 = vadd.f32 %v4276_v30, %v2862_v62  ;;  %v2860_v19 = vadd.f32 %v2759_v21, %v2554_v51  ;;  %v5738_v18 = vld [vmem:[#allocation19_spill] sm:$0xff] }
 0x1e4   : > { %v3308_v2 = vadd.f32 %v3307_v54, %v3266_v63  ;;  %v4231_v53 = vpop.f32.mrf.mxu1  ;;  %v4279_v60 = vpop.f32.mrf.mxu0  ;;  %v2564_v62 = vadd.f32 %v5738_v18, %v2257_v61  ;;  %v5753_v18 = vld [vmem:[#allocation10_spill] sm:$0xff] }
 0x1e5   : > { %v3294_v28 = vadd.f32 %v3293_v12, %v3267_v14  ;;  %3200 = vst [vmem:[%s5557_s9 + $0x58] sm:$0xff] %v3168_v29  ;;  %v3166_v37 = vadd.f32 %v3065_v20, %v2860_v19  ;;  %v2865_v40 = vadd.f32 %v4231_v53, %v2559_v17  ;;  %v3225_v25 = vadd.f32 %v3224_v11, %v3167_v46  ;;  %v5737_v12 = vld [vmem:[#allocation20_spill] sm:$0xff]  ;;  %v5739_v17 = vld [vmem:[#allocation5_spill] sm:$0xff] }
 0x1e6   : > { %v2772_v10 = vpop.f32.mrf.mxu1  ;;  %v3078_v6 = vpop.f32.mrf.mxu0  ;;  %v3270_v16 = vmul.f32 %v3168_v29, %v3168_v29  ;;  %v2255_v42 = vadd.f32 %v5737_v12, %v5736_v39  ;;  %v2260_v63 = vadd.f32 %v5740_v43, %v5739_v17  ;;  %v5742_v53 = vld [vmem:[#allocation24_spill] sm:$0xff] }
 0x1e7   : > { %3198 = vst [vmem:[%s5557_s9 + $0x48] sm:$0xff] %v3166_v37  ;;  %v3239_v8 = vadd.f32 %v3238_v38, %v3166_v37  ;;  %v3268_v4 = vmul.f32 %v3166_v37, %v3166_v37  ;;  %v3171_v55 = vadd.f32 %v4279_v60, %v2865_v40  ;;  %v2863_v13 = vadd.f32 %v2772_v10, %v2557_v31  ;;  %v5743_v40 = vld [vmem:[#allocation21_spill] sm:$0xff] }
 0x1e8   : > { %v3295_v47 = vadd.f32 %v3294_v28, %v3269_v22  ;;  %v4232_v27 = vpop.f32.mrf.mxu1  ;;  %v4280_v35 = vpop.f32.mrf.mxu0 }
 0x1e9   : > { %v3309_v7 = vadd.f32 %v3308_v2, %v3268_v4  ;;  %3203 = vst [vmem:[%s5557_s9 + $0x70] sm:$0xff] %v3171_v55  ;;  %v3169_v23 = vadd.f32 %v3078_v6, %v2863_v13  ;;  %v2866_v0 = vadd.f32 %v4232_v27, %v2560_v15  ;;  %v3240_v44 = vadd.f32 %v3239_v8, %v3168_v29  ;;  %v5741_v2 = vld [vmem:[#allocation6_spill] sm:$0xff]  ;;  %v5744_v6 = vld [vmem:[#allocation23_spill] sm:$0xff] }
 0x1ea   : > { %v2775_v32 = vpop.f32.mrf.mxu1  ;;  %v3081_v26 = vpop.f32.mrf.mxu0  ;;  %v3273_v21 = vmul.f32 %v3171_v55, %v3171_v55  ;;  %v2258_v60 = vadd.f32 %v5742_v53, %v5741_v2  ;;  %v2562_v15 = vadd.f32 %v5743_v40, %v2255_v42  ;;  %v5745_v8 = vld [vmem:[#allocation7_spill] sm:$0xff]  ;;  %v5746_v4 = vld [vmem:[#allocation26_spill] sm:$0xff] }
 0x1eb   : > { %3201 = vst [vmem:[%s5557_s9 + $0x60] sm:$0xff] %v3169_v23  ;;  %v3226_v9 = vadd.f32 %v3225_v25, %v3169_v23  ;;  %v3271_v57 = vmul.f32 %v3169_v23, %v3169_v23  ;;  %v3172_v59 = vadd.f32 %v4280_v35, %v2866_v0  ;;  %v2864_v1 = vadd.f32 %v2775_v32, %v2558_v45  ;;  %v5747_v0 = vld [vmem:[#allocation25_spill] sm:$0xff]  ;;  %v5749_v32 = vld [vmem:[#allocation28_spill] sm:$0xff]  ;;  %v5757_v2 = vld [vmem:[#allocation11_spill] sm:$0xff] }
 0x1ec   : > { %v3310_v46 = vadd.f32 %v3309_v7, %v3270_v16  ;;  %v4235_v33 = vpop.f32.mrf.mxu1  ;;  %v4283_v34 = vpop.f32.mrf.mxu0  ;;  %v2567_v25 = vadd.f32 %v5744_v6, %v2260_v63  ;;  %v5748_v16 = vld [vmem:[#allocation8_spill] sm:$0xff]  ;;  %v5758_v53 = vld [vmem:[#allocation34_spill] sm:$0xff]  ;;  %v5759_v6 = vld [vmem:[#allocation33_spill] sm:$0xff] }
 0x1ed   : > { %v3296_v30 = vadd.f32 %v3295_v47, %v3271_v57  ;;  %3204 = vst [vmem:[%s5557_s9 + $0x78] sm:$0xff] %v3172_v59  ;;  %v3170_v51 = vadd.f32 %v3081_v26, %v2864_v1  ;;  %v2869_v54 = vadd.f32 %v4235_v33, %v2563_v41  ;;  %v3227_v11 = vadd.f32 %v3226_v9, %v3171_v55  ;;  %v5750_v1 = vld [vmem:[#allocation27_spill] sm:$0xff] }
 0x1ee   : > { %v2788_v20 = vpop.f32.mrf.mxu1  ;;  %v3094_v38 = vpop.f32.mrf.mxu0  ;;  %v2261_v55 = vadd.f32 %v5746_v4, %v5745_v8  ;;  %v3274_v13 = vmul.f32 %v3172_v59, %v3172_v59  ;;  %v2565_v41 = vadd.f32 %v5747_v0, %v2258_v60  ;;  %v2259_v26 = vadd.f32 %v5749_v32, %v5748_v16  ;;  %v5763_v0 = vld [vmem:[#allocation13_spill] sm:$0xff] }
 0x1ef   : > { %3202 = vst [vmem:[%s5557_s9 + $0x68] sm:$0xff] %v3170_v51  ;;  %v3241_v14 = vadd.f32 %v3240_v44, %v3170_v51  ;;  %v3272_v29 = vmul.f32 %v3170_v51, %v3170_v51  ;;  %v3175_v19 = vadd.f32 %v4283_v34, %v2869_v54  ;;  %v2867_v31 = vadd.f32 %v2788_v20, %v2561_v50  ;;  %v5752_v50 = vld [vmem:[#allocation30_spill] sm:$0xff]  ;;  %v5755_v20 = vld [vmem:[#allocation29_spill] sm:$0xff] }
 0x1f0   : > { %v3297_v3 = vadd.f32 %v3296_v30, %v3273_v21  ;;  %v4236_v28 = vpop.f32.mrf.mxu1  ;;  %v4284_v37 = vpop.f32.mrf.mxu0  ;;  %v2265_v60 = vadd.f32 %v5758_v53, %v5757_v2 }
 0x1f1   : > { %v3311_v49 = vadd.f32 %v3310_v46, %v3272_v29  ;;  %3207 = vst [vmem:[%s5557_s9 + $0x90] sm:$0xff] %v3175_v19  ;;  %v3173_v22 = vadd.f32 %v3094_v38, %v2867_v31  ;;  %v2870_v10 = vadd.f32 %v4236_v28, %v2564_v62  ;;  %v3242_v27 = vadd.f32 %v3241_v14, %v3172_v59  ;;  %v5754_v62 = vld [vmem:[#allocation32_spill] sm:$0xff]  ;;  %v5756_v31 = vld [vmem:[#allocation31_spill] sm:$0xff] }
 0x1f2   : > { %v2791_v5 = vpop.f32.mrf.mxu1  ;;  %v3097_v47 = vpop.f32.mrf.mxu0  ;;  %v2568_v59 = vadd.f32 %v5750_v1, %v2261_v55  ;;  %v2264_v46 = vadd.f32 %v5752_v50, %v5751_v36  ;;  %v3277_v33 = vmul.f32 %v3175_v19, %v3175_v19  ;;  %v2262_v17 = vadd.f32 %v5754_v62, %v5753_v18  ;;  %v5765_v1 = vld [vmem:[#allocation14_spill] sm:$0xff]  ;;  %v5769_v18 = vld [vmem:[#allocation15_spill] sm:$0xff] }
 0x1f3   : > { %3205 = vst [vmem:[%s5557_s9 + $0x80] sm:$0xff] %v3173_v22  ;;  %v3228_v35 = vadd.f32 %v3227_v11, %v3173_v22  ;;  %v3275_v45 = vmul.f32 %v3173_v22, %v3173_v22  ;;  %v3176_v7 = vadd.f32 %v4284_v37, %v2870_v10  ;;  %v2868_v23 = vadd.f32 %v2791_v5, %v2562_v15  ;;  %v5761_v5 = vld [vmem:[#allocation36_spill] sm:$0xff] }
 0x1f4   : > { %v3312_v52 = vadd.f32 %v3311_v49, %v3274_v13  ;;  %v4239_v48 = vpop.f32.mrf.mxu1  ;;  %v4287_v61 = vpop.f32.mrf.mxu0  ;;  %v2566_v38 = vadd.f32 %v5755_v20, %v2259_v26  ;;  %v5760_v13 = vld [vmem:[#allocation12_spill] sm:$0xff]  ;;  %v2269_v62 = vadd.f32 %v5535_v58, %v5769_v18 }
 0x1f5   : > { %v3298_v44 = vadd.f32 %v3297_v3, %v3275_v45  ;;  %3208 = vst [vmem:[%s5557_s9 + $0x98] sm:$0xff] %v3176_v7  ;;  %v3174_v9 = vadd.f32 %v3097_v47, %v2868_v23  ;;  %v2873_v57 = vadd.f32 %v4239_v48, %v2567_v25  ;;  %v3229_v12 = vadd.f32 %v3228_v35, %v3175_v19  ;;  %v5762_v23 = vld [vmem:[#allocation35_spill] sm:$0xff] }
 0x1f6   : > { %v2804_v34 = vpop.f32.mrf.mxu1  ;;  %v3110_v39 = vpop.f32.mrf.mxu0  ;;  %v2571_v19 = vadd.f32 %v5756_v31, %v2264_v46  ;;  %v3278_v3 = vmul.f32 %v3176_v7, %v3176_v7  ;;  %v2569_v25 = vadd.f32 %v5759_v6, %v2262_v17  ;;  %v2263_v47 = vadd.f32 %v5761_v5, %v5760_v13  ;;  %v5772_v5 = vld [vmem:[#allocation42_spill] sm:$0xff] }
 0x1f7   : > { %3206 = vst [vmem:[%s5557_s9 + $0x88] sm:$0xff] %v3174_v9  ;;  %v3243_v42 = vadd.f32 %v3242_v27, %v3174_v9  ;;  %v3276_v30 = vmul.f32 %v3174_v9, %v3174_v9  ;;  %v3179_v51 = vadd.f32 %v4287_v61, %v2873_v57  ;;  %v2871_v54 = vadd.f32 %v2804_v34, %v2565_v41  ;;  %v5764_v41 = vld [vmem:[#allocation38_spill] sm:$0xff]  ;;  %v5767_v34 = vld [vmem:[#allocation37_spill] sm:$0xff] }
 0x1f8   : > { %v3299_v43 = vadd.f32 %v3298_v44, %v3277_v33  ;;  %v4240_v63 = vpop.f32.mrf.mxu1  ;;  %v4288_v21 = vpop.f32.mrf.mxu0 }
 0x1f9   : > { %v3313_v11 = vadd.f32 %v3312_v52, %v3276_v30  ;;  %3211 = vst [vmem:[%s5557_s9 + $0xb0] sm:$0xff] %v3179_v51  ;;  %v3177_v14 = vadd.f32 %v3110_v39, %v2871_v54  ;;  %v2874_v29 = vadd.f32 %v4240_v63, %v2568_v59  ;;  %v3244_v40 = vadd.f32 %v3243_v42, %v3176_v7  ;;  %v5766_v59 = vld [vmem:[#allocation40_spill] sm:$0xff]  ;;  %v5768_v54 = vld [vmem:[#allocation39_spill] sm:$0xff] }
 0x1fa   : > { %v2807_v28 = vpop.f32.mrf.mxu1  ;;  %v3113_v37 = vpop.f32.mrf.mxu0  ;;  %v2572_v7 = vadd.f32 %v5762_v23, %v2265_v60  ;;  %v2268_v52 = vadd.f32 %v5764_v41, %v5763_v0  ;;  %v3281_v48 = vmul.f32 %v3179_v51, %v3179_v51  ;;  %v2266_v36 = vadd.f32 %v5766_v59, %v5765_v1  ;;  %v5771_v60 = vld [vmem:[#allocation16_spill] sm:$0xff] }
 0x1fb   : > { %3209 = vst [vmem:[%s5557_s9 + $0xa0] sm:$0xff] %v3177_v14  ;;  %v3230_v15 = vadd.f32 %v3229_v12, %v3177_v14  ;;  %v3279_v49 = vmul.f32 %v3177_v14, %v3177_v14  ;;  %v3180_v22 = vadd.f32 %v4288_v21, %v2874_v29  ;;  %v2872_v10 = vadd.f32 %v2807_v28, %v2566_v38  ;;  %v5770_v29 = vld [vmem:[#allocation41_spill] sm:$0xff] }
 0x1fc   : > { %v3314_v8 = vadd.f32 %v3313_v11, %v3278_v3  ;;  %v4243_v4 = vpop.f32.mrf.mxu1  ;;  %v4291_v55 = vpop.f32.mrf.mxu0  ;;  %v2570_v39 = vadd.f32 %v5767_v34, %v2263_v47  ;;  %v2573_v31 = vadd.f32 %v5770_v29, %v2266_v36  ;;  %v2267_v3 = vadd.f32 %v5540_v24, %v5771_v60 }
 0x1fd   : > { %v3300_v27 = vadd.f32 %v3299_v43, %v3279_v49  ;;  %3212 = vst [vmem:[%s5557_s9 + $0xb8] sm:$0xff] %v3180_v22  ;;  %v3178_v35 = vadd.f32 %v3113_v37, %v2872_v10  ;;  %v2877_v45 = vadd.f32 %v4243_v4, %v2571_v19  ;;  %v3231_v32 = vadd.f32 %v3230_v15, %v3179_v51 }
 0x1fe   : > { %v2820_v61 = vpop.f32.mrf.mxu1  ;;  %v3126_v16 = vpop.f32.mrf.mxu0  ;;  %v2575_v51 = vadd.f32 %v5768_v54, %v2268_v52  ;;  %v3282_v17 = vmul.f32 %v3180_v22, %v3180_v22  ;;  %v2574_v47 = vadd.f32 %v5772_v5, %v2267_v3 }
 0x1ff   : > { %3210 = vst [vmem:[%s5557_s9 + $0xa8] sm:$0xff] %v3178_v35  ;;  %v3245_v26 = vadd.f32 %v3244_v40, %v3178_v35  ;;  %v3280_v44 = vmul.f32 %v3178_v35, %v3178_v35  ;;  %v3183_v9 = vadd.f32 %v4291_v55, %v2877_v45  ;;  %v2875_v57 = vadd.f32 %v2820_v61, %v2569_v25 }
 0x200   : > { %v3301_v50 = vadd.f32 %v3300_v27, %v3281_v48  ;;  %v4244_v46 = vpop.f32.mrf.mxu1  ;;  %v4292_v33 = vpop.f32.mrf.mxu0  ;;  %v2576_v40 = vadd.f32 %v5537_v56, %v2269_v62 }
 0x201   : > { %v3315_v12 = vadd.f32 %v3314_v8, %v3280_v44  ;;  %3215 = vst [vmem:[%s5557_s9 + $0xd0] sm:$0xff] %v3183_v9  ;;  %v3181_v42 = vadd.f32 %v3126_v16, %v2875_v57  ;;  %v2878_v30 = vadd.f32 %v4244_v46, %v2572_v7  ;;  %v3246_v21 = vadd.f32 %v3245_v26, %v3180_v22 }
 0x202   : > { %v2823_v43 = vpop.f32.mrf.mxu1  ;;  %v3129_v63 = vpop.f32.mrf.mxu0  ;;  %v3285_v15 = vmul.f32 %v3183_v9, %v3183_v9 }
 0x203   : > { %3213 = vst [vmem:[%s5557_s9 + $0xc0] sm:$0xff] %v3181_v42  ;;  %v3232_v20 = vadd.f32 %v3231_v32, %v3181_v42  ;;  %v3283_v38 = vmul.f32 %v3181_v42, %v3181_v42  ;;  %v3184_v11 = vadd.f32 %v4292_v33, %v2878_v30  ;;  %v2876_v14 = vadd.f32 %v2823_v43, %v2570_v39 }
 0x204   : > { %v3316_v19 = vadd.f32 %v3315_v12, %v3282_v17  ;;  %v4247_v2 = vpop.f32.mrf.mxu1  ;;  %v4295_v53 = vpop.f32.mrf.mxu0 }
 0x205   : > { %v3302_v58 = vadd.f32 %v3301_v50, %v3283_v38  ;;  %3216 = vst [vmem:[%s5557_s9 + $0xd8] sm:$0xff] %v3184_v11  ;;  %v3182_v28 = vadd.f32 %v3129_v63, %v2876_v14  ;;  %v2881_v37 = vadd.f32 %v4247_v2, %v2575_v51  ;;  %v3233_v10 = vadd.f32 %v3232_v20, %v3183_v9 }
 0x206   : > { %v2836_v49 = vpop.f32.mrf.mxu1  ;;  %v3142_v22 = vpop.f32.mrf.mxu0  ;;  %v3286_v45 = vmul.f32 %v3184_v11, %v3184_v11 }
 0x207   : > { %3214 = vst [vmem:[%s5557_s9 + $0xc8] sm:$0xff] %v3182_v28  ;;  %v3247_v6 = vadd.f32 %v3246_v21, %v3182_v28  ;;  %v3284_v25 = vmul.f32 %v3182_v28, %v3182_v28  ;;  %v3187_v8 = vadd.f32 %v4295_v53, %v2881_v37  ;;  %v2879_v4 = vadd.f32 %v2836_v49, %v2573_v31 }
 0x208   : > { %v3303_v55 = vadd.f32 %v3302_v58, %v3285_v15  ;;  %v4248_v13 = vpop.f32.mrf.mxu1  ;;  %v4296_v24 = vpop.f32.mrf.mxu0 }
 0x209   : > { %v3317_v27 = vadd.f32 %v3316_v19, %v3284_v25  ;;  %3219 = vst [vmem:[%s5557_s9 + $0xf0] sm:$0xff] %v3187_v8  ;;  %v3185_v35 = vadd.f32 %v3142_v22, %v2879_v4  ;;  %v2882_v56 = vadd.f32 %v4248_v13, %v2576_v40  ;;  %v3248_v7 = vadd.f32 %v3247_v6, %v3184_v11 }
 0x20a   : > { %v2839_v23 = vpop.f32.mrf.mxu1  ;;  %v3145_v61 = vpop.f32.mrf.mxu0  ;;  %v3289_v32 = vmul.f32 %v3187_v8, %v3187_v8 }
 0x20b   : > { %3217 = vst [vmem:[%s5557_s9 + $0xe0] sm:$0xff] %v3185_v35  ;;  %v3234_v0 = vadd.f32 %v3233_v10, %v3185_v35  ;;  %v3287_v41 = vmul.f32 %v3185_v35, %v3185_v35  ;;  %v3188_v52 = vadd.f32 %v4296_v24, %v2882_v56  ;;  %v2880_v48 = vadd.f32 %v2839_v23, %v2574_v47 }
 0x20c   : > { %v3318_v16 = vadd.f32 %v3317_v27, %v3286_v45 }
 0x20d   : > { %v3235_v26 = vadd.f32 %v3234_v0, %v3187_v8  ;;  %v3304_v44 = vadd.f32 %v3303_v55, %v3287_v41  ;;  %3220 = vst [vmem:[%s5557_s9 + $0xf8] sm:$0xff] %v3188_v52  ;;  %v3186_v9 = vadd.f32 %v3145_v61, %v2880_v48  ;;  %v3290_v36 = vmul.f32 %v3188_v52, %v3188_v52 }
 0x20f   : > { %v3305_v57 = vadd.f32 %v3304_v44, %v3289_v32  ;;  %3218 = vst [vmem:[%s5557_s9 + $0xe8] sm:$0xff] %v3186_v9  ;;  %v3249_v1 = vadd.f32 %v3248_v7, %v3186_v9  ;;  %v3288_v59 = vmul.f32 %v3186_v9, %v3186_v9 }
 0x211   : > { %v3250_v50 = vadd.f32 %v3249_v1, %v3188_v52  ;;  %v3319_v46 = vadd.f32 %v3318_v16, %v3288_v59 }
 0x213   : > { %v3251_v33 = vadd.f32 %v3250_v50, %v3235_v26  ;;  %v3320_v34 = vadd.f32 %v3319_v46, %v3290_v36 }
 0x215   : > { %v3252_v39 = vrot.slane %v3251_v33, 4  ;;  %v3321_v12 = vadd.f32 %v3320_v34, %v3305_v57 }
 0x217   : > { %v3253_v42 = vadd.f32 %v3252_v39, %v3251_v33  ;;  %v3322_v30 = vrot.slane %v3321_v12, 4 }
 0x219   : > { %v3254_v54 = vrot.slane %v3253_v42, 2  ;;  %v3323_v51 = vadd.f32 %v3322_v30, %v3321_v12 }
 0x21b   : > { %v3255_v18 = vadd.f32 %v3254_v54, %v3253_v42  ;;  %v3324_v62 = vrot.slane %v3323_v51, 2 }
 0x21d   : > { %v3256_v17 = vrot.slane %v3255_v18, 1  ;;  %v3325_v43 = vadd.f32 %v3324_v62, %v3323_v51 }
 0x21f   : > { %v3257_v63 = vadd.f32 %v3256_v17, %v3255_v18  ;;  %v3326_v21 = vrot.slane %v3325_v43, 1 }
 0x221   : > { %3258 = vst [vmem:[%s265_s11] sm:$0x1] %v3257_v63  ;;  %v3327_v20 = vadd.f32 %v3326_v21, %v3325_v43 }
 0x223   : > { %3328 = vst [vmem:[%s268_s14] sm:$0x1] %v3327_v20 }
 0x224 PF: > { %s17_s21 = sadd.s32 1, %s4401_s21  }
 0x225   : > { %p14_p4 = scmp.ge.s32.totalorder %s17_s21, 4  }
 0x227   :  { %16 = sbr.rel (!%p14_p4) target bundleno = 1 (0x1), region = 100 }

</bundles_post_ra>
